<compile_context>
chip_gen: v7x
topology: tpu7x:2x2x1
jax: 0.10.0
libtpu: 0.0.40
codegen_flags: <defaults>
</compile_context>

<pallas_src>
import functools

import jax
import jax.numpy as jnp
from jax.experimental import pallas as pl
from jax.experimental.pallas import tpu as pltpu


def _round_up(x, m):
    return ((x + m - 1) // m) * m


def cd_temp_kernel(z_ref, wih_t_ref, wcat_ref, b_ref, bfc_ref, out_ref, *,
                   T, H_pad):
    """One batch tile: input projection -> T-step fused tanh RNN + Linear."""
    z = z_ref[...]            # (bn, d)        f32
    wih_t = wih_t_ref[...]    # (d, H_pad)     f32 (zero-padded cols)
    wcat = wcat_ref[...]      # (H_pad, H_pad + O_pad)  [W_hh^T | W_fc^T], zero-padded
    b = b_ref[...]            # (1, H_pad)     b_ih + b_hh (zero-padded)
    bfc = bfc_ref[...]        # (1, O_pad)     b_fc (zero-padded)

    bn = z.shape[0]
    O_pad = bfc.shape[1]

    # Input is the same vector at every timestep -> project once per tile.
    xproj = jnp.dot(z, wih_t, preferred_element_type=jnp.float32) + b   # (bn, H_pad)
    # Hoist the (1, O_pad) -> (bn, O_pad) broadcast out of the time loop.
    bfc_b = jnp.broadcast_to(bfc, (bn, O_pad))

    # h0 == 0, so the first recurrence step needs no W_hh matmul.
    h = jnp.tanh(xproj)                                                 # h_1

    # T is small & static: unrolled loop; per-step lane-dense store keeps only h live.
    # TODO(synk): switch to lax.fori_loop(..., unroll=k) if T grows well beyond ~32.
    for t in range(T):
        # Fused matmul: [h @ W_hh^T | h @ W_fc^T] in a single MXU pass.
        p = jnp.dot(h, wcat, preferred_element_type=jnp.float32)        # (bn, H_pad+O_pad)
        out_ref[:, t, :] = (p[:, H_pad:] + bfc_b).astype(out_ref.dtype)
        if t + 1 < T:
            h = jnp.tanh(xproj + p[:, :H_pad])


def cd_temp_forward(z, W_ih, W_hh, b_ih, b_hh, W_fc, b_fc, *, T, block_n=128):
    """z: (N, d) -> (N, T, O), matching CD_temp.forward."""
    N, d = z.shape
    H = W_ih.shape[0]
    O = W_fc.shape[0]

    H_pad = _round_up(H, 128)
    O_pad = _round_up(O, 128)
    N_pad = _round_up(N, block_n)

    f32 = jnp.float32
    # Pre-transposed, zero-padded weights so the kernel does plain row-major matmuls.
    wih_t = jnp.zeros((d, H_pad), f32).at[:, :H].set(W_ih.T.astype(f32))
    whh_t = jnp.zeros((H_pad, H_pad), f32).at[:H, :H].set(W_hh.T.astype(f32))
    wfc_t = jnp.zeros((H_pad, O_pad), f32).at[:H, :O].set(W_fc.T.astype(f32))
    wcat = jnp.concatenate([whh_t, wfc_t], axis=1)           # (H_pad, H_pad + O_pad)
    b_comb = jnp.zeros((1, H_pad), f32).at[0, :H].set((b_ih + b_hh).astype(f32))
    bfc = jnp.zeros((1, O_pad), f32).at[0, :O].set(b_fc.astype(f32))

    z_pad = z
    if N_pad != N:
        z_pad = jnp.zeros((N_pad, d), z.dtype).at[:N].set(z)

    kernel = functools.partial(cd_temp_kernel, T=T, H_pad=H_pad)

    out = pl.pallas_call(
        kernel,
        out_shape=jax.ShapeDtypeStruct((N_pad, T, O_pad), z.dtype),
        grid_spec=pltpu.PrefetchScalarGridSpec(
            num_scalar_prefetch=0,
            grid=(N_pad // block_n,),
            in_specs=[
                pl.BlockSpec((block_n, d), lambda i: (i, 0)),               # z tile
                pl.BlockSpec((d, H_pad), lambda i: (0, 0)),                 # W_ih^T
                pl.BlockSpec((H_pad, H_pad + O_pad), lambda i: (0, 0)),     # [Whh^T|Wfc^T]
                pl.BlockSpec((1, H_pad), lambda i: (0, 0)),                 # b_ih + b_hh
                pl.BlockSpec((1, O_pad), lambda i: (0, 0)),                 # b_fc
            ],
            out_specs=pl.BlockSpec((block_n, T, O_pad), lambda i: (i, 0, 0)),
        ),
        compiler_params=pltpu.CompilerParams(
            dimension_semantics=("parallel",),      # megacore-shardable batch axis
            vmem_limit_bytes=64 * 1024 * 1024,      # tiles are small; ample headroom
        ),
    )(z_pad, wih_t, wcat, b_comb, bfc)

    # Slice off the batch / output-lane padding.
    return out[:N, :, :O]


def cd_temp_reference(z, W_ih, W_hh, b_ih, b_hh, W_fc, b_fc, *, T):
    """Pure-JAX reference of the PyTorch forward (for correctness check)."""
    xproj = z @ W_ih.T + b_ih + b_hh
    h = jnp.zeros((z.shape[0], W_hh.shape[0]), z.dtype)
    outs = []
    for _ in range(T):
        h = jnp.tanh(xproj + h @ W_hh.T)
        outs.append(h @ W_fc.T + b_fc)
    return jnp.stack(outs, axis=1)


if __name__ == "__main__":
    # Small shapes consistent with the module's args:
    #   latent_dim=10, hidden_dim=32, output_dim=15, T kept small = 8,
    #   batch N = 256 (stand-in for num_node * num_samples); block_n=128
    #   -> 2 parallel grid steps (lets v7x use both TensorCores).
    d, H, O, T, N = 10, 32, 15, 8, 256

    key = jax.random.PRNGKey(0)
    kz, k1, k2, k3, k4, k5, k6 = jax.random.split(key, 7)

    scale_rnn = 1.0 / jnp.sqrt(jnp.float32(H))
    z = jax.random.normal(kz, (N, d), jnp.float32)
    W_ih = jax.random.uniform(k1, (H, d), jnp.float32, -scale_rnn, scale_rnn)
    W_hh = jax.random.uniform(k2, (H, H), jnp.float32, -scale_rnn, scale_rnn)
    b_ih = jax.random.uniform(k3, (H,), jnp.float32, -scale_rnn, scale_rnn)
    b_hh = jax.random.uniform(k4, (H,), jnp.float32, -scale_rnn, scale_rnn)
    W_fc = jax.random.uniform(k5, (O, H), jnp.float32, -scale_rnn, scale_rnn)
    b_fc = jax.random.uniform(k6, (O,), jnp.float32, -scale_rnn, scale_rnn)

    out = cd_temp_forward(z, W_ih, W_hh, b_ih, b_hh, W_fc, b_fc, T=T, block_n=128)
    out = jax.block_until_ready(out)

    ref = cd_temp_reference(z, W_ih, W_hh, b_ih, b_hh, W_fc, b_fc, T=T)
    assert out.shape == (N, T, O)
    assert jnp.allclose(out, ref, atol=1e-5, rtol=1e-5), "mismatch vs reference"

    print("KERNEL_OK")
</pallas_src>

<mosaic_0001>
module attributes {stable_mosaic.version = 11 : i64} {
  func.func @cd_temp_kernel(%arg0: i32, %arg1: memref<128x10xf32, #tpu.memory_space<vmem>>, %arg2: memref<10x128xf32, #tpu.memory_space<vmem>>, %arg3: memref<128x256xf32, #tpu.memory_space<vmem>>, %arg4: memref<1x128xf32, #tpu.memory_space<vmem>>, %arg5: memref<1x128xf32, #tpu.memory_space<vmem>>, %arg6: memref<128x8x128xf32, #tpu.memory_space<vmem>>) attributes {dimension_semantics = [#tpu.dimension_semantics<parallel>], iteration_bounds = array<i64: 2>, scalar_prefetch = 0 : i64, scratch_operands = 0 : i64, tpu.core_type = #tpu.core_type<tc>, window_params = [{transform_indices = @transform_0, window_bounds = array<i64: 128, 10>}, {pipeline_mode = #tpu.pipeline_mode<synchronous>, transform_indices = @transform_1, window_bounds = array<i64: 10, 128>}, {pipeline_mode = #tpu.pipeline_mode<synchronous>, transform_indices = @transform_2, window_bounds = array<i64: 128, 256>}, {pipeline_mode = #tpu.pipeline_mode<synchronous>, transform_indices = @transform_3, window_bounds = array<i64: 1, 128>}, {pipeline_mode = #tpu.pipeline_mode<synchronous>, transform_indices = @transform_4, window_bounds = array<i64: 1, 128>}, {transform_indices = @transform_5, window_bounds = array<i64: 128, 8, 128>}]} {
    %c0 = arith.constant 0 : index
    %c0_0 = arith.constant 0 : index
    %0 = vector.load %arg1[%c0, %c0_0] : memref<128x10xf32, #tpu.memory_space<vmem>>, vector<128x10xf32>
    %c0_1 = arith.constant 0 : index
    %c0_2 = arith.constant 0 : index
    %1 = vector.load %arg2[%c0_1, %c0_2] : memref<10x128xf32, #tpu.memory_space<vmem>>, vector<10x128xf32>
    %c0_3 = arith.constant 0 : index
    %c0_4 = arith.constant 0 : index
    %2 = vector.load %arg3[%c0_3, %c0_4] : memref<128x256xf32, #tpu.memory_space<vmem>>, vector<128x256xf32>
    %c0_5 = arith.constant 0 : index
    %c0_6 = arith.constant 0 : index
    %3 = vector.load %arg4[%c0_5, %c0_6] : memref<1x128xf32, #tpu.memory_space<vmem>>, vector<1x128xf32>
    %c0_7 = arith.constant 0 : index
    %c0_8 = arith.constant 0 : index
    %4 = vector.load %arg5[%c0_7, %c0_8] : memref<1x128xf32, #tpu.memory_space<vmem>>, vector<1x128xf32>
    %cst = arith.constant dense<0.000000e+00> : vector<128x128xf32>
    %5 = tpu.matmul %0, %1, %cst {dimension_numbers = #tpu.dot_dimension_numbers<[1], [0], [0], [1], [0, 0, 1, 1], [], []>} : vector<128x10xf32>, vector<10x128xf32>, vector<128x128xf32> -> vector<128x128xf32>
    %6 = vector.broadcast %3 : vector<1x128xf32> to vector<128x128xf32>
    %7 = arith.addf %5, %6 : vector<128x128xf32>
    %8 = vector.shape_cast %4 : vector<1x128xf32> to vector<1x128xf32>
    %9 = vector.broadcast %8 : vector<1x128xf32> to vector<128x128xf32>
    %10 = math.tanh %7 : vector<128x128xf32>
    %cst_9 = arith.constant dense<0.000000e+00> : vector<128x256xf32>
    %11 = tpu.matmul %10, %2, %cst_9 {dimension_numbers = #tpu.dot_dimension_numbers<[1], [0], [0], [1], [0, 0, 1, 1], [], []>} : vector<128x128xf32>, vector<128x256xf32>, vector<128x256xf32> -> vector<128x256xf32>
    %12 = vector.extract_strided_slice %11 {offsets = [0, 128], sizes = [128, 128], strides = [1, 1]} : vector<128x256xf32> to vector<128x128xf32>
    %13 = arith.addf %12, %9 : vector<128x128xf32>
    %c0_10 = arith.constant 0 : index
    %c0_11 = arith.constant 0 : index
    %c0_12 = arith.constant 0 : index
    %14 = vector.load %arg6[%c0_10, %c0_11, %c0_12] : memref<128x8x128xf32, #tpu.memory_space<vmem>>, vector<128x1x128xf32>
    %15 = vector.shape_cast %14 : vector<128x1x128xf32> to vector<128x128xf32>
    %16 = vector.shape_cast %13 : vector<128x128xf32> to vector<128x1x128xf32>
    tpu.vector_store %arg6[%c0_10, %c0_11, %c0_12], %16 {strides = array<i32>} : memref<128x8x128xf32, #tpu.memory_space<vmem>>, vector<128x1x128xf32>,
    %17 = vector.extract_strided_slice %11 {offsets = [0, 0], sizes = [128, 128], strides = [1, 1]} : vector<128x256xf32> to vector<128x128xf32>
    %18 = arith.addf %7, %17 : vector<128x128xf32>
    %19 = math.tanh %18 : vector<128x128xf32>
    %cst_13 = arith.constant dense<0.000000e+00> : vector<128x256xf32>
    %20 = tpu.matmul %19, %2, %cst_13 {dimension_numbers = #tpu.dot_dimension_numbers<[1], [0], [0], [1], [0, 0, 1, 1], [], []>} : vector<128x128xf32>, vector<128x256xf32>, vector<128x256xf32> -> vector<128x256xf32>
    %21 = vector.extract_strided_slice %20 {offsets = [0, 128], sizes = [128, 128], strides = [1, 1]} : vector<128x256xf32> to vector<128x128xf32>
    %22 = arith.addf %21, %9 : vector<128x128xf32>
    %c0_14 = arith.constant 0 : index
    %c1 = arith.constant 1 : index
    %c0_15 = arith.constant 0 : index
    %23 = vector.load %arg6[%c0_14, %c1, %c0_15] : memref<128x8x128xf32, #tpu.memory_space<vmem>>, vector<128x1x128xf32>
    %24 = vector.shape_cast %23 : vector<128x1x128xf32> to vector<128x128xf32>
    %25 = vector.shape_cast %22 : vector<128x128xf32> to vector<128x1x128xf32>
    tpu.vector_store %arg6[%c0_14, %c1, %c0_15], %25 {strides = array<i32>} : memref<128x8x128xf32, #tpu.memory_space<vmem>>, vector<128x1x128xf32>,
    %26 = vector.extract_strided_slice %20 {offsets = [0, 0], sizes = [128, 128], strides = [1, 1]} : vector<128x256xf32> to vector<128x128xf32>
    %27 = arith.addf %7, %26 : vector<128x128xf32>
    %28 = math.tanh %27 : vector<128x128xf32>
    %cst_16 = arith.constant dense<0.000000e+00> : vector<128x256xf32>
    %29 = tpu.matmul %28, %2, %cst_16 {dimension_numbers = #tpu.dot_dimension_numbers<[1], [0], [0], [1], [0, 0, 1, 1], [], []>} : vector<128x128xf32>, vector<128x256xf32>, vector<128x256xf32> -> vector<128x256xf32>
    %30 = vector.extract_strided_slice %29 {offsets = [0, 128], sizes = [128, 128], strides = [1, 1]} : vector<128x256xf32> to vector<128x128xf32>
    %31 = arith.addf %30, %9 : vector<128x128xf32>
    %c0_17 = arith.constant 0 : index
    %c2 = arith.constant 2 : index
    %c0_18 = arith.constant 0 : index
    %32 = vector.load %arg6[%c0_17, %c2, %c0_18] : memref<128x8x128xf32, #tpu.memory_space<vmem>>, vector<128x1x128xf32>
    %33 = vector.shape_cast %32 : vector<128x1x128xf32> to vector<128x128xf32>
    %34 = vector.shape_cast %31 : vector<128x128xf32> to vector<128x1x128xf32>
    tpu.vector_store %arg6[%c0_17, %c2, %c0_18], %34 {strides = array<i32>} : memref<128x8x128xf32, #tpu.memory_space<vmem>>, vector<128x1x128xf32>,
    %35 = vector.extract_strided_slice %29 {offsets = [0, 0], sizes = [128, 128], strides = [1, 1]} : vector<128x256xf32> to vector<128x128xf32>
    %36 = arith.addf %7, %35 : vector<128x128xf32>
    %37 = math.tanh %36 : vector<128x128xf32>
    %cst_19 = arith.constant dense<0.000000e+00> : vector<128x256xf32>
    %38 = tpu.matmul %37, %2, %cst_19 {dimension_numbers = #tpu.dot_dimension_numbers<[1], [0], [0], [1], [0, 0, 1, 1], [], []>} : vector<128x128xf32>, vector<128x256xf32>, vector<128x256xf32> -> vector<128x256xf32>
    %39 = vector.extract_strided_slice %38 {offsets = [0, 128], sizes = [128, 128], strides = [1, 1]} : vector<128x256xf32> to vector<128x128xf32>
    %40 = arith.addf %39, %9 : vector<128x128xf32>
    %c0_20 = arith.constant 0 : index
    %c3 = arith.constant 3 : index
    %c0_21 = arith.constant 0 : index
    %41 = vector.load %arg6[%c0_20, %c3, %c0_21] : memref<128x8x128xf32, #tpu.memory_space<vmem>>, vector<128x1x128xf32>
    %42 = vector.shape_cast %41 : vector<128x1x128xf32> to vector<128x128xf32>
    %43 = vector.shape_cast %40 : vector<128x128xf32> to vector<128x1x128xf32>
    tpu.vector_store %arg6[%c0_20, %c3, %c0_21], %43 {strides = array<i32>} : memref<128x8x128xf32, #tpu.memory_space<vmem>>, vector<128x1x128xf32>,
    %44 = vector.extract_strided_slice %38 {offsets = [0, 0], sizes = [128, 128], strides = [1, 1]} : vector<128x256xf32> to vector<128x128xf32>
    %45 = arith.addf %7, %44 : vector<128x128xf32>
    %46 = math.tanh %45 : vector<128x128xf32>
    %cst_22 = arith.constant dense<0.000000e+00> : vector<128x256xf32>
    %47 = tpu.matmul %46, %2, %cst_22 {dimension_numbers = #tpu.dot_dimension_numbers<[1], [0], [0], [1], [0, 0, 1, 1], [], []>} : vector<128x128xf32>, vector<128x256xf32>, vector<128x256xf32> -> vector<128x256xf32>
    %48 = vector.extract_strided_slice %47 {offsets = [0, 128], sizes = [128, 128], strides = [1, 1]} : vector<128x256xf32> to vector<128x128xf32>
    %49 = arith.addf %48, %9 : vector<128x128xf32>
    %c0_23 = arith.constant 0 : index
    %c4 = arith.constant 4 : index
    %c0_24 = arith.constant 0 : index
    %50 = vector.load %arg6[%c0_23, %c4, %c0_24] : memref<128x8x128xf32, #tpu.memory_space<vmem>>, vector<128x1x128xf32>
    %51 = vector.shape_cast %50 : vector<128x1x128xf32> to vector<128x128xf32>
    %52 = vector.shape_cast %49 : vector<128x128xf32> to vector<128x1x128xf32>
    tpu.vector_store %arg6[%c0_23, %c4, %c0_24], %52 {strides = array<i32>} : memref<128x8x128xf32, #tpu.memory_space<vmem>>, vector<128x1x128xf32>,
    %53 = vector.extract_strided_slice %47 {offsets = [0, 0], sizes = [128, 128], strides = [1, 1]} : vector<128x256xf32> to vector<128x128xf32>
    %54 = arith.addf %7, %53 : vector<128x128xf32>
    %55 = math.tanh %54 : vector<128x128xf32>
    %cst_25 = arith.constant dense<0.000000e+00> : vector<128x256xf32>
    %56 = tpu.matmul %55, %2, %cst_25 {dimension_numbers = #tpu.dot_dimension_numbers<[1], [0], [0], [1], [0, 0, 1, 1], [], []>} : vector<128x128xf32>, vector<128x256xf32>, vector<128x256xf32> -> vector<128x256xf32>
    %57 = vector.extract_strided_slice %56 {offsets = [0, 128], sizes = [128, 128], strides = [1, 1]} : vector<128x256xf32> to vector<128x128xf32>
    %58 = arith.addf %57, %9 : vector<128x128xf32>
    %c0_26 = arith.constant 0 : index
    %c5 = arith.constant 5 : index
    %c0_27 = arith.constant 0 : index
    %59 = vector.load %arg6[%c0_26, %c5, %c0_27] : memref<128x8x128xf32, #tpu.memory_space<vmem>>, vector<128x1x128xf32>
    %60 = vector.shape_cast %59 : vector<128x1x128xf32> to vector<128x128xf32>
    %61 = vector.shape_cast %58 : vector<128x128xf32> to vector<128x1x128xf32>
    tpu.vector_store %arg6[%c0_26, %c5, %c0_27], %61 {strides = array<i32>} : memref<128x8x128xf32, #tpu.memory_space<vmem>>, vector<128x1x128xf32>,
    %62 = vector.extract_strided_slice %56 {offsets = [0, 0], sizes = [128, 128], strides = [1, 1]} : vector<128x256xf32> to vector<128x128xf32>
    %63 = arith.addf %7, %62 : vector<128x128xf32>
    %64 = math.tanh %63 : vector<128x128xf32>
    %cst_28 = arith.constant dense<0.000000e+00> : vector<128x256xf32>
    %65 = tpu.matmul %64, %2, %cst_28 {dimension_numbers = #tpu.dot_dimension_numbers<[1], [0], [0], [1], [0, 0, 1, 1], [], []>} : vector<128x128xf32>, vector<128x256xf32>, vector<128x256xf32> -> vector<128x256xf32>
    %66 = vector.extract_strided_slice %65 {offsets = [0, 128], sizes = [128, 128], strides = [1, 1]} : vector<128x256xf32> to vector<128x128xf32>
    %67 = arith.addf %66, %9 : vector<128x128xf32>
    %c0_29 = arith.constant 0 : index
    %c6 = arith.constant 6 : index
    %c0_30 = arith.constant 0 : index
    %68 = vector.load %arg6[%c0_29, %c6, %c0_30] : memref<128x8x128xf32, #tpu.memory_space<vmem>>, vector<128x1x128xf32>
    %69 = vector.shape_cast %68 : vector<128x1x128xf32> to vector<128x128xf32>
    %70 = vector.shape_cast %67 : vector<128x128xf32> to vector<128x1x128xf32>
    tpu.vector_store %arg6[%c0_29, %c6, %c0_30], %70 {strides = array<i32>} : memref<128x8x128xf32, #tpu.memory_space<vmem>>, vector<128x1x128xf32>,
    %71 = vector.extract_strided_slice %65 {offsets = [0, 0], sizes = [128, 128], strides = [1, 1]} : vector<128x256xf32> to vector<128x128xf32>
    %72 = arith.addf %7, %71 : vector<128x128xf32>
    %73 = math.tanh %72 : vector<128x128xf32>
    %cst_31 = arith.constant dense<0.000000e+00> : vector<128x256xf32>
    %74 = tpu.matmul %73, %2, %cst_31 {dimension_numbers = #tpu.dot_dimension_numbers<[1], [0], [0], [1], [0, 0, 1, 1], [], []>} : vector<128x128xf32>, vector<128x256xf32>, vector<128x256xf32> -> vector<128x256xf32>
    %75 = vector.extract_strided_slice %74 {offsets = [0, 128], sizes = [128, 128], strides = [1, 1]} : vector<128x256xf32> to vector<128x128xf32>
    %76 = arith.addf %75, %9 : vector<128x128xf32>
    %c0_32 = arith.constant 0 : index
    %c7 = arith.constant 7 : index
    %c0_33 = arith.constant 0 : index
    %77 = vector.load %arg6[%c0_32, %c7, %c0_33] : memref<128x8x128xf32, #tpu.memory_space<vmem>>, vector<128x1x128xf32>
    %78 = vector.shape_cast %77 : vector<128x1x128xf32> to vector<128x128xf32>
    %79 = vector.shape_cast %76 : vector<128x128xf32> to vector<128x1x128xf32>
    tpu.vector_store %arg6[%c0_32, %c7, %c0_33], %79 {strides = array<i32>} : memref<128x8x128xf32, #tpu.memory_space<vmem>>, vector<128x1x128xf32>,
    return
  }
  func.func @transform_0(%arg0: i32) -> (i32, i32) {
    %c0_i32 = arith.constant 0 : i32
    %c0_i32_0 = arith.constant 0 : i32
    return %arg0, %c0_i32 : i32, i32
  }
  func.func @transform_1(%arg0: i32) -> (i32, i32) {
    %c0_i32 = arith.constant 0 : i32
    %c0_i32_0 = arith.constant 0 : i32
    %c0_i32_1 = arith.constant 0 : i32
    return %c0_i32, %c0_i32_0 : i32, i32
  }
  func.func @transform_2(%arg0: i32) -> (i32, i32) {
    %c0_i32 = arith.constant 0 : i32
    %c0_i32_0 = arith.constant 0 : i32
    %c0_i32_1 = arith.constant 0 : i32
    return %c0_i32, %c0_i32_0 : i32, i32
  }
  func.func @transform_3(%arg0: i32) -> (i32, i32) {
    %c0_i32 = arith.constant 0 : i32
    %c0_i32_0 = arith.constant 0 : i32
    %c0_i32_1 = arith.constant 0 : i32
    return %c0_i32, %c0_i32_0 : i32, i32
  }
  func.func @transform_4(%arg0: i32) -> (i32, i32) {
    %c0_i32 = arith.constant 0 : i32
    %c0_i32_0 = arith.constant 0 : i32
    %c0_i32_1 = arith.constant 0 : i32
    return %c0_i32, %c0_i32_0 : i32, i32
  }
  func.func @transform_5(%arg0: i32) -> (i32, i32, i32) {
    %c0_i32 = arith.constant 0 : i32
    %c0_i32_0 = arith.constant 0 : i32
    %c0_i32_1 = arith.constant 0 : i32
    return %arg0, %c0_i32, %c0_i32_0 : i32, i32, i32
  }
}

</mosaic_0001>

<bundles_post_ra>
// kernel: tpu_custom_call.1
= control target key start
LH: loop header
LB: loop body
LE: loop exit
PB: predicated region body
PF: predicated region fallthrough
CT: control target
= control target key end

     0   :  { %10 = vsyncpa [#allocation3], 0  ;;  %s14982_s0 = inlined_call_operand.hbm [shape: f32[256,10], index: 0, kind: input, shape index: {}]   ;;  %s14983_s1 = inlined_call_operand.hbm [shape: f32[10,128], index: 1, kind: input, shape index: {}]   ;;  %s14984_s2 = inlined_call_operand.hbm [shape: f32[128,256], index: 2, kind: input, shape index: {}]   ;;  %s14985_s3 = inlined_call_operand.hbm [shape: f32[1,128], index: 3, kind: input, shape index: {}]   ;;  %s14986_s4 = inlined_call_operand.hbm [shape: f32[1,128], index: 4, kind: input, shape index: {}]   ;;  %s14987_s5 = inlined_call_operand.hbm [shape: f32[256,8,128], index: 5, kind: output, shape index: {}]  }
   0x1   :  { %12 = vsyncpa [#allocation3 + $0x1], 0 }
   0x2   :  { %13 = vsyncpa [#allocation6], 0 }
   0x3   :  { %14 = vsyncpa [#allocation9], 0 }
   0x4   :  { %15 = vsyncpa [#allocation4], 0 }
   0x5   :  { %17 = vsyncpa [#allocation4 + $0x1], 0  ;;  %s12258_s18 = smov 0   ;;  %s12260_s19 = smov 0  }
   0x6   :  { %s12262_s20 = smov 0   ;;  %s12264_s21 = smov 0  }
   0x7 LB: > { %s12279_s22 = sadd.s32 4294967295, %s12211_s21   ;;  %s10774_s23 = sadd.s32 4294967294, %s12211_s21   ;;  %s12211_s21 = sphi %s12264_s21, %s15012_s21   ;;  %s12207_s20 = sphi %s12262_s20, %s15011_s20   ;;  %s12203_s19 = sphi %s12260_s19, %s15010_s19   ;;  %s12199_s18 = sphi %s12258_s18, %s15009_s18  }
   0x8   : > { %p43_p0 = scmp.ne.s32.totalorder %s12203_s19, %s12199_s18  ;;  %p14988_p1 = scmp.eq.s32.totalorder %s12279_s22, 0 }
   0x9   : > { %p157_p3 = scmp.eq.s32.totalorder %s10774_s23, 1  ;;  %p10775_p5 = scmp.ge.s32.totalorder %s12211_s21, 1 }
   0xa   : > { %p12288_p4 = por %p14988_p1, %p43_p0  ;;  %p164_p7 = scmp.lt.s32.totalorder %s12211_s21, 3 }
   0xb   : > { %p12293_p6 = por %p157_p3, %p43_p0  ;;  %s12213_s27 = smov [#allocation5]  }
   0xc   : > { %s14992_s24 = scalar_select %p12288_p4, 1, 0 }
   0xd   : > { %s14993_s25 = scalar_select %p12293_p6, 1, 0 }
   0xe   : > { %p12298_p8 = pnand %p10775_p5, %p164_p7  ;;  %s176_s28 = sshll.u32 %s12213_s27, 4  ;;  %s12302_s28 = int_to_ptr.vmem [resolvable:$true] %s176_s28 }
   0xf   : > { %s12214_s30 = smov [#allocation8]   ;;  %s12215_s7 = smov [#allocation7]  }
  0x10   : > { %s14994_s26 = scalar_select %p12298_p8, 1, 0 }
  0x11   : > { %p11657_p9 = pneg %p12298_p8  ;;  %s203_s6 = sshll.u32 %s12214_s30, 4  ;;  %s12313_s6 = int_to_ptr.vmem [resolvable:$true] %s203_s6 }
  0x12   : > { %s12315_s8 = sshll.u32 %s12215_s7, 4  ;;  %s11995_s11 = scalar_lea.hbm %s14983_s1, 256  ;;  %s190_s8 = int_to_ptr.vmem [resolvable:$true] %s12315_s8 }
  0x13   : > { %p12309_p11 = pnand %p11657_p9, %p14988_p1  ;;  %p11996_p12 = scmp.ne.s32.totalorder %s14983_s1, %s11995_s11 }
  0x14   : > { %p12002_p5 = scmp.lt.u32.totalorder %s11995_s11, %s14983_s1 }
  0x15   : > { %p12325_p13 = pneg %p12309_p11 }
  0x17   : > { %p11998_p0 = pnand %p12325_p13, %p11996_p12 }
  0x19   : > { %p11999_p3 = pneg %p11998_p0 }
  0x1b   : > { %p12004_p7 = pnand %p12002_p5, %p11999_p3 }
  0x1d   : > { %12007 = shalt.err (!%p12004_p7)
}
  0x1e   : > { %s12008_s17 = scalar_lea.vmem %s12302_s28, 256  ;;  %p12016_p2 = scmp.lt.s32.totalorder %s12302_s28, %s12302_s28 }
  0x1f   : > { %p12009_p9 = scmp.ne.s32.totalorder %s12302_s28, %s12008_s17  ;;  %p12017_p6 = scmp.lt.s32.totalorder %s12008_s17, %s12008_s17 }
  0x21   : > { %p12011_p10 = pnand %p12009_p9, %p12325_p13  ;;  %p12018_p12 = por %p12017_p6, %p12016_p2 }
  0x23   : > { %p12012_p1 = pneg %p12011_p10 }
  0x25   : > { %p12019_p0 = pnand %p12018_p12, %p12012_p1 }
  0x27   : > { %12022 = shalt.err (!%p12019_p0)
}
  0x28   : > { %s14991_s23 = smov 128   ;;  %s12217_s27 = smov 8  }
  0x29   : > { %11660 = dma.hbm_to_vmem [thread:$0]  (!%p12309_p11), %s14983_s1, 256, %s12302_s28, [#allocation6], %s14991_s23, %s14991_s23, %s12217_s27  }
  0x2a   : > { %s12023_s11 = scalar_lea.hbm %s14985_s3, 16 }
  0x2b   : > { %p12024_p1 = scmp.ne.s32.totalorder %s14985_s3, %s12023_s11  ;;  %p12030_p10 = scmp.lt.u32.totalorder %s12023_s11, %s14985_s3 }
  0x2d   : > { %p12026_p2 = pnand %p12024_p1, %p12325_p13 }
  0x2f   : > { %p12027_p6 = pneg %p12026_p2 }
  0x31   : > { %p12032_p3 = pnand %p12030_p10, %p12027_p6 }
  0x33   : > { %12035 = shalt.err (!%p12032_p3)
}
  0x34   : > { %s12036_s28 = scalar_lea.vmem %s12313_s6, 16  ;;  %s12043_s17 = scalar_lea.vmem %s12313_s6, 32 }
  0x35   : > { %p12037_p5 = scmp.ne.s32.totalorder %s12313_s6, %s12036_s28  ;;  %p12044_p12 = scmp.lt.s32.totalorder %s12313_s6, %s12313_s6 }
  0x36   : > { %p12045_p0 = scmp.lt.s32.totalorder %s12043_s17, %s12036_s28 }
  0x37   : > { %p12039_p7 = pnand %p12037_p5, %p12325_p13 }
  0x38   : > { %p12046_p1 = por %p12045_p0, %p12044_p12 }
  0x39   : > { %p12040_p9 = pneg %p12039_p7 }
  0x3b   : > { %p12047_p2 = pnand %p12046_p1, %p12040_p9 }
  0x3d   : > { %12050 = shalt.err (!%p12047_p2)
}
  0x3e   : > { %11666 = dma.hbm_to_vmem [thread:$0]  (!%p12309_p11), %s14985_s3, 16, %s12313_s6, [#allocation9]  }
  0x3f   : > { %s12051_s11 = scalar_lea.hbm %s14984_s2, 4096 }
  0x40   : > { %p12052_p6 = scmp.ne.s32.totalorder %s14984_s2, %s12051_s11  ;;  %p12058_p5 = scmp.lt.u32.totalorder %s12051_s11, %s14984_s2 }
  0x42   : > { %p12054_p10 = pnand %p12052_p6, %p12325_p13 }
  0x44   : > { %p12055_p3 = pneg %p12054_p10 }
  0x46   : > { %p12060_p7 = pnand %p12058_p5, %p12055_p3 }
  0x48   : > { %12063 = shalt.err (!%p12060_p7)
}
  0x49   : > { %s12064_s28 = scalar_lea.vmem %s190_s8, 4096  ;;  %p12072_p1 = scmp.lt.s32.totalorder %s190_s8, %s190_s8 }
  0x4a   : > { %p12065_p9 = scmp.ne.s32.totalorder %s190_s8, %s12064_s28  ;;  %p12073_p2 = scmp.lt.s32.totalorder %s12064_s28, %s12064_s28 }
  0x4c   : > { %p12067_p12 = pnand %p12065_p9, %p12325_p13  ;;  %p12074_p4 = por %p12073_p2, %p12072_p1 }
  0x4e   : > { %p12068_p0 = pneg %p12067_p12 }
  0x50   : > { %p12075_p8 = pnand %p12074_p4, %p12068_p0 }
  0x52   : > { %12078 = shalt.err (!%p12075_p8)
}
  0x53   : > { %s12218_s6 = smov 256   ;;  %s12219_s17 = smov 16  }
  0x54   : > { %11663 = dma.hbm_to_vmem [thread:$0]  (!%p12309_p11), %s14984_s2, 4096, %s190_s8, [#allocation6], %s12218_s6, %s12218_s6, %s12219_s17  }
  0x55   : > { %s12220_s9 = smov [#allocation10]   ;;  %s12079_s13 = scalar_lea.hbm %s14986_s4, 16 }
  0x56   : > { %s214_s10 = sshll.u32 %s12220_s9, 4  ;;  %p12080_p4 = scmp.ne.s32.totalorder %s14986_s4, %s12079_s13  ;;  %s215_s10 = int_to_ptr.vmem [resolvable:$true] %s214_s10 }
  0x57   : > { %p12086_p10 = scmp.lt.u32.totalorder %s12079_s13, %s14986_s4 }
  0x58   : > { %p12082_p8 = pnand %p12080_p4, %p12325_p13 }
  0x5a   : > { %p12083_p6 = pneg %p12082_p8 }
  0x5c   : > { %p12088_p3 = pnand %p12086_p10, %p12083_p6 }
  0x5e   : > { %12091 = shalt.err (!%p12088_p3)
}
  0x5f   : > { %s12092_s8 = scalar_lea.vmem %s215_s10, 16  ;;  %s12099_s6 = scalar_lea.vmem %s215_s10, 32 }
  0x60   : > { %p12093_p5 = scmp.ne.s32.totalorder %s215_s10, %s12092_s8  ;;  %p12100_p12 = scmp.lt.s32.totalorder %s215_s10, %s215_s10 }
  0x61   : > { %p12101_p0 = scmp.lt.s32.totalorder %s12099_s6, %s12092_s8 }
  0x62   : > { %p12095_p7 = pnand %p12093_p5, %p12325_p13 }
  0x63   : > { %p12102_p1 = por %p12101_p0, %p12100_p12 }
  0x64   : > { %p12096_p9 = pneg %p12095_p7 }
  0x66   : > { %p12103_p2 = pnand %p12102_p1, %p12096_p9 }
  0x68   : > { %12106 = shalt.err (!%p12103_p2)
}
  0x69   : > { %11669 = dma.hbm_to_vmem [thread:$0]  (!%p12309_p11), %s14986_s4, 16, %s215_s10, [#allocation9]  }
  0x6a   : > { %s12411_s14 = sadd.s32 1, %s12211_s21   ;;  %s30_s23 = sadd.s32 1, %s12207_s20 }
  0x6b   : > { %s27_s29 = ssub.s32 %s12211_s21, %s12411_s14  ;;  %p37_p13 = scmp.ne.s32.totalorder %s12207_s20, %s12203_s19 }
  0x6c   : > { %p28_p4 = scmp.eq.s32.totalorder %s27_s29, 0  ;;  %p38_p8 = scmp.eq.s32.totalorder %s12211_s21, 0 }
  0x6d   : > { %p14997_p6 = scmp.eq.s32.totalorder %s12279_s22, 1  ;;  %p11682_p3 = scmp.lt.s32.totalorder %s12211_s21, 2 }
  0x6e   : > { %s12427_s9 = scalar_select %p28_p4, %s12207_s20, %s30_s23  }
  0x6f   : > { %p12421_p10 = por %p14997_p6, %p37_p13  ;;  %p39_p5 = por %p38_p8, %p37_p13 }
  0x70   : > { %s225_s11 = sand.u32 1, %s12207_s20   ;;  %s11327_s10 = sshll.u32 %s12211_s21, 11 }
  0x71   : > { %s10781_s12 = sshll.u32 %s225_s11, 7  ;;  %s12434_s16 = scalar_lea.hbm %s14982_s0, %s11327_s10 }
  0x72   : > { %s229_s28 = scalar_lea.vmem [#allocation2], %s10781_s12  ;;  %p12438_p11 = pnand %p11682_p3, %p39_p5 }
  0x73   : > { %s236_s8 = sshll.u32 %s229_s28, 4  ;;  %s12442_s17 = scalar_lea.sflag [#allocation3], %s225_s11  ;;  %s12436_s8 = int_to_ptr.vmem [resolvable:$true] %s236_s8 }
  0x74   : > { %s12107_s30 = scalar_lea.hbm %s12434_s16, 2048  ;;  %p12109_p9 = pneg %p12438_p11 }
  0x75   : > { %p12108_p7 = scmp.ne.s32.totalorder %s12434_s16, %s12107_s30  ;;  %s12112_s12 = scalar_lea.hbm %s14982_s0, 4096 }
  0x76   : > { %p12113_p1 = scmp.lt.u32.totalorder %s12434_s16, %s14982_s0  ;;  %p12114_p2 = scmp.lt.u32.totalorder %s12112_s12, %s12107_s30 }
  0x77   : > { %p12110_p12 = pnand %p12109_p9, %p12108_p7  ;;  %p12116_p4 = scmp.lt.u32.totalorder %s12107_s30, %s12434_s16 }
  0x78   : > { %p12115_p13 = por %p12114_p2, %p12113_p1 }
  0x79   : > { %p12111_p0 = pneg %p12110_p12 }
  0x7a   : > { %p12117_p8 = por %p12116_p4, %p12115_p13 }
  0x7c   : > { %p12118_p6 = pnand %p12117_p8, %p12111_p0 }
  0x7e   : > { %12121 = shalt.err (!%p12118_p6)
}
  0x7f   : > { %s12122_s11 = scalar_lea.vmem %s12436_s8, 2048  ;;  %s12221_s15 = smov [#allocation2]  }
  0x80   : > { %p12123_p3 = scmp.ne.s32.totalorder %s12436_s8, %s12122_s11  ;;  %s12127_s28 = sshll.u32 %s12221_s15, 4  ;;  %s12128_s28 = int_to_ptr.vmem [resolvable:$false] %s12127_s28 }
  0x81   : > { %s12129_s23 = scalar_lea.vmem %s12128_s28, 4096  ;;  %p12130_p12 = scmp.lt.s32.totalorder %s12436_s8, %s12128_s28 }
  0x82   : > { %p12125_p5 = pnand %p12123_p3, %p12109_p9  ;;  %p12131_p1 = scmp.lt.s32.totalorder %s12129_s23, %s12122_s11 }
  0x84   : > { %p12126_p7 = pneg %p12125_p5  ;;  %p12132_p2 = por %p12131_p1, %p12130_p12 }
  0x86   : > { %p12133_p13 = pnand %p12132_p2, %p12126_p7 }
  0x88   : > { %12136 = shalt.err (!%p12133_p13)
}
  0x89   : > { %s15000_s30 = smov 128   ;;  %p15001_p9 = scmp.ne.s32.totalorder %s14994_s26, 0 }
  0x8a   : > { %11673 = dma.hbm_to_vmem [thread:$0]  (!%p12438_p11), %s12434_s16, 2048, %s12436_s8, %s12442_s17, %s15000_s30, %s15000_s30, %s12217_s27  }
  0x8b   : > { %248 = sbr.rel (%p15001_p9) target bundleno = 2288 (0x8f0), region = 40  ;;  %s12476_s29 = sand.u32 (!%p15001_p9), 1, %s12203_s19  }
  0x8c   : > { %s10785_s12 = sshll.u32 (!%p15001_p9), %s12476_s29, 7  ;;  %s251_s10 = scalar_lea.sflag (!%p15001_p9), [#allocation3], %s12476_s29 }
  0x8d   : > { %s12480_s13 = scalar_lea.vmem (!%p15001_p9), [#allocation2], %s10785_s12  ;;  %p15002_p0 = scmp.ne.s32.totalorder (!%p15001_p9), %s14992_s24, 0 }
  0x92   : > { %12182 = dma.done.wait (%p15002_p0), %s251_s10, 2048  }
  0x93   : > { %12184 = vsyncadd (%p15002_p0), %s251_s10, 4294965248  ;;  %p15003_p11 = scmp.eq.s32.totalorder %s12279_s22, 0 }
  0x95   : > { %12186 = dma.done.wait (%p15003_p11), [#allocation6], 4352   ;;  %p15004_p4 = pmov %p15003_p11 }
  0x97   : > { %12188 = vsyncadd (%p15004_p4), [#allocation6], 4294962944  ;;  %p15005_p8 = pmov %p15004_p4 }
  0x98   : > { %p15006_p6 = pmov %p15004_p4 }
  0x99   : > { %12190 = dma.done.wait (%p15005_p8), [#allocation9], 32  }
  0x9a   : > { %12192 = vsyncadd (%p15006_p6), [#allocation9], 4294967264  ;;  %vm406_vm0 = vcmask 1041408   ;;  %vm357_vm1 = vcmask 80896   ;;  %vm12222_vm2 = vmmov 1   ;;  %v315_v0 = vld [vmem:[#allocation5] sm:$0xff] }
  0x9b   : > { %vm11376_vm3 = vmpackc.low %vm406_vm0, %vm12222_vm2  ;;  %v316_v1 = vld [vmem:[#allocation5 + $0x8] sm:$0x3]  ;;  %v299_v2 = vld [vmem:[%s12480_s13] sm:$0xff]  ;;  %s10790_s24 = sshll.u32 %s12476_s29, 10  ;;  %s11328_s27 = sshll.u32 %s12279_s22, 14 }
  0x9c   : > { %v11375_v3 = vpack.c.bf16 %v316_v1, %v315_v0  ;;  %11351 = vmatprep.mubr.msk.f32.mxu0 %vm357_vm1, %v299_v2  ;;  %v300_v4 = vld [vmem:[%s12480_s13 + $0x8] sm:$0xff]  ;;  %v301_v5 = vld [vmem:[%s12480_s13 + $0x10] sm:$0xff]  ;;  %v302_v6 = vld [vmem:[%s12480_s13 + $0x18] sm:$0xff]  ;;  %v12223_v2 = vmov 0.0   ;;  %s12703_s26 = scalar_lea.vmem [#allocation11], %s10790_s24  ;;  %s14933_s17 = scalar_lea.hbm %s14987_s5, %s11328_s27 }
  0x9d   : > { %v318_v7 = vld [vmem:[#allocation7 + $0x8] sm:$0xff]  ;;  %v320_v8 = vld [vmem:[#allocation7 + $0x18] sm:$0xff]  ;;  %v317_v9 = vld [vmem:[#allocation7] sm:$0xff]  ;;  %641 = vmatprep.mubr.f32.mxu1 %v12223_v2  ;;  %s10663_s16 = sshll.u32 %s12703_s26, 4  ;;  %s10650_s22 = scalar_lea.sflag [#allocation4], %s12476_s29  ;;  %s14935_s16 = int_to_ptr.vmem [resolvable:$true] %s10663_s16 }
  0x9e   : > { %11377 = vmatprep.subr.msk.bf16.mxu0 %vm11376_vm3, %v11375_v3  ;;  %v12500_v10 = vpack.c.bf16 %v320_v8, %v318_v7  ;;  %v319_v11 = vld [vmem:[#allocation7 + $0x10] sm:$0xff]  ;;  %v322_v12 = vld [vmem:[#allocation7 + $0x28] sm:$0xff]  ;;  %v324_v13 = vld [vmem:[#allocation7 + $0x38] sm:$0xff]  ;;  %s12137_s11 = scalar_lea.vmem %s14935_s16, 16384  ;;  %s12225_s15 = smov [#allocation11]  }
  0x9f   : > { %11380 = vmatpush3.bf16.msk.msra.mxu0 %vm11376_vm3, %v11375_v3  ;;  %v12503_v14 = vpack.c.bf16 %v319_v11, %v317_v9  ;;  %v12505_v15 = vpack.c.bf16 %v324_v13, %v322_v12  ;;  %v321_v16 = vld [vmem:[#allocation7 + $0x20] sm:$0xff]  ;;  %v323_v17 = vld [vmem:[#allocation7 + $0x30] sm:$0xff]  ;;  %v326_v18 = vld [vmem:[#allocation7 + $0x48] sm:$0xff]  ;;  %p12138_p3 = scmp.ne.s32.totalorder %s14935_s16, %s12137_s11  ;;  %s12141_s28 = sshll.u32 %s12225_s15, 4  ;;  %s12142_s28 = int_to_ptr.vmem [resolvable:$false] %s12141_s28 }
  0xa0   : > { %v303_v19 = vld [vmem:[%s12480_s13 + $0x20] sm:$0xff]  ;;  %11382 = vmatprep.subr.bf16.mxu1 %v12500_v10  ;;  %v328_v20 = vld [vmem:[#allocation7 + $0x58] sm:$0xff]  ;;  %11414 = vmatprep.subr.bf16.mxu0 %v12500_v10  ;;  %v12511_v21 = vpack.c.bf16 %v323_v17, %v321_v16  ;;  %v325_v23 = vld [vmem:[#allocation7 + $0x40] sm:$0xff]  ;;  %s12143_s23 = scalar_lea.vmem %s12142_s28, 32768  ;;  %p12144_p12 = scmp.lt.s32.totalorder %s14935_s16, %s12142_s28 }
  0xa1   : > { %11384 = vmatpush1.bf16.msra.mxu1 %v12503_v14  ;;  %v12516_v22 = vpack.c.bf16 %v328_v20, %v326_v18  ;;  %v327_v24 = vld [vmem:[#allocation7 + $0x50] sm:$0xff]  ;;  %v304_v25 = vld [vmem:[%s12480_s13 + $0x28] sm:$0xff]  ;;  %v330_v26 = vld [vmem:[#allocation7 + $0x68] sm:$0xff]  ;;  %p12139_p5 = pnand %p12138_p3, %p12421_p10  ;;  %p12145_p1 = scmp.lt.s32.totalorder %s12143_s23, %s12137_s11 }
  0xa2   : > { %11352 = vmatmul.mubr.msk.f32.vlgmr.msra.gmra.mrb[0].mxu0 %vm357_vm1, %v300_v4  ;;  %11386 = vmatprep.subr.bf16.mxu1 %v12505_v15  ;;  %v332_v27 = vld [vmem:[#allocation7 + $0x78] sm:$0xff]  ;;  %v305_v28 = vld [vmem:[%s12480_s13 + $0x30] sm:$0xff]  ;;  %v12523_v29 = vpack.c.bf16 %v327_v24, %v325_v23  ;;  %v331_v32 = vld [vmem:[#allocation7 + $0x70] sm:$0xff] }
  0xa3   : > { %11354 = vmatprep.mubr.msk.f32.mxu0 %vm357_vm1, %v301_v5  ;;  %11416 = vmatpush1.bf16.msra.mxu0 %v12503_v14  ;;  %v12528_v30 = vpack.c.bf16 %v332_v27, %v330_v26  ;;  %v329_v31 = vld [vmem:[#allocation7 + $0x60] sm:$0xff]  ;;  %v306_v33 = vld [vmem:[%s12480_s13 + $0x38] sm:$0xff]  ;;  %v336_v35 = vld [vmem:[#allocation7 + $0x98] sm:$0xff]  ;;  %p12140_p7 = pneg %p12139_p5  ;;  %p12146_p2 = por %p12145_p1, %p12144_p12 }
  0xa4   : > { %11418 = vmatprep.subr.bf16.mxu0 %v12505_v15  ;;  %v334_v34 = vld [vmem:[#allocation7 + $0x88] sm:$0xff]  ;;  %v307_v36 = vld [vmem:[%s12480_s13 + $0x40] sm:$0xff]  ;;  %v12535_v37 = vpack.c.bf16 %v331_v32, %v329_v31  ;;  %v308_v39 = vld [vmem:[%s12480_s13 + $0x48] sm:$0xff] }
  0xa5   : > { %11388 = vmatpush1.bf16.msra.mxu1 %v12511_v21  ;;  %v12540_v38 = vpack.c.bf16 %v336_v35, %v334_v34  ;;  %v309_v40 = vld [vmem:[%s12480_s13 + $0x50] sm:$0xff]  ;;  %v310_v41 = vld [vmem:[%s12480_s13 + $0x58] sm:$0xff]  ;;  %v311_v42 = vld [vmem:[%s12480_s13 + $0x60] sm:$0xff]  ;;  %p12147_p13 = pnand %p12146_p2, %p12140_p7 }
  0xa6   : > { %11355 = vmatmul.mubr.msk.f32.gmra.mrb[2].mxu0 %vm357_vm1, %v302_v6  ;;  %11390 = vmatprep.subr.bf16.mxu1 %v12516_v22  ;;  %v312_v43 = vld [vmem:[%s12480_s13 + $0x68] sm:$0xff]  ;;  %v313_v44 = vld [vmem:[%s12480_s13 + $0x70] sm:$0xff]  ;;  %v314_v45 = vld [vmem:[%s12480_s13 + $0x78] sm:$0xff] }
  0xa7   : > { %11357 = vmatprep.mubr.msk.f32.mxu0 %vm357_vm1, %v303_v19  ;;  %11420 = vmatpush1.bf16.msra.mxu0 %v12511_v21  ;;  %v333_v46 = vld [vmem:[#allocation7 + $0x80] sm:$0xff]  ;;  %v335_v47 = vld [vmem:[#allocation7 + $0x90] sm:$0xff]  ;;  %v338_v49 = vld [vmem:[#allocation7 + $0xa8] sm:$0xff] }
  0xa8   : > { %11422 = vmatprep.subr.bf16.mxu0 %v12516_v22  ;;  %v12562_v48 = vpack.c.bf16 %v335_v47, %v333_v46  ;;  %v340_v50 = vld [vmem:[#allocation7 + $0xb8] sm:$0xff]  ;;  %v337_v52 = vld [vmem:[#allocation7 + $0xa0] sm:$0xff]  ;;  %v339_v53 = vld [vmem:[#allocation7 + $0xb0] sm:$0xff] }
  0xa9   : > { %11392 = vmatpush1.bf16.msra.mxu1 %v12523_v29  ;;  %v12566_v51 = vpack.c.bf16 %v340_v50, %v338_v49  ;;  %v12568_v54 = vpack.c.bf16 %v339_v53, %v337_v52  ;;  %v342_v55 = vld [vmem:[#allocation7 + $0xc8] sm:$0xff]  ;;  %v344_v56 = vld [vmem:[#allocation7 + $0xd8] sm:$0xff]  ;;  %v341_v58 = vld [vmem:[#allocation7 + $0xc0] sm:$0xff] }
  0xaa   : > { %11358 = vmatmul.mubr.msk.f32.gmra.mrb[4].mxu0 %vm357_vm1, %v304_v25  ;;  %11394 = vmatprep.subr.bf16.mxu1 %v12528_v30  ;;  %v12574_v57 = vpack.c.bf16 %v344_v56, %v342_v55  ;;  %v343_v59 = vld [vmem:[#allocation7 + $0xd0] sm:$0xff]  ;;  %v346_v61 = vld [vmem:[#allocation7 + $0xe8] sm:$0xff]  ;;  %v348_v62 = vld [vmem:[#allocation7 + $0xf8] sm:$0xff] }
  0xab   : > { %11360 = vmatprep.mubr.msk.f32.mxu0 %vm357_vm1, %v305_v28  ;;  %11424 = vmatpush1.bf16.msra.mxu0 %v12523_v29  ;;  %v12576_v60 = vpack.c.bf16 %v343_v59, %v341_v58  ;;  %v345_v63 = vld [vmem:[#allocation7 + $0xe0] sm:$0xff]  ;;  %v12579_v0 = vpack.c.bf16 %v348_v62, %v346_v61  ;;  %v347_v1 = vld [vmem:[#allocation7 + $0xf0] sm:$0xff] }
  0xac   : > { %11426 = vmatprep.subr.bf16.mxu0 %v12528_v30  ;;  %v12583_v3 = vpack.c.bf16 %v347_v1, %v345_v63  ;;  %v12594_v4 = vld [vmem:[#allocation8] ss:$0 sm:$0xff] }
  0xad   : > { %11396 = vmatpush1.bf16.msra.mxu1 %v12535_v37 }
  0xae   : > { %11361 = vmatmul.mubr.msk.f32.gmra.mrb[6].mxu0 %vm357_vm1, %v306_v33  ;;  %11398 = vmatprep.subr.bf16.mxu1 %v12540_v38 }
  0xaf   : > { %11363 = vmatprep.mubr.msk.f32.mxu0 %vm357_vm1, %v307_v36  ;;  %11428 = vmatpush1.bf16.msra.mxu0 %v12535_v37 }
  0xb0   : > { %11430 = vmatprep.subr.bf16.mxu0 %v12540_v38 }
  0xb1   : > { %11400 = vmatpush1.bf16.msra.mxu1 %v12562_v48 }
  0xb2   : > { %11364 = vmatmul.mubr.msk.f32.gmra.mrb[8].mxu0 %vm357_vm1, %v308_v39  ;;  %11402 = vmatprep.subr.bf16.mxu1 %v12566_v51 }
  0xb3   : > { %11366 = vmatprep.mubr.msk.f32.mxu0 %vm357_vm1, %v309_v40  ;;  %11432 = vmatpush1.bf16.msra.mxu0 %v12562_v48 }
  0xb4   : > { %11434 = vmatprep.subr.bf16.mxu0 %v12566_v51 }
  0xb5   : > { %11404 = vmatpush1.bf16.msra.mxu1 %v12568_v54 }
  0xb6   : > { %11367 = vmatmul.mubr.msk.f32.gmra.mrb[10].mxu0 %vm357_vm1, %v310_v41  ;;  %11406 = vmatprep.subr.bf16.mxu1 %v12574_v57 }
  0xb7   : > { %11369 = vmatprep.mubr.msk.f32.mxu0 %vm357_vm1, %v311_v42  ;;  %11436 = vmatpush1.bf16.msra.mxu0 %v12568_v54 }
  0xb8   : > { %11438 = vmatprep.subr.bf16.mxu0 %v12574_v57 }
  0xb9   : > { %11408 = vmatpush1.bf16.msra.mxu1 %v12576_v60 }
  0xba   : > { %11370 = vmatmul.mubr.msk.f32.gmra.mrb[12].mxu0 %vm357_vm1, %v312_v43  ;;  %11410 = vmatprep.subr.bf16.mxu1 %v12579_v0 }
  0xbb   : > { %11372 = vmatprep.mubr.msk.f32.mxu0 %vm357_vm1, %v313_v44  ;;  %11440 = vmatpush1.bf16.msra.mxu0 %v12576_v60 }
  0xbc   : > { %11442 = vmatprep.subr.bf16.mxu0 %v12579_v0 }
  0xbd   : > { %11412 = vmatpush1.bf16.msra.mxu1 %v12583_v3 }
  0xbe   : > { %11373 = vmatmul.mubr.msk.f32.gmra.mrb[14].mxu0 %vm357_vm1, %v314_v45  ;;  %11446 = vmatprep.subr.bf16.mxu1 %v12500_v10 }
  0xbf   : > { %1906 = vmatprep.mubr.f32.mxu0 %v12223_v2  ;;  %11444 = vmatpush1.bf16.msra.mxu0 %v12583_v3 }
  0xc0   : > { %11478 = vmatprep.subr.bf16.mxu0 %v12500_v10 }
 0x175   : > { %v11353_v5 = vpop.f32.mrb[0].mxu0 }
 0x176   : > { %v476_v6 = vpop.f32.mrb[1].mxu0  ;;  %v12600_v8 = vadd.f32 %v11353_v5, %v12594_v4 }
 0x177   : > { %v12597_v7 = vadd.f32 %v12594_v4, %v476_v6 }
 0x179   : > { %v11356_v9 = vpop.f32.mrb[2].mxu0  ;;  %11733 = vtanh.f32 %v12597_v7 }
 0x17a   : > { %v486_v11 = vpop.f32.mrb[3].mxu0  ;;  %11735 = vtanh.f32 %v12600_v8  ;;  %v12609_v17 = vadd.f32 %v11356_v9, %v12594_v4 }
 0x17b   : > { %v12604_v12 = vadd.f32 %v12594_v4, %v486_v11  ;;  %v774_v11 = vlaneseq }
 0x17d   : > { %v11359_v13 = vpop.f32.mrb[4].mxu0  ;;  %11737 = vtanh.f32 %v12604_v12 }
 0x17e   : > { %v496_v16 = vpop.f32.mrb[5].mxu0  ;;  %11739 = vtanh.f32 %v12609_v17  ;;  %v12620_v28 = vadd.f32 %v11359_v13, %v12594_v4 }
 0x17f   : > { %v12612_v23 = vadd.f32 %v12594_v4, %v496_v16  ;;  %v775_v16 = vshrl.u32 %v774_v11, 7 }
 0x181   : > { %v11362_v18 = vpop.f32.mrb[6].mxu0  ;;  %11741 = vtanh.f32 %v12612_v23 }
 0x182   : > { %v506_v19 = vpop.f32.mrb[7].mxu0  ;;  %11743 = vtanh.f32 %v12620_v28  ;;  %v12634_v40 = vadd.f32 %v11362_v18, %v12594_v4  ;;  %v12692_v18 = vld [vmem:[#allocation10] ss:$0 sm:$0xff] }
 0x183   : > { %v11734_v20 = vpop.eup %11733  ;;  %v12626_v33 = vadd.f32 %v12594_v4, %v506_v19 }
 0x184   : > { %642 = vmatmul.mubr.f32.vlgmr.msra.gmra.mrb[0].mxu1 %v11734_v20  ;;  %v11736_v26 = vpop.eup %11735 }
 0x185   : > { %647 = vmatprep.mubr.f32.mxu1 %v12223_v2  ;;  %v11365_v24 = vpop.f32.mrb[8].mxu0  ;;  %11448 = vmatpush1.bf16.msra.mxu1 %v12503_v14  ;;  %11745 = vtanh.f32 %v12626_v33 }
 0x186   : > { %v516_v25 = vpop.f32.mrb[9].mxu0  ;;  %11450 = vmatprep.subr.bf16.mxu1 %v12505_v15  ;;  %11747 = vtanh.f32 %v12634_v40  ;;  %v12648_v46 = vadd.f32 %v11365_v24, %v12594_v4 }
 0x187   : > { %v11738_v27 = vpop.eup %11737  ;;  %v12640_v43 = vadd.f32 %v12594_v4, %v516_v25 }
 0x188   : > { %648 = vmatmul.mubr.f32.gmra.mrb[2].mxu1 %v11736_v26  ;;  %v11740_v36 = vpop.eup %11739 }
 0x189   : > { %653 = vmatprep.mubr.f32.mxu1 %v12223_v2  ;;  %v11368_v31 = vpop.f32.mrb[10].mxu0  ;;  %11452 = vmatpush1.bf16.msra.mxu1 %v12511_v21  ;;  %11749 = vtanh.f32 %v12640_v43 }
 0x18a   : > { %v526_v32 = vpop.f32.mrb[11].mxu0  ;;  %11454 = vmatprep.subr.bf16.mxu1 %v12516_v22  ;;  %11751 = vtanh.f32 %v12648_v46  ;;  %v12662_v52 = vadd.f32 %v11368_v31, %v12594_v4 }
 0x18b   : > { %v11742_v39 = vpop.eup %11741  ;;  %v12654_v47 = vadd.f32 %v12594_v4, %v526_v32 }
 0x18c   : > { %654 = vmatmul.mubr.f32.gmra.mrb[4].mxu1 %v11738_v27  ;;  %v11744_v44 = vpop.eup %11743 }
 0x18d   : > { %659 = vmatprep.mubr.f32.mxu1 %v12223_v2  ;;  %v11371_v34 = vpop.f32.mrb[12].mxu0  ;;  %11456 = vmatpush1.bf16.msra.mxu1 %v12523_v29  ;;  %11753 = vtanh.f32 %v12654_v47 }
 0x18e   : > { %v536_v35 = vpop.f32.mrb[13].mxu0  ;;  %11458 = vmatprep.subr.bf16.mxu1 %v12528_v30  ;;  %11755 = vtanh.f32 %v12662_v52  ;;  %v12674_v58 = vadd.f32 %v11371_v34, %v12594_v4 }
 0x18f   : > { %v11746_v45 = vpop.eup %11745  ;;  %v12668_v53 = vadd.f32 %v12594_v4, %v536_v35 }
 0x190   : > { %660 = vmatmul.mubr.f32.gmra.mrb[6].mxu1 %v11740_v36  ;;  %v11748_v49 = vpop.eup %11747 }
 0x191   : > { %665 = vmatprep.mubr.f32.mxu1 %v12223_v2  ;;  %v11374_v41 = vpop.f32.mrb[14].mxu0  ;;  %11460 = vmatpush1.bf16.msra.mxu1 %v12535_v37  ;;  %11757 = vtanh.f32 %v12668_v53 }
 0x192   : > { %v546_v42 = vpop.f32.mrb[15].mxu0  ;;  %11462 = vmatprep.subr.bf16.mxu1 %v12540_v38  ;;  %11759 = vtanh.f32 %v12674_v58  ;;  %v12684_v63 = vadd.f32 %v11374_v41, %v12594_v4 }
 0x193   : > { %v11750_v50 = vpop.eup %11749  ;;  %v12678_v59 = vadd.f32 %v12594_v4, %v546_v42  ;;  %v12224_v4 = vmov 1966171168  }
 0x194   : > { %666 = vmatmul.mubr.f32.gmra.mrb[8].mxu1 %v11742_v39  ;;  %v11752_v55 = vpop.eup %11751  ;;  %v772_v9 = vunpack.c.l.s4 %v12224_v4 }
 0x195   : > { %671 = vmatprep.mubr.f32.mxu1 %v12223_v2  ;;  %11464 = vmatpush1.bf16.msra.mxu1 %v12562_v48  ;;  %11761 = vtanh.f32 %v12678_v59 }
 0x196   : > { %11466 = vmatprep.subr.bf16.mxu1 %v12566_v51  ;;  %11763 = vtanh.f32 %v12684_v63  ;;  %v773_v13 = vunpack.c.0.s8 %v772_v9 }
 0x197   : > { %v11754_v56 = vpop.eup %11753 }
 0x198   : > { %672 = vmatmul.mubr.f32.gmra.mrb[10].mxu1 %v11744_v44  ;;  %v11756_v61 = vpop.eup %11755  ;;  %v12695_v20 = vsub.s32 %v773_v13, %v775_v16 }
 0x199   : > { %677 = vmatprep.mubr.f32.mxu1 %v12223_v2  ;;  %11468 = vmatpush1.bf16.msra.mxu1 %v12568_v54 }
 0x19a   : > { %11470 = vmatprep.subr.bf16.mxu1 %v12574_v57 }
 0x19b   : > { %v11758_v62 = vpop.eup %11757 }
 0x19c   : > { %678 = vmatmul.mubr.f32.gmra.mrb[12].mxu1 %v11746_v45  ;;  %v11760_v1 = vpop.eup %11759 }
 0x19d   : > { %683 = vmatprep.mubr.f32.mxu1 %v12223_v2  ;;  %11472 = vmatpush1.bf16.msra.mxu1 %v12576_v60 }
 0x19e   : > { %11474 = vmatprep.subr.bf16.mxu1 %v12579_v0 }
 0x19f   : > { %v11762_v5 = vpop.eup %11761 }
 0x1a0   : > { %684 = vmatmul.mubr.f32.gmra.mrb[14].mxu1 %v11748_v49  ;;  %v11764_v6 = vpop.eup %11763 }
 0x1a1   : > { %689 = vmatprep.mubr.f32.mxu1 %v12223_v2  ;;  %11476 = vmatpush1.bf16.msra.mxu1 %v12583_v3 }
 0x1a2   : > { %11510 = vmatprep.subr.bf16.mxu1 %v12500_v10 }
 0x1a4   : > { %690 = vmatmul.mubr.f32.gmra.mrb[16].mxu1 %v11750_v50 }
 0x1a5   : > { %695 = vmatprep.mubr.f32.mxu1 %v12223_v2 }
 0x1a8   : > { %696 = vmatmul.mubr.f32.gmra.mrb[18].mxu1 %v11752_v55 }
 0x1a9   : > { %701 = vmatprep.mubr.f32.mxu1 %v12223_v2 }
 0x1ac   : > { %702 = vmatmul.mubr.f32.gmra.mrb[20].mxu1 %v11754_v56 }
 0x1ad   : > { %707 = vmatprep.mubr.f32.mxu1 %v12223_v2 }
 0x1b0   : > { %708 = vmatmul.mubr.f32.gmra.mrb[22].mxu1 %v11756_v61 }
 0x1b1   : > { %713 = vmatprep.mubr.f32.mxu1 %v12223_v2 }
 0x1b4   : > { %714 = vmatmul.mubr.f32.gmra.mrb[24].mxu1 %v11758_v62 }
 0x1b5   : > { %719 = vmatprep.mubr.f32.mxu1 %v12223_v2 }
 0x1b8   : > { %720 = vmatmul.mubr.f32.gmra.mrb[26].mxu1 %v11760_v1 }
 0x1b9   : > { %725 = vmatprep.mubr.f32.mxu1 %v12223_v2 }
 0x1bc   : > { %726 = vmatmul.mubr.f32.gmra.mrb[28].mxu1 %v11762_v5 }
 0x1bd   : > { %731 = vmatprep.mubr.f32.mxu1 %v12223_v2 }
 0x1c0   : > { %732 = vmatmul.mubr.f32.gmra.mrb[30].mxu1 %v11764_v6 }
 0x1c1   : > { %3171 = vmatprep.mubr.f32.mxu1 %v12223_v2 }
 0x257   : > { %v643_v19 = vpop.f32.mrb[0].mxu1 }
 0x258   : > { %v1810_v24 = vadd.f32 %v643_v19, %v12597_v7  ;;  %v645_v25 = vpop.f32.mrb[1].mxu1 }
 0x259   : > { %v738_v26 = vadd.f32 %v12692_v18, %v645_v25 }
 0x25a   : > { %11765 = vtanh.f32 %v1810_v24 }
 0x25b   : > { %v770_v27 = vcombine.high %v738_v26, %v738_v26  ;;  %v777_v31 = vrot.slane %v738_v26, %v12695_v20  ;;  %v649_v32 = vpop.f32.mrb[2].mxu1 }
 0x25c   : > { %v1811_v34 = vadd.f32 %v649_v32, %v12600_v8  ;;  %v651_v35 = vpop.f32.mrb[3].mxu1 }
 0x25d   : > { %v784_v36 = vrot.slane %v770_v27, %v12695_v20  ;;  %v785_v39 = vcombine.high %v777_v31, %v777_v31  ;;  %v793_v41 = vrot.slane %v777_v31, %v12695_v20  ;;  %10810 = vst.sshfl [vmem:[%s12703_s26] sm:$0x1 pattern:$0x73625140] %v777_v31  ;;  %v739_v42 = vadd.f32 %v12692_v18, %v651_v35 }
 0x25e   : > { %11767 = vtanh.f32 %v1811_v34 }
 0x25f   : > { %v786_v44 = vcombine.high %v784_v36, %v784_v36  ;;  %v800_v45 = vrot.slane %v784_v36, %v12695_v20  ;;  %v807_v49 = vrot.slane %v785_v39, %v12695_v20  ;;  %v815_v50 = vcombine.high %v793_v41, %v793_v41  ;;  %10811 = vst.sshfl [vmem:[%s12703_s26 + $0x8] sm:$0x1 pattern:$0x73625140] %v785_v39  ;;  %v655_v55 = vpop.f32.mrb[4].mxu1 }
 0x260   : > { %10812 = vst.sshfl [vmem:[%s12703_s26 + $0x20] sm:$0x1 pattern:$0x73625140] %v784_v36  ;;  %v819_v56 = vcombine.high %v739_v42, %v739_v42  ;;  %v826_v61 = vrot.slane %v739_v42, %v12695_v20  ;;  %v1812_v62 = vadd.f32 %v655_v55, %v12604_v12  ;;  %v657_v1 = vpop.f32.mrb[5].mxu1 }
 0x261   : > { %v814_v5 = vrot.slane %v786_v44, %v12695_v20  ;;  %v816_v6 = vcombine.high %v800_v45, %v800_v45  ;;  %v817_v4 = vcombine.high %v807_v49, %v807_v49  ;;  %1684 = vst [vmem:[%s12703_s26 + $0x10] sm:$0x1] %v815_v50  ;;  %10813 = vst.sshfl [vmem:[%s12703_s26 + $0x28] sm:$0x1 pattern:$0x73625140] %v786_v44 }
 0x262   : > { %v740_v9 = vadd.f32 %v12692_v18, %v657_v1  ;;  %v833_v11 = vrot.slane %v819_v56, %v12695_v20  ;;  %v834_v13 = vcombine.high %v826_v61, %v826_v61  ;;  %v842_v16 = vrot.slane %v826_v61, %v12695_v20  ;;  %10814 = vst.sshfl [vmem:[%s12703_s26 + $0x40] sm:$0x1 pattern:$0x73625140] %v826_v61 }
 0x263   : > { %11769 = vtanh.f32 %v1812_v62  ;;  %v818_v19 = vcombine.high %v814_v5, %v814_v5  ;;  %1685 = vst [vmem:[%s12703_s26 + $0x18] sm:$0x1] %v817_v4  ;;  %1688 = vst [vmem:[%s12703_s26 + $0x30] sm:$0x1] %v816_v6  ;;  %v661_v26 = vpop.f32.mrb[6].mxu1 }
 0x264   : > { %v868_v24 = vcombine.high %v740_v9, %v740_v9  ;;  %v875_v25 = vrot.slane %v740_v9, %v12695_v20  ;;  %v11766_v27 = vpop.eup %11765  ;;  %v835_v31 = vcombine.high %v833_v11, %v833_v11  ;;  %v849_v32 = vrot.slane %v833_v11, %v12695_v20  ;;  %10815 = vst.sshfl [vmem:[%s12703_s26 + $0x48] sm:$0x1 pattern:$0x73625140] %v834_v13  ;;  %v663_v36 = vpop.f32.mrb[7].mxu1 }
 0x265   : > { %v856_v34 = vrot.slane %v834_v13, %v12695_v20  ;;  %v864_v35 = vcombine.high %v842_v16, %v842_v16  ;;  %10816 = vst.sshfl [vmem:[%s12703_s26 + $0x60] sm:$0x1 pattern:$0x73625140] %v833_v11  ;;  %1689 = vst [vmem:[%s12703_s26 + $0x38] sm:$0x1] %v818_v19  ;;  %v1813_v44 = vadd.f32 %v661_v26, %v12609_v17  ;;  %1907 = vmatmul.mubr.f32.vlgmr.msra.gmra.mrb[16].mxu0 %v11766_v27 }
 0x266   : > { %v882_v39 = vrot.slane %v868_v24, %v12695_v20  ;;  %v883_v41 = vcombine.high %v875_v25, %v875_v25  ;;  %v891_v42 = vrot.slane %v875_v25, %v12695_v20  ;;  %10818 = vst.sshfl [vmem:[%s12703_s26 + $0x80] sm:$0x1 pattern:$0x73625140] %v875_v25  ;;  %v863_v45 = vrot.slane %v835_v31, %v12695_v20 }
 0x267   : > { %v865_v49 = vcombine.high %v849_v32, %v849_v32  ;;  %v866_v50 = vcombine.high %v856_v34, %v856_v34  ;;  %1692 = vst [vmem:[%s12703_s26 + $0x50] sm:$0x1] %v864_v35  ;;  %10817 = vst.sshfl [vmem:[%s12703_s26 + $0x68] sm:$0x1 pattern:$0x73625140] %v835_v31  ;;  %v741_v55 = vadd.f32 %v12692_v18, %v663_v36  ;;  %1912 = vmatprep.mubr.f32.mxu0 %v12223_v2 }
 0x268   : > { %v884_v56 = vcombine.high %v882_v39, %v882_v39  ;;  %v898_v61 = vrot.slane %v882_v39, %v12695_v20  ;;  %v905_v62 = vrot.slane %v883_v41, %v12695_v20  ;;  %v913_v1 = vcombine.high %v891_v42, %v891_v42  ;;  %10819 = vst.sshfl [vmem:[%s12703_s26 + $0x88] sm:$0x1 pattern:$0x73625140] %v883_v41  ;;  %v667_v5 = vpop.f32.mrb[8].mxu1  ;;  %v11768_v6 = vpop.eup %11767 }
 0x269   : > { %10820 = vst.sshfl [vmem:[%s12703_s26 + $0xa0] sm:$0x1 pattern:$0x73625140] %v882_v39  ;;  %11480 = vmatpush1.bf16.msra.mxu0 %v12503_v14  ;;  %v867_v4 = vcombine.high %v863_v45, %v863_v45  ;;  %1693 = vst [vmem:[%s12703_s26 + $0x58] sm:$0x1] %v866_v50  ;;  %11771 = vtanh.f32 %v1813_v44  ;;  %v917_v9 = vcombine.high %v741_v55, %v741_v55 }
 0x26a   : > { %1696 = vst [vmem:[%s12703_s26 + $0x70] sm:$0x1] %v865_v49  ;;  %v924_v11 = vrot.slane %v741_v55, %v12695_v20  ;;  %v669_v13 = vpop.f32.mrb[9].mxu1  ;;  %11482 = vmatprep.subr.bf16.mxu0 %v12505_v15  ;;  %v912_v16 = vrot.slane %v884_v56, %v12695_v20  ;;  %v914_v19 = vcombine.high %v898_v61, %v898_v61  ;;  %1700 = vst [vmem:[%s12703_s26 + $0x90] sm:$0x1] %v913_v1 }
 0x26b   : > { %v915_v24 = vcombine.high %v905_v62, %v905_v62  ;;  %10821 = vst.sshfl [vmem:[%s12703_s26 + $0xa8] sm:$0x1 pattern:$0x73625140] %v884_v56  ;;  %v1814_v25 = vadd.f32 %v667_v5, %v12612_v23  ;;  %1913 = vmatmul.mubr.f32.gmra.mrb[18].mxu0 %v11768_v6  ;;  %1697 = vst [vmem:[%s12703_s26 + $0x78] sm:$0x1] %v867_v4  ;;  %v931_v26 = vrot.slane %v917_v9, %v12695_v20 }
 0x26c   : > { %v932_v27 = vcombine.high %v924_v11, %v924_v11  ;;  %v940_v31 = vrot.slane %v924_v11, %v12695_v20  ;;  %10822 = vst.sshfl [vmem:[%s12703_s26 + $0xc0] sm:$0x1 pattern:$0x73625140] %v924_v11  ;;  %v742_v32 = vadd.f32 %v12692_v18, %v669_v13  ;;  %1918 = vmatprep.mubr.f32.mxu0 %v12223_v2  ;;  %1704 = vst [vmem:[%s12703_s26 + $0xb0] sm:$0x1] %v914_v19 }
 0x26d   : > { %v916_v34 = vcombine.high %v912_v16, %v912_v16  ;;  %1701 = vst [vmem:[%s12703_s26 + $0x98] sm:$0x1] %v915_v24  ;;  %11773 = vtanh.f32 %v1814_v25  ;;  %v673_v35 = vpop.f32.mrb[10].mxu1  ;;  %11484 = vmatpush1.bf16.msra.mxu0 %v12511_v21  ;;  %v11770_v36 = vpop.eup %11769  ;;  %v933_v39 = vcombine.high %v931_v26, %v931_v26  ;;  %v947_v41 = vrot.slane %v931_v26, %v12695_v20 }
 0x26e   : > { %v954_v42 = vrot.slane %v932_v27, %v12695_v20  ;;  %v962_v44 = vcombine.high %v940_v31, %v940_v31  ;;  %10823 = vst.sshfl [vmem:[%s12703_s26 + $0xc8] sm:$0x1 pattern:$0x73625140] %v932_v27  ;;  %v675_v45 = vpop.f32.mrb[11].mxu1  ;;  %11486 = vmatprep.subr.bf16.mxu0 %v12516_v22  ;;  %v966_v49 = vcombine.high %v742_v32, %v742_v32 }
 0x26f   : > { %10824 = vst.sshfl [vmem:[%s12703_s26 + $0xe0] sm:$0x1 pattern:$0x73625140] %v931_v26  ;;  %1705 = vst [vmem:[%s12703_s26 + $0xb8] sm:$0x1] %v916_v34  ;;  %v973_v50 = vrot.slane %v742_v32, %v12695_v20  ;;  %v1815_v55 = vadd.f32 %v673_v35, %v12620_v28  ;;  %v743_v56 = vadd.f32 %v12692_v18, %v675_v45  ;;  %1919 = vmatmul.mubr.f32.gmra.mrb[20].mxu0 %v11770_v36 }
 0x270   : > { %v961_v61 = vrot.slane %v933_v39, %v12695_v20  ;;  %v963_v62 = vcombine.high %v947_v41, %v947_v41  ;;  %v964_v1 = vcombine.high %v954_v42, %v954_v42  ;;  %1708 = vst [vmem:[%s12703_s26 + $0xd0] sm:$0x1] %v962_v44  ;;  %10825 = vst.sshfl [vmem:[%s12703_s26 + $0xe8] sm:$0x1 pattern:$0x73625140] %v933_v39  ;;  %1924 = vmatprep.mubr.f32.mxu0 %v12223_v2 }
 0x271   : > { %v980_v5 = vrot.slane %v966_v49, %v12695_v20  ;;  %v981_v6 = vcombine.high %v973_v50, %v973_v50  ;;  %v989_v4 = vrot.slane %v973_v50, %v12695_v20  ;;  %10826 = vst.sshfl [vmem:[%s12703_s26 + $0x100] sm:$0x1 pattern:$0x73625140] %v973_v50  ;;  %11775 = vtanh.f32 %v1815_v55  ;;  %v679_v9 = vpop.f32.mrb[12].mxu1  ;;  %11488 = vmatpush1.bf16.msra.mxu0 %v12523_v29 }
 0x272   : > { %v965_v11 = vcombine.high %v961_v61, %v961_v61  ;;  %1709 = vst [vmem:[%s12703_s26 + $0xd8] sm:$0x1] %v964_v1  ;;  %1712 = vst [vmem:[%s12703_s26 + $0xf0] sm:$0x1] %v963_v62  ;;  %v1015_v13 = vcombine.high %v743_v56, %v743_v56  ;;  %v1022_v16 = vrot.slane %v743_v56, %v12695_v20  ;;  %v681_v24 = vpop.f32.mrb[13].mxu1  ;;  %11490 = vmatprep.subr.bf16.mxu0 %v12528_v30 }
 0x273   : > { %v1816_v19 = vadd.f32 %v679_v9, %v12626_v33  ;;  %v982_v25 = vcombine.high %v980_v5, %v980_v5  ;;  %v996_v26 = vrot.slane %v980_v5, %v12695_v20  ;;  %v1003_v27 = vrot.slane %v981_v6, %v12695_v20  ;;  %10827 = vst.sshfl [vmem:[%s12703_s26 + $0x108] sm:$0x1 pattern:$0x73625140] %v981_v6  ;;  %v11772_v32 = vpop.eup %11771  ;;  %v685_v45 = vpop.f32.mrb[14].mxu1 }
 0x274   : > { %v1011_v31 = vcombine.high %v989_v4, %v989_v4  ;;  %10828 = vst.sshfl [vmem:[%s12703_s26 + $0x120] sm:$0x1 pattern:$0x73625140] %v980_v5  ;;  %1713 = vst [vmem:[%s12703_s26 + $0xf8] sm:$0x1] %v965_v11  ;;  %v1029_v34 = vrot.slane %v1015_v13, %v12695_v20  ;;  %v1030_v35 = vcombine.high %v1022_v16, %v1022_v16  ;;  %1925 = vmatmul.mubr.f32.gmra.mrb[22].mxu0 %v11772_v32 }
 0x275   : > { %v1038_v36 = vrot.slane %v1022_v16, %v12695_v20  ;;  %10830 = vst.sshfl [vmem:[%s12703_s26 + $0x140] sm:$0x1 pattern:$0x73625140] %v1022_v16  ;;  %11777 = vtanh.f32 %v1816_v19  ;;  %v1010_v39 = vrot.slane %v982_v25, %v12695_v20  ;;  %v1012_v41 = vcombine.high %v996_v26, %v996_v26  ;;  %v687_v61 = vpop.f32.mrb[15].mxu1  ;;  %1930 = vmatprep.mubr.f32.mxu0 %v12223_v2 }
 0x276   : > { %v1013_v42 = vcombine.high %v1003_v27, %v1003_v27  ;;  %1716 = vst [vmem:[%s12703_s26 + $0x110] sm:$0x1] %v1011_v31  ;;  %10829 = vst.sshfl [vmem:[%s12703_s26 + $0x128] sm:$0x1 pattern:$0x73625140] %v982_v25  ;;  %v744_v44 = vadd.f32 %v12692_v18, %v681_v24  ;;  %v1031_v49 = vcombine.high %v1029_v34, %v1029_v34  ;;  %11492 = vmatpush1.bf16.msra.mxu0 %v12535_v37 }
 0x277   : > { %v1045_v50 = vrot.slane %v1029_v34, %v12695_v20  ;;  %v1052_v55 = vrot.slane %v1030_v35, %v12695_v20  ;;  %v1060_v56 = vcombine.high %v1038_v36, %v1038_v36  ;;  %10831 = vst.sshfl [vmem:[%s12703_s26 + $0x148] sm:$0x1 pattern:$0x73625140] %v1030_v35  ;;  %v11774_v62 = vpop.eup %11773  ;;  %v1014_v1 = vcombine.high %v1010_v39, %v1010_v39  ;;  %v691_v26 = vpop.f32.mrb[16].mxu1 }
 0x278   : > { %10832 = vst.sshfl [vmem:[%s12703_s26 + $0x160] sm:$0x1 pattern:$0x73625140] %v1029_v34  ;;  %1717 = vst [vmem:[%s12703_s26 + $0x118] sm:$0x1] %v1013_v42  ;;  %v1064_v5 = vcombine.high %v744_v44, %v744_v44  ;;  %v1071_v6 = vrot.slane %v744_v44, %v12695_v20  ;;  %v1817_v4 = vadd.f32 %v685_v45, %v12634_v40  ;;  %11494 = vmatprep.subr.bf16.mxu0 %v12540_v38 }
 0x279   : > { %1720 = vst [vmem:[%s12703_s26 + $0x130] sm:$0x1] %v1012_v41  ;;  %v1059_v9 = vrot.slane %v1031_v49, %v12695_v20  ;;  %v1061_v11 = vcombine.high %v1045_v50, %v1045_v50  ;;  %v1062_v13 = vcombine.high %v1052_v55, %v1052_v55  ;;  %1724 = vst [vmem:[%s12703_s26 + $0x150] sm:$0x1] %v1060_v56  ;;  %1931 = vmatmul.mubr.f32.gmra.mrb[24].mxu0 %v11774_v62  ;;  %v693_v35 = vpop.f32.mrb[17].mxu1 }
 0x27a   : > { %10833 = vst.sshfl [vmem:[%s12703_s26 + $0x168] sm:$0x1 pattern:$0x73625140] %v1031_v49  ;;  %v745_v16 = vadd.f32 %v12692_v18, %v687_v61  ;;  %1721 = vst [vmem:[%s12703_s26 + $0x138] sm:$0x1] %v1014_v1  ;;  %v1078_v19 = vrot.slane %v1064_v5, %v12695_v20  ;;  %v1079_v24 = vcombine.high %v1071_v6, %v1071_v6  ;;  %11779 = vtanh.f32 %v1817_v4 }
 0x27b   : > { %v1087_v25 = vrot.slane %v1071_v6, %v12695_v20  ;;  %10834 = vst.sshfl [vmem:[%s12703_s26 + $0x180] sm:$0x1 pattern:$0x73625140] %v1071_v6  ;;  %v1063_v27 = vcombine.high %v1059_v9, %v1059_v9  ;;  %1725 = vst [vmem:[%s12703_s26 + $0x158] sm:$0x1] %v1062_v13  ;;  %v1818_v34 = vadd.f32 %v691_v26, %v12640_v43  ;;  %1936 = vmatprep.mubr.f32.mxu0 %v12223_v2  ;;  %v11776_v36 = vpop.eup %11775 }
 0x27c   : > { %1728 = vst [vmem:[%s12703_s26 + $0x170] sm:$0x1] %v1061_v11  ;;  %v1113_v31 = vcombine.high %v745_v16, %v745_v16  ;;  %v1120_v32 = vrot.slane %v745_v16, %v12695_v20  ;;  %v1080_v39 = vcombine.high %v1078_v19, %v1078_v19  ;;  %v1094_v41 = vrot.slane %v1078_v19, %v12695_v20  ;;  %v697_v1 = vpop.f32.mrb[18].mxu1 }
 0x27d   : > { %v1101_v42 = vrot.slane %v1079_v24, %v12695_v20  ;;  %v1109_v44 = vcombine.high %v1087_v25, %v1087_v25  ;;  %10835 = vst.sshfl [vmem:[%s12703_s26 + $0x188] sm:$0x1 pattern:$0x73625140] %v1079_v24  ;;  %11496 = vmatpush1.bf16.msra.mxu0 %v12562_v48  ;;  %1729 = vst [vmem:[%s12703_s26 + $0x178] sm:$0x1] %v1063_v27  ;;  %11781 = vtanh.f32 %v1818_v34 }
 0x27e   : > { %10836 = vst.sshfl [vmem:[%s12703_s26 + $0x1a0] sm:$0x1 pattern:$0x73625140] %v1078_v19  ;;  %v1127_v45 = vrot.slane %v1113_v31, %v12695_v20  ;;  %v1128_v49 = vcombine.high %v1120_v32, %v1120_v32  ;;  %v1136_v50 = vrot.slane %v1120_v32, %v12695_v20  ;;  %11498 = vmatprep.subr.bf16.mxu0 %v12566_v51  ;;  %v699_v13 = vpop.f32.mrb[19].mxu1 }
 0x27f   : > { %10838 = vst.sshfl [vmem:[%s12703_s26 + $0x1c0] sm:$0x1 pattern:$0x73625140] %v1120_v32  ;;  %v1108_v55 = vrot.slane %v1080_v39, %v12695_v20  ;;  %v1110_v56 = vcombine.high %v1094_v41, %v1094_v41  ;;  %v1111_v61 = vcombine.high %v1101_v42, %v1101_v42  ;;  %1732 = vst [vmem:[%s12703_s26 + $0x190] sm:$0x1] %v1109_v44  ;;  %1937 = vmatmul.mubr.f32.gmra.mrb[26].mxu0 %v11776_v36  ;;  %v11778_v5 = vpop.eup %11777 }
 0x280   : > { %10837 = vst.sshfl [vmem:[%s12703_s26 + $0x1a8] sm:$0x1 pattern:$0x73625140] %v1080_v39  ;;  %v746_v62 = vadd.f32 %v12692_v18, %v693_v35  ;;  %v1129_v6 = vcombine.high %v1127_v45, %v1127_v45  ;;  %v1143_v4 = vrot.slane %v1127_v45, %v12695_v20  ;;  %v1150_v9 = vrot.slane %v1128_v49, %v12695_v20  ;;  %v703_v39 = vpop.f32.mrb[20].mxu1 }
 0x281   : > { %v1158_v11 = vcombine.high %v1136_v50, %v1136_v50  ;;  %10839 = vst.sshfl [vmem:[%s12703_s26 + $0x1c8] sm:$0x1 pattern:$0x73625140] %v1128_v49  ;;  %1942 = vmatprep.mubr.f32.mxu0 %v12223_v2  ;;  %v1112_v16 = vcombine.high %v1108_v55, %v1108_v55  ;;  %1733 = vst [vmem:[%s12703_s26 + $0x198] sm:$0x1] %v1111_v61  ;;  %v1819_v25 = vadd.f32 %v697_v1, %v12648_v46 }
 0x282   : > { %10840 = vst.sshfl [vmem:[%s12703_s26 + $0x1e0] sm:$0x1 pattern:$0x73625140] %v1127_v45  ;;  %1736 = vst [vmem:[%s12703_s26 + $0x1b0] sm:$0x1] %v1110_v56  ;;  %v1162_v19 = vcombine.high %v746_v62, %v746_v62  ;;  %v1169_v24 = vrot.slane %v746_v62, %v12695_v20  ;;  %11500 = vmatpush1.bf16.msra.mxu0 %v12568_v54  ;;  %v1157_v26 = vrot.slane %v1129_v6, %v12695_v20 }
 0x283   : > { %v1159_v27 = vcombine.high %v1143_v4, %v1143_v4  ;;  %v1160_v31 = vcombine.high %v1150_v9, %v1150_v9  ;;  %1740 = vst [vmem:[%s12703_s26 + $0x1d0] sm:$0x1] %v1158_v11  ;;  %10841 = vst.sshfl [vmem:[%s12703_s26 + $0x1e8] sm:$0x1 pattern:$0x73625140] %v1129_v6  ;;  %v747_v32 = vadd.f32 %v12692_v18, %v699_v13  ;;  %11502 = vmatprep.subr.bf16.mxu0 %v12574_v57 }
 0x284   : > { %1737 = vst [vmem:[%s12703_s26 + $0x1b8] sm:$0x1] %v1112_v16  ;;  %v1176_v34 = vrot.slane %v1162_v19, %v12695_v20  ;;  %v1177_v35 = vcombine.high %v1169_v24, %v1169_v24  ;;  %v1185_v36 = vrot.slane %v1169_v24, %v12695_v20  ;;  %10842 = vst.sshfl [vmem:[%s12703_s26 + $0x200] sm:$0x1 pattern:$0x73625140] %v1169_v24  ;;  %11783 = vtanh.f32 %v1819_v25  ;;  %v11780_v50 = vpop.eup %11779 }
 0x285   : > { %1943 = vmatmul.mubr.f32.gmra.mrb[28].mxu0 %v11778_v5  ;;  %v1161_v41 = vcombine.high %v1157_v26, %v1157_v26  ;;  %1741 = vst [vmem:[%s12703_s26 + $0x1d8] sm:$0x1] %v1160_v31  ;;  %1744 = vst [vmem:[%s12703_s26 + $0x1f0] sm:$0x1] %v1159_v27  ;;  %v1211_v42 = vcombine.high %v747_v32, %v747_v32  ;;  %v1218_v44 = vrot.slane %v747_v32, %v12695_v20  ;;  %v705_v49 = vpop.f32.mrb[21].mxu1 }
 0x286   : > { %v1820_v45 = vadd.f32 %v703_v39, %v12654_v47  ;;  %1948 = vmatprep.mubr.f32.mxu0 %v12223_v2  ;;  %v1178_v55 = vcombine.high %v1176_v34, %v1176_v34  ;;  %v1192_v56 = vrot.slane %v1176_v34, %v12695_v20  ;;  %v1199_v61 = vrot.slane %v1177_v35, %v12695_v20  ;;  %v709_v16 = vpop.f32.mrb[22].mxu1 }
 0x287   : > { %v1207_v62 = vcombine.high %v1185_v36, %v1185_v36  ;;  %10843 = vst.sshfl [vmem:[%s12703_s26 + $0x208] sm:$0x1 pattern:$0x73625140] %v1177_v35  ;;  %11504 = vmatpush1.bf16.msra.mxu0 %v12576_v60  ;;  %1745 = vst [vmem:[%s12703_s26 + $0x1f8] sm:$0x1] %v1161_v41  ;;  %v1225_v1 = vrot.slane %v1211_v42, %v12695_v20  ;;  %v1226_v5 = vcombine.high %v1218_v44, %v1218_v44  ;;  %v11782_v19 = vpop.eup %11781 }
 0x288   : > { %10844 = vst.sshfl [vmem:[%s12703_s26 + $0x220] sm:$0x1 pattern:$0x73625140] %v1176_v34  ;;  %v1234_v6 = vrot.slane %v1218_v44, %v12695_v20  ;;  %11785 = vtanh.f32 %v1820_v45  ;;  %11506 = vmatprep.subr.bf16.mxu0 %v12579_v0  ;;  %v1206_v4 = vrot.slane %v1178_v55, %v12695_v20  ;;  %v1208_v9 = vcombine.high %v1192_v56, %v1192_v56  ;;  %v711_v31 = vpop.f32.mrb[23].mxu1 }
 0x289   : > { %10846 = vst.sshfl [vmem:[%s12703_s26 + $0x240] sm:$0x1 pattern:$0x73625140] %v1218_v44  ;;  %v1209_v11 = vcombine.high %v1199_v61, %v1199_v61  ;;  %1748 = vst [vmem:[%s12703_s26 + $0x210] sm:$0x1] %v1207_v62  ;;  %v748_v13 = vadd.f32 %v12692_v18, %v705_v49  ;;  %1949 = vmatmul.mubr.f32.gmra.mrb[30].mxu0 %v11780_v50  ;;  %v1227_v24 = vcombine.high %v1225_v1, %v1225_v1 }
 0x28a   : > { %10845 = vst.sshfl [vmem:[%s12703_s26 + $0x228] sm:$0x1 pattern:$0x73625140] %v1178_v55  ;;  %v1241_v25 = vrot.slane %v1225_v1, %v12695_v20  ;;  %v1248_v26 = vrot.slane %v1226_v5, %v12695_v20  ;;  %v1256_v27 = vcombine.high %v1234_v6, %v1234_v6  ;;  %1954 = vmatprep.mubr.f32.mxu0 %v12223_v2  ;;  %1752 = vst [vmem:[%s12703_s26 + $0x230] sm:$0x1] %v1208_v9 }
 0x28b   : > { %10847 = vst.sshfl [vmem:[%s12703_s26 + $0x248] sm:$0x1 pattern:$0x73625140] %v1226_v5  ;;  %v1210_v32 = vcombine.high %v1206_v4, %v1206_v4  ;;  %1749 = vst [vmem:[%s12703_s26 + $0x218] sm:$0x1] %v1209_v11  ;;  %v1260_v34 = vcombine.high %v748_v13, %v748_v13  ;;  %v1267_v35 = vrot.slane %v748_v13, %v12695_v20  ;;  %11508 = vmatpush1.bf16.msra.mxu0 %v12583_v3 }
 0x28c   : > { %10848 = vst.sshfl [vmem:[%s12703_s26 + $0x260] sm:$0x1 pattern:$0x73625140] %v1225_v1  ;;  %v1821_v36 = vadd.f32 %v709_v16, %v12662_v52  ;;  %v1255_v39 = vrot.slane %v1227_v24, %v12695_v20  ;;  %v1257_v41 = vcombine.high %v1241_v25, %v1241_v25  ;;  %v1258_v42 = vcombine.high %v1248_v26, %v1248_v26  ;;  %v715_v55 = vpop.f32.mrb[24].mxu1 }
 0x28d   : > { %1756 = vst [vmem:[%s12703_s26 + $0x250] sm:$0x1] %v1256_v27  ;;  %10849 = vst.sshfl [vmem:[%s12703_s26 + $0x268] sm:$0x1 pattern:$0x73625140] %v1227_v24  ;;  %v749_v44 = vadd.f32 %v12692_v18, %v711_v31  ;;  %11542 = vmatprep.subr.bf16.mxu0 %v12500_v10  ;;  %v1274_v45 = vrot.slane %v1260_v34, %v12695_v20  ;;  %v1275_v49 = vcombine.high %v1267_v35, %v1267_v35 }
 0x28e   : > { %1753 = vst [vmem:[%s12703_s26 + $0x238] sm:$0x1] %v1210_v32  ;;  %v1283_v50 = vrot.slane %v1267_v35, %v12695_v20  ;;  %10850 = vst.sshfl [vmem:[%s12703_s26 + $0x280] sm:$0x1 pattern:$0x73625140] %v1267_v35  ;;  %11787 = vtanh.f32 %v1821_v36  ;;  %1955 = vmatmul.mubr.f32.gmra.mrb[32].mxu0 %v11782_v19  ;;  %v1259_v56 = vcombine.high %v1255_v39, %v1255_v39  ;;  %v11784_v6 = vpop.eup %11783 }
 0x28f   : > { %1757 = vst [vmem:[%s12703_s26 + $0x258] sm:$0x1] %v1258_v42  ;;  %1760 = vst [vmem:[%s12703_s26 + $0x270] sm:$0x1] %v1257_v41  ;;  %v1309_v61 = vcombine.high %v749_v44, %v749_v44  ;;  %v1316_v62 = vrot.slane %v749_v44, %v12695_v20  ;;  %v1822_v1 = vadd.f32 %v715_v55, %v12668_v53  ;;  %v717_v5 = vpop.f32.mrb[25].mxu1  ;;  %1960 = vmatprep.mubr.f32.mxu0 %v12223_v2 }
 0x290   : > { %v1276_v4 = vcombine.high %v1274_v45, %v1274_v45  ;;  %v1290_v9 = vrot.slane %v1274_v45, %v12695_v20  ;;  %v1297_v11 = vrot.slane %v1275_v49, %v12695_v20  ;;  %v1305_v13 = vcombine.high %v1283_v50, %v1283_v50  ;;  %10851 = vst.sshfl [vmem:[%s12703_s26 + $0x288] sm:$0x1 pattern:$0x73625140] %v1275_v49  ;;  %v721_v32 = vpop.f32.mrb[26].mxu1 }
 0x291   : > { %10852 = vst.sshfl [vmem:[%s12703_s26 + $0x2a0] sm:$0x1 pattern:$0x73625140] %v1274_v45  ;;  %1761 = vst [vmem:[%s12703_s26 + $0x278] sm:$0x1] %v1259_v56  ;;  %v1323_v16 = vrot.slane %v1309_v61, %v12695_v20  ;;  %v1324_v19 = vcombine.high %v1316_v62, %v1316_v62  ;;  %v1332_v24 = vrot.slane %v1316_v62, %v12695_v20  ;;  %11789 = vtanh.f32 %v1822_v1 }
 0x292   : > { %10854 = vst.sshfl [vmem:[%s12703_s26 + $0x2c0] sm:$0x1 pattern:$0x73625140] %v1316_v62  ;;  %v1304_v25 = vrot.slane %v1276_v4, %v12695_v20  ;;  %v1306_v26 = vcombine.high %v1290_v9, %v1290_v9  ;;  %v1307_v27 = vcombine.high %v1297_v11, %v1297_v11  ;;  %1764 = vst [vmem:[%s12703_s26 + $0x290] sm:$0x1] %v1305_v13  ;;  %1961 = vmatmul.mubr.f32.gmra.mrb[34].mxu0 %v11784_v6  ;;  %v11786_v34 = vpop.eup %11785 }
 0x293   : > { %10853 = vst.sshfl [vmem:[%s12703_s26 + $0x2a8] sm:$0x1 pattern:$0x73625140] %v1276_v4  ;;  %v750_v31 = vadd.f32 %v12692_v18, %v717_v5  ;;  %v1325_v35 = vcombine.high %v1323_v16, %v1323_v16  ;;  %v1339_v36 = vrot.slane %v1323_v16, %v12695_v20  ;;  %v1346_v39 = vrot.slane %v1324_v19, %v12695_v20  ;;  %v723_v42 = vpop.f32.mrb[27].mxu1 }
 0x294   : > { %v1354_v41 = vcombine.high %v1332_v24, %v1332_v24  ;;  %10855 = vst.sshfl [vmem:[%s12703_s26 + $0x2c8] sm:$0x1 pattern:$0x73625140] %v1324_v19  ;;  %1966 = vmatprep.mubr.f32.mxu0 %v12223_v2  ;;  %v1308_v44 = vcombine.high %v1304_v25, %v1304_v25  ;;  %1765 = vst [vmem:[%s12703_s26 + $0x298] sm:$0x1] %v1307_v27  ;;  %v1823_v50 = vadd.f32 %v721_v32, %v12674_v58 }
 0x295   : > { %10856 = vst.sshfl [vmem:[%s12703_s26 + $0x2e0] sm:$0x1 pattern:$0x73625140] %v1323_v16  ;;  %1768 = vst [vmem:[%s12703_s26 + $0x2b0] sm:$0x1] %v1306_v26  ;;  %v1358_v45 = vcombine.high %v750_v31, %v750_v31  ;;  %v1365_v49 = vrot.slane %v750_v31, %v12695_v20  ;;  %v1353_v55 = vrot.slane %v1325_v35, %v12695_v20 }
 0x296   : > { %v1355_v56 = vcombine.high %v1339_v36, %v1339_v36  ;;  %v1356_v61 = vcombine.high %v1346_v39, %v1346_v39  ;;  %1772 = vst [vmem:[%s12703_s26 + $0x2d0] sm:$0x1] %v1354_v41  ;;  %10857 = vst.sshfl [vmem:[%s12703_s26 + $0x2e8] sm:$0x1 pattern:$0x73625140] %v1325_v35  ;;  %v751_v62 = vadd.f32 %v12692_v18, %v723_v42  ;;  %11791 = vtanh.f32 %v1823_v50 }
 0x297   : > { %1769 = vst [vmem:[%s12703_s26 + $0x2b8] sm:$0x1] %v1308_v44  ;;  %v1372_v1 = vrot.slane %v1358_v45, %v12695_v20  ;;  %v1373_v5 = vcombine.high %v1365_v49, %v1365_v49  ;;  %v1381_v6 = vrot.slane %v1365_v49, %v12695_v20  ;;  %10858 = vst.sshfl [vmem:[%s12703_s26 + $0x300] sm:$0x1 pattern:$0x73625140] %v1365_v49  ;;  %1967 = vmatmul.mubr.f32.gmra.mrb[36].mxu0 %v11786_v34 }
 0x298   : > { %v727_v4 = vpop.f32.mrb[28].mxu1  ;;  %v1357_v9 = vcombine.high %v1353_v55, %v1353_v55  ;;  %1773 = vst [vmem:[%s12703_s26 + $0x2d8] sm:$0x1] %v1356_v61  ;;  %1776 = vst [vmem:[%s12703_s26 + $0x2f0] sm:$0x1] %v1355_v56  ;;  %v1407_v11 = vcombine.high %v751_v62, %v751_v62  ;;  %v1414_v13 = vrot.slane %v751_v62, %v12695_v20  ;;  %1972 = vmatprep.mubr.f32.mxu0 %v12223_v2  ;;  %v11788_v24 = vpop.eup %11787 }
 0x299   : > { %v1824_v16 = vadd.f32 %v727_v4, %v12678_v59  ;;  %v729_v19 = vpop.f32.mrb[29].mxu1  ;;  %v1374_v25 = vcombine.high %v1372_v1, %v1372_v1  ;;  %v1388_v26 = vrot.slane %v1372_v1, %v12695_v20  ;;  %v1395_v27 = vrot.slane %v1373_v5, %v12695_v20  ;;  %10859 = vst.sshfl [vmem:[%s12703_s26 + $0x308] sm:$0x1 pattern:$0x73625140] %v1373_v5 }
 0x29a   : > { %v1403_v31 = vcombine.high %v1381_v6, %v1381_v6  ;;  %10860 = vst.sshfl [vmem:[%s12703_s26 + $0x320] sm:$0x1 pattern:$0x73625140] %v1372_v1  ;;  %1777 = vst [vmem:[%s12703_s26 + $0x2f8] sm:$0x1] %v1357_v9  ;;  %v1421_v32 = vrot.slane %v1407_v11, %v12695_v20  ;;  %v1422_v34 = vcombine.high %v1414_v13, %v1414_v13 }
 0x29b   : > { %v1430_v35 = vrot.slane %v1414_v13, %v12695_v20  ;;  %10862 = vst.sshfl [vmem:[%s12703_s26 + $0x340] sm:$0x1 pattern:$0x73625140] %v1414_v13  ;;  %11793 = vtanh.f32 %v1824_v16  ;;  %v1402_v36 = vrot.slane %v1374_v25, %v12695_v20  ;;  %v1404_v39 = vcombine.high %v1388_v26, %v1388_v26  ;;  %1973 = vmatmul.mubr.f32.gmra.mrb[38].mxu0 %v11788_v24  ;;  %v733_v44 = vpop.f32.mrb[30].mxu1  ;;  %v11790_v45 = vpop.eup %11789 }
 0x29c   : > { %v1405_v41 = vcombine.high %v1395_v27, %v1395_v27  ;;  %1780 = vst [vmem:[%s12703_s26 + $0x310] sm:$0x1] %v1403_v31  ;;  %10861 = vst.sshfl [vmem:[%s12703_s26 + $0x328] sm:$0x1 pattern:$0x73625140] %v1374_v25  ;;  %v752_v42 = vadd.f32 %v12692_v18, %v729_v19  ;;  %v1423_v49 = vcombine.high %v1421_v32, %v1421_v32  ;;  %1978 = vmatprep.mubr.f32.mxu0 %v12223_v2 }
 0x29d   : > { %v1437_v50 = vrot.slane %v1421_v32, %v12695_v20  ;;  %v1444_v55 = vrot.slane %v1422_v34, %v12695_v20  ;;  %v1452_v56 = vcombine.high %v1430_v35, %v1430_v35  ;;  %10863 = vst.sshfl [vmem:[%s12703_s26 + $0x348] sm:$0x1 pattern:$0x73625140] %v1422_v34  ;;  %v735_v61 = vpop.f32.mrb[31].mxu1  ;;  %v1406_v62 = vcombine.high %v1402_v36, %v1402_v36 }
 0x29e   : > { %10864 = vst.sshfl [vmem:[%s12703_s26 + $0x360] sm:$0x1 pattern:$0x73625140] %v1421_v32  ;;  %1781 = vst [vmem:[%s12703_s26 + $0x318] sm:$0x1] %v1405_v41  ;;  %v1456_v1 = vcombine.high %v752_v42, %v752_v42  ;;  %v1463_v5 = vrot.slane %v752_v42, %v12695_v20  ;;  %v1825_v6 = vadd.f32 %v733_v44, %v12684_v63 }
 0x29f   : > { %1784 = vst [vmem:[%s12703_s26 + $0x330] sm:$0x1] %v1404_v39  ;;  %v1451_v4 = vrot.slane %v1423_v49, %v12695_v20  ;;  %v1453_v9 = vcombine.high %v1437_v50, %v1437_v50  ;;  %v1454_v11 = vcombine.high %v1444_v55, %v1444_v55  ;;  %1788 = vst [vmem:[%s12703_s26 + $0x350] sm:$0x1] %v1452_v56  ;;  %1979 = vmatmul.mubr.f32.gmra.mrb[40].mxu0 %v11790_v45 }
 0x2a0   : > { %10865 = vst.sshfl [vmem:[%s12703_s26 + $0x368] sm:$0x1 pattern:$0x73625140] %v1423_v49  ;;  %v753_v13 = vadd.f32 %v12692_v18, %v735_v61  ;;  %1785 = vst [vmem:[%s12703_s26 + $0x338] sm:$0x1] %v1406_v62  ;;  %v1470_v16 = vrot.slane %v1456_v1, %v12695_v20  ;;  %v1471_v19 = vcombine.high %v1463_v5, %v1463_v5  ;;  %11795 = vtanh.f32 %v1825_v6  ;;  %v11792_v31 = vpop.eup %11791 }
 0x2a1   : > { %v1479_v24 = vrot.slane %v1463_v5, %v12695_v20  ;;  %10866 = vst.sshfl [vmem:[%s12703_s26 + $0x380] sm:$0x1 pattern:$0x73625140] %v1463_v5  ;;  %v1455_v25 = vcombine.high %v1451_v4, %v1451_v4  ;;  %1789 = vst [vmem:[%s12703_s26 + $0x358] sm:$0x1] %v1454_v11  ;;  %1984 = vmatprep.mubr.f32.mxu0 %v12223_v2 }
 0x2a2   : > { %1792 = vst [vmem:[%s12703_s26 + $0x370] sm:$0x1] %v1453_v9  ;;  %v1505_v26 = vcombine.high %v753_v13, %v753_v13  ;;  %v1512_v27 = vrot.slane %v753_v13, %v12695_v20  ;;  %v1472_v32 = vcombine.high %v1470_v16, %v1470_v16  ;;  %v1486_v34 = vrot.slane %v1470_v16, %v12695_v20 }
 0x2a3   : > { %v1493_v35 = vrot.slane %v1471_v19, %v12695_v20  ;;  %v1501_v36 = vcombine.high %v1479_v24, %v1479_v24  ;;  %10867 = vst.sshfl [vmem:[%s12703_s26 + $0x388] sm:$0x1 pattern:$0x73625140] %v1471_v19  ;;  %1793 = vst [vmem:[%s12703_s26 + $0x378] sm:$0x1] %v1455_v25  ;;  %1985 = vmatmul.mubr.f32.gmra.mrb[42].mxu0 %v11792_v31 }
 0x2a4   : > { %10868 = vst.sshfl [vmem:[%s12703_s26 + $0x3a0] sm:$0x1 pattern:$0x73625140] %v1470_v16  ;;  %v1519_v39 = vrot.slane %v1505_v26, %v12695_v20  ;;  %v1520_v41 = vcombine.high %v1512_v27, %v1512_v27  ;;  %v1528_v42 = vrot.slane %v1512_v27, %v12695_v20  ;;  %v1500_v44 = vrot.slane %v1472_v32, %v12695_v20 }
 0x2a5   : > { %10870 = vst.sshfl [vmem:[%s12703_s26 + $0x3c0] sm:$0x1 pattern:$0x73625140] %v1512_v27  ;;  %v1502_v45 = vcombine.high %v1486_v34, %v1486_v34  ;;  %v1503_v49 = vcombine.high %v1493_v35, %v1493_v35  ;;  %1796 = vst [vmem:[%s12703_s26 + $0x390] sm:$0x1] %v1501_v36  ;;  %v11794_v50 = vpop.eup %11793  ;;  %1990 = vmatprep.mubr.f32.mxu0 %v12223_v2 }
 0x2a6   : > { %10869 = vst.sshfl [vmem:[%s12703_s26 + $0x3a8] sm:$0x1 pattern:$0x73625140] %v1472_v32  ;;  %v1521_v55 = vcombine.high %v1519_v39, %v1519_v39  ;;  %v1535_v56 = vrot.slane %v1519_v39, %v12695_v20  ;;  %v1542_v61 = vrot.slane %v1520_v41, %v12695_v20  ;;  %v1550_v62 = vcombine.high %v1528_v42, %v1528_v42 }
 0x2a7   : > { %10871 = vst.sshfl [vmem:[%s12703_s26 + $0x3c8] sm:$0x1 pattern:$0x73625140] %v1520_v41  ;;  %v1504_v1 = vcombine.high %v1500_v44, %v1500_v44  ;;  %1797 = vst [vmem:[%s12703_s26 + $0x398] sm:$0x1] %v1503_v49  ;;  %1991 = vmatmul.mubr.f32.gmra.mrb[44].mxu0 %v11794_v50 }
 0x2a8   : > { %10872 = vst.sshfl [vmem:[%s12703_s26 + $0x3e0] sm:$0x1 pattern:$0x73625140] %v1519_v39  ;;  %1800 = vst [vmem:[%s12703_s26 + $0x3b0] sm:$0x1] %v1502_v45  ;;  %v1549_v5 = vrot.slane %v1521_v55, %v12695_v20  ;;  %v1551_v6 = vcombine.high %v1535_v56, %v1535_v56  ;;  %v1552_v4 = vcombine.high %v1542_v61, %v1542_v61  ;;  %1996 = vmatprep.mubr.f32.mxu0 %v12223_v2 }
 0x2a9   : > { %1804 = vst [vmem:[%s12703_s26 + $0x3d0] sm:$0x1] %v1550_v62  ;;  %10873 = vst.sshfl [vmem:[%s12703_s26 + $0x3e8] sm:$0x1 pattern:$0x73625140] %v1521_v55 }
 0x2aa   : > { %1801 = vst [vmem:[%s12703_s26 + $0x3b8] sm:$0x1] %v1504_v1  ;;  %v1553_v9 = vcombine.high %v1549_v5, %v1549_v5  ;;  %1805 = vst [vmem:[%s12703_s26 + $0x3d8] sm:$0x1] %v1552_v4  ;;  %v11796_v11 = vpop.eup %11795  ;;  %v13004_v5 = vld [vmem:[#allocation10] ss:$0 sm:$0xff] }
 0x2ab   : > { %1808 = vst [vmem:[%s12703_s26 + $0x3f0] sm:$0x1] %v1551_v6  ;;  %1997 = vmatmul.mubr.f32.gmra.mrb[46].mxu0 %v11796_v11 }
 0x2ac   : > { %1809 = vst [vmem:[%s12703_s26 + $0x3f8] sm:$0x1] %v1553_v9  ;;  %4436 = vmatprep.mubr.f32.mxu0 %v12223_v2 }
 0x338   : > { %v1908_v13 = vpop.f32.mrb[16].mxu0 }
 0x339   : > { %v3075_v16 = vadd.f32 %v1908_v13, %v12597_v7  ;;  %v1910_v19 = vpop.f32.mrb[17].mxu0 }
 0x33a   : > { %v2003_v24 = vadd.f32 %v12692_v18, %v1910_v19 }
 0x33b   : > { %11797 = vtanh.f32 %v3075_v16 }
 0x33c   : > { %v2035_v25 = vcombine.high %v2003_v24, %v2003_v24  ;;  %v2042_v26 = vrot.slane %v2003_v24, %v12695_v20 }
 0x33e   : > { %v1914_v27 = vpop.f32.mrb[18].mxu0  ;;  %v2049_v34 = vrot.slane %v2035_v25, %v12695_v20  ;;  %v2050_v35 = vcombine.high %v2042_v26, %v2042_v26  ;;  %v2058_v36 = vrot.slane %v2042_v26, %v12695_v20  ;;  %10874 = vst.sshfl [vmem:[%s12703_s26 + $0x1] sm:$0x1 pattern:$0x73625140] %v2042_v26 }
 0x33f   : > { %v3076_v31 = vadd.f32 %v1914_v27, %v12600_v8  ;;  %v1916_v32 = vpop.f32.mrb[19].mxu0 }
 0x340   : > { %v2004_v39 = vadd.f32 %v12692_v18, %v1916_v32  ;;  %v2051_v41 = vcombine.high %v2049_v34, %v2049_v34  ;;  %v2065_v42 = vrot.slane %v2049_v34, %v12695_v20  ;;  %v2072_v44 = vrot.slane %v2050_v35, %v12695_v20  ;;  %10875 = vst.sshfl [vmem:[%s12703_s26 + $0x9] sm:$0x1 pattern:$0x73625140] %v2050_v35 }
 0x341   : > { %11799 = vtanh.f32 %v3076_v31  ;;  %v2080_v45 = vcombine.high %v2058_v36, %v2058_v36  ;;  %10876 = vst.sshfl [vmem:[%s12703_s26 + $0x21] sm:$0x1 pattern:$0x73625140] %v2049_v34 }
 0x342   : > { %v1920_v49 = vpop.f32.mrb[20].mxu0  ;;  %v2084_v50 = vcombine.high %v2004_v39, %v2004_v39  ;;  %v2091_v55 = vrot.slane %v2004_v39, %v12695_v20  ;;  %v2079_v61 = vrot.slane %v2051_v41, %v12695_v20  ;;  %v2081_v62 = vcombine.high %v2065_v42, %v2065_v42  ;;  %10877 = vst.sshfl [vmem:[%s12703_s26 + $0x29] sm:$0x1 pattern:$0x73625140] %v2051_v41 }
 0x343   : > { %v3077_v56 = vadd.f32 %v1920_v49, %v12604_v12  ;;  %v1922_v18 = vpop.f32.mrb[21].mxu0  ;;  %v2082_v1 = vcombine.high %v2072_v44, %v2072_v44  ;;  %2949 = vst [vmem:[%s12703_s26 + $0x11] sm:$0x1] %v2080_v45 }
 0x344   : > { %v2005_v6 = vadd.f32 %v13004_v5, %v1922_v18  ;;  %v2098_v4 = vrot.slane %v2084_v50, %v12695_v20  ;;  %v2099_v9 = vcombine.high %v2091_v55, %v2091_v55  ;;  %v2107_v11 = vrot.slane %v2091_v55, %v12695_v20  ;;  %10878 = vst.sshfl [vmem:[%s12703_s26 + $0x41] sm:$0x1 pattern:$0x73625140] %v2091_v55 }
 0x345   : > { %11801 = vtanh.f32 %v3077_v56  ;;  %v2083_v13 = vcombine.high %v2079_v61, %v2079_v61  ;;  %2950 = vst [vmem:[%s12703_s26 + $0x19] sm:$0x1] %v2082_v1  ;;  %2953 = vst [vmem:[%s12703_s26 + $0x31] sm:$0x1] %v2081_v62  ;;  %v11798_v24 = vpop.eup %11797 }
 0x346   : > { %v2133_v16 = vcombine.high %v2005_v6, %v2005_v6  ;;  %v2140_v19 = vrot.slane %v2005_v6, %v12695_v20  ;;  %v2100_v25 = vcombine.high %v2098_v4, %v2098_v4  ;;  %v2114_v26 = vrot.slane %v2098_v4, %v12695_v20  ;;  %10879 = vst.sshfl [vmem:[%s12703_s26 + $0x49] sm:$0x1 pattern:$0x73625140] %v2099_v9 }
 0x347   : > { %v2121_v27 = vrot.slane %v2099_v9, %v12695_v20  ;;  %v2129_v31 = vcombine.high %v2107_v11, %v2107_v11  ;;  %10880 = vst.sshfl [vmem:[%s12703_s26 + $0x61] sm:$0x1 pattern:$0x73625140] %v2098_v4  ;;  %2954 = vst [vmem:[%s12703_s26 + $0x39] sm:$0x1] %v2083_v13  ;;  %3172 = vmatmul.mubr.f32.vlgmr.msra.gmra.mrb[32].mxu1 %v11798_v24 }
 0x348   : > { %v2147_v32 = vrot.slane %v2133_v16, %v12695_v20  ;;  %v2148_v34 = vcombine.high %v2140_v19, %v2140_v19  ;;  %v2156_v35 = vrot.slane %v2140_v19, %v12695_v20  ;;  %10882 = vst.sshfl [vmem:[%s12703_s26 + $0x81] sm:$0x1 pattern:$0x73625140] %v2140_v19  ;;  %v1926_v36 = vpop.f32.mrb[22].mxu0  ;;  %v2128_v39 = vrot.slane %v2100_v25, %v12695_v20 }
 0x349   : > { %v2130_v41 = vcombine.high %v2114_v26, %v2114_v26  ;;  %v2131_v42 = vcombine.high %v2121_v27, %v2121_v27  ;;  %2957 = vst [vmem:[%s12703_s26 + $0x51] sm:$0x1] %v2129_v31  ;;  %10881 = vst.sshfl [vmem:[%s12703_s26 + $0x69] sm:$0x1 pattern:$0x73625140] %v2100_v25  ;;  %v3078_v44 = vadd.f32 %v1926_v36, %v12609_v17  ;;  %3177 = vmatprep.mubr.f32.mxu1 %v12223_v2 }
 0x34a   : > { %v1928_v45 = vpop.f32.mrb[23].mxu0  ;;  %v2149_v49 = vcombine.high %v2147_v32, %v2147_v32  ;;  %v2163_v50 = vrot.slane %v2147_v32, %v12695_v20  ;;  %v2170_v55 = vrot.slane %v2148_v34, %v12695_v20  ;;  %v2178_v56 = vcombine.high %v2156_v35, %v2156_v35  ;;  %10883 = vst.sshfl [vmem:[%s12703_s26 + $0x89] sm:$0x1 pattern:$0x73625140] %v2148_v34 }
 0x34b   : > { %10884 = vst.sshfl [vmem:[%s12703_s26 + $0xa1] sm:$0x1 pattern:$0x73625140] %v2147_v32  ;;  %11512 = vmatpush1.bf16.msra.mxu1 %v12503_v14  ;;  %v11800_v18 = vpop.eup %11799  ;;  %v2132_v61 = vcombine.high %v2128_v39, %v2128_v39  ;;  %2958 = vst [vmem:[%s12703_s26 + $0x59] sm:$0x1] %v2131_v42  ;;  %11803 = vtanh.f32 %v3078_v44  ;;  %v2006_v62 = vadd.f32 %v13004_v5, %v1928_v45 }
 0x34c   : > { %2961 = vst [vmem:[%s12703_s26 + $0x71] sm:$0x1] %v2130_v41  ;;  %11514 = vmatprep.subr.bf16.mxu1 %v12505_v15  ;;  %v2177_v1 = vrot.slane %v2149_v49, %v12695_v20  ;;  %v2179_v6 = vcombine.high %v2163_v50, %v2163_v50  ;;  %v2180_v4 = vcombine.high %v2170_v55, %v2170_v55  ;;  %2965 = vst [vmem:[%s12703_s26 + $0x91] sm:$0x1] %v2178_v56  ;;  %v1932_v9 = vpop.f32.mrb[24].mxu0 }
 0x34d   : > { %10885 = vst.sshfl [vmem:[%s12703_s26 + $0xa9] sm:$0x1 pattern:$0x73625140] %v2149_v49  ;;  %3178 = vmatmul.mubr.f32.gmra.mrb[34].mxu1 %v11800_v18  ;;  %2962 = vst [vmem:[%s12703_s26 + $0x79] sm:$0x1] %v2132_v61  ;;  %v2182_v11 = vcombine.high %v2006_v62, %v2006_v62  ;;  %v2189_v13 = vrot.slane %v2006_v62, %v12695_v20  ;;  %v3079_v16 = vadd.f32 %v1932_v9, %v12612_v23 }
 0x34e   : > { %v1934_v19 = vpop.f32.mrb[25].mxu0  ;;  %3183 = vmatprep.mubr.f32.mxu1 %v12223_v2  ;;  %v2181_v24 = vcombine.high %v2177_v1, %v2177_v1  ;;  %2966 = vst [vmem:[%s12703_s26 + $0x99] sm:$0x1] %v2180_v4  ;;  %2969 = vst [vmem:[%s12703_s26 + $0xb1] sm:$0x1] %v2179_v6 }
 0x34f   : > { %v2007_v25 = vadd.f32 %v13004_v5, %v1934_v19  ;;  %11516 = vmatpush1.bf16.msra.mxu1 %v12511_v21  ;;  %v11802_v26 = vpop.eup %11801  ;;  %v2196_v27 = vrot.slane %v2182_v11, %v12695_v20  ;;  %v2197_v31 = vcombine.high %v2189_v13, %v2189_v13  ;;  %v2205_v32 = vrot.slane %v2189_v13, %v12695_v20 }
 0x350   : > { %10886 = vst.sshfl [vmem:[%s12703_s26 + $0xc1] sm:$0x1 pattern:$0x73625140] %v2189_v13  ;;  %11805 = vtanh.f32 %v3079_v16  ;;  %11518 = vmatprep.subr.bf16.mxu1 %v12516_v22  ;;  %2970 = vst [vmem:[%s12703_s26 + $0xb9] sm:$0x1] %v2181_v24 }
 0x351   : > { %v2231_v34 = vcombine.high %v2007_v25, %v2007_v25  ;;  %v2238_v35 = vrot.slane %v2007_v25, %v12695_v20  ;;  %3184 = vmatmul.mubr.f32.gmra.mrb[36].mxu1 %v11802_v26  ;;  %v2198_v39 = vcombine.high %v2196_v27, %v2196_v27  ;;  %v2212_v41 = vrot.slane %v2196_v27, %v12695_v20 }
 0x352   : > { %v1938_v36 = vpop.f32.mrb[26].mxu0  ;;  %v2219_v42 = vrot.slane %v2197_v31, %v12695_v20  ;;  %v2227_v44 = vcombine.high %v2205_v32, %v2205_v32  ;;  %10887 = vst.sshfl [vmem:[%s12703_s26 + $0xc9] sm:$0x1 pattern:$0x73625140] %v2197_v31  ;;  %3189 = vmatprep.mubr.f32.mxu1 %v12223_v2 }
 0x353   : > { %10888 = vst.sshfl [vmem:[%s12703_s26 + $0xe1] sm:$0x1 pattern:$0x73625140] %v2196_v27  ;;  %v1940_v45 = vpop.f32.mrb[27].mxu0  ;;  %v2245_v49 = vrot.slane %v2231_v34, %v12695_v20  ;;  %v2246_v50 = vcombine.high %v2238_v35, %v2238_v35  ;;  %v2254_v55 = vrot.slane %v2238_v35, %v12695_v20  ;;  %v3080_v56 = vadd.f32 %v1938_v36, %v12620_v28 }
 0x354   : > { %10890 = vst.sshfl [vmem:[%s12703_s26 + $0x101] sm:$0x1 pattern:$0x73625140] %v2238_v35  ;;  %11520 = vmatpush1.bf16.msra.mxu1 %v12523_v29  ;;  %v2226_v18 = vrot.slane %v2198_v39, %v12695_v20  ;;  %v2228_v61 = vcombine.high %v2212_v41, %v2212_v41  ;;  %v2229_v62 = vcombine.high %v2219_v42, %v2219_v42  ;;  %2973 = vst [vmem:[%s12703_s26 + $0xd1] sm:$0x1] %v2227_v44 }
 0x355   : > { %10889 = vst.sshfl [vmem:[%s12703_s26 + $0xe9] sm:$0x1 pattern:$0x73625140] %v2198_v39  ;;  %v2008_v1 = vadd.f32 %v13004_v5, %v1940_v45  ;;  %11522 = vmatprep.subr.bf16.mxu1 %v12528_v30  ;;  %v2247_v6 = vcombine.high %v2245_v49, %v2245_v49  ;;  %v2261_v4 = vrot.slane %v2245_v49, %v12695_v20  ;;  %v11804_v16 = vpop.eup %11803  ;;  %11807 = vtanh.f32 %v3080_v56 }
 0x356   : > { %v2268_v9 = vrot.slane %v2246_v50, %v12695_v20  ;;  %v2276_v11 = vcombine.high %v2254_v55, %v2254_v55  ;;  %10891 = vst.sshfl [vmem:[%s12703_s26 + $0x109] sm:$0x1 pattern:$0x73625140] %v2246_v50  ;;  %v2230_v19 = vcombine.high %v2226_v18, %v2226_v18  ;;  %2974 = vst [vmem:[%s12703_s26 + $0xd9] sm:$0x1] %v2229_v62  ;;  %3190 = vmatmul.mubr.f32.gmra.mrb[38].mxu1 %v11804_v16 }
 0x357   : > { %10892 = vst.sshfl [vmem:[%s12703_s26 + $0x121] sm:$0x1 pattern:$0x73625140] %v2245_v49  ;;  %2977 = vst [vmem:[%s12703_s26 + $0xf1] sm:$0x1] %v2228_v61  ;;  %v2280_v24 = vcombine.high %v2008_v1, %v2008_v1  ;;  %v2287_v25 = vrot.slane %v2008_v1, %v12695_v20  ;;  %v2275_v27 = vrot.slane %v2247_v6, %v12695_v20  ;;  %3195 = vmatprep.mubr.f32.mxu1 %v12223_v2 }
 0x358   : > { %v1944_v13 = vpop.f32.mrb[28].mxu0  ;;  %v2277_v31 = vcombine.high %v2261_v4, %v2261_v4  ;;  %v2278_v32 = vcombine.high %v2268_v9, %v2268_v9  ;;  %2981 = vst [vmem:[%s12703_s26 + $0x111] sm:$0x1] %v2276_v11  ;;  %2978 = vst [vmem:[%s12703_s26 + $0xf9] sm:$0x1] %v2230_v19  ;;  %11524 = vmatpush1.bf16.msra.mxu1 %v12535_v37 }
 0x359   : > { %v1946_v26 = vpop.f32.mrb[29].mxu0  ;;  %10893 = vst.sshfl [vmem:[%s12703_s26 + $0x129] sm:$0x1 pattern:$0x73625140] %v2247_v6  ;;  %v3081_v34 = vadd.f32 %v1944_v13, %v12626_v33  ;;  %v2294_v35 = vrot.slane %v2280_v24, %v12695_v20  ;;  %v2295_v36 = vcombine.high %v2287_v25, %v2287_v25  ;;  %v2303_v39 = vrot.slane %v2287_v25, %v12695_v20 }
 0x35a   : > { %10894 = vst.sshfl [vmem:[%s12703_s26 + $0x141] sm:$0x1 pattern:$0x73625140] %v2287_v25  ;;  %v2009_v41 = vadd.f32 %v13004_v5, %v1946_v26  ;;  %v2279_v42 = vcombine.high %v2275_v27, %v2275_v27  ;;  %2982 = vst [vmem:[%s12703_s26 + $0x119] sm:$0x1] %v2278_v32  ;;  %v11806_v45 = vpop.eup %11805  ;;  %11526 = vmatprep.subr.bf16.mxu1 %v12540_v38 }
 0x35b   : > { %2985 = vst [vmem:[%s12703_s26 + $0x131] sm:$0x1] %v2277_v31  ;;  %11809 = vtanh.f32 %v3081_v34  ;;  %v2296_v49 = vcombine.high %v2294_v35, %v2294_v35  ;;  %v2310_v50 = vrot.slane %v2294_v35, %v12695_v20  ;;  %v2317_v55 = vrot.slane %v2295_v36, %v12695_v20  ;;  %10895 = vst.sshfl [vmem:[%s12703_s26 + $0x149] sm:$0x1 pattern:$0x73625140] %v2295_v36 }
 0x35c   : > { %v1950_v44 = vpop.f32.mrb[30].mxu0  ;;  %v2325_v56 = vcombine.high %v2303_v39, %v2303_v39  ;;  %10896 = vst.sshfl [vmem:[%s12703_s26 + $0x161] sm:$0x1 pattern:$0x73625140] %v2294_v35  ;;  %v2329_v61 = vcombine.high %v2009_v41, %v2009_v41  ;;  %v2336_v62 = vrot.slane %v2009_v41, %v12695_v20  ;;  %3196 = vmatmul.mubr.f32.gmra.mrb[40].mxu1 %v11806_v45 }
 0x35d   : > { %v1952_v18 = vpop.f32.mrb[31].mxu0  ;;  %2986 = vst [vmem:[%s12703_s26 + $0x139] sm:$0x1] %v2279_v42  ;;  %v3082_v1 = vadd.f32 %v1950_v44, %v12634_v40  ;;  %v2324_v4 = vrot.slane %v2296_v49, %v12695_v20  ;;  %v2326_v9 = vcombine.high %v2310_v50, %v2310_v50  ;;  %v2327_v11 = vcombine.high %v2317_v55, %v2317_v55 }
 0x35e   : > { %v2010_v6 = vadd.f32 %v13004_v5, %v1952_v18  ;;  %2989 = vst [vmem:[%s12703_s26 + $0x151] sm:$0x1] %v2325_v56  ;;  %10897 = vst.sshfl [vmem:[%s12703_s26 + $0x169] sm:$0x1 pattern:$0x73625140] %v2296_v49  ;;  %3201 = vmatprep.mubr.f32.mxu1 %v12223_v2  ;;  %v2343_v13 = vrot.slane %v2329_v61, %v12695_v20  ;;  %v2344_v16 = vcombine.high %v2336_v62, %v2336_v62 }
 0x35f   : > { %v2352_v19 = vrot.slane %v2336_v62, %v12695_v20  ;;  %10898 = vst.sshfl [vmem:[%s12703_s26 + $0x181] sm:$0x1 pattern:$0x73625140] %v2336_v62  ;;  %11811 = vtanh.f32 %v3082_v1  ;;  %11528 = vmatpush1.bf16.msra.mxu1 %v12562_v48  ;;  %v2328_v25 = vcombine.high %v2324_v4, %v2324_v4  ;;  %2990 = vst [vmem:[%s12703_s26 + $0x159] sm:$0x1] %v2327_v11  ;;  %v11808_v41 = vpop.eup %11807 }
 0x360   : > { %2993 = vst [vmem:[%s12703_s26 + $0x171] sm:$0x1] %v2326_v9  ;;  %v2378_v26 = vcombine.high %v2010_v6, %v2010_v6  ;;  %v2385_v27 = vrot.slane %v2010_v6, %v12695_v20  ;;  %11530 = vmatprep.subr.bf16.mxu1 %v12566_v51  ;;  %v2345_v34 = vcombine.high %v2343_v13, %v2343_v13  ;;  %10899 = vst.sshfl [vmem:[%s12703_s26 + $0x189] sm:$0x1 pattern:$0x73625140] %v2344_v16 }
 0x361   : > { %v1956_v24 = vpop.f32.mrb[32].mxu0  ;;  %v2359_v35 = vrot.slane %v2343_v13, %v12695_v20  ;;  %v2366_v36 = vrot.slane %v2344_v16, %v12695_v20  ;;  %v2374_v39 = vcombine.high %v2352_v19, %v2352_v19  ;;  %10900 = vst.sshfl [vmem:[%s12703_s26 + $0x1a1] sm:$0x1 pattern:$0x73625140] %v2343_v13  ;;  %3202 = vmatmul.mubr.f32.gmra.mrb[42].mxu1 %v11808_v41 }
 0x362   : > { %v3083_v31 = vadd.f32 %v1956_v24, %v12640_v43  ;;  %v1958_v32 = vpop.f32.mrb[33].mxu0  ;;  %2994 = vst [vmem:[%s12703_s26 + $0x179] sm:$0x1] %v2328_v25  ;;  %v2392_v42 = vrot.slane %v2378_v26, %v12695_v20  ;;  %v2393_v44 = vcombine.high %v2385_v27, %v2385_v27  ;;  %v2401_v45 = vrot.slane %v2385_v27, %v12695_v20 }
 0x363   : > { %10902 = vst.sshfl [vmem:[%s12703_s26 + $0x1c1] sm:$0x1 pattern:$0x73625140] %v2385_v27  ;;  %v2373_v49 = vrot.slane %v2345_v34, %v12695_v20  ;;  %v2375_v50 = vcombine.high %v2359_v35, %v2359_v35  ;;  %v2376_v55 = vcombine.high %v2366_v36, %v2366_v36  ;;  %2997 = vst [vmem:[%s12703_s26 + $0x191] sm:$0x1] %v2374_v39  ;;  %3207 = vmatprep.mubr.f32.mxu1 %v12223_v2 }
 0x364   : > { %11813 = vtanh.f32 %v3083_v31  ;;  %10901 = vst.sshfl [vmem:[%s12703_s26 + $0x1a9] sm:$0x1 pattern:$0x73625140] %v2345_v34  ;;  %v2011_v56 = vadd.f32 %v13004_v5, %v1958_v32  ;;  %v2394_v61 = vcombine.high %v2392_v42, %v2392_v42  ;;  %v2408_v62 = vrot.slane %v2392_v42, %v12695_v20  ;;  %11532 = vmatpush1.bf16.msra.mxu1 %v12568_v54 }
 0x365   : > { %v1962_v18 = vpop.f32.mrb[34].mxu0  ;;  %v2415_v1 = vrot.slane %v2393_v44, %v12695_v20  ;;  %v2423_v6 = vcombine.high %v2401_v45, %v2401_v45  ;;  %10903 = vst.sshfl [vmem:[%s12703_s26 + $0x1c9] sm:$0x1 pattern:$0x73625140] %v2393_v44  ;;  %v11810_v9 = vpop.eup %11809  ;;  %v2377_v11 = vcombine.high %v2373_v49, %v2373_v49  ;;  %11534 = vmatprep.subr.bf16.mxu1 %v12574_v57 }
 0x366   : > { %10904 = vst.sshfl [vmem:[%s12703_s26 + $0x1e1] sm:$0x1 pattern:$0x73625140] %v2392_v42  ;;  %v1964_v4 = vpop.f32.mrb[35].mxu0  ;;  %v2427_v13 = vcombine.high %v2011_v56, %v2011_v56  ;;  %v2434_v16 = vrot.slane %v2011_v56, %v12695_v20  ;;  %v3084_v19 = vadd.f32 %v1962_v18, %v12648_v46  ;;  %v2422_v24 = vrot.slane %v2394_v61, %v12695_v20 }
 0x367   : > { %2998 = vst [vmem:[%s12703_s26 + $0x199] sm:$0x1] %v2376_v55  ;;  %3001 = vst [vmem:[%s12703_s26 + $0x1b1] sm:$0x1] %v2375_v50  ;;  %v2424_v25 = vcombine.high %v2408_v62, %v2408_v62  ;;  %v2425_v26 = vcombine.high %v2415_v1, %v2415_v1  ;;  %v2012_v27 = vadd.f32 %v13004_v5, %v1964_v4  ;;  %3208 = vmatmul.mubr.f32.gmra.mrb[44].mxu1 %v11810_v9 }
 0x368   : > { %3005 = vst [vmem:[%s12703_s26 + $0x1d1] sm:$0x1] %v2423_v6  ;;  %10905 = vst.sshfl [vmem:[%s12703_s26 + $0x1e9] sm:$0x1 pattern:$0x73625140] %v2394_v61  ;;  %v2441_v31 = vrot.slane %v2427_v13, %v12695_v20  ;;  %v2442_v32 = vcombine.high %v2434_v16, %v2434_v16  ;;  %v2450_v34 = vrot.slane %v2434_v16, %v12695_v20  ;;  %11815 = vtanh.f32 %v3084_v19 }
 0x369   : > { %3002 = vst [vmem:[%s12703_s26 + $0x1b9] sm:$0x1] %v2377_v11  ;;  %10906 = vst.sshfl [vmem:[%s12703_s26 + $0x201] sm:$0x1 pattern:$0x73625140] %v2434_v16  ;;  %v2426_v36 = vcombine.high %v2422_v24, %v2422_v24  ;;  %v2476_v39 = vcombine.high %v2012_v27, %v2012_v27  ;;  %v2483_v41 = vrot.slane %v2012_v27, %v12695_v20  ;;  %3213 = vmatprep.mubr.f32.mxu1 %v12223_v2  ;;  %v11812_v45 = vpop.eup %11811 }
 0x36a   : > { %v1968_v35 = vpop.f32.mrb[36].mxu0  ;;  %3006 = vst [vmem:[%s12703_s26 + $0x1d9] sm:$0x1] %v2425_v26  ;;  %3009 = vst [vmem:[%s12703_s26 + $0x1f1] sm:$0x1] %v2424_v25  ;;  %v2443_v49 = vcombine.high %v2441_v31, %v2441_v31  ;;  %v2457_v50 = vrot.slane %v2441_v31, %v12695_v20  ;;  %v2464_v55 = vrot.slane %v2442_v32, %v12695_v20  ;;  %11536 = vmatpush1.bf16.msra.mxu1 %v12576_v60 }
 0x36b   : > { %v3085_v42 = vadd.f32 %v1968_v35, %v12654_v47  ;;  %v1970_v44 = vpop.f32.mrb[37].mxu0  ;;  %v2472_v56 = vcombine.high %v2450_v34, %v2450_v34  ;;  %10907 = vst.sshfl [vmem:[%s12703_s26 + $0x209] sm:$0x1 pattern:$0x73625140] %v2442_v32  ;;  %v2490_v18 = vrot.slane %v2476_v39, %v12695_v20  ;;  %v2491_v61 = vcombine.high %v2483_v41, %v2483_v41 }
 0x36c   : > { %10908 = vst.sshfl [vmem:[%s12703_s26 + $0x221] sm:$0x1 pattern:$0x73625140] %v2441_v31  ;;  %3010 = vst [vmem:[%s12703_s26 + $0x1f9] sm:$0x1] %v2426_v36  ;;  %v2499_v62 = vrot.slane %v2483_v41, %v12695_v20  ;;  %11538 = vmatprep.subr.bf16.mxu1 %v12579_v0  ;;  %v2471_v1 = vrot.slane %v2443_v49, %v12695_v20  ;;  %v2473_v6 = vcombine.high %v2457_v50, %v2457_v50 }
 0x36d   : > { %10910 = vst.sshfl [vmem:[%s12703_s26 + $0x241] sm:$0x1 pattern:$0x73625140] %v2483_v41  ;;  %11817 = vtanh.f32 %v3085_v42  ;;  %v2474_v4 = vcombine.high %v2464_v55, %v2464_v55  ;;  %3013 = vst [vmem:[%s12703_s26 + $0x211] sm:$0x1] %v2472_v56  ;;  %v2013_v9 = vadd.f32 %v13004_v5, %v1970_v44  ;;  %3214 = vmatmul.mubr.f32.gmra.mrb[46].mxu1 %v11812_v45 }
 0x36e   : > { %10909 = vst.sshfl [vmem:[%s12703_s26 + $0x229] sm:$0x1 pattern:$0x73625140] %v2443_v49  ;;  %v1974_v11 = vpop.f32.mrb[38].mxu0  ;;  %v11814_v13 = vpop.eup %11813  ;;  %v2492_v16 = vcombine.high %v2490_v18, %v2490_v18  ;;  %v2506_v19 = vrot.slane %v2490_v18, %v12695_v20  ;;  %v2513_v24 = vrot.slane %v2491_v61, %v12695_v20  ;;  %v2521_v25 = vcombine.high %v2499_v62, %v2499_v62 }
 0x36f   : > { %10911 = vst.sshfl [vmem:[%s12703_s26 + $0x249] sm:$0x1 pattern:$0x73625140] %v2491_v61  ;;  %v1976_v26 = vpop.f32.mrb[39].mxu0  ;;  %3219 = vmatprep.mubr.f32.mxu1 %v12223_v2  ;;  %v2475_v27 = vcombine.high %v2471_v1, %v2471_v1  ;;  %v2525_v31 = vcombine.high %v2013_v9, %v2013_v9  ;;  %v2532_v32 = vrot.slane %v2013_v9, %v12695_v20 }
 0x370   : > { %10912 = vst.sshfl [vmem:[%s12703_s26 + $0x261] sm:$0x1 pattern:$0x73625140] %v2490_v18  ;;  %3014 = vst [vmem:[%s12703_s26 + $0x219] sm:$0x1] %v2474_v4  ;;  %v3086_v34 = vadd.f32 %v1974_v11, %v12662_v52  ;;  %11540 = vmatpush1.bf16.msra.mxu1 %v12583_v3  ;;  %v2520_v35 = vrot.slane %v2492_v16, %v12695_v20  ;;  %v2522_v36 = vcombine.high %v2506_v19, %v2506_v19 }
 0x371   : > { %3017 = vst [vmem:[%s12703_s26 + $0x231] sm:$0x1] %v2473_v6  ;;  %v2523_v39 = vcombine.high %v2513_v24, %v2513_v24  ;;  %3021 = vst [vmem:[%s12703_s26 + $0x251] sm:$0x1] %v2521_v25  ;;  %v2014_v41 = vadd.f32 %v13004_v5, %v1976_v26  ;;  %11574 = vmatprep.subr.bf16.mxu1 %v12500_v10  ;;  %v2539_v42 = vrot.slane %v2525_v31, %v12695_v20 }
 0x372   : > { %10913 = vst.sshfl [vmem:[%s12703_s26 + $0x269] sm:$0x1 pattern:$0x73625140] %v2492_v16  ;;  %3018 = vst [vmem:[%s12703_s26 + $0x239] sm:$0x1] %v2475_v27  ;;  %v2540_v44 = vcombine.high %v2532_v32, %v2532_v32  ;;  %v2548_v45 = vrot.slane %v2532_v32, %v12695_v20  ;;  %11819 = vtanh.f32 %v3086_v34  ;;  %3220 = vmatmul.mubr.f32.gmra.mrb[48].mxu1 %v11814_v13  ;;  %v11816_v62 = vpop.eup %11815 }
 0x373   : > { %10914 = vst.sshfl [vmem:[%s12703_s26 + $0x281] sm:$0x1 pattern:$0x73625140] %v2532_v32  ;;  %v1980_v49 = vpop.f32.mrb[40].mxu0  ;;  %v2524_v50 = vcombine.high %v2520_v35, %v2520_v35  ;;  %v2574_v55 = vcombine.high %v2014_v41, %v2014_v41  ;;  %v2581_v56 = vrot.slane %v2014_v41, %v12695_v20  ;;  %3225 = vmatprep.mubr.f32.mxu1 %v12223_v2 }
 0x374   : > { %3022 = vst [vmem:[%s12703_s26 + $0x259] sm:$0x1] %v2523_v39  ;;  %3025 = vst [vmem:[%s12703_s26 + $0x271] sm:$0x1] %v2522_v36  ;;  %v3087_v18 = vadd.f32 %v1980_v49, %v12668_v53  ;;  %v1982_v61 = vpop.f32.mrb[41].mxu0  ;;  %v2541_v1 = vcombine.high %v2539_v42, %v2539_v42  ;;  %v2555_v6 = vrot.slane %v2539_v42, %v12695_v20 }
 0x375   : > { %v2562_v4 = vrot.slane %v2540_v44, %v12695_v20  ;;  %v2570_v9 = vcombine.high %v2548_v45, %v2548_v45  ;;  %10915 = vst.sshfl [vmem:[%s12703_s26 + $0x289] sm:$0x1 pattern:$0x73625140] %v2540_v44  ;;  %3026 = vst [vmem:[%s12703_s26 + $0x279] sm:$0x1] %v2524_v50  ;;  %v2588_v11 = vrot.slane %v2574_v55, %v12695_v20 }
 0x376   : > { %10916 = vst.sshfl [vmem:[%s12703_s26 + $0x2a1] sm:$0x1 pattern:$0x73625140] %v2539_v42  ;;  %v2589_v13 = vcombine.high %v2581_v56, %v2581_v56  ;;  %v2597_v16 = vrot.slane %v2581_v56, %v12695_v20  ;;  %11821 = vtanh.f32 %v3087_v18  ;;  %v2569_v19 = vrot.slane %v2541_v1, %v12695_v20  ;;  %3226 = vmatmul.mubr.f32.gmra.mrb[50].mxu1 %v11816_v62  ;;  %v1986_v27 = vpop.f32.mrb[42].mxu0 }
 0x377   : > { %10918 = vst.sshfl [vmem:[%s12703_s26 + $0x2c1] sm:$0x1 pattern:$0x73625140] %v2581_v56  ;;  %v2571_v24 = vcombine.high %v2555_v6, %v2555_v6  ;;  %v2572_v25 = vcombine.high %v2562_v4, %v2562_v4  ;;  %3029 = vst [vmem:[%s12703_s26 + $0x291] sm:$0x1] %v2570_v9  ;;  %v2015_v26 = vadd.f32 %v13004_v5, %v1982_v61  ;;  %v11818_v31 = vpop.eup %11817  ;;  %3231 = vmatprep.mubr.f32.mxu1 %v12223_v2 }
 0x378   : > { %10917 = vst.sshfl [vmem:[%s12703_s26 + $0x2a9] sm:$0x1 pattern:$0x73625140] %v2541_v1  ;;  %v2590_v32 = vcombine.high %v2588_v11, %v2588_v11  ;;  %v2604_v34 = vrot.slane %v2588_v11, %v12695_v20  ;;  %v2611_v35 = vrot.slane %v2589_v13, %v12695_v20  ;;  %v2619_v36 = vcombine.high %v2597_v16, %v2597_v16  ;;  %v1988_v39 = vpop.f32.mrb[43].mxu0 }
 0x379   : > { %10919 = vst.sshfl [vmem:[%s12703_s26 + $0x2c9] sm:$0x1 pattern:$0x73625140] %v2589_v13  ;;  %v2573_v41 = vcombine.high %v2569_v19, %v2569_v19  ;;  %3030 = vst [vmem:[%s12703_s26 + $0x299] sm:$0x1] %v2572_v25  ;;  %v2623_v42 = vcombine.high %v2015_v26, %v2015_v26  ;;  %v2630_v44 = vrot.slane %v2015_v26, %v12695_v20 }
 0x37a   : > { %10920 = vst.sshfl [vmem:[%s12703_s26 + $0x2e1] sm:$0x1 pattern:$0x73625140] %v2588_v11  ;;  %3033 = vst [vmem:[%s12703_s26 + $0x2b1] sm:$0x1] %v2571_v24  ;;  %v3088_v45 = vadd.f32 %v1986_v27, %v12674_v58  ;;  %v2618_v49 = vrot.slane %v2590_v32, %v12695_v20  ;;  %v2620_v50 = vcombine.high %v2604_v34, %v2604_v34  ;;  %3232 = vmatmul.mubr.f32.gmra.mrb[52].mxu1 %v11818_v31 }
 0x37b   : > { %v2621_v55 = vcombine.high %v2611_v35, %v2611_v35  ;;  %3037 = vst [vmem:[%s12703_s26 + $0x2d1] sm:$0x1] %v2619_v36  ;;  %10921 = vst.sshfl [vmem:[%s12703_s26 + $0x2e9] sm:$0x1 pattern:$0x73625140] %v2590_v32  ;;  %v2016_v56 = vadd.f32 %v13004_v5, %v1988_v39  ;;  %v2637_v18 = vrot.slane %v2623_v42, %v12695_v20  ;;  %3237 = vmatprep.mubr.f32.mxu1 %v12223_v2 }
 0x37c   : > { %3034 = vst [vmem:[%s12703_s26 + $0x2b9] sm:$0x1] %v2573_v41  ;;  %v2638_v61 = vcombine.high %v2630_v44, %v2630_v44  ;;  %v2646_v62 = vrot.slane %v2630_v44, %v12695_v20  ;;  %10922 = vst.sshfl [vmem:[%s12703_s26 + $0x301] sm:$0x1 pattern:$0x73625140] %v2630_v44  ;;  %11823 = vtanh.f32 %v3088_v45  ;;  %v2622_v6 = vcombine.high %v2618_v49, %v2618_v49  ;;  %v11820_v16 = vpop.eup %11819 }
 0x37d   : > { %v1992_v1 = vpop.f32.mrb[44].mxu0  ;;  %3038 = vst [vmem:[%s12703_s26 + $0x2d9] sm:$0x1] %v2621_v55  ;;  %3041 = vst [vmem:[%s12703_s26 + $0x2f1] sm:$0x1] %v2620_v50  ;;  %v2672_v4 = vcombine.high %v2016_v56, %v2016_v56  ;;  %v2679_v9 = vrot.slane %v2016_v56, %v12695_v20  ;;  %v2639_v19 = vcombine.high %v2637_v18, %v2637_v18 }
 0x37e   : > { %v3089_v11 = vadd.f32 %v1992_v1, %v12678_v59  ;;  %v1994_v13 = vpop.f32.mrb[45].mxu0  ;;  %v2653_v24 = vrot.slane %v2637_v18, %v12695_v20  ;;  %v2660_v25 = vrot.slane %v2638_v61, %v12695_v20  ;;  %v2668_v26 = vcombine.high %v2646_v62, %v2646_v62  ;;  %10923 = vst.sshfl [vmem:[%s12703_s26 + $0x309] sm:$0x1 pattern:$0x73625140] %v2638_v61 }
 0x37f   : > { %10924 = vst.sshfl [vmem:[%s12703_s26 + $0x321] sm:$0x1 pattern:$0x73625140] %v2637_v18  ;;  %3042 = vst [vmem:[%s12703_s26 + $0x2f9] sm:$0x1] %v2622_v6  ;;  %v2686_v27 = vrot.slane %v2672_v4, %v12695_v20  ;;  %v2687_v31 = vcombine.high %v2679_v9, %v2679_v9  ;;  %v2695_v32 = vrot.slane %v2679_v9, %v12695_v20  ;;  %3238 = vmatmul.mubr.f32.gmra.mrb[54].mxu1 %v11820_v16 }
 0x380   : > { %10926 = vst.sshfl [vmem:[%s12703_s26 + $0x341] sm:$0x1 pattern:$0x73625140] %v2679_v9  ;;  %11825 = vtanh.f32 %v3089_v11  ;;  %v2667_v34 = vrot.slane %v2639_v19, %v12695_v20  ;;  %v2669_v35 = vcombine.high %v2653_v24, %v2653_v24  ;;  %v2670_v36 = vcombine.high %v2660_v25, %v2660_v25  ;;  %3045 = vst [vmem:[%s12703_s26 + $0x311] sm:$0x1] %v2668_v26  ;;  %v11822_v42 = vpop.eup %11821 }
 0x381   : > { %10925 = vst.sshfl [vmem:[%s12703_s26 + $0x329] sm:$0x1 pattern:$0x73625140] %v2639_v19  ;;  %v2017_v39 = vadd.f32 %v13004_v5, %v1994_v13  ;;  %v1998_v41 = vpop.f32.mrb[46].mxu0  ;;  %v2688_v44 = vcombine.high %v2686_v27, %v2686_v27  ;;  %v2702_v45 = vrot.slane %v2686_v27, %v12695_v20  ;;  %v2709_v49 = vrot.slane %v2687_v31, %v12695_v20 }
 0x382   : > { %v2717_v50 = vcombine.high %v2695_v32, %v2695_v32  ;;  %10927 = vst.sshfl [vmem:[%s12703_s26 + $0x349] sm:$0x1 pattern:$0x73625140] %v2687_v31  ;;  %v2000_v55 = vpop.f32.mrb[47].mxu0  ;;  %3243 = vmatprep.mubr.f32.mxu1 %v12223_v2  ;;  %v2671_v56 = vcombine.high %v2667_v34, %v2667_v34  ;;  %v3090_v62 = vadd.f32 %v1998_v41, %v12684_v63 }
 0x383   : > { %10928 = vst.sshfl [vmem:[%s12703_s26 + $0x361] sm:$0x1 pattern:$0x73625140] %v2686_v27  ;;  %3046 = vst [vmem:[%s12703_s26 + $0x319] sm:$0x1] %v2670_v36  ;;  %v2721_v18 = vcombine.high %v2017_v39, %v2017_v39  ;;  %v2728_v61 = vrot.slane %v2017_v39, %v12695_v20  ;;  %v2716_v1 = vrot.slane %v2688_v44, %v12695_v20  ;;  %3244 = vmatmul.mubr.f32.gmra.mrb[56].mxu1 %v11822_v42 }
 0x384   : > { %3049 = vst [vmem:[%s12703_s26 + $0x331] sm:$0x1] %v2669_v35  ;;  %v2718_v6 = vcombine.high %v2702_v45, %v2702_v45  ;;  %v2719_v4 = vcombine.high %v2709_v49, %v2709_v49  ;;  %3053 = vst [vmem:[%s12703_s26 + $0x351] sm:$0x1] %v2717_v50  ;;  %v2018_v9 = vadd.f32 %v13004_v5, %v2000_v55  ;;  %11827 = vtanh.f32 %v3090_v62 }
 0x385   : > { %10929 = vst.sshfl [vmem:[%s12703_s26 + $0x369] sm:$0x1 pattern:$0x73625140] %v2688_v44  ;;  %3050 = vst [vmem:[%s12703_s26 + $0x339] sm:$0x1] %v2671_v56  ;;  %v2735_v11 = vrot.slane %v2721_v18, %v12695_v20  ;;  %v2736_v13 = vcombine.high %v2728_v61, %v2728_v61  ;;  %v2744_v16 = vrot.slane %v2728_v61, %v12695_v20  ;;  %3249 = vmatprep.mubr.f32.mxu1 %v12223_v2 }
 0x386   : > { %10930 = vst.sshfl [vmem:[%s12703_s26 + $0x381] sm:$0x1 pattern:$0x73625140] %v2728_v61  ;;  %v2720_v19 = vcombine.high %v2716_v1, %v2716_v1  ;;  %3054 = vst [vmem:[%s12703_s26 + $0x359] sm:$0x1] %v2719_v4  ;;  %v2770_v24 = vcombine.high %v2018_v9, %v2018_v9  ;;  %v2777_v25 = vrot.slane %v2018_v9, %v12695_v20  ;;  %v11824_v26 = vpop.eup %11823 }
 0x387   : > { %3057 = vst [vmem:[%s12703_s26 + $0x371] sm:$0x1] %v2718_v6  ;;  %v2737_v27 = vcombine.high %v2735_v11, %v2735_v11  ;;  %v2751_v31 = vrot.slane %v2735_v11, %v12695_v20  ;;  %v2758_v32 = vrot.slane %v2736_v13, %v12695_v20  ;;  %v2766_v34 = vcombine.high %v2744_v16, %v2744_v16 }
 0x388   : > { %10931 = vst.sshfl [vmem:[%s12703_s26 + $0x389] sm:$0x1 pattern:$0x73625140] %v2736_v13  ;;  %3058 = vst [vmem:[%s12703_s26 + $0x379] sm:$0x1] %v2720_v19  ;;  %v2784_v35 = vrot.slane %v2770_v24, %v12695_v20  ;;  %v2785_v36 = vcombine.high %v2777_v25, %v2777_v25  ;;  %v2793_v39 = vrot.slane %v2777_v25, %v12695_v20  ;;  %3250 = vmatmul.mubr.f32.gmra.mrb[58].mxu1 %v11824_v26 }
 0x389   : > { %10932 = vst.sshfl [vmem:[%s12703_s26 + $0x3a1] sm:$0x1 pattern:$0x73625140] %v2735_v11  ;;  %v2765_v41 = vrot.slane %v2737_v27, %v12695_v20  ;;  %v2767_v42 = vcombine.high %v2751_v31, %v2751_v31  ;;  %v2768_v44 = vcombine.high %v2758_v32, %v2758_v32  ;;  %3061 = vst [vmem:[%s12703_s26 + $0x391] sm:$0x1] %v2766_v34  ;;  %3255 = vmatprep.mubr.f32.mxu1 %v12223_v2 }
 0x38a   : > { %10934 = vst.sshfl [vmem:[%s12703_s26 + $0x3c1] sm:$0x1 pattern:$0x73625140] %v2777_v25  ;;  %v11826_v45 = vpop.eup %11825  ;;  %v2786_v49 = vcombine.high %v2784_v35, %v2784_v35  ;;  %v2800_v50 = vrot.slane %v2784_v35, %v12695_v20  ;;  %v2807_v55 = vrot.slane %v2785_v36, %v12695_v20  ;;  %v2815_v56 = vcombine.high %v2793_v39, %v2793_v39 }
 0x38b   : > { %10933 = vst.sshfl [vmem:[%s12703_s26 + $0x3a9] sm:$0x1 pattern:$0x73625140] %v2737_v27  ;;  %v2769_v18 = vcombine.high %v2765_v41, %v2765_v41  ;;  %3062 = vst [vmem:[%s12703_s26 + $0x399] sm:$0x1] %v2768_v44 }
 0x38c   : > { %10935 = vst.sshfl [vmem:[%s12703_s26 + $0x3c9] sm:$0x1 pattern:$0x73625140] %v2785_v36  ;;  %3065 = vst [vmem:[%s12703_s26 + $0x3b1] sm:$0x1] %v2767_v42  ;;  %v2814_v61 = vrot.slane %v2786_v49, %v12695_v20  ;;  %v2816_v62 = vcombine.high %v2800_v50, %v2800_v50  ;;  %v2817_v1 = vcombine.high %v2807_v55, %v2807_v55  ;;  %3256 = vmatmul.mubr.f32.gmra.mrb[60].mxu1 %v11826_v45 }
 0x38d   : > { %10936 = vst.sshfl [vmem:[%s12703_s26 + $0x3e1] sm:$0x1 pattern:$0x73625140] %v2784_v35  ;;  %3069 = vst [vmem:[%s12703_s26 + $0x3d1] sm:$0x1] %v2815_v56  ;;  %3261 = vmatprep.mubr.f32.mxu1 %v12223_v2 }
 0x38e   : > { %10937 = vst.sshfl [vmem:[%s12703_s26 + $0x3e9] sm:$0x1 pattern:$0x73625140] %v2786_v49  ;;  %3066 = vst [vmem:[%s12703_s26 + $0x3b9] sm:$0x1] %v2769_v18  ;;  %v2818_v6 = vcombine.high %v2814_v61, %v2814_v61  ;;  %v11828_v4 = vpop.eup %11827 }
 0x38f   : > { %3070 = vst [vmem:[%s12703_s26 + $0x3d9] sm:$0x1] %v2817_v1  ;;  %3073 = vst [vmem:[%s12703_s26 + $0x3f1] sm:$0x1] %v2816_v62 }
 0x390   : > { %3074 = vst [vmem:[%s12703_s26 + $0x3f9] sm:$0x1] %v2818_v6  ;;  %3262 = vmatmul.mubr.f32.gmra.mrb[62].mxu1 %v11828_v4 }
 0x391   : > { %5701 = vmatprep.mubr.f32.mxu1 %v12223_v2 }
 0x41a   : > { %v3173_v9 = vpop.f32.mrb[32].mxu1 }
 0x41b   : > { %v4340_v11 = vadd.f32 %v3173_v9, %v12597_v7  ;;  %v3175_v13 = vpop.f32.mrb[33].mxu1 }
 0x41c   : > { %v3268_v16 = vadd.f32 %v13004_v5, %v3175_v13 }
 0x41d   : > { %11829 = vtanh.f32 %v4340_v11 }
 0x41e   : > { %v3300_v19 = vcombine.high %v3268_v16, %v3268_v16  ;;  %v3307_v24 = vrot.slane %v3268_v16, %v12695_v20 }
 0x420   : > { %v3179_v25 = vpop.f32.mrb[34].mxu1  ;;  %v3314_v31 = vrot.slane %v3300_v19, %v12695_v20  ;;  %v3315_v32 = vcombine.high %v3307_v24, %v3307_v24  ;;  %v3323_v34 = vrot.slane %v3307_v24, %v12695_v20  ;;  %10938 = vst.sshfl [vmem:[%s12703_s26 + $0x2] sm:$0x1 pattern:$0x73625140] %v3307_v24 }
 0x421   : > { %v4341_v26 = vadd.f32 %v3179_v25, %v12600_v8  ;;  %v3181_v27 = vpop.f32.mrb[35].mxu1 }
 0x422   : > { %v3269_v35 = vadd.f32 %v13004_v5, %v3181_v27  ;;  %v3316_v36 = vcombine.high %v3314_v31, %v3314_v31  ;;  %v3330_v39 = vrot.slane %v3314_v31, %v12695_v20  ;;  %v3337_v41 = vrot.slane %v3315_v32, %v12695_v20  ;;  %10939 = vst.sshfl [vmem:[%s12703_s26 + $0xa] sm:$0x1 pattern:$0x73625140] %v3315_v32 }
 0x423   : > { %11831 = vtanh.f32 %v4341_v26  ;;  %v3345_v42 = vcombine.high %v3323_v34, %v3323_v34  ;;  %10940 = vst.sshfl [vmem:[%s12703_s26 + $0x22] sm:$0x1 pattern:$0x73625140] %v3314_v31 }
 0x424   : > { %v3185_v44 = vpop.f32.mrb[36].mxu1  ;;  %v3349_v45 = vcombine.high %v3269_v35, %v3269_v35  ;;  %v3356_v49 = vrot.slane %v3269_v35, %v12695_v20  ;;  %v3344_v56 = vrot.slane %v3316_v36, %v12695_v20  ;;  %v3346_v18 = vcombine.high %v3330_v39, %v3330_v39  ;;  %10941 = vst.sshfl [vmem:[%s12703_s26 + $0x2a] sm:$0x1 pattern:$0x73625140] %v3316_v36 }
 0x425   : > { %v4342_v50 = vadd.f32 %v3185_v44, %v12604_v12  ;;  %v3187_v55 = vpop.f32.mrb[37].mxu1  ;;  %v3347_v61 = vcombine.high %v3337_v41, %v3337_v41  ;;  %4214 = vst [vmem:[%s12703_s26 + $0x12] sm:$0x1] %v3345_v42 }
 0x426   : > { %v3270_v62 = vadd.f32 %v13004_v5, %v3187_v55  ;;  %v3363_v1 = vrot.slane %v3349_v45, %v12695_v20  ;;  %v3364_v6 = vcombine.high %v3356_v49, %v3356_v49  ;;  %v3372_v4 = vrot.slane %v3356_v49, %v12695_v20  ;;  %10942 = vst.sshfl [vmem:[%s12703_s26 + $0x42] sm:$0x1 pattern:$0x73625140] %v3356_v49 }
 0x427   : > { %11833 = vtanh.f32 %v4342_v50  ;;  %v3348_v9 = vcombine.high %v3344_v56, %v3344_v56  ;;  %4215 = vst [vmem:[%s12703_s26 + $0x1a] sm:$0x1] %v3347_v61  ;;  %4218 = vst [vmem:[%s12703_s26 + $0x32] sm:$0x1] %v3346_v18  ;;  %v11830_v16 = vpop.eup %11829  ;;  %v13321_v56 = vld [vmem:[#allocation10] ss:$0 sm:$0xff] }
 0x428   : > { %v3398_v11 = vcombine.high %v3270_v62, %v3270_v62  ;;  %v3405_v13 = vrot.slane %v3270_v62, %v12695_v20  ;;  %v3365_v19 = vcombine.high %v3363_v1, %v3363_v1  ;;  %v3379_v5 = vrot.slane %v3363_v1, %v12695_v20  ;;  %10943 = vst.sshfl [vmem:[%s12703_s26 + $0x4a] sm:$0x1 pattern:$0x73625140] %v3364_v6 }
 0x429   : > { %v3386_v24 = vrot.slane %v3364_v6, %v12695_v20  ;;  %v3394_v25 = vcombine.high %v3372_v4, %v3372_v4  ;;  %10944 = vst.sshfl [vmem:[%s12703_s26 + $0x62] sm:$0x1 pattern:$0x73625140] %v3363_v1  ;;  %4219 = vst [vmem:[%s12703_s26 + $0x3a] sm:$0x1] %v3348_v9  ;;  %4437 = vmatmul.mubr.f32.vlgmr.msra.gmra.mrb[48].mxu0 %v11830_v16 }
 0x42a   : > { %v3412_v26 = vrot.slane %v3398_v11, %v12695_v20  ;;  %v3413_v27 = vcombine.high %v3405_v13, %v3405_v13  ;;  %v3421_v31 = vrot.slane %v3405_v13, %v12695_v20  ;;  %10946 = vst.sshfl [vmem:[%s12703_s26 + $0x82] sm:$0x1 pattern:$0x73625140] %v3405_v13  ;;  %v3191_v32 = vpop.f32.mrb[38].mxu1  ;;  %v3393_v34 = vrot.slane %v3365_v19, %v12695_v20 }
 0x42b   : > { %v3395_v35 = vcombine.high %v3379_v5, %v3379_v5  ;;  %v3396_v36 = vcombine.high %v3386_v24, %v3386_v24  ;;  %4222 = vst [vmem:[%s12703_s26 + $0x52] sm:$0x1] %v3394_v25  ;;  %10945 = vst.sshfl [vmem:[%s12703_s26 + $0x6a] sm:$0x1 pattern:$0x73625140] %v3365_v19  ;;  %v4343_v39 = vadd.f32 %v3191_v32, %v12609_v17  ;;  %4442 = vmatprep.mubr.f32.mxu0 %v12223_v2 }
 0x42c   : > { %v3193_v41 = vpop.f32.mrb[39].mxu1  ;;  %v3414_v42 = vcombine.high %v3412_v26, %v3412_v26  ;;  %v3428_v44 = vrot.slane %v3412_v26, %v12695_v20  ;;  %v3435_v45 = vrot.slane %v3413_v27, %v12695_v20  ;;  %v3443_v49 = vcombine.high %v3421_v31, %v3421_v31  ;;  %10947 = vst.sshfl [vmem:[%s12703_s26 + $0x8a] sm:$0x1 pattern:$0x73625140] %v3413_v27 }
 0x42d   : > { %10948 = vst.sshfl [vmem:[%s12703_s26 + $0xa2] sm:$0x1 pattern:$0x73625140] %v3412_v26  ;;  %11544 = vmatpush1.bf16.msra.mxu0 %v12503_v14  ;;  %v11832_v50 = vpop.eup %11831  ;;  %v3397_v55 = vcombine.high %v3393_v34, %v3393_v34  ;;  %4223 = vst [vmem:[%s12703_s26 + $0x5a] sm:$0x1] %v3396_v36  ;;  %11835 = vtanh.f32 %v4343_v39  ;;  %v3271_v18 = vadd.f32 %v13321_v56, %v3193_v41 }
 0x42e   : > { %4226 = vst [vmem:[%s12703_s26 + $0x72] sm:$0x1] %v3395_v35  ;;  %11546 = vmatprep.subr.bf16.mxu0 %v12505_v15  ;;  %v3442_v61 = vrot.slane %v3414_v42, %v12695_v20  ;;  %v3444_v62 = vcombine.high %v3428_v44, %v3428_v44  ;;  %v3445_v1 = vcombine.high %v3435_v45, %v3435_v45  ;;  %4230 = vst [vmem:[%s12703_s26 + $0x92] sm:$0x1] %v3443_v49 }
 0x42f   : > { %10949 = vst.sshfl [vmem:[%s12703_s26 + $0xaa] sm:$0x1 pattern:$0x73625140] %v3414_v42  ;;  %v3197_v6 = vpop.f32.mrb[40].mxu1  ;;  %4443 = vmatmul.mubr.f32.gmra.mrb[50].mxu0 %v11832_v50  ;;  %v3447_v4 = vcombine.high %v3271_v18, %v3271_v18  ;;  %v3454_v9 = vrot.slane %v3271_v18, %v12695_v20 }
 0x430   : > { %4227 = vst [vmem:[%s12703_s26 + $0x7a] sm:$0x1] %v3397_v55  ;;  %v4344_v11 = vadd.f32 %v3197_v6, %v12612_v23  ;;  %v3199_v13 = vpop.f32.mrb[41].mxu1  ;;  %4448 = vmatprep.mubr.f32.mxu0 %v12223_v2  ;;  %v3446_v16 = vcombine.high %v3442_v61, %v3442_v61  ;;  %4231 = vst [vmem:[%s12703_s26 + $0x9a] sm:$0x1] %v3445_v1 }
 0x431   : > { %4234 = vst [vmem:[%s12703_s26 + $0xb2] sm:$0x1] %v3444_v62  ;;  %v3272_v19 = vadd.f32 %v13321_v56, %v3199_v13  ;;  %11548 = vmatpush1.bf16.msra.mxu0 %v12511_v21  ;;  %v11834_v5 = vpop.eup %11833  ;;  %v3461_v24 = vrot.slane %v3447_v4, %v12695_v20  ;;  %v3462_v25 = vcombine.high %v3454_v9, %v3454_v9  ;;  %10950 = vst.sshfl [vmem:[%s12703_s26 + $0xc2] sm:$0x1 pattern:$0x73625140] %v3454_v9 }
 0x432   : > { %v3470_v26 = vrot.slane %v3454_v9, %v12695_v20  ;;  %11837 = vtanh.f32 %v4344_v11  ;;  %11550 = vmatprep.subr.bf16.mxu0 %v12516_v22  ;;  %4235 = vst [vmem:[%s12703_s26 + $0xba] sm:$0x1] %v3446_v16 }
 0x433   : > { %v3496_v27 = vcombine.high %v3272_v19, %v3272_v19  ;;  %v3503_v31 = vrot.slane %v3272_v19, %v12695_v20  ;;  %4449 = vmatmul.mubr.f32.gmra.mrb[52].mxu0 %v11834_v5  ;;  %v3463_v32 = vcombine.high %v3461_v24, %v3461_v24  ;;  %v3477_v34 = vrot.slane %v3461_v24, %v12695_v20 }
 0x434   : > { %v3484_v35 = vrot.slane %v3462_v25, %v12695_v20  ;;  %v3492_v36 = vcombine.high %v3470_v26, %v3470_v26  ;;  %10951 = vst.sshfl [vmem:[%s12703_s26 + $0xca] sm:$0x1 pattern:$0x73625140] %v3462_v25  ;;  %4454 = vmatprep.mubr.f32.mxu0 %v12223_v2  ;;  %v3203_v44 = vpop.f32.mrb[42].mxu1 }
 0x435   : > { %10952 = vst.sshfl [vmem:[%s12703_s26 + $0xe2] sm:$0x1 pattern:$0x73625140] %v3461_v24  ;;  %v3510_v39 = vrot.slane %v3496_v27, %v12695_v20  ;;  %v3511_v41 = vcombine.high %v3503_v31, %v3503_v31  ;;  %v3519_v42 = vrot.slane %v3503_v31, %v12695_v20  ;;  %11552 = vmatpush1.bf16.msra.mxu0 %v12523_v29  ;;  %v3205_v18 = vpop.f32.mrb[43].mxu1 }
 0x436   : > { %10954 = vst.sshfl [vmem:[%s12703_s26 + $0x102] sm:$0x1 pattern:$0x73625140] %v3503_v31  ;;  %v3491_v45 = vrot.slane %v3463_v32, %v12695_v20  ;;  %v3493_v49 = vcombine.high %v3477_v34, %v3477_v34  ;;  %v3494_v50 = vcombine.high %v3484_v35, %v3484_v35  ;;  %4238 = vst [vmem:[%s12703_s26 + $0xd2] sm:$0x1] %v3492_v36  ;;  %11554 = vmatprep.subr.bf16.mxu0 %v12528_v30 }
 0x437   : > { %10953 = vst.sshfl [vmem:[%s12703_s26 + $0xea] sm:$0x1 pattern:$0x73625140] %v3463_v32  ;;  %v4345_v55 = vadd.f32 %v3203_v44, %v12620_v28  ;;  %v3512_v61 = vcombine.high %v3510_v39, %v3510_v39  ;;  %v3526_v62 = vrot.slane %v3510_v39, %v12695_v20  ;;  %v3533_v1 = vrot.slane %v3511_v41, %v12695_v20  ;;  %v11836_v4 = vpop.eup %11835 }
 0x438   : > { %v3541_v6 = vcombine.high %v3519_v42, %v3519_v42  ;;  %10955 = vst.sshfl [vmem:[%s12703_s26 + $0x10a] sm:$0x1 pattern:$0x73625140] %v3511_v41  ;;  %v3495_v9 = vcombine.high %v3491_v45, %v3491_v45  ;;  %4239 = vst [vmem:[%s12703_s26 + $0xda] sm:$0x1] %v3494_v50  ;;  %v3273_v11 = vadd.f32 %v13321_v56, %v3205_v18  ;;  %4455 = vmatmul.mubr.f32.gmra.mrb[54].mxu0 %v11836_v4 }
 0x439   : > { %10956 = vst.sshfl [vmem:[%s12703_s26 + $0x122] sm:$0x1 pattern:$0x73625140] %v3510_v39  ;;  %4242 = vst [vmem:[%s12703_s26 + $0xf2] sm:$0x1] %v3493_v49  ;;  %11839 = vtanh.f32 %v4345_v55  ;;  %v3540_v13 = vrot.slane %v3512_v61, %v12695_v20  ;;  %v3542_v16 = vcombine.high %v3526_v62, %v3526_v62  ;;  %v3543_v19 = vcombine.high %v3533_v1, %v3533_v1 }
 0x43a   : > { %4246 = vst [vmem:[%s12703_s26 + $0x112] sm:$0x1] %v3541_v6  ;;  %10957 = vst.sshfl [vmem:[%s12703_s26 + $0x12a] sm:$0x1 pattern:$0x73625140] %v3512_v61  ;;  %v3545_v24 = vcombine.high %v3273_v11, %v3273_v11  ;;  %v3552_v25 = vrot.slane %v3273_v11, %v12695_v20  ;;  %4460 = vmatprep.mubr.f32.mxu0 %v12223_v2  ;;  %11556 = vmatpush1.bf16.msra.mxu0 %v12535_v37 }
 0x43b   : > { %v3209_v5 = vpop.f32.mrb[44].mxu1  ;;  %4243 = vst [vmem:[%s12703_s26 + $0xfa] sm:$0x1] %v3495_v9  ;;  %v3544_v31 = vcombine.high %v3540_v13, %v3540_v13  ;;  %4247 = vst [vmem:[%s12703_s26 + $0x11a] sm:$0x1] %v3543_v19  ;;  %11558 = vmatprep.subr.bf16.mxu0 %v12540_v38 }
 0x43c   : > { %v4346_v26 = vadd.f32 %v3209_v5, %v12626_v33  ;;  %v3211_v27 = vpop.f32.mrb[45].mxu1  ;;  %4250 = vst [vmem:[%s12703_s26 + $0x132] sm:$0x1] %v3542_v16  ;;  %v11838_v34 = vpop.eup %11837  ;;  %v3559_v35 = vrot.slane %v3545_v24, %v12695_v20  ;;  %v3560_v36 = vcombine.high %v3552_v25, %v3552_v25  ;;  %v3568_v39 = vrot.slane %v3552_v25, %v12695_v20 }
 0x43d   : > { %v3274_v32 = vadd.f32 %v13321_v56, %v3211_v27  ;;  %10958 = vst.sshfl [vmem:[%s12703_s26 + $0x142] sm:$0x1 pattern:$0x73625140] %v3552_v25  ;;  %4251 = vst [vmem:[%s12703_s26 + $0x13a] sm:$0x1] %v3544_v31  ;;  %4461 = vmatmul.mubr.f32.gmra.mrb[56].mxu0 %v11838_v34 }
 0x43e   : > { %11841 = vtanh.f32 %v4346_v26  ;;  %v3561_v45 = vcombine.high %v3559_v35, %v3559_v35  ;;  %v3575_v49 = vrot.slane %v3559_v35, %v12695_v20  ;;  %v3582_v50 = vrot.slane %v3560_v36, %v12695_v20  ;;  %10959 = vst.sshfl [vmem:[%s12703_s26 + $0x14a] sm:$0x1 pattern:$0x73625140] %v3560_v36  ;;  %4466 = vmatprep.mubr.f32.mxu0 %v12223_v2 }
 0x43f   : > { %v3594_v41 = vcombine.high %v3274_v32, %v3274_v32  ;;  %v3601_v42 = vrot.slane %v3274_v32, %v12695_v20  ;;  %v3590_v55 = vcombine.high %v3568_v39, %v3568_v39  ;;  %10960 = vst.sshfl [vmem:[%s12703_s26 + $0x162] sm:$0x1 pattern:$0x73625140] %v3559_v35  ;;  %11560 = vmatpush1.bf16.msra.mxu0 %v12562_v48 }
 0x440   : > { %v3215_v44 = vpop.f32.mrb[46].mxu1  ;;  %v3589_v4 = vrot.slane %v3561_v45, %v12695_v20  ;;  %v3591_v9 = vcombine.high %v3575_v49, %v3575_v49  ;;  %v3592_v11 = vcombine.high %v3582_v50, %v3582_v50  ;;  %10961 = vst.sshfl [vmem:[%s12703_s26 + $0x16a] sm:$0x1 pattern:$0x73625140] %v3561_v45  ;;  %11562 = vmatprep.subr.bf16.mxu0 %v12566_v51 }
 0x441   : > { %v3217_v18 = vpop.f32.mrb[47].mxu1  ;;  %v3608_v61 = vrot.slane %v3594_v41, %v12695_v20  ;;  %v3609_v62 = vcombine.high %v3601_v42, %v3601_v42  ;;  %v3617_v1 = vrot.slane %v3601_v42, %v12695_v20  ;;  %10962 = vst.sshfl [vmem:[%s12703_s26 + $0x182] sm:$0x1 pattern:$0x73625140] %v3601_v42  ;;  %v4347_v6 = vadd.f32 %v3215_v44, %v12634_v40 }
 0x442   : > { %4254 = vst [vmem:[%s12703_s26 + $0x152] sm:$0x1] %v3590_v55  ;;  %v3275_v13 = vadd.f32 %v13321_v56, %v3217_v18  ;;  %v3593_v27 = vcombine.high %v3589_v4, %v3589_v4  ;;  %4255 = vst [vmem:[%s12703_s26 + $0x15a] sm:$0x1] %v3592_v11 }
 0x443   : > { %v3610_v16 = vcombine.high %v3608_v61, %v3608_v61  ;;  %v3624_v19 = vrot.slane %v3608_v61, %v12695_v20  ;;  %v3631_v5 = vrot.slane %v3609_v62, %v12695_v20  ;;  %v3639_v24 = vcombine.high %v3617_v1, %v3617_v1  ;;  %10963 = vst.sshfl [vmem:[%s12703_s26 + $0x18a] sm:$0x1 pattern:$0x73625140] %v3609_v62  ;;  %v11840_v26 = vpop.eup %11839 }
 0x444   : > { %10964 = vst.sshfl [vmem:[%s12703_s26 + $0x1a2] sm:$0x1 pattern:$0x73625140] %v3608_v61  ;;  %4258 = vst [vmem:[%s12703_s26 + $0x172] sm:$0x1] %v3591_v9  ;;  %11843 = vtanh.f32 %v4347_v6  ;;  %v3643_v31 = vcombine.high %v3275_v13, %v3275_v13  ;;  %v3650_v32 = vrot.slane %v3275_v13, %v12695_v20  ;;  %4467 = vmatmul.mubr.f32.gmra.mrb[58].mxu0 %v11840_v26 }
 0x445   : > { %v3221_v25 = vpop.f32.mrb[48].mxu1  ;;  %v3638_v35 = vrot.slane %v3610_v16, %v12695_v20  ;;  %v3640_v36 = vcombine.high %v3624_v19, %v3624_v19  ;;  %v3641_v39 = vcombine.high %v3631_v5, %v3631_v5  ;;  %4262 = vst [vmem:[%s12703_s26 + $0x192] sm:$0x1] %v3639_v24  ;;  %4259 = vst [vmem:[%s12703_s26 + $0x17a] sm:$0x1] %v3593_v27  ;;  %4472 = vmatprep.mubr.f32.mxu0 %v12223_v2 }
 0x446   : > { %v3223_v34 = vpop.f32.mrb[49].mxu1  ;;  %10965 = vst.sshfl [vmem:[%s12703_s26 + $0x1aa] sm:$0x1 pattern:$0x73625140] %v3610_v16  ;;  %v4348_v41 = vadd.f32 %v3221_v25, %v12640_v43  ;;  %v3657_v42 = vrot.slane %v3643_v31, %v12695_v20  ;;  %v3658_v44 = vcombine.high %v3650_v32, %v3650_v32  ;;  %v3666_v45 = vrot.slane %v3650_v32, %v12695_v20 }
 0x447   : > { %10966 = vst.sshfl [vmem:[%s12703_s26 + $0x1c2] sm:$0x1 pattern:$0x73625140] %v3650_v32  ;;  %v3276_v49 = vadd.f32 %v13321_v56, %v3223_v34  ;;  %v3642_v50 = vcombine.high %v3638_v35, %v3638_v35  ;;  %4263 = vst [vmem:[%s12703_s26 + $0x19a] sm:$0x1] %v3641_v39  ;;  %11564 = vmatpush1.bf16.msra.mxu0 %v12568_v54 }
 0x448   : > { %4266 = vst [vmem:[%s12703_s26 + $0x1b2] sm:$0x1] %v3640_v36  ;;  %11845 = vtanh.f32 %v4348_v41  ;;  %v11842_v18 = vpop.eup %11841  ;;  %v3659_v61 = vcombine.high %v3657_v42, %v3657_v42  ;;  %v3673_v62 = vrot.slane %v3657_v42, %v12695_v20  ;;  %v3680_v1 = vrot.slane %v3658_v44, %v12695_v20  ;;  %10967 = vst.sshfl [vmem:[%s12703_s26 + $0x1ca] sm:$0x1 pattern:$0x73625140] %v3658_v44 }
 0x449   : > { %v3227_v55 = vpop.f32.mrb[50].mxu1  ;;  %v3688_v6 = vcombine.high %v3666_v45, %v3666_v45  ;;  %10968 = vst.sshfl [vmem:[%s12703_s26 + $0x1e2] sm:$0x1 pattern:$0x73625140] %v3657_v42  ;;  %11566 = vmatprep.subr.bf16.mxu0 %v12574_v57  ;;  %v3692_v9 = vcombine.high %v3276_v49, %v3276_v49  ;;  %v3699_v11 = vrot.slane %v3276_v49, %v12695_v20 }
 0x44a   : > { %v3229_v4 = vpop.f32.mrb[51].mxu1  ;;  %4267 = vst [vmem:[%s12703_s26 + $0x1ba] sm:$0x1] %v3642_v50  ;;  %v4349_v13 = vadd.f32 %v3227_v55, %v12648_v46  ;;  %4473 = vmatmul.mubr.f32.gmra.mrb[60].mxu0 %v11842_v18  ;;  %v3687_v19 = vrot.slane %v3659_v61, %v12695_v20  ;;  %v3689_v5 = vcombine.high %v3673_v62, %v3673_v62 }
 0x44b   : > { %v3277_v16 = vadd.f32 %v13321_v56, %v3229_v4  ;;  %v3690_v24 = vcombine.high %v3680_v1, %v3680_v1  ;;  %4270 = vst [vmem:[%s12703_s26 + $0x1d2] sm:$0x1] %v3688_v6  ;;  %10969 = vst.sshfl [vmem:[%s12703_s26 + $0x1ea] sm:$0x1 pattern:$0x73625140] %v3659_v61  ;;  %4478 = vmatprep.mubr.f32.mxu0 %v12223_v2  ;;  %v3706_v25 = vrot.slane %v3692_v9, %v12695_v20 }
 0x44c   : > { %v3707_v26 = vcombine.high %v3699_v11, %v3699_v11  ;;  %v3715_v27 = vrot.slane %v3699_v11, %v12695_v20  ;;  %10970 = vst.sshfl [vmem:[%s12703_s26 + $0x202] sm:$0x1 pattern:$0x73625140] %v3699_v11  ;;  %11847 = vtanh.f32 %v4349_v13  ;;  %11568 = vmatpush1.bf16.msra.mxu0 %v12576_v60  ;;  %v3691_v32 = vcombine.high %v3687_v19, %v3687_v19 }
 0x44d   : > { %v3233_v31 = vpop.f32.mrb[52].mxu1  ;;  %4271 = vst [vmem:[%s12703_s26 + $0x1da] sm:$0x1] %v3690_v24  ;;  %4274 = vst [vmem:[%s12703_s26 + $0x1f2] sm:$0x1] %v3689_v5  ;;  %v3741_v34 = vcombine.high %v3277_v16, %v3277_v16  ;;  %v3748_v35 = vrot.slane %v3277_v16, %v12695_v20  ;;  %11570 = vmatprep.subr.bf16.mxu0 %v12579_v0  ;;  %v3708_v41 = vcombine.high %v3706_v25, %v3706_v25 }
 0x44e   : > { %v4350_v36 = vadd.f32 %v3233_v31, %v12654_v47  ;;  %v3235_v39 = vpop.f32.mrb[53].mxu1  ;;  %v3722_v42 = vrot.slane %v3706_v25, %v12695_v20  ;;  %v3729_v44 = vrot.slane %v3707_v26, %v12695_v20  ;;  %v3737_v45 = vcombine.high %v3715_v27, %v3715_v27  ;;  %10971 = vst.sshfl [vmem:[%s12703_s26 + $0x20a] sm:$0x1 pattern:$0x73625140] %v3707_v26  ;;  %v11844_v49 = vpop.eup %11843 }
 0x44f   : > { %10972 = vst.sshfl [vmem:[%s12703_s26 + $0x222] sm:$0x1 pattern:$0x73625140] %v3706_v25  ;;  %4275 = vst [vmem:[%s12703_s26 + $0x1fa] sm:$0x1] %v3691_v32  ;;  %v3755_v50 = vrot.slane %v3741_v34, %v12695_v20  ;;  %v3756_v55 = vcombine.high %v3748_v35, %v3748_v35  ;;  %v3764_v18 = vrot.slane %v3748_v35, %v12695_v20  ;;  %4479 = vmatmul.mubr.f32.gmra.mrb[62].mxu0 %v11844_v49 }
 0x450   : > { %10974 = vst.sshfl [vmem:[%s12703_s26 + $0x242] sm:$0x1 pattern:$0x73625140] %v3748_v35  ;;  %11849 = vtanh.f32 %v4350_v36  ;;  %v3736_v61 = vrot.slane %v3708_v41, %v12695_v20  ;;  %v3738_v62 = vcombine.high %v3722_v42, %v3722_v42  ;;  %v3739_v1 = vcombine.high %v3729_v44, %v3729_v44  ;;  %4278 = vst [vmem:[%s12703_s26 + $0x212] sm:$0x1] %v3737_v45 }
 0x451   : > { %10973 = vst.sshfl [vmem:[%s12703_s26 + $0x22a] sm:$0x1 pattern:$0x73625140] %v3708_v41  ;;  %v3278_v6 = vadd.f32 %v13321_v56, %v3235_v39  ;;  %v3757_v9 = vcombine.high %v3755_v50, %v3755_v50  ;;  %v3771_v11 = vrot.slane %v3755_v50, %v12695_v20  ;;  %v3778_v13 = vrot.slane %v3756_v55, %v12695_v20 }
 0x452   : > { %v3239_v4 = vpop.f32.mrb[54].mxu1  ;;  %v3786_v16 = vcombine.high %v3764_v18, %v3764_v18  ;;  %10975 = vst.sshfl [vmem:[%s12703_s26 + $0x24a] sm:$0x1 pattern:$0x73625140] %v3756_v55  ;;  %4484 = vmatprep.mubr.f32.mxu0 %v12223_v2  ;;  %v11846_v5 = vpop.eup %11845  ;;  %v3740_v24 = vcombine.high %v3736_v61, %v3736_v61  ;;  %11572 = vmatpush1.bf16.msra.mxu0 %v12583_v3 }
 0x453   : > { %10976 = vst.sshfl [vmem:[%s12703_s26 + $0x262] sm:$0x1 pattern:$0x73625140] %v3755_v50  ;;  %v3241_v19 = vpop.f32.mrb[55].mxu1  ;;  %v3790_v25 = vcombine.high %v3278_v6, %v3278_v6  ;;  %v3797_v26 = vrot.slane %v3278_v6, %v12695_v20  ;;  %v4351_v27 = vadd.f32 %v3239_v4, %v12662_v52  ;;  %v3785_v31 = vrot.slane %v3757_v9, %v12695_v20 }
 0x454   : > { %4279 = vst [vmem:[%s12703_s26 + $0x21a] sm:$0x1] %v3739_v1  ;;  %4282 = vst [vmem:[%s12703_s26 + $0x232] sm:$0x1] %v3738_v62  ;;  %v3787_v32 = vcombine.high %v3771_v11, %v3771_v11  ;;  %v3788_v34 = vcombine.high %v3778_v13, %v3778_v13  ;;  %v3279_v35 = vadd.f32 %v13321_v56, %v3241_v19  ;;  %11606 = vmatprep.subr.bf16.mxu0 %v12500_v10 }
 0x455   : > { %4286 = vst [vmem:[%s12703_s26 + $0x252] sm:$0x1] %v3786_v16  ;;  %10977 = vst.sshfl [vmem:[%s12703_s26 + $0x26a] sm:$0x1 pattern:$0x73625140] %v3757_v9  ;;  %v3804_v36 = vrot.slane %v3790_v25, %v12695_v20  ;;  %v3805_v39 = vcombine.high %v3797_v26, %v3797_v26  ;;  %v3813_v41 = vrot.slane %v3797_v26, %v12695_v20  ;;  %11851 = vtanh.f32 %v4351_v27 }
 0x456   : > { %4283 = vst [vmem:[%s12703_s26 + $0x23a] sm:$0x1] %v3740_v24  ;;  %10978 = vst.sshfl [vmem:[%s12703_s26 + $0x282] sm:$0x1 pattern:$0x73625140] %v3797_v26  ;;  %4485 = vmatmul.mubr.f32.gmra.mrb[64].mxu0 %v11846_v5  ;;  %v3789_v44 = vcombine.high %v3785_v31, %v3785_v31  ;;  %v3839_v45 = vcombine.high %v3279_v35, %v3279_v35  ;;  %v3846_v10 = vrot.slane %v3279_v35, %v12695_v20  ;;  %v11848_v55 = vpop.eup %11847 }
 0x457   : > { %v3245_v42 = vpop.f32.mrb[56].mxu1  ;;  %4287 = vst [vmem:[%s12703_s26 + $0x25a] sm:$0x1] %v3788_v34  ;;  %4290 = vst [vmem:[%s12703_s26 + $0x272] sm:$0x1] %v3787_v32  ;;  %4490 = vmatprep.mubr.f32.mxu0 %v12223_v2  ;;  %v3806_v18 = vcombine.high %v3804_v36, %v3804_v36  ;;  %v3820_v61 = vrot.slane %v3804_v36, %v12695_v20  ;;  %v3827_v62 = vrot.slane %v3805_v39, %v12695_v20 }
 0x458   : > { %v4352_v49 = vadd.f32 %v3245_v42, %v12668_v53  ;;  %v3247_v50 = vpop.f32.mrb[57].mxu1  ;;  %v3835_v1 = vcombine.high %v3813_v41, %v3813_v41  ;;  %10979 = vst.sshfl [vmem:[%s12703_s26 + $0x28a] sm:$0x1 pattern:$0x73625140] %v3805_v39  ;;  %v3853_v6 = vrot.slane %v3839_v45, %v12695_v20  ;;  %v3854_v4 = vcombine.high %v3846_v10, %v3846_v10 }
 0x459   : > { %10980 = vst.sshfl [vmem:[%s12703_s26 + $0x2a2] sm:$0x1 pattern:$0x73625140] %v3804_v36  ;;  %4291 = vst [vmem:[%s12703_s26 + $0x27a] sm:$0x1] %v3789_v44  ;;  %v3862_v9 = vrot.slane %v3846_v10, %v12695_v20  ;;  %v3834_v11 = vrot.slane %v3806_v18, %v12695_v20  ;;  %v3836_v13 = vcombine.high %v3820_v61, %v3820_v61 }
 0x45a   : > { %10982 = vst.sshfl [vmem:[%s12703_s26 + $0x2c2] sm:$0x1 pattern:$0x73625140] %v3846_v10  ;;  %11853 = vtanh.f32 %v4352_v49  ;;  %v3837_v16 = vcombine.high %v3827_v62, %v3827_v62  ;;  %4294 = vst [vmem:[%s12703_s26 + $0x292] sm:$0x1] %v3835_v1  ;;  %v3280_v19 = vadd.f32 %v13321_v56, %v3247_v50  ;;  %4491 = vmatmul.mubr.f32.gmra.mrb[66].mxu0 %v11848_v55  ;;  %v11850_v24 = vpop.eup %11849 }
 0x45b   : > { %10981 = vst.sshfl [vmem:[%s12703_s26 + $0x2aa] sm:$0x1 pattern:$0x73625140] %v3806_v18  ;;  %v3251_v5 = vpop.f32.mrb[58].mxu1  ;;  %v3855_v25 = vcombine.high %v3853_v6, %v3853_v6  ;;  %v3869_v26 = vrot.slane %v3853_v6, %v12695_v20  ;;  %v3876_v27 = vrot.slane %v3854_v4, %v12695_v20  ;;  %v3884_v31 = vcombine.high %v3862_v9, %v3862_v9 }
 0x45c   : > { %10983 = vst.sshfl [vmem:[%s12703_s26 + $0x2ca] sm:$0x1 pattern:$0x73625140] %v3854_v4  ;;  %v3253_v32 = vpop.f32.mrb[59].mxu1  ;;  %4496 = vmatprep.mubr.f32.mxu0 %v12223_v2  ;;  %v3838_v34 = vcombine.high %v3834_v11, %v3834_v11  ;;  %v3888_v35 = vcombine.high %v3280_v19, %v3280_v19  ;;  %v3895_v36 = vrot.slane %v3280_v19, %v12695_v20 }
 0x45d   : > { %10984 = vst.sshfl [vmem:[%s12703_s26 + $0x2e2] sm:$0x1 pattern:$0x73625140] %v3853_v6  ;;  %4295 = vst [vmem:[%s12703_s26 + $0x29a] sm:$0x1] %v3837_v16  ;;  %v4353_v39 = vadd.f32 %v3251_v5, %v12674_v58  ;;  %v3883_v41 = vrot.slane %v3855_v25, %v12695_v20  ;;  %v3885_v42 = vcombine.high %v3869_v26, %v3869_v26 }
 0x45e   : > { %4298 = vst [vmem:[%s12703_s26 + $0x2b2] sm:$0x1] %v3836_v13  ;;  %v3886_v44 = vcombine.high %v3876_v27, %v3876_v27  ;;  %4302 = vst [vmem:[%s12703_s26 + $0x2d2] sm:$0x1] %v3884_v31  ;;  %v3281_v45 = vadd.f32 %v13321_v56, %v3253_v32  ;;  %v3902_v10 = vrot.slane %v3888_v35, %v12695_v20  ;;  %4497 = vmatmul.mubr.f32.gmra.mrb[68].mxu0 %v11850_v24 }
 0x45f   : > { %10985 = vst.sshfl [vmem:[%s12703_s26 + $0x2ea] sm:$0x1 pattern:$0x73625140] %v3855_v25  ;;  %4299 = vst [vmem:[%s12703_s26 + $0x2ba] sm:$0x1] %v3838_v34  ;;  %v3903_v49 = vcombine.high %v3895_v36, %v3895_v36  ;;  %v3911_v50 = vrot.slane %v3895_v36, %v12695_v20  ;;  %11855 = vtanh.f32 %v4353_v39  ;;  %v3887_v18 = vcombine.high %v3883_v41, %v3883_v41  ;;  %v11852_v4 = vpop.eup %11851 }
 0x460   : > { %10986 = vst.sshfl [vmem:[%s12703_s26 + $0x302] sm:$0x1 pattern:$0x73625140] %v3895_v36  ;;  %v3257_v55 = vpop.f32.mrb[60].mxu1  ;;  %v3937_v61 = vcombine.high %v3281_v45, %v3281_v45  ;;  %v3944_v62 = vrot.slane %v3281_v45, %v12695_v20  ;;  %4502 = vmatprep.mubr.f32.mxu0 %v12223_v2  ;;  %v3904_v9 = vcombine.high %v3902_v10, %v3902_v10 }
 0x461   : > { %4303 = vst [vmem:[%s12703_s26 + $0x2da] sm:$0x1] %v3886_v44  ;;  %4306 = vst [vmem:[%s12703_s26 + $0x2f2] sm:$0x1] %v3885_v42  ;;  %v4354_v1 = vadd.f32 %v3257_v55, %v12678_v59  ;;  %v3259_v6 = vpop.f32.mrb[61].mxu1  ;;  %v3918_v11 = vrot.slane %v3902_v10, %v12695_v20  ;;  %v3925_v13 = vrot.slane %v3903_v49, %v12695_v20 }
 0x462   : > { %v3933_v16 = vcombine.high %v3911_v50, %v3911_v50  ;;  %10987 = vst.sshfl [vmem:[%s12703_s26 + $0x30a] sm:$0x1 pattern:$0x73625140] %v3903_v49  ;;  %4307 = vst [vmem:[%s12703_s26 + $0x2fa] sm:$0x1] %v3887_v18  ;;  %v3951_v19 = vrot.slane %v3937_v61, %v12695_v20  ;;  %v3952_v5 = vcombine.high %v3944_v62, %v3944_v62  ;;  %4503 = vmatmul.mubr.f32.gmra.mrb[70].mxu0 %v11852_v4 }
 0x463   : > { %10988 = vst.sshfl [vmem:[%s12703_s26 + $0x322] sm:$0x1 pattern:$0x73625140] %v3902_v10  ;;  %v3960_v24 = vrot.slane %v3944_v62, %v12695_v20  ;;  %11857 = vtanh.f32 %v4354_v1  ;;  %v3932_v25 = vrot.slane %v3904_v9, %v12695_v20  ;;  %v3934_v26 = vcombine.high %v3918_v11, %v3918_v11  ;;  %v3263_v32 = vpop.f32.mrb[62].mxu1  ;;  %4508 = vmatprep.mubr.f32.mxu0 %v12223_v2 }
 0x464   : > { %10990 = vst.sshfl [vmem:[%s12703_s26 + $0x342] sm:$0x1 pattern:$0x73625140] %v3944_v62  ;;  %v3935_v27 = vcombine.high %v3925_v13, %v3925_v13  ;;  %4310 = vst [vmem:[%s12703_s26 + $0x312] sm:$0x1] %v3933_v16  ;;  %v3282_v31 = vadd.f32 %v13321_v56, %v3259_v6  ;;  %v11854_v34 = vpop.eup %11853  ;;  %v3953_v35 = vcombine.high %v3951_v19, %v3951_v19 }
 0x465   : > { %10989 = vst.sshfl [vmem:[%s12703_s26 + $0x32a] sm:$0x1 pattern:$0x73625140] %v3904_v9  ;;  %v3967_v36 = vrot.slane %v3951_v19, %v12695_v20  ;;  %v3974_v39 = vrot.slane %v3952_v5, %v12695_v20  ;;  %v3982_v41 = vcombine.high %v3960_v24, %v3960_v24  ;;  %v3265_v42 = vpop.f32.mrb[63].mxu1  ;;  %v3936_v44 = vcombine.high %v3932_v25, %v3932_v25 }
 0x466   : > { %10991 = vst.sshfl [vmem:[%s12703_s26 + $0x34a] sm:$0x1 pattern:$0x73625140] %v3952_v5  ;;  %4311 = vst [vmem:[%s12703_s26 + $0x31a] sm:$0x1] %v3935_v27  ;;  %v3986_v45 = vcombine.high %v3282_v31, %v3282_v31  ;;  %v3993_v10 = vrot.slane %v3282_v31, %v12695_v20  ;;  %v4355_v49 = vadd.f32 %v3263_v32, %v12684_v63  ;;  %4509 = vmatmul.mubr.f32.gmra.mrb[72].mxu0 %v11854_v34 }
 0x467   : > { %10992 = vst.sshfl [vmem:[%s12703_s26 + $0x362] sm:$0x1 pattern:$0x73625140] %v3951_v19  ;;  %4314 = vst [vmem:[%s12703_s26 + $0x332] sm:$0x1] %v3934_v26  ;;  %v3981_v50 = vrot.slane %v3953_v35, %v12695_v20  ;;  %v3983_v55 = vcombine.high %v3967_v36, %v3967_v36  ;;  %v3984_v18 = vcombine.high %v3974_v39, %v3974_v39  ;;  %4514 = vmatprep.mubr.f32.mxu0 %v12223_v2 }
 0x468   : > { %4318 = vst [vmem:[%s12703_s26 + $0x352] sm:$0x1] %v3982_v41  ;;  %10993 = vst.sshfl [vmem:[%s12703_s26 + $0x36a] sm:$0x1 pattern:$0x73625140] %v3953_v35  ;;  %v3283_v61 = vadd.f32 %v13321_v56, %v3265_v42  ;;  %v4000_v62 = vrot.slane %v3986_v45, %v12695_v20  ;;  %v4001_v1 = vcombine.high %v3993_v10, %v3993_v10  ;;  %11859 = vtanh.f32 %v4355_v49 }
 0x469   : > { %4315 = vst [vmem:[%s12703_s26 + $0x33a] sm:$0x1] %v3936_v44  ;;  %v4009_v6 = vrot.slane %v3993_v10, %v12695_v20  ;;  %10994 = vst.sshfl [vmem:[%s12703_s26 + $0x382] sm:$0x1 pattern:$0x73625140] %v3993_v10  ;;  %v3985_v4 = vcombine.high %v3981_v50, %v3981_v50  ;;  %v11856_v13 = vpop.eup %11855 }
 0x46a   : > { %4319 = vst [vmem:[%s12703_s26 + $0x35a] sm:$0x1] %v3984_v18  ;;  %4322 = vst [vmem:[%s12703_s26 + $0x372] sm:$0x1] %v3983_v55  ;;  %v4035_v9 = vcombine.high %v3283_v61, %v3283_v61  ;;  %v4042_v11 = vrot.slane %v3283_v61, %v12695_v20  ;;  %v4002_v16 = vcombine.high %v4000_v62, %v4000_v62  ;;  %4515 = vmatmul.mubr.f32.gmra.mrb[74].mxu0 %v11856_v13 }
 0x46b   : > { %v4016_v19 = vrot.slane %v4000_v62, %v12695_v20  ;;  %v4023_v5 = vrot.slane %v4001_v1, %v12695_v20  ;;  %v4031_v24 = vcombine.high %v4009_v6, %v4009_v6  ;;  %10995 = vst.sshfl [vmem:[%s12703_s26 + $0x38a] sm:$0x1 pattern:$0x73625140] %v4001_v1  ;;  %4323 = vst [vmem:[%s12703_s26 + $0x37a] sm:$0x1] %v3985_v4  ;;  %4520 = vmatprep.mubr.f32.mxu0 %v12223_v2 }
 0x46c   : > { %10996 = vst.sshfl [vmem:[%s12703_s26 + $0x3a2] sm:$0x1 pattern:$0x73625140] %v4000_v62  ;;  %v4049_v25 = vrot.slane %v4035_v9, %v12695_v20  ;;  %v4050_v26 = vcombine.high %v4042_v11, %v4042_v11  ;;  %v4058_v27 = vrot.slane %v4042_v11, %v12695_v20  ;;  %v4030_v31 = vrot.slane %v4002_v16, %v12695_v20 }
 0x46d   : > { %10998 = vst.sshfl [vmem:[%s12703_s26 + $0x3c2] sm:$0x1 pattern:$0x73625140] %v4042_v11  ;;  %v4032_v32 = vcombine.high %v4016_v19, %v4016_v19  ;;  %v4033_v34 = vcombine.high %v4023_v5, %v4023_v5  ;;  %4326 = vst [vmem:[%s12703_s26 + $0x392] sm:$0x1] %v4031_v24  ;;  %v11858_v35 = vpop.eup %11857 }
 0x46e   : > { %10997 = vst.sshfl [vmem:[%s12703_s26 + $0x3aa] sm:$0x1 pattern:$0x73625140] %v4002_v16  ;;  %v4051_v36 = vcombine.high %v4049_v25, %v4049_v25  ;;  %v4065_v39 = vrot.slane %v4049_v25, %v12695_v20  ;;  %v4072_v41 = vrot.slane %v4050_v26, %v12695_v20  ;;  %v4080_v42 = vcombine.high %v4058_v27, %v4058_v27 }
 0x46f   : > { %10999 = vst.sshfl [vmem:[%s12703_s26 + $0x3ca] sm:$0x1 pattern:$0x73625140] %v4050_v26  ;;  %v4034_v44 = vcombine.high %v4030_v31, %v4030_v31  ;;  %4327 = vst [vmem:[%s12703_s26 + $0x39a] sm:$0x1] %v4033_v34  ;;  %4521 = vmatmul.mubr.f32.gmra.mrb[76].mxu0 %v11858_v35 }
 0x470   : > { %11000 = vst.sshfl [vmem:[%s12703_s26 + $0x3e2] sm:$0x1 pattern:$0x73625140] %v4049_v25  ;;  %4330 = vst [vmem:[%s12703_s26 + $0x3b2] sm:$0x1] %v4032_v32  ;;  %v4079_v45 = vrot.slane %v4051_v36, %v12695_v20  ;;  %v4081_v10 = vcombine.high %v4065_v39, %v4065_v39  ;;  %v4082_v49 = vcombine.high %v4072_v41, %v4072_v41  ;;  %4526 = vmatprep.mubr.f32.mxu0 %v12223_v2 }
 0x471   : > { %4334 = vst [vmem:[%s12703_s26 + $0x3d2] sm:$0x1] %v4080_v42  ;;  %11001 = vst.sshfl [vmem:[%s12703_s26 + $0x3ea] sm:$0x1 pattern:$0x73625140] %v4051_v36 }
 0x472   : > { %4331 = vst [vmem:[%s12703_s26 + $0x3ba] sm:$0x1] %v4034_v44  ;;  %v4083_v50 = vcombine.high %v4079_v45, %v4079_v45  ;;  %4335 = vst [vmem:[%s12703_s26 + $0x3da] sm:$0x1] %v4082_v49  ;;  %v11860_v55 = vpop.eup %11859 }
 0x473   : > { %4338 = vst [vmem:[%s12703_s26 + $0x3f2] sm:$0x1] %v4081_v10  ;;  %4527 = vmatmul.mubr.f32.gmra.mrb[78].mxu0 %v11860_v55 }
 0x474   : > { %4339 = vst [vmem:[%s12703_s26 + $0x3fa] sm:$0x1] %v4083_v50  ;;  %6966 = vmatprep.mubr.f32.mxu0 %v12223_v2 }
 0x4fc   : > { %v4438_v18 = vpop.f32.mrb[48].mxu0 }
 0x4fd   : > { %v5605_v61 = vadd.f32 %v4438_v18, %v12597_v7  ;;  %v4440_v62 = vpop.f32.mrb[49].mxu0 }
 0x4fe   : > { %v4533_v1 = vadd.f32 %v13321_v56, %v4440_v62 }
 0x4ff   : > { %11861 = vtanh.f32 %v5605_v61 }
 0x500   : > { %v4565_v6 = vcombine.high %v4533_v1, %v4533_v1  ;;  %v4572_v4 = vrot.slane %v4533_v1, %v12695_v20 }
 0x502   : > { %v4444_v9 = vpop.f32.mrb[50].mxu0  ;;  %v4579_v16 = vrot.slane %v4565_v6, %v12695_v20  ;;  %v4580_v19 = vcombine.high %v4572_v4, %v4572_v4  ;;  %v4588_v5 = vrot.slane %v4572_v4, %v12695_v20  ;;  %11002 = vst.sshfl [vmem:[%s12703_s26 + $0x3] sm:$0x1 pattern:$0x73625140] %v4572_v4 }
 0x503   : > { %v5606_v11 = vadd.f32 %v4444_v9, %v12600_v8  ;;  %v4446_v13 = vpop.f32.mrb[51].mxu0 }
 0x504   : > { %v4534_v24 = vadd.f32 %v13321_v56, %v4446_v13  ;;  %v4581_v25 = vcombine.high %v4579_v16, %v4579_v16  ;;  %v4595_v26 = vrot.slane %v4579_v16, %v12695_v20  ;;  %v4602_v27 = vrot.slane %v4580_v19, %v12695_v20  ;;  %11003 = vst.sshfl [vmem:[%s12703_s26 + $0xb] sm:$0x1 pattern:$0x73625140] %v4580_v19 }
 0x505   : > { %11863 = vtanh.f32 %v5606_v11  ;;  %v4610_v31 = vcombine.high %v4588_v5, %v4588_v5  ;;  %11004 = vst.sshfl [vmem:[%s12703_s26 + $0x23] sm:$0x1 pattern:$0x73625140] %v4579_v16 }
 0x506   : > { %v4450_v32 = vpop.f32.mrb[52].mxu0  ;;  %v4614_v34 = vcombine.high %v4534_v24, %v4534_v24  ;;  %v4621_v35 = vrot.slane %v4534_v24, %v12695_v20  ;;  %v4609_v41 = vrot.slane %v4581_v25, %v12695_v20  ;;  %v4611_v42 = vcombine.high %v4595_v26, %v4595_v26  ;;  %11005 = vst.sshfl [vmem:[%s12703_s26 + $0x2b] sm:$0x1 pattern:$0x73625140] %v4581_v25 }
 0x507   : > { %v5607_v36 = vadd.f32 %v4450_v32, %v12604_v12  ;;  %v4452_v39 = vpop.f32.mrb[53].mxu0  ;;  %v4612_v44 = vcombine.high %v4602_v27, %v4602_v27  ;;  %5479 = vst [vmem:[%s12703_s26 + $0x13] sm:$0x1] %v4610_v31 }
 0x508   : > { %v4535_v45 = vadd.f32 %v13321_v56, %v4452_v39  ;;  %v4628_v10 = vrot.slane %v4614_v34, %v12695_v20  ;;  %v4629_v49 = vcombine.high %v4621_v35, %v4621_v35  ;;  %v4637_v50 = vrot.slane %v4621_v35, %v12695_v20  ;;  %11006 = vst.sshfl [vmem:[%s12703_s26 + $0x43] sm:$0x1 pattern:$0x73625140] %v4621_v35 }
 0x509   : > { %11865 = vtanh.f32 %v5607_v36  ;;  %v4613_v55 = vcombine.high %v4609_v41, %v4609_v41  ;;  %5480 = vst [vmem:[%s12703_s26 + $0x1b] sm:$0x1] %v4612_v44  ;;  %5483 = vst [vmem:[%s12703_s26 + $0x33] sm:$0x1] %v4611_v42  ;;  %v11862_v62 = vpop.eup %11861 }
 0x50a   : > { %v4663_v18 = vcombine.high %v4535_v45, %v4535_v45  ;;  %v4670_v61 = vrot.slane %v4535_v45, %v12695_v20  ;;  %v4630_v1 = vcombine.high %v4628_v10, %v4628_v10  ;;  %v4644_v6 = vrot.slane %v4628_v10, %v12695_v20  ;;  %11007 = vst.sshfl [vmem:[%s12703_s26 + $0x4b] sm:$0x1 pattern:$0x73625140] %v4629_v49 }
 0x50b   : > { %v4651_v4 = vrot.slane %v4629_v49, %v12695_v20  ;;  %v4659_v9 = vcombine.high %v4637_v50, %v4637_v50  ;;  %11008 = vst.sshfl [vmem:[%s12703_s26 + $0x63] sm:$0x1 pattern:$0x73625140] %v4628_v10  ;;  %5484 = vst [vmem:[%s12703_s26 + $0x3b] sm:$0x1] %v4613_v55  ;;  %5702 = vmatmul.mubr.f32.vlgmr.msra.gmra.mrb[64].mxu1 %v11862_v62 }
 0x50c   : > { %v4677_v11 = vrot.slane %v4663_v18, %v12695_v20  ;;  %v4678_v13 = vcombine.high %v4670_v61, %v4670_v61  ;;  %v4686_v16 = vrot.slane %v4670_v61, %v12695_v20  ;;  %11010 = vst.sshfl [vmem:[%s12703_s26 + $0x83] sm:$0x1 pattern:$0x73625140] %v4670_v61  ;;  %v4456_v19 = vpop.f32.mrb[54].mxu0  ;;  %v4658_v5 = vrot.slane %v4630_v1, %v12695_v20 }
 0x50d   : > { %v4660_v24 = vcombine.high %v4644_v6, %v4644_v6  ;;  %v4661_v25 = vcombine.high %v4651_v4, %v4651_v4  ;;  %5487 = vst [vmem:[%s12703_s26 + $0x53] sm:$0x1] %v4659_v9  ;;  %11009 = vst.sshfl [vmem:[%s12703_s26 + $0x6b] sm:$0x1 pattern:$0x73625140] %v4630_v1  ;;  %v5608_v26 = vadd.f32 %v4456_v19, %v12609_v17  ;;  %5707 = vmatprep.mubr.f32.mxu1 %v12223_v2 }
 0x50e   : > { %v4458_v27 = vpop.f32.mrb[55].mxu0  ;;  %v4679_v31 = vcombine.high %v4677_v11, %v4677_v11  ;;  %v4693_v32 = vrot.slane %v4677_v11, %v12695_v20  ;;  %v4700_v34 = vrot.slane %v4678_v13, %v12695_v20  ;;  %v4708_v35 = vcombine.high %v4686_v16, %v4686_v16  ;;  %11011 = vst.sshfl [vmem:[%s12703_s26 + $0x8b] sm:$0x1 pattern:$0x73625140] %v4678_v13 }
 0x50f   : > { %11012 = vst.sshfl [vmem:[%s12703_s26 + $0xa3] sm:$0x1 pattern:$0x73625140] %v4677_v11  ;;  %11576 = vmatpush1.bf16.msra.mxu1 %v12503_v14  ;;  %v11864_v36 = vpop.eup %11863  ;;  %v4662_v39 = vcombine.high %v4658_v5, %v4658_v5  ;;  %5488 = vst [vmem:[%s12703_s26 + $0x5b] sm:$0x1] %v4661_v25  ;;  %11867 = vtanh.f32 %v5608_v26  ;;  %v4536_v41 = vadd.f32 %v13321_v56, %v4458_v27 }
 0x510   : > { %5491 = vst [vmem:[%s12703_s26 + $0x73] sm:$0x1] %v4660_v24  ;;  %11578 = vmatprep.subr.bf16.mxu1 %v12505_v15  ;;  %v4707_v42 = vrot.slane %v4679_v31, %v12695_v20  ;;  %v4709_v44 = vcombine.high %v4693_v32, %v4693_v32  ;;  %v4710_v45 = vcombine.high %v4700_v34, %v4700_v34  ;;  %5495 = vst [vmem:[%s12703_s26 + $0x93] sm:$0x1] %v4708_v35  ;;  %v4462_v10 = vpop.f32.mrb[56].mxu0 }
 0x511   : > { %11013 = vst.sshfl [vmem:[%s12703_s26 + $0xab] sm:$0x1 pattern:$0x73625140] %v4679_v31  ;;  %5708 = vmatmul.mubr.f32.gmra.mrb[66].mxu1 %v11864_v36  ;;  %5492 = vst [vmem:[%s12703_s26 + $0x7b] sm:$0x1] %v4662_v39  ;;  %v4712_v49 = vcombine.high %v4536_v41, %v4536_v41  ;;  %v4719_v50 = vrot.slane %v4536_v41, %v12695_v20  ;;  %v5609_v55 = vadd.f32 %v4462_v10, %v12612_v23 }
 0x512   : > { %v4464_v18 = vpop.f32.mrb[57].mxu0  ;;  %5713 = vmatprep.mubr.f32.mxu1 %v12223_v2  ;;  %v4711_v61 = vcombine.high %v4707_v42, %v4707_v42  ;;  %5496 = vst [vmem:[%s12703_s26 + $0x9b] sm:$0x1] %v4710_v45  ;;  %5499 = vst [vmem:[%s12703_s26 + $0xb3] sm:$0x1] %v4709_v44 }
 0x513   : > { %v4537_v62 = vadd.f32 %v13321_v56, %v4464_v18  ;;  %11580 = vmatpush1.bf16.msra.mxu1 %v12511_v21  ;;  %v11866_v1 = vpop.eup %11865  ;;  %v4726_v6 = vrot.slane %v4712_v49, %v12695_v20  ;;  %v4727_v4 = vcombine.high %v4719_v50, %v4719_v50  ;;  %v4735_v9 = vrot.slane %v4719_v50, %v12695_v20  ;;  %v13650_v49 = vld [vmem:[#allocation10] ss:$0 sm:$0xff] }
 0x514   : > { %11014 = vst.sshfl [vmem:[%s12703_s26 + $0xc3] sm:$0x1 pattern:$0x73625140] %v4719_v50  ;;  %11869 = vtanh.f32 %v5609_v55  ;;  %11582 = vmatprep.subr.bf16.mxu1 %v12516_v22  ;;  %5500 = vst [vmem:[%s12703_s26 + $0xbb] sm:$0x1] %v4711_v61 }
 0x515   : > { %v4761_v11 = vcombine.high %v4537_v62, %v4537_v62  ;;  %v4768_v13 = vrot.slane %v4537_v62, %v12695_v20  ;;  %5714 = vmatmul.mubr.f32.gmra.mrb[68].mxu1 %v11866_v1  ;;  %v4728_v56 = vcombine.high %v4726_v6, %v4726_v6  ;;  %v4742_v16 = vrot.slane %v4726_v6, %v12695_v20 }
 0x516   : > { %v4749_v19 = vrot.slane %v4727_v4, %v12695_v20  ;;  %v4757_v5 = vcombine.high %v4735_v9, %v4735_v9  ;;  %11015 = vst.sshfl [vmem:[%s12703_s26 + $0xcb] sm:$0x1 pattern:$0x73625140] %v4727_v4  ;;  %5719 = vmatprep.mubr.f32.mxu1 %v12223_v2 }
 0x517   : > { %11016 = vst.sshfl [vmem:[%s12703_s26 + $0xe3] sm:$0x1 pattern:$0x73625140] %v4726_v6  ;;  %v4775_v24 = vrot.slane %v4761_v11, %v12695_v20  ;;  %v4776_v25 = vcombine.high %v4768_v13, %v4768_v13  ;;  %v4784_v26 = vrot.slane %v4768_v13, %v12695_v20  ;;  %v4468_v27 = vpop.f32.mrb[58].mxu0  ;;  %11584 = vmatpush1.bf16.msra.mxu1 %v12523_v29 }
 0x518   : > { %11018 = vst.sshfl [vmem:[%s12703_s26 + $0x103] sm:$0x1 pattern:$0x73625140] %v4768_v13  ;;  %v4756_v31 = vrot.slane %v4728_v56, %v12695_v20  ;;  %v4758_v32 = vcombine.high %v4742_v16, %v4742_v16  ;;  %v4759_v34 = vcombine.high %v4749_v19, %v4749_v19  ;;  %5503 = vst [vmem:[%s12703_s26 + $0xd3] sm:$0x1] %v4757_v5  ;;  %11586 = vmatprep.subr.bf16.mxu1 %v12528_v30 }
 0x519   : > { %11017 = vst.sshfl [vmem:[%s12703_s26 + $0xeb] sm:$0x1 pattern:$0x73625140] %v4728_v56  ;;  %v5610_v35 = vadd.f32 %v4468_v27, %v12620_v28  ;;  %v4470_v36 = vpop.f32.mrb[59].mxu0  ;;  %v4777_v39 = vcombine.high %v4775_v24, %v4775_v24  ;;  %v4791_v41 = vrot.slane %v4775_v24, %v12695_v20  ;;  %v4798_v42 = vrot.slane %v4776_v25, %v12695_v20  ;;  %v11868_v45 = vpop.eup %11867 }
 0x51a   : > { %v4806_v44 = vcombine.high %v4784_v26, %v4784_v26  ;;  %11019 = vst.sshfl [vmem:[%s12703_s26 + $0x10b] sm:$0x1 pattern:$0x73625140] %v4776_v25  ;;  %v4760_v10 = vcombine.high %v4756_v31, %v4756_v31  ;;  %5504 = vst [vmem:[%s12703_s26 + $0xdb] sm:$0x1] %v4759_v34  ;;  %v4538_v50 = vadd.f32 %v13650_v49, %v4470_v36  ;;  %5720 = vmatmul.mubr.f32.gmra.mrb[70].mxu1 %v11868_v45 }
 0x51b   : > { %11020 = vst.sshfl [vmem:[%s12703_s26 + $0x123] sm:$0x1 pattern:$0x73625140] %v4775_v24  ;;  %5507 = vst [vmem:[%s12703_s26 + $0xf3] sm:$0x1] %v4758_v32  ;;  %11871 = vtanh.f32 %v5610_v35  ;;  %v4805_v55 = vrot.slane %v4777_v39, %v12695_v20  ;;  %v4807_v18 = vcombine.high %v4791_v41, %v4791_v41  ;;  %v4808_v61 = vcombine.high %v4798_v42, %v4798_v42 }
 0x51c   : > { %5511 = vst [vmem:[%s12703_s26 + $0x113] sm:$0x1] %v4806_v44  ;;  %11021 = vst.sshfl [vmem:[%s12703_s26 + $0x12b] sm:$0x1 pattern:$0x73625140] %v4777_v39  ;;  %v4810_v1 = vcombine.high %v4538_v50, %v4538_v50  ;;  %v4817_v6 = vrot.slane %v4538_v50, %v12695_v20  ;;  %5725 = vmatprep.mubr.f32.mxu1 %v12223_v2  ;;  %11588 = vmatpush1.bf16.msra.mxu1 %v12535_v37 }
 0x51d   : > { %v4474_v62 = vpop.f32.mrb[60].mxu0  ;;  %5508 = vst [vmem:[%s12703_s26 + $0xfb] sm:$0x1] %v4760_v10  ;;  %v4809_v11 = vcombine.high %v4805_v55, %v4805_v55  ;;  %5512 = vst [vmem:[%s12703_s26 + $0x11b] sm:$0x1] %v4808_v61  ;;  %11590 = vmatprep.subr.bf16.mxu1 %v12540_v38 }
 0x51e   : > { %v5611_v4 = vadd.f32 %v4474_v62, %v12626_v33  ;;  %v4476_v9 = vpop.f32.mrb[61].mxu0  ;;  %5515 = vst [vmem:[%s12703_s26 + $0x133] sm:$0x1] %v4807_v18  ;;  %v11870_v56 = vpop.eup %11869  ;;  %v4824_v16 = vrot.slane %v4810_v1, %v12695_v20  ;;  %v4825_v19 = vcombine.high %v4817_v6, %v4817_v6  ;;  %v4833_v5 = vrot.slane %v4817_v6, %v12695_v20 }
 0x51f   : > { %v4539_v13 = vadd.f32 %v13650_v49, %v4476_v9  ;;  %11022 = vst.sshfl [vmem:[%s12703_s26 + $0x143] sm:$0x1 pattern:$0x73625140] %v4817_v6  ;;  %5516 = vst [vmem:[%s12703_s26 + $0x13b] sm:$0x1] %v4809_v11  ;;  %5726 = vmatmul.mubr.f32.gmra.mrb[72].mxu1 %v11870_v56 }
 0x520   : > { %11873 = vtanh.f32 %v5611_v4  ;;  %v4826_v26 = vcombine.high %v4824_v16, %v4824_v16  ;;  %v4840_v27 = vrot.slane %v4824_v16, %v12695_v20  ;;  %v4847_v31 = vrot.slane %v4825_v19, %v12695_v20  ;;  %11023 = vst.sshfl [vmem:[%s12703_s26 + $0x14b] sm:$0x1 pattern:$0x73625140] %v4825_v19  ;;  %5731 = vmatprep.mubr.f32.mxu1 %v12223_v2 }
 0x521   : > { %v4859_v24 = vcombine.high %v4539_v13, %v4539_v13  ;;  %v4866_v25 = vrot.slane %v4539_v13, %v12695_v20  ;;  %v4855_v32 = vcombine.high %v4833_v5, %v4833_v5  ;;  %11024 = vst.sshfl [vmem:[%s12703_s26 + $0x163] sm:$0x1 pattern:$0x73625140] %v4824_v16  ;;  %11592 = vmatpush1.bf16.msra.mxu1 %v12562_v48 }
 0x522   : > { %v4480_v39 = vpop.f32.mrb[62].mxu0  ;;  %v4854_v41 = vrot.slane %v4826_v26, %v12695_v20  ;;  %v4856_v42 = vcombine.high %v4840_v27, %v4840_v27  ;;  %v4857_v44 = vcombine.high %v4847_v31, %v4847_v31  ;;  %11025 = vst.sshfl [vmem:[%s12703_s26 + $0x16b] sm:$0x1 pattern:$0x73625140] %v4826_v26  ;;  %11594 = vmatprep.subr.bf16.mxu1 %v12566_v51 }
 0x523   : > { %v4873_v34 = vrot.slane %v4859_v24, %v12695_v20  ;;  %v4874_v35 = vcombine.high %v4866_v25, %v4866_v25  ;;  %v4882_v36 = vrot.slane %v4866_v25, %v12695_v20  ;;  %11026 = vst.sshfl [vmem:[%s12703_s26 + $0x183] sm:$0x1 pattern:$0x73625140] %v4866_v25  ;;  %5519 = vst [vmem:[%s12703_s26 + $0x153] sm:$0x1] %v4855_v32 }
 0x524   : > { %v5612_v45 = vadd.f32 %v4480_v39, %v12634_v40  ;;  %v4482_v10 = vpop.f32.mrb[63].mxu0  ;;  %v4858_v1 = vcombine.high %v4854_v41, %v4854_v41  ;;  %5520 = vst [vmem:[%s12703_s26 + $0x15b] sm:$0x1] %v4857_v44  ;;  %5523 = vst [vmem:[%s12703_s26 + $0x173] sm:$0x1] %v4856_v42 }
 0x525   : > { %v4875_v50 = vcombine.high %v4873_v34, %v4873_v34  ;;  %v4889_v55 = vrot.slane %v4873_v34, %v12695_v20  ;;  %v4896_v18 = vrot.slane %v4874_v35, %v12695_v20  ;;  %v4904_v61 = vcombine.high %v4882_v36, %v4882_v36  ;;  %11027 = vst.sshfl [vmem:[%s12703_s26 + $0x18b] sm:$0x1 pattern:$0x73625140] %v4874_v35  ;;  %v11872_v62 = vpop.eup %11871 }
 0x526   : > { %11028 = vst.sshfl [vmem:[%s12703_s26 + $0x1a3] sm:$0x1 pattern:$0x73625140] %v4873_v34  ;;  %11875 = vtanh.f32 %v5612_v45  ;;  %v4540_v6 = vadd.f32 %v13650_v49, %v4482_v10  ;;  %5732 = vmatmul.mubr.f32.gmra.mrb[74].mxu1 %v11872_v62  ;;  %5524 = vst [vmem:[%s12703_s26 + $0x17b] sm:$0x1] %v4858_v1 }
 0x527   : > { %v4903_v4 = vrot.slane %v4875_v50, %v12695_v20  ;;  %v4905_v9 = vcombine.high %v4889_v55, %v4889_v55  ;;  %v4906_v11 = vcombine.high %v4896_v18, %v4896_v18  ;;  %5527 = vst [vmem:[%s12703_s26 + $0x193] sm:$0x1] %v4904_v61  ;;  %11029 = vst.sshfl [vmem:[%s12703_s26 + $0x1ab] sm:$0x1 pattern:$0x73625140] %v4875_v50  ;;  %5737 = vmatprep.mubr.f32.mxu1 %v12223_v2 }
 0x528   : > { %v4908_v56 = vcombine.high %v4540_v6, %v4540_v6  ;;  %v4915_v16 = vrot.slane %v4540_v6, %v12695_v20  ;;  %11596 = vmatpush1.bf16.msra.mxu1 %v12568_v54 }
 0x529   : > { %v4486_v13 = vpop.f32.mrb[64].mxu0  ;;  %v4907_v24 = vcombine.high %v4903_v4, %v4903_v4  ;;  %5528 = vst [vmem:[%s12703_s26 + $0x19b] sm:$0x1] %v4906_v11  ;;  %5531 = vst [vmem:[%s12703_s26 + $0x1b3] sm:$0x1] %v4905_v9  ;;  %11598 = vmatprep.subr.bf16.mxu1 %v12574_v57 }
 0x52a   : > { %v5613_v19 = vadd.f32 %v4486_v13, %v12640_v43  ;;  %v4488_v5 = vpop.f32.mrb[65].mxu0  ;;  %v11874_v26 = vpop.eup %11873  ;;  %v4922_v27 = vrot.slane %v4908_v56, %v12695_v20  ;;  %v4923_v31 = vcombine.high %v4915_v16, %v4915_v16  ;;  %v4931_v32 = vrot.slane %v4915_v16, %v12695_v20  ;;  %11030 = vst.sshfl [vmem:[%s12703_s26 + $0x1c3] sm:$0x1 pattern:$0x73625140] %v4915_v16 }
 0x52b   : > { %v4541_v25 = vadd.f32 %v13650_v49, %v4488_v5  ;;  %5532 = vst [vmem:[%s12703_s26 + $0x1bb] sm:$0x1] %v4907_v24  ;;  %5738 = vmatmul.mubr.f32.gmra.mrb[76].mxu1 %v11874_v26 }
 0x52c   : > { %11877 = vtanh.f32 %v5613_v19  ;;  %v4924_v39 = vcombine.high %v4922_v27, %v4922_v27  ;;  %v4938_v41 = vrot.slane %v4922_v27, %v12695_v20  ;;  %v4945_v42 = vrot.slane %v4923_v31, %v12695_v20  ;;  %11031 = vst.sshfl [vmem:[%s12703_s26 + $0x1cb] sm:$0x1 pattern:$0x73625140] %v4923_v31  ;;  %5743 = vmatprep.mubr.f32.mxu1 %v12223_v2 }
 0x52d   : > { %v4957_v34 = vcombine.high %v4541_v25, %v4541_v25  ;;  %v4964_v35 = vrot.slane %v4541_v25, %v12695_v20  ;;  %v4492_v36 = vpop.f32.mrb[66].mxu0  ;;  %v4953_v44 = vcombine.high %v4931_v32, %v4931_v32  ;;  %11032 = vst.sshfl [vmem:[%s12703_s26 + $0x1e3] sm:$0x1 pattern:$0x73625140] %v4922_v27  ;;  %11600 = vmatpush1.bf16.msra.mxu1 %v12576_v60 }
 0x52e   : > { %v4494_v45 = vpop.f32.mrb[67].mxu0  ;;  %v5614_v18 = vadd.f32 %v4492_v36, %v12648_v46  ;;  %v4952_v61 = vrot.slane %v4924_v39, %v12695_v20  ;;  %v4954_v62 = vcombine.high %v4938_v41, %v4938_v41  ;;  %v4955_v1 = vcombine.high %v4945_v42, %v4945_v42  ;;  %11033 = vst.sshfl [vmem:[%s12703_s26 + $0x1eb] sm:$0x1 pattern:$0x73625140] %v4924_v39 }
 0x52f   : > { %v4971_v10 = vrot.slane %v4957_v34, %v12695_v20  ;;  %v4972_v50 = vcombine.high %v4964_v35, %v4964_v35  ;;  %v4980_v55 = vrot.slane %v4964_v35, %v12695_v20  ;;  %11034 = vst.sshfl [vmem:[%s12703_s26 + $0x203] sm:$0x1 pattern:$0x73625140] %v4964_v35  ;;  %5535 = vst [vmem:[%s12703_s26 + $0x1d3] sm:$0x1] %v4953_v44  ;;  %11602 = vmatprep.subr.bf16.mxu1 %v12579_v0 }
 0x530   : > { %v4542_v6 = vadd.f32 %v13650_v49, %v4494_v45  ;;  %v11876_v16 = vpop.eup %11875  ;;  %v4956_v19 = vcombine.high %v4952_v61, %v4952_v61  ;;  %5536 = vst [vmem:[%s12703_s26 + $0x1db] sm:$0x1] %v4955_v1  ;;  %5539 = vst [vmem:[%s12703_s26 + $0x1f3] sm:$0x1] %v4954_v62  ;;  %11879 = vtanh.f32 %v5614_v18 }
 0x531   : > { %v4973_v4 = vcombine.high %v4971_v10, %v4971_v10  ;;  %v4987_v9 = vrot.slane %v4971_v10, %v12695_v20  ;;  %v4994_v11 = vrot.slane %v4972_v50, %v12695_v20  ;;  %v5002_v13 = vcombine.high %v4980_v55, %v4980_v55  ;;  %11035 = vst.sshfl [vmem:[%s12703_s26 + $0x20b] sm:$0x1 pattern:$0x73625140] %v4972_v50  ;;  %v4498_v56 = vpop.f32.mrb[68].mxu0 }
 0x532   : > { %11036 = vst.sshfl [vmem:[%s12703_s26 + $0x223] sm:$0x1 pattern:$0x73625140] %v4971_v10  ;;  %v5006_v5 = vcombine.high %v4542_v6, %v4542_v6  ;;  %v5013_v24 = vrot.slane %v4542_v6, %v12695_v20  ;;  %v4500_v25 = vpop.f32.mrb[69].mxu0  ;;  %v5615_v32 = vadd.f32 %v4498_v56, %v12654_v47  ;;  %5744 = vmatmul.mubr.f32.gmra.mrb[78].mxu1 %v11876_v16 }
 0x533   : > { %v5001_v26 = vrot.slane %v4973_v4, %v12695_v20  ;;  %v5003_v27 = vcombine.high %v4987_v9, %v4987_v9  ;;  %v5004_v31 = vcombine.high %v4994_v11, %v4994_v11  ;;  %5543 = vst [vmem:[%s12703_s26 + $0x213] sm:$0x1] %v5002_v13  ;;  %11037 = vst.sshfl [vmem:[%s12703_s26 + $0x22b] sm:$0x1 pattern:$0x73625140] %v4973_v4  ;;  %5749 = vmatprep.mubr.f32.mxu1 %v12223_v2 }
 0x534   : > { %5540 = vst [vmem:[%s12703_s26 + $0x1fb] sm:$0x1] %v4956_v19  ;;  %v5020_v34 = vrot.slane %v5006_v5, %v12695_v20  ;;  %v5021_v35 = vcombine.high %v5013_v24, %v5013_v24  ;;  %v5029_v36 = vrot.slane %v5013_v24, %v12695_v20  ;;  %11038 = vst.sshfl [vmem:[%s12703_s26 + $0x243] sm:$0x1 pattern:$0x73625140] %v5013_v24  ;;  %11881 = vtanh.f32 %v5615_v32 }
 0x535   : > { %v4543_v39 = vadd.f32 %v13650_v49, %v4500_v25  ;;  %v5005_v41 = vcombine.high %v5001_v26, %v5001_v26  ;;  %5544 = vst [vmem:[%s12703_s26 + $0x21b] sm:$0x1] %v5004_v31  ;;  %5547 = vst [vmem:[%s12703_s26 + $0x233] sm:$0x1] %v5003_v27  ;;  %v4504_v42 = vpop.f32.mrb[70].mxu0  ;;  %11604 = vmatpush1.bf16.msra.mxu1 %v12583_v3 }
 0x536   : > { %v11878_v44 = vpop.eup %11877  ;;  %v5022_v45 = vcombine.high %v5020_v34, %v5020_v34  ;;  %v5036_v10 = vrot.slane %v5020_v34, %v12695_v20  ;;  %v5043_v50 = vrot.slane %v5021_v35, %v12695_v20  ;;  %v5051_v55 = vcombine.high %v5029_v36, %v5029_v36  ;;  %11039 = vst.sshfl [vmem:[%s12703_s26 + $0x24b] sm:$0x1 pattern:$0x73625140] %v5021_v35  ;;  %v4506_v18 = vpop.f32.mrb[71].mxu0 }
 0x537   : > { %11040 = vst.sshfl [vmem:[%s12703_s26 + $0x263] sm:$0x1 pattern:$0x73625140] %v5020_v34  ;;  %5548 = vst [vmem:[%s12703_s26 + $0x23b] sm:$0x1] %v5005_v41  ;;  %v5055_v61 = vcombine.high %v4543_v39, %v4543_v39  ;;  %v5062_v62 = vrot.slane %v4543_v39, %v12695_v20  ;;  %v5616_v1 = vadd.f32 %v4504_v42, %v12662_v52  ;;  %5750 = vmatmul.mubr.f32.gmra.mrb[80].mxu1 %v11878_v44 }
 0x538   : > { %v4544_v6 = vadd.f32 %v13650_v49, %v4506_v18  ;;  %v5050_v4 = vrot.slane %v5022_v45, %v12695_v20  ;;  %v5052_v9 = vcombine.high %v5036_v10, %v5036_v10  ;;  %v5053_v11 = vcombine.high %v5043_v50, %v5043_v50  ;;  %5551 = vst [vmem:[%s12703_s26 + $0x253] sm:$0x1] %v5051_v55 }
 0x539   : > { %11041 = vst.sshfl [vmem:[%s12703_s26 + $0x26b] sm:$0x1 pattern:$0x73625140] %v5022_v45  ;;  %5755 = vmatprep.mubr.f32.mxu1 %v12223_v2  ;;  %v5069_v13 = vrot.slane %v5055_v61, %v12695_v20  ;;  %v5070_v56 = vcombine.high %v5062_v62, %v5062_v62  ;;  %v5078_v16 = vrot.slane %v5062_v62, %v12695_v20  ;;  %11883 = vtanh.f32 %v5616_v1  ;;  %v4510_v19 = vpop.f32.mrb[72].mxu0 }
 0x53a   : > { %11042 = vst.sshfl [vmem:[%s12703_s26 + $0x283] sm:$0x1 pattern:$0x73625140] %v5062_v62  ;;  %v5054_v5 = vcombine.high %v5050_v4, %v5050_v4  ;;  %5552 = vst [vmem:[%s12703_s26 + $0x25b] sm:$0x1] %v5053_v11  ;;  %v5104_v24 = vcombine.high %v4544_v6, %v4544_v6  ;;  %v5111_v25 = vrot.slane %v4544_v6, %v12695_v20  ;;  %v11880_v36 = vpop.eup %11879 }
 0x53b   : > { %5555 = vst [vmem:[%s12703_s26 + $0x273] sm:$0x1] %v5052_v9  ;;  %v5617_v26 = vadd.f32 %v4510_v19, %v12668_v53  ;;  %v4512_v27 = vpop.f32.mrb[73].mxu0  ;;  %v5071_v31 = vcombine.high %v5069_v13, %v5069_v13  ;;  %v5085_v32 = vrot.slane %v5069_v13, %v12695_v20  ;;  %v5092_v34 = vrot.slane %v5070_v56, %v12695_v20 }
 0x53c   : > { %v5100_v35 = vcombine.high %v5078_v16, %v5078_v16  ;;  %11043 = vst.sshfl [vmem:[%s12703_s26 + $0x28b] sm:$0x1 pattern:$0x73625140] %v5070_v56  ;;  %5556 = vst [vmem:[%s12703_s26 + $0x27b] sm:$0x1] %v5054_v5  ;;  %v5118_v39 = vrot.slane %v5104_v24, %v12695_v20  ;;  %v5119_v41 = vcombine.high %v5111_v25, %v5111_v25  ;;  %5756 = vmatmul.mubr.f32.gmra.mrb[82].mxu1 %v11880_v36 }
 0x53d   : > { %11044 = vst.sshfl [vmem:[%s12703_s26 + $0x2a3] sm:$0x1 pattern:$0x73625140] %v5069_v13  ;;  %v5127_v42 = vrot.slane %v5111_v25, %v12695_v20  ;;  %11885 = vtanh.f32 %v5617_v26  ;;  %v5099_v44 = vrot.slane %v5071_v31, %v12695_v20  ;;  %v5101_v45 = vcombine.high %v5085_v32, %v5085_v32  ;;  %v4516_v55 = vpop.f32.mrb[74].mxu0  ;;  %5761 = vmatprep.mubr.f32.mxu1 %v12223_v2 }
 0x53e   : > { %11046 = vst.sshfl [vmem:[%s12703_s26 + $0x2c3] sm:$0x1 pattern:$0x73625140] %v5111_v25  ;;  %v5102_v10 = vcombine.high %v5092_v34, %v5092_v34  ;;  %5559 = vst [vmem:[%s12703_s26 + $0x293] sm:$0x1] %v5100_v35  ;;  %v4545_v50 = vadd.f32 %v13650_v49, %v4512_v27  ;;  %v5120_v18 = vcombine.high %v5118_v39, %v5118_v39  ;;  %v11882_v4 = vpop.eup %11881 }
 0x53f   : > { %11045 = vst.sshfl [vmem:[%s12703_s26 + $0x2ab] sm:$0x1 pattern:$0x73625140] %v5071_v31  ;;  %v5134_v61 = vrot.slane %v5118_v39, %v12695_v20  ;;  %v5141_v62 = vrot.slane %v5119_v41, %v12695_v20  ;;  %v5149_v1 = vcombine.high %v5127_v42, %v5127_v42  ;;  %v4518_v6 = vpop.f32.mrb[75].mxu0  ;;  %v5103_v9 = vcombine.high %v5099_v44, %v5099_v44 }
 0x540   : > { %11047 = vst.sshfl [vmem:[%s12703_s26 + $0x2cb] sm:$0x1 pattern:$0x73625140] %v5119_v41  ;;  %5560 = vst [vmem:[%s12703_s26 + $0x29b] sm:$0x1] %v5102_v10  ;;  %v5153_v11 = vcombine.high %v4545_v50, %v4545_v50  ;;  %v5160_v13 = vrot.slane %v4545_v50, %v12695_v20  ;;  %v5618_v56 = vadd.f32 %v4516_v55, %v12674_v58  ;;  %5762 = vmatmul.mubr.f32.gmra.mrb[84].mxu1 %v11882_v4 }
 0x541   : > { %11048 = vst.sshfl [vmem:[%s12703_s26 + $0x2e3] sm:$0x1 pattern:$0x73625140] %v5118_v39  ;;  %5563 = vst [vmem:[%s12703_s26 + $0x2b3] sm:$0x1] %v5101_v45  ;;  %v5148_v16 = vrot.slane %v5120_v18, %v12695_v20  ;;  %v5150_v19 = vcombine.high %v5134_v61, %v5134_v61  ;;  %v5151_v5 = vcombine.high %v5141_v62, %v5141_v62  ;;  %5767 = vmatprep.mubr.f32.mxu1 %v12223_v2 }
 0x542   : > { %5567 = vst [vmem:[%s12703_s26 + $0x2d3] sm:$0x1] %v5149_v1  ;;  %11049 = vst.sshfl [vmem:[%s12703_s26 + $0x2eb] sm:$0x1 pattern:$0x73625140] %v5120_v18  ;;  %v4546_v24 = vadd.f32 %v13650_v49, %v4518_v6  ;;  %v5167_v25 = vrot.slane %v5153_v11, %v12695_v20  ;;  %v5168_v26 = vcombine.high %v5160_v13, %v5160_v13  ;;  %11887 = vtanh.f32 %v5618_v56 }
 0x543   : > { %5564 = vst [vmem:[%s12703_s26 + $0x2bb] sm:$0x1] %v5103_v9  ;;  %v5176_v27 = vrot.slane %v5160_v13, %v12695_v20  ;;  %11050 = vst.sshfl [vmem:[%s12703_s26 + $0x303] sm:$0x1 pattern:$0x73625140] %v5160_v13  ;;  %v5152_v32 = vcombine.high %v5148_v16, %v5148_v16  ;;  %v11884_v41 = vpop.eup %11883 }
 0x544   : > { %v4522_v31 = vpop.f32.mrb[76].mxu0  ;;  %5568 = vst [vmem:[%s12703_s26 + $0x2db] sm:$0x1] %v5151_v5  ;;  %5571 = vst [vmem:[%s12703_s26 + $0x2f3] sm:$0x1] %v5150_v19  ;;  %v5202_v34 = vcombine.high %v4546_v24, %v4546_v24  ;;  %v5209_v35 = vrot.slane %v4546_v24, %v12695_v20  ;;  %v5169_v42 = vcombine.high %v5167_v25, %v5167_v25  ;;  %5768 = vmatmul.mubr.f32.gmra.mrb[86].mxu1 %v11884_v41 }
 0x545   : > { %v5619_v36 = vadd.f32 %v4522_v31, %v12678_v59  ;;  %v4524_v39 = vpop.f32.mrb[77].mxu0  ;;  %v5183_v44 = vrot.slane %v5167_v25, %v12695_v20  ;;  %v5190_v45 = vrot.slane %v5168_v26, %v12695_v20  ;;  %v5198_v10 = vcombine.high %v5176_v27, %v5176_v27  ;;  %11051 = vst.sshfl [vmem:[%s12703_s26 + $0x30b] sm:$0x1 pattern:$0x73625140] %v5168_v26 }
 0x546   : > { %11052 = vst.sshfl [vmem:[%s12703_s26 + $0x323] sm:$0x1 pattern:$0x73625140] %v5167_v25  ;;  %5572 = vst [vmem:[%s12703_s26 + $0x2fb] sm:$0x1] %v5152_v32  ;;  %v5216_v50 = vrot.slane %v5202_v34, %v12695_v20  ;;  %v5217_v55 = vcombine.high %v5209_v35, %v5209_v35  ;;  %v5225_v18 = vrot.slane %v5209_v35, %v12695_v20  ;;  %5773 = vmatprep.mubr.f32.mxu1 %v12223_v2 }
 0x547   : > { %11054 = vst.sshfl [vmem:[%s12703_s26 + $0x343] sm:$0x1 pattern:$0x73625140] %v5209_v35  ;;  %11889 = vtanh.f32 %v5619_v36  ;;  %v5197_v61 = vrot.slane %v5169_v42, %v12695_v20  ;;  %v5199_v62 = vcombine.high %v5183_v44, %v5183_v44  ;;  %v5200_v1 = vcombine.high %v5190_v45, %v5190_v45  ;;  %5575 = vst [vmem:[%s12703_s26 + $0x313] sm:$0x1] %v5198_v10  ;;  %v11886_v9 = vpop.eup %11885 }
 0x548   : > { %11053 = vst.sshfl [vmem:[%s12703_s26 + $0x32b] sm:$0x1 pattern:$0x73625140] %v5169_v42  ;;  %v4547_v6 = vadd.f32 %v13650_v49, %v4524_v39  ;;  %v4528_v4 = vpop.f32.mrb[78].mxu0  ;;  %v5218_v11 = vcombine.high %v5216_v50, %v5216_v50  ;;  %v5232_v13 = vrot.slane %v5216_v50, %v12695_v20  ;;  %v5239_v56 = vrot.slane %v5217_v55, %v12695_v20 }
 0x549   : > { %v5247_v16 = vcombine.high %v5225_v18, %v5225_v18  ;;  %11055 = vst.sshfl [vmem:[%s12703_s26 + $0x34b] sm:$0x1 pattern:$0x73625140] %v5217_v55  ;;  %v4530_v19 = vpop.f32.mrb[79].mxu0  ;;  %v5201_v5 = vcombine.high %v5197_v61, %v5197_v61  ;;  %v5620_v26 = vadd.f32 %v4528_v4, %v12684_v63  ;;  %5774 = vmatmul.mubr.f32.gmra.mrb[88].mxu1 %v11886_v9 }
 0x54a   : > { %11056 = vst.sshfl [vmem:[%s12703_s26 + $0x363] sm:$0x1 pattern:$0x73625140] %v5216_v50  ;;  %5576 = vst [vmem:[%s12703_s26 + $0x31b] sm:$0x1] %v5200_v1  ;;  %v5251_v24 = vcombine.high %v4547_v6, %v4547_v6  ;;  %v5258_v25 = vrot.slane %v4547_v6, %v12695_v20  ;;  %v5246_v27 = vrot.slane %v5218_v11, %v12695_v20  ;;  %5779 = vmatprep.mubr.f32.mxu1 %v12223_v2 }
 0x54b   : > { %5579 = vst [vmem:[%s12703_s26 + $0x333] sm:$0x1] %v5199_v62  ;;  %v5248_v31 = vcombine.high %v5232_v13, %v5232_v13  ;;  %v5249_v32 = vcombine.high %v5239_v56, %v5239_v56  ;;  %5583 = vst [vmem:[%s12703_s26 + $0x353] sm:$0x1] %v5247_v16  ;;  %v4548_v34 = vadd.f32 %v13650_v49, %v4530_v19  ;;  %11891 = vtanh.f32 %v5620_v26 }
 0x54c   : > { %11057 = vst.sshfl [vmem:[%s12703_s26 + $0x36b] sm:$0x1 pattern:$0x73625140] %v5218_v11  ;;  %5580 = vst [vmem:[%s12703_s26 + $0x33b] sm:$0x1] %v5201_v5  ;;  %v5265_v35 = vrot.slane %v5251_v24, %v12695_v20  ;;  %v5266_v36 = vcombine.high %v5258_v25, %v5258_v25  ;;  %v5274_v39 = vrot.slane %v5258_v25, %v12695_v20  ;;  %v11888_v45 = vpop.eup %11887 }
 0x54d   : > { %11058 = vst.sshfl [vmem:[%s12703_s26 + $0x383] sm:$0x1 pattern:$0x73625140] %v5258_v25  ;;  %v5250_v41 = vcombine.high %v5246_v27, %v5246_v27  ;;  %5584 = vst [vmem:[%s12703_s26 + $0x35b] sm:$0x1] %v5249_v32  ;;  %v5300_v42 = vcombine.high %v4548_v34, %v4548_v34  ;;  %v5307_v44 = vrot.slane %v4548_v34, %v12695_v20  ;;  %5780 = vmatmul.mubr.f32.gmra.mrb[90].mxu1 %v11888_v45 }
 0x54e   : > { %5587 = vst [vmem:[%s12703_s26 + $0x373] sm:$0x1] %v5248_v31  ;;  %v5267_v10 = vcombine.high %v5265_v35, %v5265_v35  ;;  %v5281_v50 = vrot.slane %v5265_v35, %v12695_v20  ;;  %v5288_v55 = vrot.slane %v5266_v36, %v12695_v20  ;;  %v5296_v18 = vcombine.high %v5274_v39, %v5274_v39 }
 0x54f   : > { %11059 = vst.sshfl [vmem:[%s12703_s26 + $0x38b] sm:$0x1 pattern:$0x73625140] %v5266_v36  ;;  %5588 = vst [vmem:[%s12703_s26 + $0x37b] sm:$0x1] %v5250_v41  ;;  %v5314_v61 = vrot.slane %v5300_v42, %v12695_v20  ;;  %v5315_v62 = vcombine.high %v5307_v44, %v5307_v44  ;;  %v5323_v1 = vrot.slane %v5307_v44, %v12695_v20  ;;  %5785 = vmatprep.mubr.f32.mxu1 %v12223_v2 }
 0x550   : > { %11060 = vst.sshfl [vmem:[%s12703_s26 + $0x3a3] sm:$0x1 pattern:$0x73625140] %v5265_v35  ;;  %v5295_v6 = vrot.slane %v5267_v10, %v12695_v20  ;;  %v5297_v4 = vcombine.high %v5281_v50, %v5281_v50  ;;  %v5298_v9 = vcombine.high %v5288_v55, %v5288_v55  ;;  %5591 = vst [vmem:[%s12703_s26 + $0x393] sm:$0x1] %v5296_v18 }
 0x551   : > { %11062 = vst.sshfl [vmem:[%s12703_s26 + $0x3c3] sm:$0x1 pattern:$0x73625140] %v5307_v44  ;;  %v11890_v11 = vpop.eup %11889  ;;  %v5316_v13 = vcombine.high %v5314_v61, %v5314_v61  ;;  %v5330_v56 = vrot.slane %v5314_v61, %v12695_v20  ;;  %v5337_v16 = vrot.slane %v5315_v62, %v12695_v20  ;;  %v5345_v19 = vcombine.high %v5323_v1, %v5323_v1 }
 0x552   : > { %11061 = vst.sshfl [vmem:[%s12703_s26 + $0x3ab] sm:$0x1 pattern:$0x73625140] %v5267_v10  ;;  %v5299_v5 = vcombine.high %v5295_v6, %v5295_v6  ;;  %5592 = vst [vmem:[%s12703_s26 + $0x39b] sm:$0x1] %v5298_v9  ;;  %5786 = vmatmul.mubr.f32.gmra.mrb[92].mxu1 %v11890_v11 }
 0x553   : > { %11063 = vst.sshfl [vmem:[%s12703_s26 + $0x3cb] sm:$0x1 pattern:$0x73625140] %v5315_v62  ;;  %5595 = vst [vmem:[%s12703_s26 + $0x3b3] sm:$0x1] %v5297_v4  ;;  %v5344_v24 = vrot.slane %v5316_v13, %v12695_v20  ;;  %v5346_v25 = vcombine.high %v5330_v56, %v5330_v56  ;;  %v5347_v26 = vcombine.high %v5337_v16, %v5337_v16  ;;  %5791 = vmatprep.mubr.f32.mxu1 %v12223_v2 }
 0x554   : > { %11064 = vst.sshfl [vmem:[%s12703_s26 + $0x3e3] sm:$0x1 pattern:$0x73625140] %v5314_v61  ;;  %5599 = vst [vmem:[%s12703_s26 + $0x3d3] sm:$0x1] %v5345_v19 }
 0x555   : > { %11065 = vst.sshfl [vmem:[%s12703_s26 + $0x3eb] sm:$0x1 pattern:$0x73625140] %v5316_v13  ;;  %5596 = vst [vmem:[%s12703_s26 + $0x3bb] sm:$0x1] %v5299_v5  ;;  %v5348_v27 = vcombine.high %v5344_v24, %v5344_v24  ;;  %v11892_v31 = vpop.eup %11891 }
 0x556   : > { %5600 = vst [vmem:[%s12703_s26 + $0x3db] sm:$0x1] %v5347_v26  ;;  %5603 = vst [vmem:[%s12703_s26 + $0x3f3] sm:$0x1] %v5346_v25  ;;  %5792 = vmatmul.mubr.f32.gmra.mrb[94].mxu1 %v11892_v31 }
 0x557   : > { %5604 = vst [vmem:[%s12703_s26 + $0x3fb] sm:$0x1] %v5348_v27  ;;  %8231 = vmatprep.mubr.f32.mxu1 %v12223_v2 }
 0x5de   : > { %v5703_v32 = vpop.f32.mrb[64].mxu1 }
 0x5df   : > { %v6870_v34 = vadd.f32 %v5703_v32, %v12597_v7  ;;  %v5705_v35 = vpop.f32.mrb[65].mxu1 }
 0x5e0   : > { %v5798_v36 = vadd.f32 %v13650_v49, %v5705_v35 }
 0x5e1   : > { %11893 = vtanh.f32 %v6870_v34 }
 0x5e2   : > { %v5830_v39 = vcombine.high %v5798_v36, %v5798_v36  ;;  %v5837_v41 = vrot.slane %v5798_v36, %v12695_v20 }
 0x5e4   : > { %v5709_v42 = vpop.f32.mrb[66].mxu1  ;;  %v5844_v10 = vrot.slane %v5830_v39, %v12695_v20  ;;  %v5845_v50 = vcombine.high %v5837_v41, %v5837_v41  ;;  %v5853_v55 = vrot.slane %v5837_v41, %v12695_v20  ;;  %11066 = vst.sshfl [vmem:[%s12703_s26 + $0x4] sm:$0x1 pattern:$0x73625140] %v5837_v41 }
 0x5e5   : > { %v6871_v44 = vadd.f32 %v5709_v42, %v12600_v8  ;;  %v5711_v45 = vpop.f32.mrb[67].mxu1 }
 0x5e6   : > { %v5799_v18 = vadd.f32 %v13650_v49, %v5711_v45  ;;  %v5846_v61 = vcombine.high %v5844_v10, %v5844_v10  ;;  %v5860_v62 = vrot.slane %v5844_v10, %v12695_v20  ;;  %v5867_v1 = vrot.slane %v5845_v50, %v12695_v20  ;;  %11067 = vst.sshfl [vmem:[%s12703_s26 + $0xc] sm:$0x1 pattern:$0x73625140] %v5845_v50 }
 0x5e7   : > { %11895 = vtanh.f32 %v6871_v44  ;;  %v5875_v6 = vcombine.high %v5853_v55, %v5853_v55  ;;  %11068 = vst.sshfl [vmem:[%s12703_s26 + $0x24] sm:$0x1 pattern:$0x73625140] %v5844_v10 }
 0x5e8   : > { %v5715_v4 = vpop.f32.mrb[68].mxu1  ;;  %v5879_v9 = vcombine.high %v5799_v18, %v5799_v18  ;;  %v5886_v11 = vrot.slane %v5799_v18, %v12695_v20  ;;  %v5874_v16 = vrot.slane %v5846_v61, %v12695_v20  ;;  %v5876_v19 = vcombine.high %v5860_v62, %v5860_v62  ;;  %11069 = vst.sshfl [vmem:[%s12703_s26 + $0x2c] sm:$0x1 pattern:$0x73625140] %v5846_v61 }
 0x5e9   : > { %v6872_v13 = vadd.f32 %v5715_v4, %v12604_v12  ;;  %v5717_v56 = vpop.f32.mrb[69].mxu1  ;;  %v5877_v5 = vcombine.high %v5867_v1, %v5867_v1  ;;  %6744 = vst [vmem:[%s12703_s26 + $0x14] sm:$0x1] %v5875_v6 }
 0x5ea   : > { %v5800_v24 = vadd.f32 %v13650_v49, %v5717_v56  ;;  %v5893_v25 = vrot.slane %v5879_v9, %v12695_v20  ;;  %v5894_v26 = vcombine.high %v5886_v11, %v5886_v11  ;;  %v5902_v27 = vrot.slane %v5886_v11, %v12695_v20  ;;  %11070 = vst.sshfl [vmem:[%s12703_s26 + $0x44] sm:$0x1 pattern:$0x73625140] %v5886_v11 }
 0x5eb   : > { %11897 = vtanh.f32 %v6872_v13  ;;  %v5878_v31 = vcombine.high %v5874_v16, %v5874_v16  ;;  %6745 = vst [vmem:[%s12703_s26 + $0x1c] sm:$0x1] %v5877_v5  ;;  %6748 = vst [vmem:[%s12703_s26 + $0x34] sm:$0x1] %v5876_v19  ;;  %v11894_v35 = vpop.eup %11893 }
 0x5ec   : > { %v5928_v32 = vcombine.high %v5800_v24, %v5800_v24  ;;  %v5935_v34 = vrot.slane %v5800_v24, %v12695_v20  ;;  %v5895_v36 = vcombine.high %v5893_v25, %v5893_v25  ;;  %v5909_v39 = vrot.slane %v5893_v25, %v12695_v20  ;;  %11071 = vst.sshfl [vmem:[%s12703_s26 + $0x4c] sm:$0x1 pattern:$0x73625140] %v5894_v26 }
 0x5ed   : > { %v5916_v41 = vrot.slane %v5894_v26, %v12695_v20  ;;  %v5924_v42 = vcombine.high %v5902_v27, %v5902_v27  ;;  %11072 = vst.sshfl [vmem:[%s12703_s26 + $0x64] sm:$0x1 pattern:$0x73625140] %v5893_v25  ;;  %6749 = vst [vmem:[%s12703_s26 + $0x3c] sm:$0x1] %v5878_v31  ;;  %6967 = vmatmul.mubr.f32.vlgmr.msra.gmra.mrb[80].mxu0 %v11894_v35 }
 0x5ee   : > { %v5942_v44 = vrot.slane %v5928_v32, %v12695_v20  ;;  %v5943_v45 = vcombine.high %v5935_v34, %v5935_v34  ;;  %v5951_v10 = vrot.slane %v5935_v34, %v12695_v20  ;;  %11074 = vst.sshfl [vmem:[%s12703_s26 + $0x84] sm:$0x1 pattern:$0x73625140] %v5935_v34  ;;  %v5721_v50 = vpop.f32.mrb[70].mxu1  ;;  %v5923_v55 = vrot.slane %v5895_v36, %v12695_v20 }
 0x5ef   : > { %v5925_v18 = vcombine.high %v5909_v39, %v5909_v39  ;;  %v5926_v61 = vcombine.high %v5916_v41, %v5916_v41  ;;  %6752 = vst [vmem:[%s12703_s26 + $0x54] sm:$0x1] %v5924_v42  ;;  %11073 = vst.sshfl [vmem:[%s12703_s26 + $0x6c] sm:$0x1 pattern:$0x73625140] %v5895_v36  ;;  %v6873_v62 = vadd.f32 %v5721_v50, %v12609_v17  ;;  %6972 = vmatprep.mubr.f32.mxu0 %v12223_v2 }
 0x5f0   : > { %v5723_v1 = vpop.f32.mrb[71].mxu1  ;;  %v5944_v6 = vcombine.high %v5942_v44, %v5942_v44  ;;  %v5958_v4 = vrot.slane %v5942_v44, %v12695_v20  ;;  %v5965_v9 = vrot.slane %v5943_v45, %v12695_v20  ;;  %v5973_v11 = vcombine.high %v5951_v10, %v5951_v10  ;;  %11075 = vst.sshfl [vmem:[%s12703_s26 + $0x8c] sm:$0x1 pattern:$0x73625140] %v5943_v45 }
 0x5f1   : > { %11076 = vst.sshfl [vmem:[%s12703_s26 + $0xa4] sm:$0x1 pattern:$0x73625140] %v5942_v44  ;;  %11608 = vmatpush1.bf16.msra.mxu0 %v12503_v14  ;;  %v11896_v13 = vpop.eup %11895  ;;  %v5927_v56 = vcombine.high %v5923_v55, %v5923_v55  ;;  %6753 = vst [vmem:[%s12703_s26 + $0x5c] sm:$0x1] %v5926_v61  ;;  %11899 = vtanh.f32 %v6873_v62  ;;  %v5801_v16 = vadd.f32 %v13650_v49, %v5723_v1 }
 0x5f2   : > { %6756 = vst [vmem:[%s12703_s26 + $0x74] sm:$0x1] %v5925_v18  ;;  %11610 = vmatprep.subr.bf16.mxu0 %v12505_v15  ;;  %v5972_v19 = vrot.slane %v5944_v6, %v12695_v20  ;;  %v5974_v5 = vcombine.high %v5958_v4, %v5958_v4  ;;  %v5975_v24 = vcombine.high %v5965_v9, %v5965_v9  ;;  %6760 = vst [vmem:[%s12703_s26 + $0x94] sm:$0x1] %v5973_v11  ;;  %v5727_v25 = vpop.f32.mrb[72].mxu1 }
 0x5f3   : > { %11077 = vst.sshfl [vmem:[%s12703_s26 + $0xac] sm:$0x1 pattern:$0x73625140] %v5944_v6  ;;  %6973 = vmatmul.mubr.f32.gmra.mrb[82].mxu0 %v11896_v13  ;;  %6757 = vst [vmem:[%s12703_s26 + $0x7c] sm:$0x1] %v5927_v56  ;;  %v5977_v14 = vcombine.high %v5801_v16, %v5801_v16  ;;  %v5984_v26 = vrot.slane %v5801_v16, %v12695_v20  ;;  %v6874_v27 = vadd.f32 %v5727_v25, %v12612_v23 }
 0x5f4   : > { %v5729_v31 = vpop.f32.mrb[73].mxu1  ;;  %6978 = vmatprep.mubr.f32.mxu0 %v12223_v2  ;;  %v5976_v15 = vcombine.high %v5972_v19, %v5972_v19  ;;  %6761 = vst [vmem:[%s12703_s26 + $0x9c] sm:$0x1] %v5975_v24  ;;  %6764 = vst [vmem:[%s12703_s26 + $0xb4] sm:$0x1] %v5974_v5 }
 0x5f5   : > { %v5802_v32 = vadd.f32 %v13650_v49, %v5729_v31  ;;  %11612 = vmatpush1.bf16.msra.mxu0 %v12511_v21  ;;  %v11898_v34 = vpop.eup %11897  ;;  %v5991_v35 = vrot.slane %v5977_v14, %v12695_v20  ;;  %v5992_v36 = vcombine.high %v5984_v26, %v5984_v26  ;;  %v6000_v39 = vrot.slane %v5984_v26, %v12695_v20 }
 0x5f6   : > { %11078 = vst.sshfl [vmem:[%s12703_s26 + $0xc4] sm:$0x1 pattern:$0x73625140] %v5984_v26  ;;  %11901 = vtanh.f32 %v6874_v27  ;;  %11614 = vmatprep.subr.bf16.mxu0 %v12516_v22  ;;  %6765 = vst [vmem:[%s12703_s26 + $0xbc] sm:$0x1] %v5976_v15 }
 0x5f7   : > { %v6026_v41 = vcombine.high %v5802_v32, %v5802_v32  ;;  %v6033_v42 = vrot.slane %v5802_v32, %v12695_v20  ;;  %6979 = vmatmul.mubr.f32.gmra.mrb[84].mxu0 %v11898_v34  ;;  %v5993_v44 = vcombine.high %v5991_v35, %v5991_v35  ;;  %v6007_v21 = vrot.slane %v5991_v35, %v12695_v20 }
 0x5f8   : > { %v6014_v45 = vrot.slane %v5992_v36, %v12695_v20  ;;  %v6022_v10 = vcombine.high %v6000_v39, %v6000_v39  ;;  %11079 = vst.sshfl [vmem:[%s12703_s26 + $0xcc] sm:$0x1 pattern:$0x73625140] %v5992_v36  ;;  %6984 = vmatprep.mubr.f32.mxu0 %v12223_v2 }
 0x5f9   : > { %11080 = vst.sshfl [vmem:[%s12703_s26 + $0xe4] sm:$0x1 pattern:$0x73625140] %v5991_v35  ;;  %v6040_v50 = vrot.slane %v6026_v41, %v12695_v20  ;;  %v6041_v22 = vcombine.high %v6033_v42, %v6033_v42  ;;  %v6049_v55 = vrot.slane %v6033_v42, %v12695_v20  ;;  %v5733_v18 = vpop.f32.mrb[74].mxu1  ;;  %11616 = vmatpush1.bf16.msra.mxu0 %v12523_v29 }
 0x5fa   : > { %11082 = vst.sshfl [vmem:[%s12703_s26 + $0x104] sm:$0x1 pattern:$0x73625140] %v6033_v42  ;;  %v6021_v61 = vrot.slane %v5993_v44, %v12695_v20  ;;  %v6023_v62 = vcombine.high %v6007_v21, %v6007_v21  ;;  %v6024_v1 = vcombine.high %v6014_v45, %v6014_v45  ;;  %6768 = vst [vmem:[%s12703_s26 + $0xd4] sm:$0x1] %v6022_v10  ;;  %11618 = vmatprep.subr.bf16.mxu0 %v12528_v30 }
 0x5fb   : > { %11081 = vst.sshfl [vmem:[%s12703_s26 + $0xec] sm:$0x1 pattern:$0x73625140] %v5993_v44  ;;  %v6875_v6 = vadd.f32 %v5733_v18, %v12620_v28  ;;  %v5735_v4 = vpop.f32.mrb[75].mxu1  ;;  %v6042_v9 = vcombine.high %v6040_v50, %v6040_v50  ;;  %v6056_v11 = vrot.slane %v6040_v50, %v12695_v20  ;;  %v6063_v29 = vrot.slane %v6041_v22, %v12695_v20  ;;  %v11900_v56 = vpop.eup %11899 }
 0x5fc   : > { %v6071_v13 = vcombine.high %v6049_v55, %v6049_v55  ;;  %11083 = vst.sshfl [vmem:[%s12703_s26 + $0x10c] sm:$0x1 pattern:$0x73625140] %v6041_v22  ;;  %v6025_v16 = vcombine.high %v6021_v61, %v6021_v61  ;;  %6769 = vst [vmem:[%s12703_s26 + $0xdc] sm:$0x1] %v6024_v1  ;;  %v5803_v19 = vadd.f32 %v13650_v49, %v5735_v4  ;;  %6985 = vmatmul.mubr.f32.gmra.mrb[86].mxu0 %v11900_v56 }
 0x5fd   : > { %11084 = vst.sshfl [vmem:[%s12703_s26 + $0x124] sm:$0x1 pattern:$0x73625140] %v6040_v50  ;;  %6772 = vst [vmem:[%s12703_s26 + $0xf4] sm:$0x1] %v6023_v62  ;;  %11903 = vtanh.f32 %v6875_v6  ;;  %v6070_v30 = vrot.slane %v6042_v9, %v12695_v20  ;;  %v6072_v5 = vcombine.high %v6056_v11, %v6056_v11  ;;  %v6073_v24 = vcombine.high %v6063_v29, %v6063_v29 }
 0x5fe   : > { %6776 = vst [vmem:[%s12703_s26 + $0x114] sm:$0x1] %v6071_v13  ;;  %11085 = vst.sshfl [vmem:[%s12703_s26 + $0x12c] sm:$0x1 pattern:$0x73625140] %v6042_v9  ;;  %v6075_v14 = vcombine.high %v5803_v19, %v5803_v19  ;;  %v6082_v26 = vrot.slane %v5803_v19, %v12695_v20  ;;  %6990 = vmatprep.mubr.f32.mxu0 %v12223_v2  ;;  %11620 = vmatpush1.bf16.msra.mxu0 %v12535_v37 }
 0x5ff   : > { %v5739_v25 = vpop.f32.mrb[76].mxu1  ;;  %6773 = vst [vmem:[%s12703_s26 + $0xfc] sm:$0x1] %v6025_v16  ;;  %v6074_v15 = vcombine.high %v6070_v30, %v6070_v30  ;;  %6777 = vst [vmem:[%s12703_s26 + $0x11c] sm:$0x1] %v6073_v24  ;;  %11622 = vmatprep.subr.bf16.mxu0 %v12540_v38 }
 0x600   : > { %v6876_v27 = vadd.f32 %v5739_v25, %v12626_v33  ;;  %v5741_v31 = vpop.f32.mrb[77].mxu1  ;;  %6780 = vst [vmem:[%s12703_s26 + $0x134] sm:$0x1] %v6072_v5  ;;  %v11902_v34 = vpop.eup %11901  ;;  %v6089_v35 = vrot.slane %v6075_v14, %v12695_v20  ;;  %v6090_v36 = vcombine.high %v6082_v26, %v6082_v26  ;;  %v6098_v39 = vrot.slane %v6082_v26, %v12695_v20  ;;  %v13977_v29 = vld [vmem:[#allocation10] ss:$0 sm:$0xff] }
 0x601   : > { %v5804_v32 = vadd.f32 %v13650_v49, %v5741_v31  ;;  %11086 = vst.sshfl [vmem:[%s12703_s26 + $0x144] sm:$0x1 pattern:$0x73625140] %v6082_v26  ;;  %6781 = vst [vmem:[%s12703_s26 + $0x13c] sm:$0x1] %v6074_v15  ;;  %6991 = vmatmul.mubr.f32.gmra.mrb[88].mxu0 %v11902_v34 }
 0x602   : > { %11905 = vtanh.f32 %v6876_v27  ;;  %v6091_v42 = vcombine.high %v6089_v35, %v6089_v35  ;;  %v6105_v49 = vrot.slane %v6089_v35, %v12695_v20  ;;  %v6112_v38 = vrot.slane %v6090_v36, %v12695_v20  ;;  %11087 = vst.sshfl [vmem:[%s12703_s26 + $0x14c] sm:$0x1 pattern:$0x73625140] %v6090_v36  ;;  %6996 = vmatprep.mubr.f32.mxu0 %v12223_v2 }
 0x603   : > { %v6124_v37 = vcombine.high %v5804_v32, %v5804_v32  ;;  %v6131_v41 = vrot.slane %v5804_v32, %v12695_v20  ;;  %v6120_v44 = vcombine.high %v6098_v39, %v6098_v39  ;;  %11088 = vst.sshfl [vmem:[%s12703_s26 + $0x164] sm:$0x1 pattern:$0x73625140] %v6089_v35  ;;  %11624 = vmatpush1.bf16.msra.mxu0 %v12562_v48 }
 0x604   : > { %v6119_v22 = vrot.slane %v6091_v42, %v12695_v20  ;;  %v6121_v55 = vcombine.high %v6105_v49, %v6105_v49  ;;  %v6122_v18 = vcombine.high %v6112_v38, %v6112_v38  ;;  %11089 = vst.sshfl [vmem:[%s12703_s26 + $0x16c] sm:$0x1 pattern:$0x73625140] %v6091_v42  ;;  %11626 = vmatprep.subr.bf16.mxu0 %v12566_v51 }
 0x605   : > { %v6138_v21 = vrot.slane %v6124_v37, %v12695_v20  ;;  %v6139_v45 = vcombine.high %v6131_v41, %v6131_v41  ;;  %v6147_v10 = vrot.slane %v6131_v41, %v12695_v20  ;;  %11090 = vst.sshfl [vmem:[%s12703_s26 + $0x184] sm:$0x1 pattern:$0x73625140] %v6131_v41  ;;  %v5745_v50 = vpop.f32.mrb[78].mxu1 }
 0x606   : > { %6784 = vst [vmem:[%s12703_s26 + $0x154] sm:$0x1] %v6120_v44  ;;  %v6877_v61 = vadd.f32 %v5745_v50, %v12634_v40  ;;  %v5747_v62 = vpop.f32.mrb[79].mxu1  ;;  %v6123_v11 = vcombine.high %v6119_v22, %v6119_v22  ;;  %6785 = vst [vmem:[%s12703_s26 + $0x15c] sm:$0x1] %v6122_v18 }
 0x607   : > { %v6140_v1 = vcombine.high %v6138_v21, %v6138_v21  ;;  %v6154_v6 = vrot.slane %v6138_v21, %v12695_v20  ;;  %v6161_v48 = vrot.slane %v6139_v45, %v12695_v20  ;;  %v6169_v4 = vcombine.high %v6147_v10, %v6147_v10  ;;  %11091 = vst.sshfl [vmem:[%s12703_s26 + $0x18c] sm:$0x1 pattern:$0x73625140] %v6139_v45  ;;  %v11904_v9 = vpop.eup %11903 }
 0x608   : > { %11092 = vst.sshfl [vmem:[%s12703_s26 + $0x1a4] sm:$0x1 pattern:$0x73625140] %v6138_v21  ;;  %6788 = vst [vmem:[%s12703_s26 + $0x174] sm:$0x1] %v6121_v55  ;;  %11907 = vtanh.f32 %v6877_v61  ;;  %v5805_v51 = vadd.f32 %v13977_v29, %v5747_v62  ;;  %6997 = vmatmul.mubr.f32.gmra.mrb[90].mxu0 %v11904_v9 }
 0x609   : > { %v6168_v13 = vrot.slane %v6140_v1, %v12695_v20  ;;  %v6170_v56 = vcombine.high %v6154_v6, %v6154_v6  ;;  %v6171_v16 = vcombine.high %v6161_v48, %v6161_v48  ;;  %6792 = vst [vmem:[%s12703_s26 + $0x194] sm:$0x1] %v6169_v4  ;;  %11093 = vst.sshfl [vmem:[%s12703_s26 + $0x1ac] sm:$0x1 pattern:$0x73625140] %v6140_v1  ;;  %7002 = vmatprep.mubr.f32.mxu0 %v12223_v2 }
 0x60a   : > { %v5751_v19 = vpop.f32.mrb[80].mxu1  ;;  %6789 = vst [vmem:[%s12703_s26 + $0x17c] sm:$0x1] %v6123_v11  ;;  %v6173_v30 = vcombine.high %v5805_v51, %v5805_v51  ;;  %v6180_v5 = vrot.slane %v5805_v51, %v12695_v20  ;;  %11628 = vmatpush1.bf16.msra.mxu0 %v12568_v54 }
 0x60b   : > { %v6878_v24 = vadd.f32 %v5751_v19, %v12640_v43  ;;  %v5753_v25 = vpop.f32.mrb[81].mxu1  ;;  %v6172_v14 = vcombine.high %v6168_v13, %v6168_v13  ;;  %6793 = vst [vmem:[%s12703_s26 + $0x19c] sm:$0x1] %v6171_v16  ;;  %6796 = vst [vmem:[%s12703_s26 + $0x1b4] sm:$0x1] %v6170_v56  ;;  %11630 = vmatprep.subr.bf16.mxu0 %v12574_v57 }
 0x60c   : > { %v5806_v26 = vadd.f32 %v13977_v29, %v5753_v25  ;;  %v11906_v27 = vpop.eup %11905  ;;  %v6187_v31 = vrot.slane %v6173_v30, %v12695_v20  ;;  %v6188_v15 = vcombine.high %v6180_v5, %v6180_v5  ;;  %v6196_v32 = vrot.slane %v6180_v5, %v12695_v20  ;;  %11094 = vst.sshfl [vmem:[%s12703_s26 + $0x1c4] sm:$0x1 pattern:$0x73625140] %v6180_v5 }
 0x60d   : > { %11909 = vtanh.f32 %v6878_v24  ;;  %6797 = vst [vmem:[%s12703_s26 + $0x1bc] sm:$0x1] %v6172_v14  ;;  %7003 = vmatmul.mubr.f32.gmra.mrb[92].mxu0 %v11906_v27 }
 0x60e   : > { %v6222_v54 = vcombine.high %v5806_v26, %v5806_v26  ;;  %v6229_v34 = vrot.slane %v5806_v26, %v12695_v20  ;;  %v6189_v35 = vcombine.high %v6187_v31, %v6187_v31  ;;  %v6203_v36 = vrot.slane %v6187_v31, %v12695_v20  ;;  %11095 = vst.sshfl [vmem:[%s12703_s26 + $0x1cc] sm:$0x1 pattern:$0x73625140] %v6188_v15 }
 0x60f   : > { %v6210_v57 = vrot.slane %v6188_v15, %v12695_v20  ;;  %v6218_v39 = vcombine.high %v6196_v32, %v6196_v32  ;;  %11096 = vst.sshfl [vmem:[%s12703_s26 + $0x1e4] sm:$0x1 pattern:$0x73625140] %v6187_v31  ;;  %7008 = vmatprep.mubr.f32.mxu0 %v12223_v2  ;;  %v5757_v49 = vpop.f32.mrb[82].mxu1  ;;  %11632 = vmatpush1.bf16.msra.mxu0 %v12576_v60 }
 0x610   : > { %v6236_v37 = vrot.slane %v6222_v54, %v12695_v20  ;;  %v6237_v41 = vcombine.high %v6229_v34, %v6229_v34  ;;  %v6245_v42 = vrot.slane %v6229_v34, %v12695_v20  ;;  %11098 = vst.sshfl [vmem:[%s12703_s26 + $0x204] sm:$0x1 pattern:$0x73625140] %v6229_v34  ;;  %v6217_v38 = vrot.slane %v6189_v35, %v12695_v20  ;;  %v5759_v10 = vpop.f32.mrb[83].mxu1 }
 0x611   : > { %v6219_v44 = vcombine.high %v6203_v36, %v6203_v36  ;;  %v6220_v21 = vcombine.high %v6210_v57, %v6210_v57  ;;  %6800 = vst [vmem:[%s12703_s26 + $0x1d4] sm:$0x1] %v6218_v39  ;;  %11097 = vst.sshfl [vmem:[%s12703_s26 + $0x1ec] sm:$0x1 pattern:$0x73625140] %v6189_v35  ;;  %v6879_v45 = vadd.f32 %v5757_v49, %v12648_v46  ;;  %11634 = vmatprep.subr.bf16.mxu0 %v12579_v0 }
 0x612   : > { %v6238_v50 = vcombine.high %v6236_v37, %v6236_v37  ;;  %v6252_v22 = vrot.slane %v6236_v37, %v12695_v20  ;;  %v6259_v60 = vrot.slane %v6237_v41, %v12695_v20  ;;  %v6267_v55 = vcombine.high %v6245_v42, %v6245_v42  ;;  %11099 = vst.sshfl [vmem:[%s12703_s26 + $0x20c] sm:$0x1 pattern:$0x73625140] %v6237_v41  ;;  %v11908_v18 = vpop.eup %11907 }
 0x613   : > { %11100 = vst.sshfl [vmem:[%s12703_s26 + $0x224] sm:$0x1 pattern:$0x73625140] %v6236_v37  ;;  %v6221_v61 = vcombine.high %v6217_v38, %v6217_v38  ;;  %6801 = vst [vmem:[%s12703_s26 + $0x1dc] sm:$0x1] %v6220_v21  ;;  %11911 = vtanh.f32 %v6879_v45  ;;  %v5807_v62 = vadd.f32 %v13977_v29, %v5759_v10  ;;  %7009 = vmatmul.mubr.f32.gmra.mrb[94].mxu0 %v11908_v18 }
 0x614   : > { %6804 = vst [vmem:[%s12703_s26 + $0x1f4] sm:$0x1] %v6219_v44  ;;  %v6266_v0 = vrot.slane %v6238_v50, %v12695_v20  ;;  %v6268_v1 = vcombine.high %v6252_v22, %v6252_v22  ;;  %v6269_v6 = vcombine.high %v6259_v60, %v6259_v60  ;;  %6808 = vst [vmem:[%s12703_s26 + $0x214] sm:$0x1] %v6267_v55  ;;  %v5763_v48 = vpop.f32.mrb[84].mxu1  ;;  %7014 = vmatprep.mubr.f32.mxu0 %v12223_v2 }
 0x615   : > { %11101 = vst.sshfl [vmem:[%s12703_s26 + $0x22c] sm:$0x1 pattern:$0x73625140] %v6238_v50  ;;  %6805 = vst [vmem:[%s12703_s26 + $0x1fc] sm:$0x1] %v6221_v61  ;;  %v6271_v4 = vcombine.high %v5807_v62, %v5807_v62  ;;  %v6278_v9 = vrot.slane %v5807_v62, %v12695_v20  ;;  %v6880_v11 = vadd.f32 %v5763_v48, %v12654_v47  ;;  %11636 = vmatpush1.bf16.msra.mxu0 %v12583_v3 }
 0x616   : > { %v5765_v51 = vpop.f32.mrb[85].mxu1  ;;  %v6270_v13 = vcombine.high %v6266_v0, %v6266_v0  ;;  %6809 = vst [vmem:[%s12703_s26 + $0x21c] sm:$0x1] %v6269_v6  ;;  %6812 = vst [vmem:[%s12703_s26 + $0x234] sm:$0x1] %v6268_v1 }
 0x617   : > { %v5808_v56 = vadd.f32 %v13977_v29, %v5765_v51  ;;  %v11910_v16 = vpop.eup %11909  ;;  %v6285_v19 = vrot.slane %v6271_v4, %v12695_v20  ;;  %v6286_v30 = vcombine.high %v6278_v9, %v6278_v9  ;;  %v6294_v5 = vrot.slane %v6278_v9, %v12695_v20  ;;  %11102 = vst.sshfl [vmem:[%s12703_s26 + $0x244] sm:$0x1 pattern:$0x73625140] %v6278_v9  ;;  %v5769_v25 = vpop.f32.mrb[86].mxu1 }
 0x618   : > { %11913 = vtanh.f32 %v6880_v11  ;;  %6813 = vst [vmem:[%s12703_s26 + $0x23c] sm:$0x1] %v6270_v13  ;;  %7015 = vmatmul.mubr.f32.gmra.mrb[96].mxu0 %v11910_v16  ;;  %v5771_v15 = vpop.f32.mrb[87].mxu1  ;;  %v6881_v35 = vadd.f32 %v5769_v25, %v12662_v52 }
 0x619   : > { %v6320_v24 = vcombine.high %v5808_v56, %v5808_v56  ;;  %v6327_v3 = vrot.slane %v5808_v56, %v12695_v20  ;;  %v6287_v14 = vcombine.high %v6285_v19, %v6285_v19  ;;  %v6301_v26 = vrot.slane %v6285_v19, %v12695_v20  ;;  %11103 = vst.sshfl [vmem:[%s12703_s26 + $0x24c] sm:$0x1 pattern:$0x73625140] %v6286_v30 }
 0x61a   : > { %v6308_v27 = vrot.slane %v6286_v30, %v12695_v20  ;;  %v6316_v31 = vcombine.high %v6294_v5, %v6294_v5  ;;  %11104 = vst.sshfl [vmem:[%s12703_s26 + $0x264] sm:$0x1 pattern:$0x73625140] %v6285_v19  ;;  %7020 = vmatprep.mubr.f32.mxu0 %v12223_v2  ;;  %v5809_v37 = vadd.f32 %v13977_v29, %v5771_v15  ;;  %11915 = vtanh.f32 %v6881_v35 }
 0x61b   : > { %v6334_v32 = vrot.slane %v6320_v24, %v12695_v20  ;;  %v6335_v54 = vcombine.high %v6327_v3, %v6327_v3  ;;  %v6343_v34 = vrot.slane %v6327_v3, %v12695_v20  ;;  %11106 = vst.sshfl [vmem:[%s12703_s26 + $0x284] sm:$0x1 pattern:$0x73625140] %v6327_v3  ;;  %v6315_v36 = vrot.slane %v6287_v14, %v12695_v20 }
 0x61c   : > { %v6317_v57 = vcombine.high %v6301_v26, %v6301_v26  ;;  %v6318_v39 = vcombine.high %v6308_v27, %v6308_v27  ;;  %6816 = vst [vmem:[%s12703_s26 + $0x254] sm:$0x1] %v6316_v31  ;;  %11105 = vst.sshfl [vmem:[%s12703_s26 + $0x26c] sm:$0x1 pattern:$0x73625140] %v6287_v14  ;;  %v6369_v10 = vcombine.high %v5809_v37, %v5809_v37 }
 0x61d   : > { %v6336_v41 = vcombine.high %v6334_v32, %v6334_v32  ;;  %v6350_v42 = vrot.slane %v6334_v32, %v12695_v20  ;;  %v6357_v49 = vrot.slane %v6335_v54, %v12695_v20  ;;  %v6365_v38 = vcombine.high %v6343_v34, %v6343_v34  ;;  %11107 = vst.sshfl [vmem:[%s12703_s26 + $0x28c] sm:$0x1 pattern:$0x73625140] %v6335_v54  ;;  %v5775_v44 = vpop.f32.mrb[88].mxu1  ;;  %v11912_v21 = vpop.eup %11911 }
 0x61e   : > { %11108 = vst.sshfl [vmem:[%s12703_s26 + $0x2a4] sm:$0x1 pattern:$0x73625140] %v6334_v32  ;;  %v6319_v45 = vcombine.high %v6315_v36, %v6315_v36  ;;  %6817 = vst [vmem:[%s12703_s26 + $0x25c] sm:$0x1] %v6318_v39  ;;  %v6376_v50 = vrot.slane %v5809_v37, %v12695_v20  ;;  %v6882_v61 = vadd.f32 %v5775_v44, %v12668_v53  ;;  %7021 = vmatmul.mubr.f32.gmra.mrb[98].mxu0 %v11912_v21 }
 0x61f   : > { %6820 = vst [vmem:[%s12703_s26 + $0x274] sm:$0x1] %v6317_v57  ;;  %v5777_v22 = vpop.f32.mrb[89].mxu1  ;;  %v6364_v60 = vrot.slane %v6336_v41, %v12695_v20  ;;  %v6366_v55 = vcombine.high %v6350_v42, %v6350_v42  ;;  %v6367_v18 = vcombine.high %v6357_v49, %v6357_v49  ;;  %6824 = vst [vmem:[%s12703_s26 + $0x294] sm:$0x1] %v6365_v38  ;;  %7026 = vmatprep.mubr.f32.mxu0 %v12223_v2 }
 0x620   : > { %11109 = vst.sshfl [vmem:[%s12703_s26 + $0x2ac] sm:$0x1 pattern:$0x73625140] %v6336_v41  ;;  %6821 = vst [vmem:[%s12703_s26 + $0x27c] sm:$0x1] %v6319_v45  ;;  %v6383_v62 = vrot.slane %v6369_v10, %v12695_v20  ;;  %v6384_v0 = vcombine.high %v6376_v50, %v6376_v50  ;;  %v6392_v1 = vrot.slane %v6376_v50, %v12695_v20  ;;  %11917 = vtanh.f32 %v6882_v61 }
 0x621   : > { %11110 = vst.sshfl [vmem:[%s12703_s26 + $0x2c4] sm:$0x1 pattern:$0x73625140] %v6376_v50  ;;  %v5810_v6 = vadd.f32 %v13977_v29, %v5777_v22  ;;  %v6368_v48 = vcombine.high %v6364_v60, %v6364_v60  ;;  %6825 = vst [vmem:[%s12703_s26 + $0x29c] sm:$0x1] %v6367_v18 }
 0x622   : > { %6828 = vst [vmem:[%s12703_s26 + $0x2b4] sm:$0x1] %v6366_v55  ;;  %v5781_v4 = vpop.f32.mrb[90].mxu1  ;;  %v11914_v9 = vpop.eup %11913  ;;  %v6385_v11 = vcombine.high %v6383_v62, %v6383_v62  ;;  %v6399_v51 = vrot.slane %v6383_v62, %v12695_v20  ;;  %v6406_v13 = vrot.slane %v6384_v0, %v12695_v20  ;;  %v6414_v56 = vcombine.high %v6392_v1, %v6392_v1 }
 0x623   : > { %11111 = vst.sshfl [vmem:[%s12703_s26 + $0x2cc] sm:$0x1 pattern:$0x73625140] %v6384_v0  ;;  %v5783_v16 = vpop.f32.mrb[91].mxu1  ;;  %v6418_v19 = vcombine.high %v5810_v6, %v5810_v6  ;;  %v6425_v30 = vrot.slane %v5810_v6, %v12695_v20  ;;  %v6883_v5 = vadd.f32 %v5781_v4, %v12674_v58  ;;  %7027 = vmatmul.mubr.f32.gmra.mrb[100].mxu0 %v11914_v9 }
 0x624   : > { %11112 = vst.sshfl [vmem:[%s12703_s26 + $0x2e4] sm:$0x1 pattern:$0x73625140] %v6383_v62  ;;  %6829 = vst [vmem:[%s12703_s26 + $0x2bc] sm:$0x1] %v6368_v48  ;;  %v5811_v24 = vadd.f32 %v13977_v29, %v5783_v16  ;;  %v6413_v3 = vrot.slane %v6385_v11, %v12695_v20  ;;  %v6415_v25 = vcombine.high %v6399_v51, %v6399_v51  ;;  %7032 = vmatprep.mubr.f32.mxu0 %v12223_v2  ;;  %v11916_v42 = vpop.eup %11915 }
 0x625   : > { %v6416_v14 = vcombine.high %v6406_v13, %v6406_v13  ;;  %6832 = vst [vmem:[%s12703_s26 + $0x2d4] sm:$0x1] %v6414_v56  ;;  %11113 = vst.sshfl [vmem:[%s12703_s26 + $0x2ec] sm:$0x1 pattern:$0x73625140] %v6385_v11  ;;  %v6432_v26 = vrot.slane %v6418_v19, %v12695_v20  ;;  %v6433_v27 = vcombine.high %v6425_v30, %v6425_v30  ;;  %11919 = vtanh.f32 %v6883_v5 }
 0x626   : > { %v6441_v31 = vrot.slane %v6425_v30, %v12695_v20  ;;  %11114 = vst.sshfl [vmem:[%s12703_s26 + $0x304] sm:$0x1 pattern:$0x73625140] %v6425_v30  ;;  %v5787_v15 = vpop.f32.mrb[92].mxu1  ;;  %v6417_v32 = vcombine.high %v6413_v3, %v6413_v3  ;;  %v6467_v54 = vcombine.high %v5811_v24, %v5811_v24  ;;  %v6474_v34 = vrot.slane %v5811_v24, %v12695_v20 }
 0x627   : > { %6833 = vst [vmem:[%s12703_s26 + $0x2dc] sm:$0x1] %v6416_v14  ;;  %6836 = vst [vmem:[%s12703_s26 + $0x2f4] sm:$0x1] %v6415_v25  ;;  %v6884_v35 = vadd.f32 %v5787_v15, %v12678_v59  ;;  %v5789_v36 = vpop.f32.mrb[93].mxu1  ;;  %v6434_v57 = vcombine.high %v6432_v26, %v6432_v26  ;;  %v6448_v39 = vrot.slane %v6432_v26, %v12695_v20  ;;  %7033 = vmatmul.mubr.f32.gmra.mrb[102].mxu0 %v11916_v42 }
 0x628   : > { %v6455_v37 = vrot.slane %v6433_v27, %v12695_v20  ;;  %v6463_v41 = vcombine.high %v6441_v31, %v6441_v31  ;;  %11115 = vst.sshfl [vmem:[%s12703_s26 + $0x30c] sm:$0x1 pattern:$0x73625140] %v6433_v27  ;;  %6837 = vst [vmem:[%s12703_s26 + $0x2fc] sm:$0x1] %v6417_v32  ;;  %v6481_v49 = vrot.slane %v6467_v54, %v12695_v20  ;;  %7038 = vmatprep.mubr.f32.mxu0 %v12223_v2 }
 0x629   : > { %11116 = vst.sshfl [vmem:[%s12703_s26 + $0x324] sm:$0x1 pattern:$0x73625140] %v6432_v26  ;;  %v6482_v38 = vcombine.high %v6474_v34, %v6474_v34  ;;  %v6490_v44 = vrot.slane %v6474_v34, %v12695_v20  ;;  %11921 = vtanh.f32 %v6884_v35  ;;  %v6462_v21 = vrot.slane %v6434_v57, %v12695_v20  ;;  %v5793_v22 = vpop.f32.mrb[94].mxu1 }
 0x62a   : > { %11118 = vst.sshfl [vmem:[%s12703_s26 + $0x344] sm:$0x1 pattern:$0x73625140] %v6474_v34  ;;  %v6464_v45 = vcombine.high %v6448_v39, %v6448_v39  ;;  %v6465_v10 = vcombine.high %v6455_v37, %v6455_v37  ;;  %6840 = vst [vmem:[%s12703_s26 + $0x314] sm:$0x1] %v6463_v41  ;;  %v5812_v50 = vadd.f32 %v13977_v29, %v5789_v36  ;;  %v11918_v0 = vpop.eup %11917 }
 0x62b   : > { %11117 = vst.sshfl [vmem:[%s12703_s26 + $0x32c] sm:$0x1 pattern:$0x73625140] %v6434_v57  ;;  %v6483_v60 = vcombine.high %v6481_v49, %v6481_v49  ;;  %v6497_v55 = vrot.slane %v6481_v49, %v12695_v20  ;;  %v6504_v18 = vrot.slane %v6482_v38, %v12695_v20  ;;  %v6512_v61 = vcombine.high %v6490_v44, %v6490_v44  ;;  %v5795_v62 = vpop.f32.mrb[95].mxu1 }
 0x62c   : > { %11119 = vst.sshfl [vmem:[%s12703_s26 + $0x34c] sm:$0x1 pattern:$0x73625140] %v6482_v38  ;;  %v6466_v1 = vcombine.high %v6462_v21, %v6462_v21  ;;  %6841 = vst [vmem:[%s12703_s26 + $0x31c] sm:$0x1] %v6465_v10  ;;  %v6516_v6 = vcombine.high %v5812_v50, %v5812_v50  ;;  %v6523_v48 = vrot.slane %v5812_v50, %v12695_v20  ;;  %7039 = vmatmul.mubr.f32.gmra.mrb[104].mxu0 %v11918_v0 }
 0x62d   : > { %11120 = vst.sshfl [vmem:[%s12703_s26 + $0x364] sm:$0x1 pattern:$0x73625140] %v6481_v49  ;;  %6844 = vst [vmem:[%s12703_s26 + $0x334] sm:$0x1] %v6464_v45  ;;  %v6885_v4 = vadd.f32 %v5793_v22, %v12684_v63  ;;  %v6511_v9 = vrot.slane %v6483_v60, %v12695_v20  ;;  %v6513_v11 = vcombine.high %v6497_v55, %v6497_v55  ;;  %7044 = vmatprep.mubr.f32.mxu0 %v12223_v2 }
 0x62e   : > { %v6514_v51 = vcombine.high %v6504_v18, %v6504_v18  ;;  %6848 = vst [vmem:[%s12703_s26 + $0x354] sm:$0x1] %v6512_v61  ;;  %11121 = vst.sshfl [vmem:[%s12703_s26 + $0x36c] sm:$0x1 pattern:$0x73625140] %v6483_v60  ;;  %v5813_v13 = vadd.f32 %v13977_v29, %v5795_v62  ;;  %v6530_v56 = vrot.slane %v6516_v6, %v12695_v20 }
 0x62f   : > { %6845 = vst [vmem:[%s12703_s26 + $0x33c] sm:$0x1] %v6466_v1  ;;  %v6531_v16 = vcombine.high %v6523_v48, %v6523_v48  ;;  %v6539_v19 = vrot.slane %v6523_v48, %v12695_v20  ;;  %11122 = vst.sshfl [vmem:[%s12703_s26 + $0x384] sm:$0x1 pattern:$0x73625140] %v6523_v48  ;;  %11923 = vtanh.f32 %v6885_v4  ;;  %v6515_v30 = vcombine.high %v6511_v9, %v6511_v9  ;;  %v11920_v3 = vpop.eup %11919 }
 0x630   : > { %6849 = vst [vmem:[%s12703_s26 + $0x35c] sm:$0x1] %v6514_v51  ;;  %6852 = vst [vmem:[%s12703_s26 + $0x374] sm:$0x1] %v6513_v11  ;;  %v6565_v5 = vcombine.high %v5813_v13, %v5813_v13  ;;  %v6572_v24 = vrot.slane %v5813_v13, %v12695_v20  ;;  %v6532_v25 = vcombine.high %v6530_v56, %v6530_v56  ;;  %7045 = vmatmul.mubr.f32.gmra.mrb[106].mxu0 %v11920_v3 }
 0x631   : > { %v6546_v14 = vrot.slane %v6530_v56, %v12695_v20  ;;  %v6553_v26 = vrot.slane %v6531_v16, %v12695_v20  ;;  %v6561_v27 = vcombine.high %v6539_v19, %v6539_v19  ;;  %11123 = vst.sshfl [vmem:[%s12703_s26 + $0x38c] sm:$0x1 pattern:$0x73625140] %v6531_v16  ;;  %6853 = vst [vmem:[%s12703_s26 + $0x37c] sm:$0x1] %v6515_v30  ;;  %7050 = vmatprep.mubr.f32.mxu0 %v12223_v2 }
 0x632   : > { %11124 = vst.sshfl [vmem:[%s12703_s26 + $0x3a4] sm:$0x1 pattern:$0x73625140] %v6530_v56  ;;  %v6579_v31 = vrot.slane %v6565_v5, %v12695_v20  ;;  %v6580_v15 = vcombine.high %v6572_v24, %v6572_v24  ;;  %v6588_v32 = vrot.slane %v6572_v24, %v12695_v20  ;;  %v6560_v54 = vrot.slane %v6532_v25, %v12695_v20 }
 0x633   : > { %11126 = vst.sshfl [vmem:[%s12703_s26 + $0x3c4] sm:$0x1 pattern:$0x73625140] %v6572_v24  ;;  %v6562_v34 = vcombine.high %v6546_v14, %v6546_v14  ;;  %v6563_v35 = vcombine.high %v6553_v26, %v6553_v26  ;;  %6856 = vst [vmem:[%s12703_s26 + $0x394] sm:$0x1] %v6561_v27  ;;  %v11922_v36 = vpop.eup %11921 }
 0x634   : > { %11125 = vst.sshfl [vmem:[%s12703_s26 + $0x3ac] sm:$0x1 pattern:$0x73625140] %v6532_v25  ;;  %v6581_v57 = vcombine.high %v6579_v31, %v6579_v31  ;;  %v6595_v39 = vrot.slane %v6579_v31, %v12695_v20  ;;  %v6602_v37 = vrot.slane %v6580_v15, %v12695_v20  ;;  %v6610_v41 = vcombine.high %v6588_v32, %v6588_v32 }
 0x635   : > { %11127 = vst.sshfl [vmem:[%s12703_s26 + $0x3cc] sm:$0x1 pattern:$0x73625140] %v6580_v15  ;;  %v6564_v42 = vcombine.high %v6560_v54, %v6560_v54  ;;  %6857 = vst [vmem:[%s12703_s26 + $0x39c] sm:$0x1] %v6563_v35  ;;  %7051 = vmatmul.mubr.f32.gmra.mrb[108].mxu0 %v11922_v36 }
 0x636   : > { %11128 = vst.sshfl [vmem:[%s12703_s26 + $0x3e4] sm:$0x1 pattern:$0x73625140] %v6579_v31  ;;  %6860 = vst [vmem:[%s12703_s26 + $0x3b4] sm:$0x1] %v6562_v34  ;;  %v6609_v49 = vrot.slane %v6581_v57, %v12695_v20  ;;  %v6611_v38 = vcombine.high %v6595_v39, %v6595_v39  ;;  %v6612_v44 = vcombine.high %v6602_v37, %v6602_v37  ;;  %7056 = vmatprep.mubr.f32.mxu0 %v12223_v2 }
 0x637   : > { %6864 = vst [vmem:[%s12703_s26 + $0x3d4] sm:$0x1] %v6610_v41  ;;  %11129 = vst.sshfl [vmem:[%s12703_s26 + $0x3ec] sm:$0x1 pattern:$0x73625140] %v6581_v57 }
 0x638   : > { %6861 = vst [vmem:[%s12703_s26 + $0x3bc] sm:$0x1] %v6564_v42  ;;  %v6613_v21 = vcombine.high %v6609_v49, %v6609_v49  ;;  %6865 = vst [vmem:[%s12703_s26 + $0x3dc] sm:$0x1] %v6612_v44 }
 0x639   : > { %6868 = vst [vmem:[%s12703_s26 + $0x3f4] sm:$0x1] %v6611_v38  ;;  %v11924_v45 = vpop.eup %11923 }
 0x63a   : > { %6869 = vst [vmem:[%s12703_s26 + $0x3fc] sm:$0x1] %v6613_v21  ;;  %7057 = vmatmul.mubr.f32.gmra.mrb[110].mxu0 %v11924_v45 }
 0x63b   : > { %9496 = vmatprep.mubr.f32.mxu0 %v12223_v2 }
 0x6c0   : > { %v6968_v10 = vpop.f32.mrb[80].mxu0 }
 0x6c1   : > { %v8135_v50 = vadd.f32 %v6968_v10, %v12597_v7  ;;  %v6970_v22 = vpop.f32.mrb[81].mxu0 }
 0x6c2   : > { %v7063_v60 = vadd.f32 %v13977_v29, %v6970_v22 }
 0x6c3   : > { %11925 = vtanh.f32 %v8135_v50 }
 0x6c4   : > { %v7095_v55 = vcombine.high %v7063_v60, %v7063_v60  ;;  %v7102_v18 = vrot.slane %v7063_v60, %v12695_v20 }
 0x6c6   : > { %v6974_v61 = vpop.f32.mrb[82].mxu0  ;;  %v7109_v1 = vrot.slane %v7095_v55, %v12695_v20  ;;  %v7110_v6 = vcombine.high %v7102_v18, %v7102_v18  ;;  %v7118_v48 = vrot.slane %v7102_v18, %v12695_v20  ;;  %11130 = vst.sshfl [vmem:[%s12703_s26 + $0x5] sm:$0x1 pattern:$0x73625140] %v7102_v18 }
 0x6c7   : > { %v8136_v62 = vadd.f32 %v6974_v61, %v12600_v8  ;;  %v6976_v0 = vpop.f32.mrb[83].mxu0 }
 0x6c8   : > { %v7064_v4 = vadd.f32 %v13977_v29, %v6976_v0  ;;  %v7111_v9 = vcombine.high %v7109_v1, %v7109_v1  ;;  %v7125_v11 = vrot.slane %v7109_v1, %v12695_v20  ;;  %v7132_v51 = vrot.slane %v7110_v6, %v12695_v20  ;;  %11131 = vst.sshfl [vmem:[%s12703_s26 + $0xd] sm:$0x1 pattern:$0x73625140] %v7110_v6 }
 0x6c9   : > { %11927 = vtanh.f32 %v8136_v62  ;;  %v7140_v13 = vcombine.high %v7118_v48, %v7118_v48  ;;  %11132 = vst.sshfl [vmem:[%s12703_s26 + $0x25] sm:$0x1 pattern:$0x73625140] %v7109_v1 }
 0x6ca   : > { %v6980_v56 = vpop.f32.mrb[84].mxu0  ;;  %v7144_v16 = vcombine.high %v7064_v4, %v7064_v4  ;;  %v7151_v19 = vrot.slane %v7064_v4, %v12695_v20  ;;  %v7139_v24 = vrot.slane %v7111_v9, %v12695_v20  ;;  %v7141_v3 = vcombine.high %v7125_v11, %v7125_v11  ;;  %11133 = vst.sshfl [vmem:[%s12703_s26 + $0x2d] sm:$0x1 pattern:$0x73625140] %v7111_v9 }
 0x6cb   : > { %v8137_v30 = vadd.f32 %v6980_v56, %v12604_v12  ;;  %v6982_v5 = vpop.f32.mrb[85].mxu0  ;;  %v7142_v25 = vcombine.high %v7132_v51, %v7132_v51  ;;  %8009 = vst [vmem:[%s12703_s26 + $0x15] sm:$0x1] %v7140_v13 }
 0x6cc   : > { %v7065_v14 = vadd.f32 %v13977_v29, %v6982_v5  ;;  %v7158_v26 = vrot.slane %v7144_v16, %v12695_v20  ;;  %v7159_v27 = vcombine.high %v7151_v19, %v7151_v19  ;;  %v7167_v31 = vrot.slane %v7151_v19, %v12695_v20  ;;  %11134 = vst.sshfl [vmem:[%s12703_s26 + $0x45] sm:$0x1 pattern:$0x73625140] %v7151_v19 }
 0x6cd   : > { %11929 = vtanh.f32 %v8137_v30  ;;  %v7143_v15 = vcombine.high %v7139_v24, %v7139_v24  ;;  %8010 = vst [vmem:[%s12703_s26 + $0x1d] sm:$0x1] %v7142_v25  ;;  %8013 = vst [vmem:[%s12703_s26 + $0x35] sm:$0x1] %v7141_v3  ;;  %v11926_v34 = vpop.eup %11925 }
 0x6ce   : > { %v7193_v32 = vcombine.high %v7065_v14, %v7065_v14  ;;  %v7200_v54 = vrot.slane %v7065_v14, %v12695_v20  ;;  %v7160_v35 = vcombine.high %v7158_v26, %v7158_v26  ;;  %v7174_v36 = vrot.slane %v7158_v26, %v12695_v20  ;;  %11135 = vst.sshfl [vmem:[%s12703_s26 + $0x4d] sm:$0x1 pattern:$0x73625140] %v7159_v27 }
 0x6cf   : > { %v7181_v57 = vrot.slane %v7159_v27, %v12695_v20  ;;  %v7189_v39 = vcombine.high %v7167_v31, %v7167_v31  ;;  %11136 = vst.sshfl [vmem:[%s12703_s26 + $0x65] sm:$0x1 pattern:$0x73625140] %v7158_v26  ;;  %8014 = vst [vmem:[%s12703_s26 + $0x3d] sm:$0x1] %v7143_v15  ;;  %8232 = vmatmul.mubr.f32.vlgmr.msra.gmra.mrb[96].mxu1 %v11926_v34 }
 0x6d0   : > { %v7207_v37 = vrot.slane %v7193_v32, %v12695_v20  ;;  %v7208_v41 = vcombine.high %v7200_v54, %v7200_v54  ;;  %v7216_v42 = vrot.slane %v7200_v54, %v12695_v20  ;;  %11138 = vst.sshfl [vmem:[%s12703_s26 + $0x85] sm:$0x1 pattern:$0x73625140] %v7200_v54  ;;  %v6986_v49 = vpop.f32.mrb[86].mxu0  ;;  %v7188_v38 = vrot.slane %v7160_v35, %v12695_v20 }
 0x6d1   : > { %v7190_v44 = vcombine.high %v7174_v36, %v7174_v36  ;;  %v7191_v21 = vcombine.high %v7181_v57, %v7181_v57  ;;  %8017 = vst [vmem:[%s12703_s26 + $0x55] sm:$0x1] %v7189_v39  ;;  %11137 = vst.sshfl [vmem:[%s12703_s26 + $0x6d] sm:$0x1 pattern:$0x73625140] %v7160_v35  ;;  %v8138_v45 = vadd.f32 %v6986_v49, %v12609_v17  ;;  %8237 = vmatprep.mubr.f32.mxu1 %v12223_v2 }
 0x6d2   : > { %v6988_v10 = vpop.f32.mrb[87].mxu0  ;;  %v7209_v50 = vcombine.high %v7207_v37, %v7207_v37  ;;  %v7223_v22 = vrot.slane %v7207_v37, %v12695_v20  ;;  %v7230_v60 = vrot.slane %v7208_v41, %v12695_v20  ;;  %v7238_v55 = vcombine.high %v7216_v42, %v7216_v42  ;;  %11139 = vst.sshfl [vmem:[%s12703_s26 + $0x8d] sm:$0x1 pattern:$0x73625140] %v7208_v41 }
 0x6d3   : > { %11140 = vst.sshfl [vmem:[%s12703_s26 + $0xa5] sm:$0x1 pattern:$0x73625140] %v7207_v37  ;;  %v11928_v18 = vpop.eup %11927  ;;  %v7192_v61 = vcombine.high %v7188_v38, %v7188_v38  ;;  %8018 = vst [vmem:[%s12703_s26 + $0x5d] sm:$0x1] %v7191_v21  ;;  %11931 = vtanh.f32 %v8138_v45  ;;  %v7066_v62 = vadd.f32 %v13977_v29, %v6988_v10 }
 0x6d4   : > { %8021 = vst [vmem:[%s12703_s26 + $0x75] sm:$0x1] %v7190_v44  ;;  %v7237_v0 = vrot.slane %v7209_v50, %v12695_v20  ;;  %v7239_v1 = vcombine.high %v7223_v22, %v7223_v22  ;;  %v7240_v6 = vcombine.high %v7230_v60, %v7230_v60  ;;  %8025 = vst [vmem:[%s12703_s26 + $0x95] sm:$0x1] %v7238_v55  ;;  %v6992_v48 = vpop.f32.mrb[88].mxu0  ;;  %8238 = vmatmul.mubr.f32.gmra.mrb[98].mxu1 %v11928_v18 }
 0x6d5   : > { %11141 = vst.sshfl [vmem:[%s12703_s26 + $0xad] sm:$0x1 pattern:$0x73625140] %v7209_v50  ;;  %8022 = vst [vmem:[%s12703_s26 + $0x7d] sm:$0x1] %v7192_v61  ;;  %v7242_v4 = vcombine.high %v7066_v62, %v7066_v62  ;;  %v7249_v9 = vrot.slane %v7066_v62, %v12695_v20  ;;  %v8139_v11 = vadd.f32 %v6992_v48, %v12612_v23  ;;  %8243 = vmatprep.mubr.f32.mxu1 %v12223_v2 }
 0x6d6   : > { %v6994_v51 = vpop.f32.mrb[89].mxu0  ;;  %v7241_v13 = vcombine.high %v7237_v0, %v7237_v0  ;;  %8026 = vst [vmem:[%s12703_s26 + $0x9d] sm:$0x1] %v7240_v6  ;;  %8029 = vst [vmem:[%s12703_s26 + $0xb5] sm:$0x1] %v7239_v1 }
 0x6d7   : > { %v7067_v56 = vadd.f32 %v13977_v29, %v6994_v51  ;;  %v11930_v16 = vpop.eup %11929  ;;  %v7256_v19 = vrot.slane %v7242_v4, %v12695_v20  ;;  %v7257_v30 = vcombine.high %v7249_v9, %v7249_v9  ;;  %v7265_v5 = vrot.slane %v7249_v9, %v12695_v20  ;;  %11142 = vst.sshfl [vmem:[%s12703_s26 + $0xc5] sm:$0x1 pattern:$0x73625140] %v7249_v9 }
 0x6d8   : > { %11933 = vtanh.f32 %v8139_v11  ;;  %8030 = vst [vmem:[%s12703_s26 + $0xbd] sm:$0x1] %v7241_v13  ;;  %8244 = vmatmul.mubr.f32.gmra.mrb[100].mxu1 %v11930_v16 }
 0x6d9   : > { %v7291_v24 = vcombine.high %v7067_v56, %v7067_v56  ;;  %v7298_v3 = vrot.slane %v7067_v56, %v12695_v20  ;;  %v7258_v25 = vcombine.high %v7256_v19, %v7256_v19  ;;  %v7272_v14 = vrot.slane %v7256_v19, %v12695_v20  ;;  %11143 = vst.sshfl [vmem:[%s12703_s26 + $0xcd] sm:$0x1 pattern:$0x73625140] %v7257_v30 }
 0x6da   : > { %v7279_v26 = vrot.slane %v7257_v30, %v12695_v20  ;;  %v7287_v27 = vcombine.high %v7265_v5, %v7265_v5  ;;  %11144 = vst.sshfl [vmem:[%s12703_s26 + $0xe5] sm:$0x1 pattern:$0x73625140] %v7256_v19  ;;  %8249 = vmatprep.mubr.f32.mxu1 %v12223_v2 }
 0x6db   : > { %v7305_v31 = vrot.slane %v7291_v24, %v12695_v20  ;;  %v7306_v15 = vcombine.high %v7298_v3, %v7298_v3  ;;  %v7314_v32 = vrot.slane %v7298_v3, %v12695_v20  ;;  %11146 = vst.sshfl [vmem:[%s12703_s26 + $0x105] sm:$0x1 pattern:$0x73625140] %v7298_v3  ;;  %v6998_v54 = vpop.f32.mrb[90].mxu0  ;;  %v7286_v34 = vrot.slane %v7258_v25, %v12695_v20 }
 0x6dc   : > { %v7288_v35 = vcombine.high %v7272_v14, %v7272_v14  ;;  %v7289_v36 = vcombine.high %v7279_v26, %v7279_v26  ;;  %8033 = vst [vmem:[%s12703_s26 + $0xd5] sm:$0x1] %v7287_v27  ;;  %11145 = vst.sshfl [vmem:[%s12703_s26 + $0xed] sm:$0x1 pattern:$0x73625140] %v7258_v25  ;;  %v8140_v57 = vadd.f32 %v6998_v54, %v12620_v28 }
 0x6dd   : > { %v7000_v39 = vpop.f32.mrb[91].mxu0  ;;  %v7307_v37 = vcombine.high %v7305_v31, %v7305_v31  ;;  %v7321_v41 = vrot.slane %v7305_v31, %v12695_v20  ;;  %v7328_v42 = vrot.slane %v7306_v15, %v12695_v20  ;;  %v7336_v49 = vcombine.high %v7314_v32, %v7314_v32  ;;  %11147 = vst.sshfl [vmem:[%s12703_s26 + $0x10d] sm:$0x1 pattern:$0x73625140] %v7306_v15  ;;  %v11932_v38 = vpop.eup %11931 }
 0x6de   : > { %11148 = vst.sshfl [vmem:[%s12703_s26 + $0x125] sm:$0x1 pattern:$0x73625140] %v7305_v31  ;;  %v7290_v44 = vcombine.high %v7286_v34, %v7286_v34  ;;  %8034 = vst [vmem:[%s12703_s26 + $0xdd] sm:$0x1] %v7289_v36  ;;  %11935 = vtanh.f32 %v8140_v57  ;;  %v7068_v21 = vadd.f32 %v13977_v29, %v7000_v39  ;;  %8250 = vmatmul.mubr.f32.gmra.mrb[102].mxu1 %v11932_v38 }
 0x6df   : > { %8037 = vst [vmem:[%s12703_s26 + $0xf5] sm:$0x1] %v7288_v35  ;;  %v7335_v45 = vrot.slane %v7307_v37, %v12695_v20  ;;  %v7337_v10 = vcombine.high %v7321_v41, %v7321_v41  ;;  %v7338_v50 = vcombine.high %v7328_v42, %v7328_v42  ;;  %8041 = vst [vmem:[%s12703_s26 + $0x115] sm:$0x1] %v7336_v49  ;;  %8255 = vmatprep.mubr.f32.mxu1 %v12223_v2 }
 0x6e0   : > { %11149 = vst.sshfl [vmem:[%s12703_s26 + $0x12d] sm:$0x1 pattern:$0x73625140] %v7307_v37  ;;  %v7004_v22 = vpop.f32.mrb[92].mxu0  ;;  %v7340_v60 = vcombine.high %v7068_v21, %v7068_v21  ;;  %v7347_v55 = vrot.slane %v7068_v21, %v12695_v20 }
 0x6e1   : > { %8038 = vst [vmem:[%s12703_s26 + $0xfd] sm:$0x1] %v7290_v44  ;;  %v8141_v18 = vadd.f32 %v7004_v22, %v12626_v33  ;;  %v7006_v61 = vpop.f32.mrb[93].mxu0  ;;  %v7339_v62 = vcombine.high %v7335_v45, %v7335_v45  ;;  %8042 = vst [vmem:[%s12703_s26 + $0x11d] sm:$0x1] %v7338_v50 }
 0x6e2   : > { %8045 = vst [vmem:[%s12703_s26 + $0x135] sm:$0x1] %v7337_v10  ;;  %v7069_v0 = vadd.f32 %v13977_v29, %v7006_v61  ;;  %v11934_v1 = vpop.eup %11933  ;;  %v7354_v6 = vrot.slane %v7340_v60, %v12695_v20  ;;  %v7355_v48 = vcombine.high %v7347_v55, %v7347_v55  ;;  %v7363_v4 = vrot.slane %v7347_v55, %v12695_v20 }
 0x6e3   : > { %11150 = vst.sshfl [vmem:[%s12703_s26 + $0x145] sm:$0x1 pattern:$0x73625140] %v7347_v55  ;;  %11937 = vtanh.f32 %v8141_v18  ;;  %8046 = vst [vmem:[%s12703_s26 + $0x13d] sm:$0x1] %v7339_v62  ;;  %8256 = vmatmul.mubr.f32.gmra.mrb[104].mxu1 %v11934_v1 }
 0x6e4   : > { %v7389_v9 = vcombine.high %v7069_v0, %v7069_v0  ;;  %v7396_v11 = vrot.slane %v7069_v0, %v12695_v20  ;;  %v7356_v51 = vcombine.high %v7354_v6, %v7354_v6  ;;  %v7370_v13 = vrot.slane %v7354_v6, %v12695_v20  ;;  %11151 = vst.sshfl [vmem:[%s12703_s26 + $0x14d] sm:$0x1 pattern:$0x73625140] %v7355_v48 }
 0x6e5   : > { %v7377_v56 = vrot.slane %v7355_v48, %v12695_v20  ;;  %v7385_v16 = vcombine.high %v7363_v4, %v7363_v4  ;;  %11152 = vst.sshfl [vmem:[%s12703_s26 + $0x165] sm:$0x1 pattern:$0x73625140] %v7354_v6  ;;  %8261 = vmatprep.mubr.f32.mxu1 %v12223_v2 }
 0x6e6   : > { %v7403_v19 = vrot.slane %v7389_v9, %v12695_v20  ;;  %v7404_v30 = vcombine.high %v7396_v11, %v7396_v11  ;;  %v7412_v5 = vrot.slane %v7396_v11, %v12695_v20  ;;  %11154 = vst.sshfl [vmem:[%s12703_s26 + $0x185] sm:$0x1 pattern:$0x73625140] %v7396_v11  ;;  %v7010_v24 = vpop.f32.mrb[94].mxu0  ;;  %v7384_v3 = vrot.slane %v7356_v51, %v12695_v20 }
 0x6e7   : > { %v7386_v25 = vcombine.high %v7370_v13, %v7370_v13  ;;  %v7387_v14 = vcombine.high %v7377_v56, %v7377_v56  ;;  %8049 = vst [vmem:[%s12703_s26 + $0x155] sm:$0x1] %v7385_v16  ;;  %11153 = vst.sshfl [vmem:[%s12703_s26 + $0x16d] sm:$0x1 pattern:$0x73625140] %v7356_v51  ;;  %v8142_v26 = vadd.f32 %v7010_v24, %v12634_v40 }
 0x6e8   : > { %v7012_v27 = vpop.f32.mrb[95].mxu0  ;;  %v7405_v31 = vcombine.high %v7403_v19, %v7403_v19  ;;  %v7419_v15 = vrot.slane %v7403_v19, %v12695_v20  ;;  %v7426_v32 = vrot.slane %v7404_v30, %v12695_v20  ;;  %v7434_v54 = vcombine.high %v7412_v5, %v7412_v5  ;;  %11155 = vst.sshfl [vmem:[%s12703_s26 + $0x18d] sm:$0x1 pattern:$0x73625140] %v7404_v30  ;;  %v11936_v34 = vpop.eup %11935 }
 0x6e9   : > { %11156 = vst.sshfl [vmem:[%s12703_s26 + $0x1a5] sm:$0x1 pattern:$0x73625140] %v7403_v19  ;;  %v7388_v35 = vcombine.high %v7384_v3, %v7384_v3  ;;  %8050 = vst [vmem:[%s12703_s26 + $0x15d] sm:$0x1] %v7387_v14  ;;  %11939 = vtanh.f32 %v8142_v26  ;;  %v7070_v36 = vadd.f32 %v13977_v29, %v7012_v27  ;;  %8262 = vmatmul.mubr.f32.gmra.mrb[106].mxu1 %v11936_v34 }
 0x6ea   : > { %8053 = vst [vmem:[%s12703_s26 + $0x175] sm:$0x1] %v7386_v25  ;;  %v7433_v57 = vrot.slane %v7405_v31, %v12695_v20  ;;  %v7435_v39 = vcombine.high %v7419_v15, %v7419_v15  ;;  %v7436_v37 = vcombine.high %v7426_v32, %v7426_v32  ;;  %8057 = vst [vmem:[%s12703_s26 + $0x195] sm:$0x1] %v7434_v54  ;;  %8267 = vmatprep.mubr.f32.mxu1 %v12223_v2  ;;  %v14290_v25 = vld [vmem:[#allocation10] ss:$0 sm:$0xff] }
 0x6eb   : > { %11157 = vst.sshfl [vmem:[%s12703_s26 + $0x1ad] sm:$0x1 pattern:$0x73625140] %v7405_v31  ;;  %v7016_v41 = vpop.f32.mrb[96].mxu0  ;;  %v7438_v42 = vcombine.high %v7070_v36, %v7070_v36  ;;  %v7445_v49 = vrot.slane %v7070_v36, %v12695_v20 }
 0x6ec   : > { %8054 = vst [vmem:[%s12703_s26 + $0x17d] sm:$0x1] %v7388_v35  ;;  %v8143_v38 = vadd.f32 %v7016_v41, %v12640_v43  ;;  %v7018_v44 = vpop.f32.mrb[97].mxu0  ;;  %v7437_v21 = vcombine.high %v7433_v57, %v7433_v57  ;;  %8058 = vst [vmem:[%s12703_s26 + $0x19d] sm:$0x1] %v7436_v37 }
 0x6ed   : > { %8061 = vst [vmem:[%s12703_s26 + $0x1b5] sm:$0x1] %v7435_v39  ;;  %v7071_v45 = vadd.f32 %v13977_v29, %v7018_v44  ;;  %v11938_v10 = vpop.eup %11937  ;;  %v7452_v50 = vrot.slane %v7438_v42, %v12695_v20  ;;  %v7453_v22 = vcombine.high %v7445_v49, %v7445_v49  ;;  %v7461_v60 = vrot.slane %v7445_v49, %v12695_v20 }
 0x6ee   : > { %11158 = vst.sshfl [vmem:[%s12703_s26 + $0x1c5] sm:$0x1 pattern:$0x73625140] %v7445_v49  ;;  %11941 = vtanh.f32 %v8143_v38  ;;  %8062 = vst [vmem:[%s12703_s26 + $0x1bd] sm:$0x1] %v7437_v21  ;;  %8268 = vmatmul.mubr.f32.gmra.mrb[108].mxu1 %v11938_v10 }
 0x6ef   : > { %v7487_v55 = vcombine.high %v7071_v45, %v7071_v45  ;;  %v7494_v18 = vrot.slane %v7071_v45, %v12695_v20  ;;  %v7454_v61 = vcombine.high %v7452_v50, %v7452_v50  ;;  %v7468_v29 = vrot.slane %v7452_v50, %v12695_v20  ;;  %11159 = vst.sshfl [vmem:[%s12703_s26 + $0x1cd] sm:$0x1 pattern:$0x73625140] %v7453_v22 }
 0x6f0   : > { %v7475_v62 = vrot.slane %v7453_v22, %v12695_v20  ;;  %v7483_v0 = vcombine.high %v7461_v60, %v7461_v60  ;;  %11160 = vst.sshfl [vmem:[%s12703_s26 + $0x1e5] sm:$0x1 pattern:$0x73625140] %v7452_v50  ;;  %8273 = vmatprep.mubr.f32.mxu1 %v12223_v2 }
 0x6f1   : > { %v7501_v1 = vrot.slane %v7487_v55, %v12695_v20  ;;  %v7502_v6 = vcombine.high %v7494_v18, %v7494_v18  ;;  %v7510_v48 = vrot.slane %v7494_v18, %v12695_v20  ;;  %11162 = vst.sshfl [vmem:[%s12703_s26 + $0x205] sm:$0x1 pattern:$0x73625140] %v7494_v18  ;;  %v7022_v4 = vpop.f32.mrb[98].mxu0  ;;  %v7482_v9 = vrot.slane %v7454_v61, %v12695_v20 }
 0x6f2   : > { %v7484_v11 = vcombine.high %v7468_v29, %v7468_v29  ;;  %v7485_v51 = vcombine.high %v7475_v62, %v7475_v62  ;;  %8065 = vst [vmem:[%s12703_s26 + $0x1d5] sm:$0x1] %v7483_v0  ;;  %11161 = vst.sshfl [vmem:[%s12703_s26 + $0x1ed] sm:$0x1 pattern:$0x73625140] %v7454_v61  ;;  %v8144_v13 = vadd.f32 %v7022_v4, %v12648_v46 }
 0x6f3   : > { %v7024_v56 = vpop.f32.mrb[99].mxu0  ;;  %v7503_v16 = vcombine.high %v7501_v1, %v7501_v1  ;;  %v7517_v19 = vrot.slane %v7501_v1, %v12695_v20  ;;  %v7524_v30 = vrot.slane %v7502_v6, %v12695_v20  ;;  %v7532_v5 = vcombine.high %v7510_v48, %v7510_v48  ;;  %11163 = vst.sshfl [vmem:[%s12703_s26 + $0x20d] sm:$0x1 pattern:$0x73625140] %v7502_v6  ;;  %v11940_v24 = vpop.eup %11939 }
 0x6f4   : > { %11164 = vst.sshfl [vmem:[%s12703_s26 + $0x225] sm:$0x1 pattern:$0x73625140] %v7501_v1  ;;  %v7486_v3 = vcombine.high %v7482_v9, %v7482_v9  ;;  %8066 = vst [vmem:[%s12703_s26 + $0x1dd] sm:$0x1] %v7485_v51  ;;  %11943 = vtanh.f32 %v8144_v13  ;;  %v7072_v14 = vadd.f32 %v14290_v25, %v7024_v56  ;;  %8274 = vmatmul.mubr.f32.gmra.mrb[110].mxu1 %v11940_v24 }
 0x6f5   : > { %8069 = vst [vmem:[%s12703_s26 + $0x1f5] sm:$0x1] %v7484_v11  ;;  %v7531_v26 = vrot.slane %v7503_v16, %v12695_v20  ;;  %v7533_v27 = vcombine.high %v7517_v19, %v7517_v19  ;;  %v7534_v31 = vcombine.high %v7524_v30, %v7524_v30  ;;  %8073 = vst [vmem:[%s12703_s26 + $0x215] sm:$0x1] %v7532_v5  ;;  %8279 = vmatprep.mubr.f32.mxu1 %v12223_v2 }
 0x6f6   : > { %11165 = vst.sshfl [vmem:[%s12703_s26 + $0x22d] sm:$0x1 pattern:$0x73625140] %v7503_v16  ;;  %v7028_v15 = vpop.f32.mrb[100].mxu0  ;;  %v7536_v32 = vcombine.high %v7072_v14, %v7072_v14  ;;  %v7543_v54 = vrot.slane %v7072_v14, %v12695_v20 }
 0x6f7   : > { %8070 = vst [vmem:[%s12703_s26 + $0x1fd] sm:$0x1] %v7486_v3  ;;  %v8145_v34 = vadd.f32 %v7028_v15, %v12654_v47  ;;  %v7030_v35 = vpop.f32.mrb[101].mxu0  ;;  %v7535_v36 = vcombine.high %v7531_v26, %v7531_v26  ;;  %8074 = vst [vmem:[%s12703_s26 + $0x21d] sm:$0x1] %v7534_v31 }
 0x6f8   : > { %8077 = vst [vmem:[%s12703_s26 + $0x235] sm:$0x1] %v7533_v27  ;;  %v7073_v57 = vadd.f32 %v14290_v25, %v7030_v35  ;;  %v11942_v39 = vpop.eup %11941  ;;  %v7550_v37 = vrot.slane %v7536_v32, %v12695_v20  ;;  %v7551_v41 = vcombine.high %v7543_v54, %v7543_v54  ;;  %v7559_v42 = vrot.slane %v7543_v54, %v12695_v20 }
 0x6f9   : > { %11166 = vst.sshfl [vmem:[%s12703_s26 + $0x245] sm:$0x1 pattern:$0x73625140] %v7543_v54  ;;  %11945 = vtanh.f32 %v8145_v34  ;;  %8078 = vst [vmem:[%s12703_s26 + $0x23d] sm:$0x1] %v7535_v36  ;;  %8280 = vmatmul.mubr.f32.gmra.mrb[112].mxu1 %v11942_v39 }
 0x6fa   : > { %v7585_v49 = vcombine.high %v7073_v57, %v7073_v57  ;;  %v7592_v38 = vrot.slane %v7073_v57, %v12695_v20  ;;  %v7552_v44 = vcombine.high %v7550_v37, %v7550_v37  ;;  %v7566_v21 = vrot.slane %v7550_v37, %v12695_v20  ;;  %11167 = vst.sshfl [vmem:[%s12703_s26 + $0x24d] sm:$0x1 pattern:$0x73625140] %v7551_v41  ;;  %v7034_v55 = vpop.f32.mrb[102].mxu0 }
 0x6fb   : > { %v7573_v45 = vrot.slane %v7551_v41, %v12695_v20  ;;  %v7581_v10 = vcombine.high %v7559_v42, %v7559_v42  ;;  %11168 = vst.sshfl [vmem:[%s12703_s26 + $0x265] sm:$0x1 pattern:$0x73625140] %v7550_v37  ;;  %8285 = vmatprep.mubr.f32.mxu1 %v12223_v2  ;;  %v8146_v62 = vadd.f32 %v7034_v55, %v12662_v52  ;;  %v7036_v0 = vpop.f32.mrb[103].mxu0 }
 0x6fc   : > { %v7599_v50 = vrot.slane %v7585_v49, %v12695_v20  ;;  %v7600_v22 = vcombine.high %v7592_v38, %v7592_v38  ;;  %v7608_v60 = vrot.slane %v7592_v38, %v12695_v20  ;;  %11170 = vst.sshfl [vmem:[%s12703_s26 + $0x285] sm:$0x1 pattern:$0x73625140] %v7592_v38  ;;  %v7580_v18 = vrot.slane %v7552_v44, %v12695_v20 }
 0x6fd   : > { %v7582_v61 = vcombine.high %v7566_v21, %v7566_v21  ;;  %v7583_v29 = vcombine.high %v7573_v45, %v7573_v45  ;;  %8081 = vst [vmem:[%s12703_s26 + $0x255] sm:$0x1] %v7581_v10  ;;  %11169 = vst.sshfl [vmem:[%s12703_s26 + $0x26d] sm:$0x1 pattern:$0x73625140] %v7552_v44  ;;  %11947 = vtanh.f32 %v8146_v62  ;;  %v7074_v51 = vadd.f32 %v14290_v25, %v7036_v0 }
 0x6fe   : > { %v7601_v1 = vcombine.high %v7599_v50, %v7599_v50  ;;  %v7615_v6 = vrot.slane %v7599_v50, %v12695_v20  ;;  %v7622_v48 = vrot.slane %v7600_v22, %v12695_v20  ;;  %v7630_v4 = vcombine.high %v7608_v60, %v7608_v60  ;;  %11171 = vst.sshfl [vmem:[%s12703_s26 + $0x28d] sm:$0x1 pattern:$0x73625140] %v7600_v22  ;;  %v11944_v9 = vpop.eup %11943 }
 0x6ff   : > { %11172 = vst.sshfl [vmem:[%s12703_s26 + $0x2a5] sm:$0x1 pattern:$0x73625140] %v7599_v50  ;;  %v7584_v11 = vcombine.high %v7580_v18, %v7580_v18  ;;  %8082 = vst [vmem:[%s12703_s26 + $0x25d] sm:$0x1] %v7583_v29  ;;  %8286 = vmatmul.mubr.f32.gmra.mrb[114].mxu1 %v11944_v9  ;;  %v7634_v30 = vcombine.high %v7074_v51, %v7074_v51  ;;  %v7641_v5 = vrot.slane %v7074_v51, %v12695_v20 }
 0x700   : > { %8085 = vst [vmem:[%s12703_s26 + $0x275] sm:$0x1] %v7582_v61  ;;  %v7629_v13 = vrot.slane %v7601_v1, %v12695_v20  ;;  %v7631_v56 = vcombine.high %v7615_v6, %v7615_v6  ;;  %v7632_v16 = vcombine.high %v7622_v48, %v7622_v48  ;;  %8089 = vst [vmem:[%s12703_s26 + $0x295] sm:$0x1] %v7630_v4  ;;  %v7040_v19 = vpop.f32.mrb[104].mxu0  ;;  %8291 = vmatprep.mubr.f32.mxu1 %v12223_v2 }
 0x701   : > { %11173 = vst.sshfl [vmem:[%s12703_s26 + $0x2ad] sm:$0x1 pattern:$0x73625140] %v7601_v1  ;;  %8086 = vst [vmem:[%s12703_s26 + $0x27d] sm:$0x1] %v7584_v11  ;;  %v8147_v24 = vadd.f32 %v7040_v19, %v12668_v53  ;;  %v7648_v31 = vrot.slane %v7634_v30, %v12695_v20  ;;  %v7649_v15 = vcombine.high %v7641_v5, %v7641_v5 }
 0x702   : > { %v7042_v3 = vpop.f32.mrb[105].mxu0  ;;  %v7633_v14 = vcombine.high %v7629_v13, %v7629_v13  ;;  %8090 = vst [vmem:[%s12703_s26 + $0x29d] sm:$0x1] %v7632_v16  ;;  %8093 = vst [vmem:[%s12703_s26 + $0x2b5] sm:$0x1] %v7631_v56  ;;  %v7657_v32 = vrot.slane %v7641_v5, %v12695_v20 }
 0x703   : > { %v7075_v26 = vadd.f32 %v14290_v25, %v7042_v3  ;;  %v11946_v27 = vpop.eup %11945  ;;  %11174 = vst.sshfl [vmem:[%s12703_s26 + $0x2c5] sm:$0x1 pattern:$0x73625140] %v7641_v5  ;;  %11949 = vtanh.f32 %v8147_v24  ;;  %v7046_v35 = vpop.f32.mrb[106].mxu0  ;;  %v7650_v36 = vcombine.high %v7648_v31, %v7648_v31  ;;  %v7664_v57 = vrot.slane %v7648_v31, %v12695_v20 }
 0x704   : > { %8094 = vst [vmem:[%s12703_s26 + $0x2bd] sm:$0x1] %v7633_v14  ;;  %8292 = vmatmul.mubr.f32.gmra.mrb[116].mxu1 %v11946_v27  ;;  %v7671_v39 = vrot.slane %v7649_v15, %v12695_v20  ;;  %v7679_v37 = vcombine.high %v7657_v32, %v7657_v32  ;;  %11175 = vst.sshfl [vmem:[%s12703_s26 + $0x2cd] sm:$0x1 pattern:$0x73625140] %v7649_v15  ;;  %v8148_v44 = vadd.f32 %v7046_v35, %v12674_v58 }
 0x705   : > { %v7683_v54 = vcombine.high %v7075_v26, %v7075_v26  ;;  %v7690_v34 = vrot.slane %v7075_v26, %v12695_v20  ;;  %11176 = vst.sshfl [vmem:[%s12703_s26 + $0x2e5] sm:$0x1 pattern:$0x73625140] %v7648_v31  ;;  %v7048_v41 = vpop.f32.mrb[107].mxu0  ;;  %8297 = vmatprep.mubr.f32.mxu1 %v12223_v2  ;;  %v7678_v21 = vrot.slane %v7650_v36, %v12695_v20 }
 0x706   : > { %v7680_v45 = vcombine.high %v7664_v57, %v7664_v57  ;;  %v7681_v10 = vcombine.high %v7671_v39, %v7671_v39  ;;  %8097 = vst [vmem:[%s12703_s26 + $0x2d5] sm:$0x1] %v7679_v37  ;;  %11177 = vst.sshfl [vmem:[%s12703_s26 + $0x2ed] sm:$0x1 pattern:$0x73625140] %v7650_v36  ;;  %v7076_v50 = vadd.f32 %v14290_v25, %v7048_v41  ;;  %11951 = vtanh.f32 %v8148_v44 }
 0x707   : > { %v7697_v42 = vrot.slane %v7683_v54, %v12695_v20  ;;  %v7698_v49 = vcombine.high %v7690_v34, %v7690_v34  ;;  %v7706_v38 = vrot.slane %v7690_v34, %v12695_v20  ;;  %11178 = vst.sshfl [vmem:[%s12703_s26 + $0x305] sm:$0x1 pattern:$0x73625140] %v7690_v34  ;;  %v11948_v29 = vpop.eup %11947  ;;  %v7682_v62 = vcombine.high %v7678_v21, %v7678_v21 }
 0x708   : > { %v7052_v61 = vpop.f32.mrb[108].mxu0  ;;  %8098 = vst [vmem:[%s12703_s26 + $0x2dd] sm:$0x1] %v7681_v10  ;;  %8101 = vst [vmem:[%s12703_s26 + $0x2f5] sm:$0x1] %v7680_v45  ;;  %v7732_v0 = vcombine.high %v7076_v50, %v7076_v50  ;;  %v7739_v1 = vrot.slane %v7076_v50, %v12695_v20  ;;  %8298 = vmatmul.mubr.f32.gmra.mrb[118].mxu1 %v11948_v29 }
 0x709   : > { %v7699_v22 = vcombine.high %v7697_v42, %v7697_v42  ;;  %v7713_v60 = vrot.slane %v7697_v42, %v12695_v20  ;;  %v7720_v55 = vrot.slane %v7698_v49, %v12695_v20  ;;  %v7728_v18 = vcombine.high %v7706_v38, %v7706_v38  ;;  %11179 = vst.sshfl [vmem:[%s12703_s26 + $0x30d] sm:$0x1 pattern:$0x73625140] %v7698_v49  ;;  %v7054_v6 = vpop.f32.mrb[109].mxu0 }
 0x70a   : > { %11180 = vst.sshfl [vmem:[%s12703_s26 + $0x325] sm:$0x1 pattern:$0x73625140] %v7697_v42  ;;  %v8149_v11 = vadd.f32 %v7052_v61, %v12678_v59  ;;  %8102 = vst [vmem:[%s12703_s26 + $0x2fd] sm:$0x1] %v7682_v62  ;;  %v7746_v51 = vrot.slane %v7732_v0, %v12695_v20  ;;  %v7747_v13 = vcombine.high %v7739_v1, %v7739_v1  ;;  %8303 = vmatprep.mubr.f32.mxu1 %v12223_v2 }
 0x70b   : > { %v7727_v48 = vrot.slane %v7699_v22, %v12695_v20  ;;  %v7729_v4 = vcombine.high %v7713_v60, %v7713_v60  ;;  %v7730_v9 = vcombine.high %v7720_v55, %v7720_v55  ;;  %8105 = vst [vmem:[%s12703_s26 + $0x315] sm:$0x1] %v7728_v18  ;;  %11181 = vst.sshfl [vmem:[%s12703_s26 + $0x32d] sm:$0x1 pattern:$0x73625140] %v7699_v22 }
 0x70c   : > { %v7755_v56 = vrot.slane %v7739_v1, %v12695_v20  ;;  %11182 = vst.sshfl [vmem:[%s12703_s26 + $0x345] sm:$0x1 pattern:$0x73625140] %v7739_v1  ;;  %v7077_v16 = vadd.f32 %v14290_v25, %v7054_v6  ;;  %11953 = vtanh.f32 %v8149_v11  ;;  %v7748_v24 = vcombine.high %v7746_v51, %v7746_v51 }
 0x70d   : > { %v7731_v19 = vcombine.high %v7727_v48, %v7727_v48  ;;  %8106 = vst [vmem:[%s12703_s26 + $0x31d] sm:$0x1] %v7730_v9  ;;  %8109 = vst [vmem:[%s12703_s26 + $0x335] sm:$0x1] %v7729_v4  ;;  %v7058_v30 = vpop.f32.mrb[110].mxu0  ;;  %v11950_v5 = vpop.eup %11949  ;;  %v7762_v3 = vrot.slane %v7746_v51, %v12695_v20  ;;  %v7769_v14 = vrot.slane %v7747_v13, %v12695_v20 }
 0x70e   : > { %v7777_v26 = vcombine.high %v7755_v56, %v7755_v56  ;;  %11183 = vst.sshfl [vmem:[%s12703_s26 + $0x34d] sm:$0x1 pattern:$0x73625140] %v7747_v13  ;;  %v7060_v27 = vpop.f32.mrb[111].mxu0  ;;  %v7781_v31 = vcombine.high %v7077_v16, %v7077_v16  ;;  %v7788_v15 = vrot.slane %v7077_v16, %v12695_v20  ;;  %v8150_v32 = vadd.f32 %v7058_v30, %v12684_v63 }
 0x70f   : > { %11184 = vst.sshfl [vmem:[%s12703_s26 + $0x365] sm:$0x1 pattern:$0x73625140] %v7746_v51  ;;  %8110 = vst [vmem:[%s12703_s26 + $0x33d] sm:$0x1] %v7731_v19  ;;  %v7078_v54 = vadd.f32 %v14290_v25, %v7060_v27  ;;  %8304 = vmatmul.mubr.f32.gmra.mrb[120].mxu1 %v11950_v5  ;;  %v7776_v34 = vrot.slane %v7748_v24, %v12695_v20  ;;  %v7778_v35 = vcombine.high %v7762_v3, %v7762_v3 }
 0x710   : > { %v7779_v36 = vcombine.high %v7769_v14, %v7769_v14  ;;  %8113 = vst [vmem:[%s12703_s26 + $0x355] sm:$0x1] %v7777_v26  ;;  %11185 = vst.sshfl [vmem:[%s12703_s26 + $0x36d] sm:$0x1 pattern:$0x73625140] %v7748_v24  ;;  %8309 = vmatprep.mubr.f32.mxu1 %v12223_v2  ;;  %v7795_v57 = vrot.slane %v7781_v31, %v12695_v20  ;;  %v7796_v39 = vcombine.high %v7788_v15, %v7788_v15  ;;  %v11952_v10 = vpop.eup %11951 }
 0x711   : > { %v7804_v37 = vrot.slane %v7788_v15, %v12695_v20  ;;  %11186 = vst.sshfl [vmem:[%s12703_s26 + $0x385] sm:$0x1 pattern:$0x73625140] %v7788_v15  ;;  %11955 = vtanh.f32 %v8150_v32  ;;  %v7780_v41 = vcombine.high %v7776_v34, %v7776_v34  ;;  %8117 = vst [vmem:[%s12703_s26 + $0x375] sm:$0x1] %v7778_v35  ;;  %v7830_v42 = vcombine.high %v7078_v54, %v7078_v54 }
 0x712   : > { %8114 = vst [vmem:[%s12703_s26 + $0x35d] sm:$0x1] %v7779_v36  ;;  %v7837_v49 = vrot.slane %v7078_v54, %v12695_v20  ;;  %v7797_v38 = vcombine.high %v7795_v57, %v7795_v57  ;;  %v7811_v44 = vrot.slane %v7795_v57, %v12695_v20  ;;  %v7818_v21 = vrot.slane %v7796_v39, %v12695_v20 }
 0x713   : > { %v7826_v45 = vcombine.high %v7804_v37, %v7804_v37  ;;  %11187 = vst.sshfl [vmem:[%s12703_s26 + $0x38d] sm:$0x1 pattern:$0x73625140] %v7796_v39  ;;  %8118 = vst [vmem:[%s12703_s26 + $0x37d] sm:$0x1] %v7780_v41  ;;  %v7844_v50 = vrot.slane %v7830_v42, %v12695_v20  ;;  %8310 = vmatmul.mubr.f32.gmra.mrb[122].mxu1 %v11952_v10 }
 0x714   : > { %11188 = vst.sshfl [vmem:[%s12703_s26 + $0x3a5] sm:$0x1 pattern:$0x73625140] %v7795_v57  ;;  %v7845_v22 = vcombine.high %v7837_v49, %v7837_v49  ;;  %v7853_v60 = vrot.slane %v7837_v49, %v12695_v20  ;;  %v7825_v55 = vrot.slane %v7797_v38, %v12695_v20  ;;  %v7827_v18 = vcombine.high %v7811_v44, %v7811_v44 }
 0x715   : > { %11190 = vst.sshfl [vmem:[%s12703_s26 + $0x3c5] sm:$0x1 pattern:$0x73625140] %v7837_v49  ;;  %v7828_v61 = vcombine.high %v7818_v21, %v7818_v21  ;;  %8121 = vst [vmem:[%s12703_s26 + $0x395] sm:$0x1] %v7826_v45  ;;  %v7846_v29 = vcombine.high %v7844_v50, %v7844_v50  ;;  %v7860_v62 = vrot.slane %v7844_v50, %v12695_v20  ;;  %8315 = vmatprep.mubr.f32.mxu1 %v12223_v2 }
 0x716   : > { %11189 = vst.sshfl [vmem:[%s12703_s26 + $0x3ad] sm:$0x1 pattern:$0x73625140] %v7797_v38  ;;  %v7867_v0 = vrot.slane %v7845_v22, %v12695_v20  ;;  %v7875_v1 = vcombine.high %v7853_v60, %v7853_v60  ;;  %v11954_v6 = vpop.eup %11953  ;;  %v7829_v48 = vcombine.high %v7825_v55, %v7825_v55  ;;  %8125 = vst [vmem:[%s12703_s26 + $0x3b5] sm:$0x1] %v7827_v18 }
 0x717   : > { %11191 = vst.sshfl [vmem:[%s12703_s26 + $0x3cd] sm:$0x1 pattern:$0x73625140] %v7845_v22  ;;  %8122 = vst [vmem:[%s12703_s26 + $0x39d] sm:$0x1] %v7828_v61  ;;  %v7874_v4 = vrot.slane %v7846_v29, %v12695_v20  ;;  %v7876_v9 = vcombine.high %v7860_v62, %v7860_v62  ;;  %8316 = vmatmul.mubr.f32.gmra.mrb[124].mxu1 %v11954_v6 }
 0x718   : > { %11192 = vst.sshfl [vmem:[%s12703_s26 + $0x3e5] sm:$0x1 pattern:$0x73625140] %v7844_v50  ;;  %v7877_v11 = vcombine.high %v7867_v0, %v7867_v0  ;;  %8129 = vst [vmem:[%s12703_s26 + $0x3d5] sm:$0x1] %v7875_v1  ;;  %8321 = vmatprep.mubr.f32.mxu1 %v12223_v2 }
 0x719   : > { %11193 = vst.sshfl [vmem:[%s12703_s26 + $0x3ed] sm:$0x1 pattern:$0x73625140] %v7846_v29  ;;  %8126 = vst [vmem:[%s12703_s26 + $0x3bd] sm:$0x1] %v7829_v48  ;;  %v7878_v51 = vcombine.high %v7874_v4, %v7874_v4 }
 0x71a   : > { %8130 = vst [vmem:[%s12703_s26 + $0x3dd] sm:$0x1] %v7877_v11  ;;  %8133 = vst [vmem:[%s12703_s26 + $0x3f5] sm:$0x1] %v7876_v9 }
 0x71b   : > { %v11956_v13 = vpop.eup %11955  ;;  %8134 = vst [vmem:[%s12703_s26 + $0x3fd] sm:$0x1] %v7878_v51 }
 0x71c   : > { %8322 = vmatmul.mubr.f32.gmra.mrb[126].mxu1 %v11956_v13 }
 0x7a2   : > { %v8233_v56 = vpop.f32.mrb[96].mxu1 }
 0x7a3   : > { %v9400_v16 = vadd.f32 %v8233_v56, %v12597_v7  ;;  %v8235_v19 = vpop.f32.mrb[97].mxu1 }
 0x7a4   : > { %v8328_v30 = vadd.f32 %v14290_v25, %v8235_v19 }
 0x7a5   : > { %11957 = vtanh.f32 %v9400_v16 }
 0x7a6   : > { %v8360_v5 = vcombine.high %v8328_v30, %v8328_v30  ;;  %v8367_v24 = vrot.slane %v8328_v30, %v12695_v20 }
 0x7a7   : > { %v8239_v3 = vpop.f32.mrb[98].mxu1 }
 0x7a8   : > { %v9401_v14 = vadd.f32 %v8239_v3, %v12600_v8  ;;  %v8241_v26 = vpop.f32.mrb[99].mxu1  ;;  %v8374_v27 = vrot.slane %v8360_v5, %v12695_v20  ;;  %v8375_v31 = vcombine.high %v8367_v24, %v8367_v24  ;;  %v8383_v15 = vrot.slane %v8367_v24, %v12695_v20  ;;  %11194 = vst.sshfl [vmem:[%s12703_s26 + $0x6] sm:$0x1 pattern:$0x73625140] %v8367_v24 }
 0x7a9   : > { %v8329_v7 = vadd.f32 %v14290_v25, %v8241_v26 }
 0x7aa   : > { %11959 = vtanh.f32 %v9401_v14  ;;  %v8376_v32 = vcombine.high %v8374_v27, %v8374_v27  ;;  %v8390_v54 = vrot.slane %v8374_v27, %v12695_v20  ;;  %v8397_v34 = vrot.slane %v8375_v31, %v12695_v20  ;;  %11195 = vst.sshfl [vmem:[%s12703_s26 + $0xe] sm:$0x1 pattern:$0x73625140] %v8375_v31 }
 0x7ab   : > { %v8405_v35 = vcombine.high %v8383_v15, %v8383_v15  ;;  %11196 = vst.sshfl [vmem:[%s12703_s26 + $0x26] sm:$0x1 pattern:$0x73625140] %v8374_v27  ;;  %v8245_v8 = vpop.f32.mrb[100].mxu1  ;;  %v8409_v36 = vcombine.high %v8329_v7, %v8329_v7  ;;  %v8416_v57 = vrot.slane %v8329_v7, %v12695_v20 }
 0x7ac   : > { %v9402_v39 = vadd.f32 %v8245_v8, %v12604_v12  ;;  %v8247_v37 = vpop.f32.mrb[101].mxu1  ;;  %v8404_v41 = vrot.slane %v8376_v32, %v12695_v20  ;;  %v8406_v42 = vcombine.high %v8390_v54, %v8390_v54  ;;  %v8407_v49 = vcombine.high %v8397_v34, %v8397_v34  ;;  %11197 = vst.sshfl [vmem:[%s12703_s26 + $0x2e] sm:$0x1 pattern:$0x73625140] %v8376_v32 }
 0x7ad   : > { %9274 = vst [vmem:[%s12703_s26 + $0x16] sm:$0x1] %v8405_v35  ;;  %v8330_v38 = vadd.f32 %v14290_v25, %v8247_v37  ;;  %v8423_v44 = vrot.slane %v8409_v36, %v12695_v20  ;;  %v8424_v21 = vcombine.high %v8416_v57, %v8416_v57  ;;  %v8432_v45 = vrot.slane %v8416_v57, %v12695_v20 }
 0x7ae   : > { %11198 = vst.sshfl [vmem:[%s12703_s26 + $0x46] sm:$0x1 pattern:$0x73625140] %v8416_v57  ;;  %11961 = vtanh.f32 %v9402_v39  ;;  %v8408_v12 = vcombine.high %v8404_v41, %v8404_v41  ;;  %9275 = vst [vmem:[%s12703_s26 + $0x1e] sm:$0x1] %v8407_v49 }
 0x7af   : > { %9278 = vst [vmem:[%s12703_s26 + $0x36] sm:$0x1] %v8406_v42  ;;  %v8458_v10 = vcombine.high %v8330_v38, %v8330_v38  ;;  %v8465_v50 = vrot.slane %v8330_v38, %v12695_v20  ;;  %v11958_v22 = vpop.eup %11957  ;;  %v8425_v60 = vcombine.high %v8423_v44, %v8423_v44  ;;  %v8439_v55 = vrot.slane %v8423_v44, %v12695_v20 }
 0x7b0   : > { %v8446_v18 = vrot.slane %v8424_v21, %v12695_v20  ;;  %v8454_v61 = vcombine.high %v8432_v45, %v8432_v45  ;;  %11199 = vst.sshfl [vmem:[%s12703_s26 + $0x4e] sm:$0x1 pattern:$0x73625140] %v8424_v21  ;;  %9279 = vst [vmem:[%s12703_s26 + $0x3e] sm:$0x1] %v8408_v12  ;;  %9497 = vmatmul.mubr.f32.vlgmr.msra.gmra.mrb[112].mxu0 %v11958_v22 }
 0x7b1   : > { %11200 = vst.sshfl [vmem:[%s12703_s26 + $0x66] sm:$0x1 pattern:$0x73625140] %v8423_v44  ;;  %v8472_v29 = vrot.slane %v8458_v10, %v12695_v20  ;;  %v8473_v62 = vcombine.high %v8465_v50, %v8465_v50  ;;  %v8481_v0 = vrot.slane %v8465_v50, %v12695_v20  ;;  %v8251_v1 = vpop.f32.mrb[102].mxu1  ;;  %v8453_v6 = vrot.slane %v8425_v60, %v12695_v20 }
 0x7b2   : > { %11202 = vst.sshfl [vmem:[%s12703_s26 + $0x86] sm:$0x1 pattern:$0x73625140] %v8465_v50  ;;  %v8455_v48 = vcombine.high %v8439_v55, %v8439_v55  ;;  %v8456_v4 = vcombine.high %v8446_v18, %v8446_v18  ;;  %9282 = vst [vmem:[%s12703_s26 + $0x56] sm:$0x1] %v8454_v61  ;;  %v9403_v9 = vadd.f32 %v8251_v1, %v12609_v17  ;;  %9501 = vmatprep.mubr.f32.mxu0 %v12223_v2 }
 0x7b3   : > { %11201 = vst.sshfl [vmem:[%s12703_s26 + $0x6e] sm:$0x1 pattern:$0x73625140] %v8425_v60  ;;  %v8253_v11 = vpop.f32.mrb[103].mxu1  ;;  %v8474_v51 = vcombine.high %v8472_v29, %v8472_v29  ;;  %v8488_v13 = vrot.slane %v8472_v29, %v12695_v20  ;;  %v8495_v56 = vrot.slane %v8473_v62, %v12695_v20  ;;  %v8503_v16 = vcombine.high %v8481_v0, %v8481_v0 }
 0x7b4   : > { %11203 = vst.sshfl [vmem:[%s12703_s26 + $0x8e] sm:$0x1 pattern:$0x73625140] %v8473_v62  ;;  %v11960_v19 = vpop.eup %11959  ;;  %v8457_v30 = vcombine.high %v8453_v6, %v8453_v6  ;;  %9283 = vst [vmem:[%s12703_s26 + $0x5e] sm:$0x1] %v8456_v4  ;;  %11963 = vtanh.f32 %v9403_v9  ;;  %v8331_v17 = vadd.f32 %v14290_v25, %v8253_v11 }
 0x7b5   : > { %11204 = vst.sshfl [vmem:[%s12703_s26 + $0xa6] sm:$0x1 pattern:$0x73625140] %v8472_v29  ;;  %9286 = vst [vmem:[%s12703_s26 + $0x76] sm:$0x1] %v8455_v48  ;;  %v8502_v5 = vrot.slane %v8474_v51, %v12695_v20  ;;  %v8504_v24 = vcombine.high %v8488_v13, %v8488_v13  ;;  %v8505_v3 = vcombine.high %v8495_v56, %v8495_v56  ;;  %9502 = vmatmul.mubr.f32.gmra.mrb[114].mxu0 %v11960_v19 }
 0x7b6   : > { %9290 = vst [vmem:[%s12703_s26 + $0x96] sm:$0x1] %v8503_v16  ;;  %11205 = vst.sshfl [vmem:[%s12703_s26 + $0xae] sm:$0x1 pattern:$0x73625140] %v8474_v51  ;;  %v8507_v26 = vcombine.high %v8331_v17, %v8331_v17  ;;  %v8514_v27 = vrot.slane %v8331_v17, %v12695_v20  ;;  %9506 = vmatprep.mubr.f32.mxu0 %v12223_v2 }
 0x7b7   : > { %v8257_v14 = vpop.f32.mrb[104].mxu1  ;;  %9287 = vst [vmem:[%s12703_s26 + $0x7e] sm:$0x1] %v8457_v30  ;;  %v8506_v7 = vcombine.high %v8502_v5, %v8502_v5  ;;  %9291 = vst [vmem:[%s12703_s26 + $0x9e] sm:$0x1] %v8505_v3 }
 0x7b8   : > { %v9404_v31 = vadd.f32 %v8257_v14, %v12612_v23  ;;  %v8259_v15 = vpop.f32.mrb[105].mxu1  ;;  %9294 = vst [vmem:[%s12703_s26 + $0xb6] sm:$0x1] %v8504_v24  ;;  %v11962_v54 = vpop.eup %11961  ;;  %v8521_v34 = vrot.slane %v8507_v26, %v12695_v20  ;;  %v8522_v35 = vcombine.high %v8514_v27, %v8514_v27  ;;  %v8530_v8 = vrot.slane %v8514_v27, %v12695_v20 }
 0x7b9   : > { %v8332_v32 = vadd.f32 %v14290_v25, %v8259_v15  ;;  %11206 = vst.sshfl [vmem:[%s12703_s26 + $0xc6] sm:$0x1 pattern:$0x73625140] %v8514_v27  ;;  %9295 = vst [vmem:[%s12703_s26 + $0xbe] sm:$0x1] %v8506_v7  ;;  %9507 = vmatmul.mubr.f32.gmra.mrb[116].mxu0 %v11962_v54 }
 0x7ba   : > { %11965 = vtanh.f32 %v9404_v31  ;;  %v8523_v57 = vcombine.high %v8521_v34, %v8521_v34  ;;  %v8537_v39 = vrot.slane %v8521_v34, %v12695_v20  ;;  %v8544_v37 = vrot.slane %v8522_v35, %v12695_v20  ;;  %11207 = vst.sshfl [vmem:[%s12703_s26 + $0xce] sm:$0x1 pattern:$0x73625140] %v8522_v35  ;;  %9511 = vmatprep.mubr.f32.mxu0 %v12223_v2 }
 0x7bb   : > { %v8556_v23 = vcombine.high %v8332_v32, %v8332_v32  ;;  %v8563_v36 = vrot.slane %v8332_v32, %v12695_v20  ;;  %v8552_v41 = vcombine.high %v8530_v8, %v8530_v8  ;;  %11208 = vst.sshfl [vmem:[%s12703_s26 + $0xe6] sm:$0x1 pattern:$0x73625140] %v8521_v34 }
 0x7bc   : > { %v8263_v44 = vpop.f32.mrb[106].mxu1  ;;  %v8551_v21 = vrot.slane %v8523_v57, %v12695_v20  ;;  %v8553_v45 = vcombine.high %v8537_v39, %v8537_v39  ;;  %v8554_v12 = vcombine.high %v8544_v37, %v8544_v37  ;;  %11209 = vst.sshfl [vmem:[%s12703_s26 + $0xee] sm:$0x1 pattern:$0x73625140] %v8523_v57 }
 0x7bd   : > { %v8570_v42 = vrot.slane %v8556_v23, %v12695_v20  ;;  %v8571_v49 = vcombine.high %v8563_v36, %v8563_v36  ;;  %v8579_v38 = vrot.slane %v8563_v36, %v12695_v20  ;;  %11210 = vst.sshfl [vmem:[%s12703_s26 + $0x106] sm:$0x1 pattern:$0x73625140] %v8563_v36  ;;  %9298 = vst [vmem:[%s12703_s26 + $0xd6] sm:$0x1] %v8552_v41 }
 0x7be   : > { %v9405_v10 = vadd.f32 %v8263_v44, %v12620_v28  ;;  %v8265_v50 = vpop.f32.mrb[107].mxu1  ;;  %v11964_v61 = vpop.eup %11963  ;;  %v8555_v29 = vcombine.high %v8551_v21, %v8551_v21  ;;  %9299 = vst [vmem:[%s12703_s26 + $0xde] sm:$0x1] %v8554_v12  ;;  %9302 = vst [vmem:[%s12703_s26 + $0xf6] sm:$0x1] %v8553_v45 }
 0x7bf   : > { %v8572_v22 = vcombine.high %v8570_v42, %v8570_v42  ;;  %v8586_v60 = vrot.slane %v8570_v42, %v12695_v20  ;;  %v8593_v55 = vrot.slane %v8571_v49, %v12695_v20  ;;  %v8601_v18 = vcombine.high %v8579_v38, %v8579_v38  ;;  %11211 = vst.sshfl [vmem:[%s12703_s26 + $0x10e] sm:$0x1 pattern:$0x73625140] %v8571_v49 }
 0x7c0   : > { %11212 = vst.sshfl [vmem:[%s12703_s26 + $0x126] sm:$0x1 pattern:$0x73625140] %v8570_v42  ;;  %11967 = vtanh.f32 %v9405_v10  ;;  %v8333_v28 = vadd.f32 %v14290_v25, %v8265_v50  ;;  %9512 = vmatmul.mubr.f32.gmra.mrb[118].mxu0 %v11964_v61  ;;  %9303 = vst [vmem:[%s12703_s26 + $0xfe] sm:$0x1] %v8555_v29 }
 0x7c1   : > { %v8600_v62 = vrot.slane %v8572_v22, %v12695_v20  ;;  %v8602_v0 = vcombine.high %v8586_v60, %v8586_v60  ;;  %v8603_v1 = vcombine.high %v8593_v55, %v8593_v55  ;;  %9306 = vst [vmem:[%s12703_s26 + $0x116] sm:$0x1] %v8601_v18  ;;  %11213 = vst.sshfl [vmem:[%s12703_s26 + $0x12e] sm:$0x1 pattern:$0x73625140] %v8572_v22  ;;  %9516 = vmatprep.mubr.f32.mxu0 %v12223_v2 }
 0x7c2   : > { %v8269_v6 = vpop.f32.mrb[108].mxu1  ;;  %v8605_v48 = vcombine.high %v8333_v28, %v8333_v28  ;;  %v8612_v4 = vrot.slane %v8333_v28, %v12695_v20 }
 0x7c3   : > { %v9406_v9 = vadd.f32 %v8269_v6, %v12626_v33  ;;  %v8271_v11 = vpop.f32.mrb[109].mxu1  ;;  %v8604_v51 = vcombine.high %v8600_v62, %v8600_v62  ;;  %9307 = vst [vmem:[%s12703_s26 + $0x11e] sm:$0x1] %v8603_v1  ;;  %9310 = vst [vmem:[%s12703_s26 + $0x136] sm:$0x1] %v8602_v0 }
 0x7c4   : > { %v8334_v13 = vadd.f32 %v14290_v25, %v8271_v11  ;;  %v11966_v56 = vpop.eup %11965  ;;  %v8619_v16 = vrot.slane %v8605_v48, %v12695_v20  ;;  %v8620_v19 = vcombine.high %v8612_v4, %v8612_v4  ;;  %v8628_v30 = vrot.slane %v8612_v4, %v12695_v20  ;;  %11214 = vst.sshfl [vmem:[%s12703_s26 + $0x146] sm:$0x1 pattern:$0x73625140] %v8612_v4 }
 0x7c5   : > { %11969 = vtanh.f32 %v9406_v9  ;;  %9311 = vst [vmem:[%s12703_s26 + $0x13e] sm:$0x1] %v8604_v51  ;;  %9517 = vmatmul.mubr.f32.gmra.mrb[120].mxu0 %v11966_v56 }
 0x7c6   : > { %v8654_v33 = vcombine.high %v8334_v13, %v8334_v13  ;;  %v8661_v17 = vrot.slane %v8334_v13, %v12695_v20  ;;  %v8621_v5 = vcombine.high %v8619_v16, %v8619_v16  ;;  %v8635_v24 = vrot.slane %v8619_v16, %v12695_v20  ;;  %11215 = vst.sshfl [vmem:[%s12703_s26 + $0x14e] sm:$0x1 pattern:$0x73625140] %v8620_v19 }
 0x7c7   : > { %v8642_v3 = vrot.slane %v8620_v19, %v12695_v20  ;;  %v8650_v14 = vcombine.high %v8628_v30, %v8628_v30  ;;  %11216 = vst.sshfl [vmem:[%s12703_s26 + $0x166] sm:$0x1 pattern:$0x73625140] %v8619_v16  ;;  %9521 = vmatprep.mubr.f32.mxu0 %v12223_v2  ;;  %v8275_v15 = vpop.f32.mrb[110].mxu1 }
 0x7c8   : > { %v8668_v26 = vrot.slane %v8654_v33, %v12695_v20  ;;  %v8669_v27 = vcombine.high %v8661_v17, %v8661_v17  ;;  %v8677_v31 = vrot.slane %v8661_v17, %v12695_v20  ;;  %11218 = vst.sshfl [vmem:[%s12703_s26 + $0x186] sm:$0x1 pattern:$0x73625140] %v8661_v17  ;;  %v8649_v7 = vrot.slane %v8621_v5, %v12695_v20  ;;  %v8277_v35 = vpop.f32.mrb[111].mxu1 }
 0x7c9   : > { %v8651_v32 = vcombine.high %v8635_v24, %v8635_v24  ;;  %v8652_v54 = vcombine.high %v8642_v3, %v8642_v3  ;;  %9314 = vst [vmem:[%s12703_s26 + $0x156] sm:$0x1] %v8650_v14  ;;  %11217 = vst.sshfl [vmem:[%s12703_s26 + $0x16e] sm:$0x1 pattern:$0x73625140] %v8621_v5  ;;  %v9407_v34 = vadd.f32 %v8275_v15, %v12634_v40 }
 0x7ca   : > { %v8670_v8 = vcombine.high %v8668_v26, %v8668_v26  ;;  %v8684_v23 = vrot.slane %v8668_v26, %v12695_v20  ;;  %v8691_v36 = vrot.slane %v8669_v27, %v12695_v20  ;;  %v8699_v57 = vcombine.high %v8677_v31, %v8677_v31  ;;  %11219 = vst.sshfl [vmem:[%s12703_s26 + $0x18e] sm:$0x1 pattern:$0x73625140] %v8669_v27  ;;  %v11968_v39 = vpop.eup %11967 }
 0x7cb   : > { %11220 = vst.sshfl [vmem:[%s12703_s26 + $0x1a6] sm:$0x1 pattern:$0x73625140] %v8668_v26  ;;  %v8653_v37 = vcombine.high %v8649_v7, %v8649_v7  ;;  %9315 = vst [vmem:[%s12703_s26 + $0x15e] sm:$0x1] %v8652_v54  ;;  %11971 = vtanh.f32 %v9407_v34  ;;  %v8335_v40 = vadd.f32 %v14290_v25, %v8277_v35  ;;  %9522 = vmatmul.mubr.f32.gmra.mrb[122].mxu0 %v11968_v39 }
 0x7cc   : > { %9318 = vst [vmem:[%s12703_s26 + $0x176] sm:$0x1] %v8651_v32  ;;  %v8698_v41 = vrot.slane %v8670_v8, %v12695_v20  ;;  %v8700_v42 = vcombine.high %v8684_v23, %v8684_v23  ;;  %v8701_v49 = vcombine.high %v8691_v36, %v8691_v36  ;;  %9322 = vst [vmem:[%s12703_s26 + $0x196] sm:$0x1] %v8699_v57  ;;  %v8281_v38 = vpop.f32.mrb[112].mxu1  ;;  %9526 = vmatprep.mubr.f32.mxu0 %v12223_v2 }
 0x7cd   : > { %11221 = vst.sshfl [vmem:[%s12703_s26 + $0x1ae] sm:$0x1 pattern:$0x73625140] %v8670_v8  ;;  %9319 = vst [vmem:[%s12703_s26 + $0x17e] sm:$0x1] %v8653_v37  ;;  %v8703_v44 = vcombine.high %v8335_v40, %v8335_v40  ;;  %v8710_v21 = vrot.slane %v8335_v40, %v12695_v20  ;;  %v9408_v45 = vadd.f32 %v8281_v38, %v12640_v43 }
 0x7ce   : > { %v8283_v12 = vpop.f32.mrb[113].mxu1  ;;  %v8702_v10 = vcombine.high %v8698_v41, %v8698_v41  ;;  %9323 = vst [vmem:[%s12703_s26 + $0x19e] sm:$0x1] %v8701_v49  ;;  %9326 = vst [vmem:[%s12703_s26 + $0x1b6] sm:$0x1] %v8700_v42 }
 0x7cf   : > { %v8336_v50 = vadd.f32 %v14290_v25, %v8283_v12  ;;  %v11970_v22 = vpop.eup %11969  ;;  %v8717_v60 = vrot.slane %v8703_v44, %v12695_v20  ;;  %v8718_v55 = vcombine.high %v8710_v21, %v8710_v21  ;;  %v8726_v18 = vrot.slane %v8710_v21, %v12695_v20  ;;  %11222 = vst.sshfl [vmem:[%s12703_s26 + $0x1c6] sm:$0x1 pattern:$0x73625140] %v8710_v21 }
 0x7d0   : > { %11973 = vtanh.f32 %v9408_v45  ;;  %9327 = vst [vmem:[%s12703_s26 + $0x1be] sm:$0x1] %v8702_v10  ;;  %9527 = vmatmul.mubr.f32.gmra.mrb[124].mxu0 %v11970_v22 }
 0x7d1   : > { %v8752_v43 = vcombine.high %v8336_v50, %v8336_v50  ;;  %v8759_v61 = vrot.slane %v8336_v50, %v12695_v20  ;;  %v8719_v29 = vcombine.high %v8717_v60, %v8717_v60  ;;  %v8733_v28 = vrot.slane %v8717_v60, %v12695_v20  ;;  %11223 = vst.sshfl [vmem:[%s12703_s26 + $0x1ce] sm:$0x1 pattern:$0x73625140] %v8718_v55 }
 0x7d2   : > { %v8740_v62 = vrot.slane %v8718_v55, %v12695_v20  ;;  %v8748_v0 = vcombine.high %v8726_v18, %v8726_v18  ;;  %11224 = vst.sshfl [vmem:[%s12703_s26 + $0x1e6] sm:$0x1 pattern:$0x73625140] %v8717_v60  ;;  %9531 = vmatprep.mubr.f32.mxu0 %v12223_v2  ;;  %v8287_v4 = vpop.f32.mrb[114].mxu1 }
 0x7d3   : > { %v8766_v1 = vrot.slane %v8752_v43, %v12695_v20  ;;  %v8767_v6 = vcombine.high %v8759_v61, %v8759_v61  ;;  %v8775_v48 = vrot.slane %v8759_v61, %v12695_v20  ;;  %11226 = vst.sshfl [vmem:[%s12703_s26 + $0x206] sm:$0x1 pattern:$0x73625140] %v8759_v61  ;;  %v8747_v9 = vrot.slane %v8719_v29, %v12695_v20  ;;  %v8289_v56 = vpop.f32.mrb[115].mxu1 }
 0x7d4   : > { %v8749_v11 = vcombine.high %v8733_v28, %v8733_v28  ;;  %v8750_v51 = vcombine.high %v8740_v62, %v8740_v62  ;;  %9330 = vst [vmem:[%s12703_s26 + $0x1d6] sm:$0x1] %v8748_v0  ;;  %11225 = vst.sshfl [vmem:[%s12703_s26 + $0x1ee] sm:$0x1 pattern:$0x73625140] %v8719_v29  ;;  %v9409_v13 = vadd.f32 %v8287_v4, %v12648_v46 }
 0x7d5   : > { %v8768_v16 = vcombine.high %v8766_v1, %v8766_v1  ;;  %v8782_v19 = vrot.slane %v8766_v1, %v12695_v20  ;;  %v8789_v30 = vrot.slane %v8767_v6, %v12695_v20  ;;  %v8797_v33 = vcombine.high %v8775_v48, %v8775_v48  ;;  %11227 = vst.sshfl [vmem:[%s12703_s26 + $0x20e] sm:$0x1 pattern:$0x73625140] %v8767_v6  ;;  %v11972_v17 = vpop.eup %11971  ;;  %v14597_v43 = vld [vmem:[#allocation10] ss:$0 sm:$0xff] }
 0x7d6   : > { %11228 = vst.sshfl [vmem:[%s12703_s26 + $0x226] sm:$0x1 pattern:$0x73625140] %v8766_v1  ;;  %v8751_v5 = vcombine.high %v8747_v9, %v8747_v9  ;;  %9331 = vst [vmem:[%s12703_s26 + $0x1de] sm:$0x1] %v8750_v51  ;;  %11975 = vtanh.f32 %v9409_v13  ;;  %v8337_v46 = vadd.f32 %v14290_v25, %v8289_v56  ;;  %9532 = vmatmul.mubr.f32.gmra.mrb[126].mxu0 %v11972_v17 }
 0x7d7   : > { %9334 = vst [vmem:[%s12703_s26 + $0x1f6] sm:$0x1] %v8749_v11  ;;  %v8796_v24 = vrot.slane %v8768_v16, %v12695_v20  ;;  %v8798_v3 = vcombine.high %v8782_v19, %v8782_v19  ;;  %v8799_v14 = vcombine.high %v8789_v30, %v8789_v30  ;;  %9338 = vst [vmem:[%s12703_s26 + $0x216] sm:$0x1] %v8797_v33  ;;  %v8293_v26 = vpop.f32.mrb[116].mxu1  ;;  %9536 = vmatprep.mubr.f32.mxu0 %v12223_v2 }
 0x7d8   : > { %11229 = vst.sshfl [vmem:[%s12703_s26 + $0x22e] sm:$0x1 pattern:$0x73625140] %v8768_v16  ;;  %9335 = vst [vmem:[%s12703_s26 + $0x1fe] sm:$0x1] %v8751_v5  ;;  %v8801_v27 = vcombine.high %v8337_v46, %v8337_v46  ;;  %v8808_v31 = vrot.slane %v8337_v46, %v12695_v20  ;;  %v9410_v15 = vadd.f32 %v8293_v26, %v12654_v47 }
 0x7d9   : > { %v8295_v7 = vpop.f32.mrb[117].mxu1  ;;  %v8800_v32 = vcombine.high %v8796_v24, %v8796_v24  ;;  %9339 = vst [vmem:[%s12703_s26 + $0x21e] sm:$0x1] %v8799_v14  ;;  %9342 = vst [vmem:[%s12703_s26 + $0x236] sm:$0x1] %v8798_v3 }
 0x7da   : > { %v8338_v54 = vadd.f32 %v14290_v25, %v8295_v7  ;;  %v11974_v34 = vpop.eup %11973  ;;  %v8815_v35 = vrot.slane %v8801_v27, %v12695_v20  ;;  %v8816_v8 = vcombine.high %v8808_v31, %v8808_v31  ;;  %v8824_v23 = vrot.slane %v8808_v31, %v12695_v20  ;;  %11230 = vst.sshfl [vmem:[%s12703_s26 + $0x246] sm:$0x1 pattern:$0x73625140] %v8808_v31 }
 0x7db   : > { %11977 = vtanh.f32 %v9410_v15  ;;  %9343 = vst [vmem:[%s12703_s26 + $0x23e] sm:$0x1] %v8800_v32  ;;  %9537 = vmatmul.mubr.f32.gmra.mrb[128].mxu0 %v11974_v34  ;;  %v8299_v49 = vpop.f32.mrb[118].mxu1 }
 0x7dc   : > { %v8850_v47 = vcombine.high %v8338_v54, %v8338_v54  ;;  %v8857_v36 = vrot.slane %v8338_v54, %v12695_v20  ;;  %v8817_v57 = vcombine.high %v8815_v35, %v8815_v35  ;;  %v8831_v25 = vrot.slane %v8815_v35, %v12695_v20  ;;  %11231 = vst.sshfl [vmem:[%s12703_s26 + $0x24e] sm:$0x1 pattern:$0x73625140] %v8816_v8  ;;  %v8301_v12 = vpop.f32.mrb[119].mxu1 }
 0x7dd   : > { %v8838_v39 = vrot.slane %v8816_v8, %v12695_v20  ;;  %v8846_v37 = vcombine.high %v8824_v23, %v8824_v23  ;;  %11232 = vst.sshfl [vmem:[%s12703_s26 + $0x266] sm:$0x1 pattern:$0x73625140] %v8815_v35  ;;  %9541 = vmatprep.mubr.f32.mxu0 %v12223_v2  ;;  %v9411_v45 = vadd.f32 %v8299_v49, %v12662_v52 }
 0x7de   : > { %v8864_v40 = vrot.slane %v8850_v47, %v12695_v20  ;;  %v8865_v41 = vcombine.high %v8857_v36, %v8857_v36  ;;  %v8873_v42 = vrot.slane %v8857_v36, %v12695_v20  ;;  %11234 = vst.sshfl [vmem:[%s12703_s26 + $0x286] sm:$0x1 pattern:$0x73625140] %v8857_v36  ;;  %v8845_v38 = vrot.slane %v8817_v57, %v12695_v20 }
 0x7df   : > { %v8847_v44 = vcombine.high %v8831_v25, %v8831_v25  ;;  %v8848_v21 = vcombine.high %v8838_v39, %v8838_v39  ;;  %9346 = vst [vmem:[%s12703_s26 + $0x256] sm:$0x1] %v8846_v37  ;;  %11233 = vst.sshfl [vmem:[%s12703_s26 + $0x26e] sm:$0x1 pattern:$0x73625140] %v8817_v57  ;;  %11979 = vtanh.f32 %v9411_v45  ;;  %v8339_v52 = vadd.f32 %v14597_v43, %v8301_v12 }
 0x7e0   : > { %v8866_v10 = vcombine.high %v8864_v40, %v8864_v40  ;;  %v8880_v50 = vrot.slane %v8864_v40, %v12695_v20  ;;  %v8887_v22 = vrot.slane %v8865_v41, %v12695_v20  ;;  %v8895_v60 = vcombine.high %v8873_v42, %v8873_v42  ;;  %11235 = vst.sshfl [vmem:[%s12703_s26 + $0x28e] sm:$0x1 pattern:$0x73625140] %v8865_v41  ;;  %v11976_v55 = vpop.eup %11975 }
 0x7e1   : > { %11236 = vst.sshfl [vmem:[%s12703_s26 + $0x2a6] sm:$0x1 pattern:$0x73625140] %v8864_v40  ;;  %v8849_v18 = vcombine.high %v8845_v38, %v8845_v38  ;;  %9347 = vst [vmem:[%s12703_s26 + $0x25e] sm:$0x1] %v8848_v21  ;;  %9542 = vmatmul.mubr.f32.gmra.mrb[130].mxu0 %v11976_v55  ;;  %v8899_v0 = vcombine.high %v8339_v52, %v8339_v52  ;;  %v8906_v1 = vrot.slane %v8339_v52, %v12695_v20 }
 0x7e2   : > { %9350 = vst [vmem:[%s12703_s26 + $0x276] sm:$0x1] %v8847_v44  ;;  %v8894_v61 = vrot.slane %v8866_v10, %v12695_v20  ;;  %v8896_v29 = vcombine.high %v8880_v50, %v8880_v50  ;;  %v8897_v28 = vcombine.high %v8887_v22, %v8887_v22  ;;  %9354 = vst [vmem:[%s12703_s26 + $0x296] sm:$0x1] %v8895_v60  ;;  %v8305_v62 = vpop.f32.mrb[120].mxu1  ;;  %9546 = vmatprep.mubr.f32.mxu0 %v12223_v2 }
 0x7e3   : > { %11237 = vst.sshfl [vmem:[%s12703_s26 + $0x2ae] sm:$0x1 pattern:$0x73625140] %v8866_v10  ;;  %9351 = vst [vmem:[%s12703_s26 + $0x27e] sm:$0x1] %v8849_v18  ;;  %v9412_v6 = vadd.f32 %v8305_v62, %v12668_v53  ;;  %v8913_v51 = vrot.slane %v8899_v0, %v12695_v20  ;;  %v8914_v13 = vcombine.high %v8906_v1, %v8906_v1 }
 0x7e4   : > { %v8307_v48 = vpop.f32.mrb[121].mxu1  ;;  %v8898_v4 = vcombine.high %v8894_v61, %v8894_v61  ;;  %9355 = vst [vmem:[%s12703_s26 + $0x29e] sm:$0x1] %v8897_v28  ;;  %9358 = vst [vmem:[%s12703_s26 + $0x2b6] sm:$0x1] %v8896_v29  ;;  %v8922_v56 = vrot.slane %v8906_v1, %v12695_v20 }
 0x7e5   : > { %v8340_v9 = vadd.f32 %v14597_v43, %v8307_v48  ;;  %v11978_v11 = vpop.eup %11977  ;;  %11238 = vst.sshfl [vmem:[%s12703_s26 + $0x2c6] sm:$0x1 pattern:$0x73625140] %v8906_v1  ;;  %11981 = vtanh.f32 %v9412_v6  ;;  %v8915_v19 = vcombine.high %v8913_v51, %v8913_v51  ;;  %v8929_v30 = vrot.slane %v8913_v51, %v12695_v20 }
 0x7e6   : > { %9359 = vst [vmem:[%s12703_s26 + $0x2be] sm:$0x1] %v8898_v4  ;;  %9547 = vmatmul.mubr.f32.gmra.mrb[132].mxu0 %v11978_v11  ;;  %v8936_v33 = vrot.slane %v8914_v13, %v12695_v20  ;;  %v8944_v17 = vcombine.high %v8922_v56, %v8922_v56  ;;  %11239 = vst.sshfl [vmem:[%s12703_s26 + $0x2ce] sm:$0x1 pattern:$0x73625140] %v8914_v13 }
 0x7e7   : > { %v8948_v53 = vcombine.high %v8340_v9, %v8340_v9  ;;  %v8955_v16 = vrot.slane %v8340_v9, %v12695_v20  ;;  %11240 = vst.sshfl [vmem:[%s12703_s26 + $0x2e6] sm:$0x1 pattern:$0x73625140] %v8913_v51  ;;  %9551 = vmatprep.mubr.f32.mxu0 %v12223_v2  ;;  %v8311_v3 = vpop.f32.mrb[122].mxu1  ;;  %v8943_v14 = vrot.slane %v8915_v19, %v12695_v20 }
 0x7e8   : > { %v8945_v26 = vcombine.high %v8929_v30, %v8929_v30  ;;  %v8946_v27 = vcombine.high %v8936_v33, %v8936_v33  ;;  %9362 = vst [vmem:[%s12703_s26 + $0x2d6] sm:$0x1] %v8944_v17  ;;  %11241 = vst.sshfl [vmem:[%s12703_s26 + $0x2ee] sm:$0x1 pattern:$0x73625140] %v8915_v19  ;;  %v9413_v31 = vadd.f32 %v8311_v3, %v12674_v58 }
 0x7e9   : > { %v8962_v5 = vrot.slane %v8948_v53, %v12695_v20  ;;  %v8963_v46 = vcombine.high %v8955_v16, %v8955_v16  ;;  %v8971_v24 = vrot.slane %v8955_v16, %v12695_v20  ;;  %11242 = vst.sshfl [vmem:[%s12703_s26 + $0x306] sm:$0x1 pattern:$0x73625140] %v8955_v16  ;;  %v8313_v15 = vpop.f32.mrb[123].mxu1  ;;  %v11980_v35 = vpop.eup %11979  ;;  %v8947_v8 = vcombine.high %v8943_v14, %v8943_v14 }
 0x7ea   : > { %9363 = vst [vmem:[%s12703_s26 + $0x2de] sm:$0x1] %v8946_v27  ;;  %9366 = vst [vmem:[%s12703_s26 + $0x2f6] sm:$0x1] %v8945_v26  ;;  %11983 = vtanh.f32 %v9413_v31  ;;  %v8341_v58 = vadd.f32 %v14597_v43, %v8313_v15  ;;  %v8317_v57 = vpop.f32.mrb[124].mxu1  ;;  %9552 = vmatmul.mubr.f32.gmra.mrb[134].mxu0 %v11980_v35 }
 0x7eb   : > { %v8964_v7 = vcombine.high %v8962_v5, %v8962_v5  ;;  %v8978_v32 = vrot.slane %v8962_v5, %v12695_v20  ;;  %v8985_v54 = vrot.slane %v8963_v46, %v12695_v20  ;;  %v8993_v34 = vcombine.high %v8971_v24, %v8971_v24  ;;  %11243 = vst.sshfl [vmem:[%s12703_s26 + $0x30e] sm:$0x1 pattern:$0x73625140] %v8963_v46  ;;  %v8319_v40 = vpop.f32.mrb[125].mxu1 }
 0x7ec   : > { %11244 = vst.sshfl [vmem:[%s12703_s26 + $0x326] sm:$0x1 pattern:$0x73625140] %v8962_v5  ;;  %9367 = vst [vmem:[%s12703_s26 + $0x2fe] sm:$0x1] %v8947_v8  ;;  %v8997_v25 = vcombine.high %v8341_v58, %v8341_v58  ;;  %v9004_v39 = vrot.slane %v8341_v58, %v12695_v20  ;;  %v9414_v37 = vadd.f32 %v8317_v57, %v12678_v59  ;;  %9556 = vmatprep.mubr.f32.mxu0 %v12223_v2 }
 0x7ed   : > { %v8992_v23 = vrot.slane %v8964_v7, %v12695_v20  ;;  %v8994_v47 = vcombine.high %v8978_v32, %v8978_v32  ;;  %v8995_v36 = vcombine.high %v8985_v54, %v8985_v54  ;;  %9370 = vst [vmem:[%s12703_s26 + $0x316] sm:$0x1] %v8993_v34  ;;  %11245 = vst.sshfl [vmem:[%s12703_s26 + $0x32e] sm:$0x1 pattern:$0x73625140] %v8964_v7 }
 0x7ee   : > { %v8342_v42 = vadd.f32 %v14597_v43, %v8319_v40  ;;  %v9011_v38 = vrot.slane %v8997_v25, %v12695_v20  ;;  %v9012_v44 = vcombine.high %v9004_v39, %v9004_v39  ;;  %v9020_v21 = vrot.slane %v9004_v39, %v12695_v20  ;;  %11246 = vst.sshfl [vmem:[%s12703_s26 + $0x346] sm:$0x1 pattern:$0x73625140] %v9004_v39 }
 0x7ef   : > { %v8996_v41 = vcombine.high %v8992_v23, %v8992_v23  ;;  %9371 = vst [vmem:[%s12703_s26 + $0x31e] sm:$0x1] %v8995_v36  ;;  %9374 = vst [vmem:[%s12703_s26 + $0x336] sm:$0x1] %v8994_v47  ;;  %v11982_v49 = vpop.eup %11981  ;;  %11985 = vtanh.f32 %v9414_v37  ;;  %v8323_v12 = vpop.f32.mrb[126].mxu1 }
 0x7f0   : > { %v9046_v59 = vcombine.high %v8342_v42, %v8342_v42  ;;  %v9053_v45 = vrot.slane %v8342_v42, %v12695_v20  ;;  %9557 = vmatmul.mubr.f32.gmra.mrb[136].mxu0 %v11982_v49  ;;  %v9013_v10 = vcombine.high %v9011_v38, %v9011_v38  ;;  %v9027_v50 = vrot.slane %v9011_v38, %v12695_v20  ;;  %v8325_v55 = vpop.f32.mrb[127].mxu1 }
 0x7f1   : > { %9375 = vst [vmem:[%s12703_s26 + $0x33e] sm:$0x1] %v8996_v41  ;;  %v9034_v22 = vrot.slane %v9012_v44, %v12695_v20  ;;  %v9042_v60 = vcombine.high %v9020_v21, %v9020_v21  ;;  %11247 = vst.sshfl [vmem:[%s12703_s26 + $0x34e] sm:$0x1 pattern:$0x73625140] %v9012_v44  ;;  %9561 = vmatprep.mubr.f32.mxu0 %v12223_v2  ;;  %v9415_v29 = vadd.f32 %v8323_v12, %v12684_v63 }
 0x7f2   : > { %11248 = vst.sshfl [vmem:[%s12703_s26 + $0x366] sm:$0x1 pattern:$0x73625140] %v9011_v38  ;;  %v9060_v18 = vrot.slane %v9046_v59, %v12695_v20  ;;  %v9061_v52 = vcombine.high %v9053_v45, %v9053_v45  ;;  %v9069_v61 = vrot.slane %v9053_v45, %v12695_v20  ;;  %v9041_v28 = vrot.slane %v9013_v10, %v12695_v20 }
 0x7f3   : > { %11250 = vst.sshfl [vmem:[%s12703_s26 + $0x386] sm:$0x1 pattern:$0x73625140] %v9053_v45  ;;  %v9043_v62 = vcombine.high %v9027_v50, %v9027_v50  ;;  %v9044_v0 = vcombine.high %v9034_v22, %v9034_v22  ;;  %9378 = vst [vmem:[%s12703_s26 + $0x356] sm:$0x1] %v9042_v60  ;;  %v8343_v1 = vadd.f32 %v14597_v43, %v8325_v55  ;;  %11987 = vtanh.f32 %v9415_v29 }
 0x7f4   : > { %11249 = vst.sshfl [vmem:[%s12703_s26 + $0x36e] sm:$0x1 pattern:$0x73625140] %v9013_v10  ;;  %v9062_v6 = vcombine.high %v9060_v18, %v9060_v18  ;;  %v9076_v48 = vrot.slane %v9060_v18, %v12695_v20  ;;  %v9083_v4 = vrot.slane %v9061_v52, %v12695_v20  ;;  %v9091_v9 = vcombine.high %v9069_v61, %v9069_v61  ;;  %v11984_v63 = vpop.eup %11983 }
 0x7f5   : > { %11251 = vst.sshfl [vmem:[%s12703_s26 + $0x38e] sm:$0x1 pattern:$0x73625140] %v9061_v52  ;;  %v9045_v11 = vcombine.high %v9041_v28, %v9041_v28  ;;  %9379 = vst [vmem:[%s12703_s26 + $0x35e] sm:$0x1] %v9044_v0  ;;  %v9095_v51 = vcombine.high %v8343_v1, %v8343_v1  ;;  %v9102_v13 = vrot.slane %v8343_v1, %v12695_v20  ;;  %9562 = vmatmul.mubr.f32.gmra.mrb[138].mxu0 %v11984_v63 }
 0x7f6   : > { %11252 = vst.sshfl [vmem:[%s12703_s26 + $0x3a6] sm:$0x1 pattern:$0x73625140] %v9060_v18  ;;  %9382 = vst [vmem:[%s12703_s26 + $0x376] sm:$0x1] %v9043_v62  ;;  %v9090_v56 = vrot.slane %v9062_v6, %v12695_v20  ;;  %v9092_v53 = vcombine.high %v9076_v48, %v9076_v48  ;;  %v9093_v16 = vcombine.high %v9083_v4, %v9083_v4  ;;  %9566 = vmatprep.mubr.f32.mxu0 %v12223_v2 }
 0x7f7   : > { %9386 = vst [vmem:[%s12703_s26 + $0x396] sm:$0x1] %v9091_v9  ;;  %11253 = vst.sshfl [vmem:[%s12703_s26 + $0x3ae] sm:$0x1 pattern:$0x73625140] %v9062_v6  ;;  %v9109_v19 = vrot.slane %v9095_v51, %v12695_v20  ;;  %v9110_v30 = vcombine.high %v9102_v13, %v9102_v13  ;;  %v9118_v33 = vrot.slane %v9102_v13, %v12695_v20 }
 0x7f8   : > { %9383 = vst [vmem:[%s12703_s26 + $0x37e] sm:$0x1] %v9045_v11  ;;  %11254 = vst.sshfl [vmem:[%s12703_s26 + $0x3c6] sm:$0x1 pattern:$0x73625140] %v9102_v13  ;;  %v9094_v17 = vcombine.high %v9090_v56, %v9090_v56 }
 0x7f9   : > { %9387 = vst [vmem:[%s12703_s26 + $0x39e] sm:$0x1] %v9093_v16  ;;  %9390 = vst [vmem:[%s12703_s26 + $0x3b6] sm:$0x1] %v9092_v53  ;;  %v11986_v5 = vpop.eup %11985  ;;  %v9111_v46 = vcombine.high %v9109_v19, %v9109_v19  ;;  %v9125_v24 = vrot.slane %v9109_v19, %v12695_v20  ;;  %v9132_v3 = vrot.slane %v9110_v30, %v12695_v20 }
 0x7fa   : > { %v9140_v14 = vcombine.high %v9118_v33, %v9118_v33  ;;  %11255 = vst.sshfl [vmem:[%s12703_s26 + $0x3ce] sm:$0x1 pattern:$0x73625140] %v9110_v30  ;;  %9391 = vst [vmem:[%s12703_s26 + $0x3be] sm:$0x1] %v9094_v17  ;;  %9567 = vmatmul.mubr.f32.gmra.mrb[140].mxu0 %v11986_v5 }
 0x7fb   : > { %11256 = vst.sshfl [vmem:[%s12703_s26 + $0x3e6] sm:$0x1 pattern:$0x73625140] %v9109_v19  ;;  %v9139_v26 = vrot.slane %v9111_v46, %v12695_v20  ;;  %v9141_v27 = vcombine.high %v9125_v24, %v9125_v24  ;;  %v9142_v31 = vcombine.high %v9132_v3, %v9132_v3  ;;  %9571 = vmatprep.mubr.f32.mxu0 %v12223_v2 }
 0x7fc   : > { %9394 = vst [vmem:[%s12703_s26 + $0x3d6] sm:$0x1] %v9140_v14  ;;  %11257 = vst.sshfl [vmem:[%s12703_s26 + $0x3ee] sm:$0x1 pattern:$0x73625140] %v9111_v46 }
 0x7fd   : > { %v9143_v15 = vcombine.high %v9139_v26, %v9139_v26  ;;  %9395 = vst [vmem:[%s12703_s26 + $0x3de] sm:$0x1] %v9142_v31  ;;  %9398 = vst [vmem:[%s12703_s26 + $0x3f6] sm:$0x1] %v9141_v27  ;;  %v11988_v7 = vpop.eup %11987 }
 0x7fe   : > { %9572 = vmatmul.mubr.f32.gmra.mrb[142].mxu0 %v11988_v7 }
 0x7ff   : > { %9399 = vst [vmem:[%s12703_s26 + $0x3fe] sm:$0x1] %v9143_v15 }
 0x883   : > { %v9498_v32 = vpop.f32.mrb[112].mxu0 }
 0x884   : > { %v9499_v54 = vpop.f32.mrb[113].mxu0 }
 0x885   : > { %v9577_v34 = vadd.f32 %v14597_v43, %v9499_v54 }
 0x887   : > { %v9609_v35 = vcombine.high %v9577_v34, %v9577_v34  ;;  %v9616_v8 = vrot.slane %v9577_v34, %v12695_v20 }
 0x888   : > { %v9503_v58 = vpop.f32.mrb[114].mxu0 }
 0x889   : > { %v9504_v23 = vpop.f32.mrb[115].mxu0  ;;  %v9623_v2 = vrot.slane %v9609_v35, %v12695_v20  ;;  %v9624_v47 = vcombine.high %v9616_v8, %v9616_v8  ;;  %v9632_v36 = vrot.slane %v9616_v8, %v12695_v20  ;;  %11258 = vst.sshfl [vmem:[%s12703_s26 + $0x7] sm:$0x1 pattern:$0x73625140] %v9616_v8 }
 0x88a   : > { %v9578_v57 = vadd.f32 %v14597_v43, %v9504_v23 }
 0x88b   : > { %v9625_v25 = vcombine.high %v9623_v2, %v9623_v2  ;;  %v9639_v39 = vrot.slane %v9623_v2, %v12695_v20  ;;  %v9646_v37 = vrot.slane %v9624_v47, %v12695_v20  ;;  %v9654_v40 = vcombine.high %v9632_v36, %v9632_v36  ;;  %11259 = vst.sshfl [vmem:[%s12703_s26 + $0xf] sm:$0x1 pattern:$0x73625140] %v9624_v47 }
 0x88c   : > { %11260 = vst.sshfl [vmem:[%s12703_s26 + $0x27] sm:$0x1 pattern:$0x73625140] %v9623_v2  ;;  %v9508_v41 = vpop.f32.mrb[116].mxu0  ;;  %v9658_v42 = vcombine.high %v9578_v57, %v9578_v57  ;;  %v9665_v49 = vrot.slane %v9578_v57, %v12695_v20 }
 0x88d   : > { %v9509_v38 = vpop.f32.mrb[117].mxu0  ;;  %v9653_v44 = vrot.slane %v9625_v25, %v12695_v20  ;;  %v9655_v21 = vcombine.high %v9639_v39, %v9639_v39  ;;  %v9656_v59 = vcombine.high %v9646_v37, %v9646_v37  ;;  %10523 = vst [vmem:[%s12703_s26 + $0x17] sm:$0x1] %v9654_v40 }
 0x88e   : > { %11261 = vst.sshfl [vmem:[%s12703_s26 + $0x2f] sm:$0x1 pattern:$0x73625140] %v9625_v25  ;;  %v9579_v45 = vadd.f32 %v14597_v43, %v9509_v38  ;;  %v9672_v12 = vrot.slane %v9658_v42, %v12695_v20  ;;  %v9673_v10 = vcombine.high %v9665_v49, %v9665_v49  ;;  %v9681_v50 = vrot.slane %v9665_v49, %v12695_v20 }
 0x88f   : > { %11262 = vst.sshfl [vmem:[%s12703_s26 + $0x47] sm:$0x1 pattern:$0x73625140] %v9665_v49  ;;  %v9657_v22 = vcombine.high %v9653_v44, %v9653_v44  ;;  %10524 = vst [vmem:[%s12703_s26 + $0x1f] sm:$0x1] %v9656_v59 }
 0x890   : > { %10527 = vst [vmem:[%s12703_s26 + $0x37] sm:$0x1] %v9655_v21  ;;  %v9707_v60 = vcombine.high %v9579_v45, %v9579_v45  ;;  %v9714_v55 = vrot.slane %v9579_v45, %v12695_v20  ;;  %v9674_v18 = vcombine.high %v9672_v12, %v9672_v12  ;;  %v9688_v52 = vrot.slane %v9672_v12, %v12695_v20 }
 0x891   : > { %v9695_v61 = vrot.slane %v9673_v10, %v12695_v20  ;;  %v9703_v29 = vcombine.high %v9681_v50, %v9681_v50  ;;  %11263 = vst.sshfl [vmem:[%s12703_s26 + $0x4f] sm:$0x1 pattern:$0x73625140] %v9673_v10  ;;  %10528 = vst [vmem:[%s12703_s26 + $0x3f] sm:$0x1] %v9657_v22 }
 0x892   : > { %11264 = vst.sshfl [vmem:[%s12703_s26 + $0x67] sm:$0x1 pattern:$0x73625140] %v9672_v12  ;;  %v9721_v28 = vrot.slane %v9707_v60, %v12695_v20  ;;  %v9722_v62 = vcombine.high %v9714_v55, %v9714_v55  ;;  %v9730_v0 = vrot.slane %v9714_v55, %v12695_v20  ;;  %v9702_v6 = vrot.slane %v9674_v18, %v12695_v20 }
 0x893   : > { %11266 = vst.sshfl [vmem:[%s12703_s26 + $0x87] sm:$0x1 pattern:$0x73625140] %v9714_v55  ;;  %v9513_v1 = vpop.f32.mrb[118].mxu0  ;;  %v9704_v48 = vcombine.high %v9688_v52, %v9688_v52  ;;  %v9705_v4 = vcombine.high %v9695_v61, %v9695_v61 }
 0x894   : > { %10531 = vst [vmem:[%s12703_s26 + $0x57] sm:$0x1] %v9703_v29  ;;  %11265 = vst.sshfl [vmem:[%s12703_s26 + $0x6f] sm:$0x1 pattern:$0x73625140] %v9674_v18  ;;  %v9723_v63 = vcombine.high %v9721_v28, %v9721_v28  ;;  %v9737_v11 = vrot.slane %v9721_v28, %v12695_v20  ;;  %v9744_v51 = vrot.slane %v9722_v62, %v12695_v20 }
 0x895   : > { %v9514_v9 = vpop.f32.mrb[119].mxu0  ;;  %v9752_v13 = vcombine.high %v9730_v0, %v9730_v0  ;;  %11267 = vst.sshfl [vmem:[%s12703_s26 + $0x8f] sm:$0x1 pattern:$0x73625140] %v9722_v62  ;;  %v9706_v56 = vcombine.high %v9702_v6, %v9702_v6 }
 0x896   : > { %11268 = vst.sshfl [vmem:[%s12703_s26 + $0xa7] sm:$0x1 pattern:$0x73625140] %v9721_v28  ;;  %10532 = vst [vmem:[%s12703_s26 + $0x5f] sm:$0x1] %v9705_v4  ;;  %v9580_v53 = vadd.f32 %v14597_v43, %v9514_v9  ;;  %v9751_v16 = vrot.slane %v9723_v63, %v12695_v20  ;;  %v9753_v19 = vcombine.high %v9737_v11, %v9737_v11 }
 0x897   : > { %10535 = vst [vmem:[%s12703_s26 + $0x77] sm:$0x1] %v9704_v48  ;;  %v9754_v30 = vcombine.high %v9744_v51, %v9744_v51  ;;  %10539 = vst [vmem:[%s12703_s26 + $0x97] sm:$0x1] %v9752_v13 }
 0x898   : > { %11269 = vst.sshfl [vmem:[%s12703_s26 + $0xaf] sm:$0x1 pattern:$0x73625140] %v9723_v63  ;;  %v9518_v33 = vpop.f32.mrb[120].mxu0  ;;  %v9756_v17 = vcombine.high %v9580_v53, %v9580_v53  ;;  %v9763_v5 = vrot.slane %v9580_v53, %v12695_v20  ;;  %v9755_v24 = vcombine.high %v9751_v16, %v9751_v16 }
 0x899   : > { %10536 = vst [vmem:[%s12703_s26 + $0x7f] sm:$0x1] %v9706_v56  ;;  %v9519_v46 = vpop.f32.mrb[121].mxu0  ;;  %10540 = vst [vmem:[%s12703_s26 + $0x9f] sm:$0x1] %v9754_v30 }
 0x89a   : > { %10543 = vst [vmem:[%s12703_s26 + $0xb7] sm:$0x1] %v9753_v19  ;;  %v9581_v3 = vadd.f32 %v14597_v43, %v9519_v46  ;;  %v9770_v14 = vrot.slane %v9756_v17, %v12695_v20  ;;  %v9771_v26 = vcombine.high %v9763_v5, %v9763_v5  ;;  %v9779_v27 = vrot.slane %v9763_v5, %v12695_v20 }
 0x89b   : > { %11270 = vst.sshfl [vmem:[%s12703_s26 + $0xc7] sm:$0x1 pattern:$0x73625140] %v9763_v5  ;;  %10544 = vst [vmem:[%s12703_s26 + $0xbf] sm:$0x1] %v9755_v24 }
 0x89c   : > { %v9805_v31 = vcombine.high %v9581_v3, %v9581_v3  ;;  %v9812_v15 = vrot.slane %v9581_v3, %v12695_v20  ;;  %v9772_v7 = vcombine.high %v9770_v14, %v9770_v14  ;;  %v9786_v32 = vrot.slane %v9770_v14, %v12695_v20  ;;  %11271 = vst.sshfl [vmem:[%s12703_s26 + $0xcf] sm:$0x1 pattern:$0x73625140] %v9771_v26 }
 0x89d   : > { %v9793_v54 = vrot.slane %v9771_v26, %v12695_v20  ;;  %v9801_v34 = vcombine.high %v9779_v27, %v9779_v27  ;;  %11272 = vst.sshfl [vmem:[%s12703_s26 + $0xe7] sm:$0x1 pattern:$0x73625140] %v9770_v14 }
 0x89e   : > { %v9819_v35 = vrot.slane %v9805_v31, %v12695_v20  ;;  %v9820_v8 = vcombine.high %v9812_v15, %v9812_v15  ;;  %v9828_v58 = vrot.slane %v9812_v15, %v12695_v20  ;;  %11274 = vst.sshfl [vmem:[%s12703_s26 + $0x107] sm:$0x1 pattern:$0x73625140] %v9812_v15  ;;  %v9523_v23 = vpop.f32.mrb[122].mxu0  ;;  %v9800_v2 = vrot.slane %v9772_v7, %v12695_v20 }
 0x89f   : > { %v9802_v47 = vcombine.high %v9786_v32, %v9786_v32  ;;  %v9803_v36 = vcombine.high %v9793_v54, %v9793_v54  ;;  %10547 = vst [vmem:[%s12703_s26 + $0xd7] sm:$0x1] %v9801_v34  ;;  %11273 = vst.sshfl [vmem:[%s12703_s26 + $0xef] sm:$0x1 pattern:$0x73625140] %v9772_v7 }
 0x8a0   : > { %v9524_v57 = vpop.f32.mrb[123].mxu0  ;;  %v9821_v25 = vcombine.high %v9819_v35, %v9819_v35  ;;  %v9835_v39 = vrot.slane %v9819_v35, %v12695_v20  ;;  %v9842_v37 = vrot.slane %v9820_v8, %v12695_v20  ;;  %v9850_v40 = vcombine.high %v9828_v58, %v9828_v58  ;;  %11275 = vst.sshfl [vmem:[%s12703_s26 + $0x10f] sm:$0x1 pattern:$0x73625140] %v9820_v8 }
 0x8a1   : > { %11276 = vst.sshfl [vmem:[%s12703_s26 + $0x127] sm:$0x1 pattern:$0x73625140] %v9819_v35  ;;  %v9804_v41 = vcombine.high %v9800_v2, %v9800_v2  ;;  %10548 = vst [vmem:[%s12703_s26 + $0xdf] sm:$0x1] %v9803_v36  ;;  %v9582_v42 = vadd.f32 %v14597_v43, %v9524_v57 }
 0x8a2   : > { %10551 = vst [vmem:[%s12703_s26 + $0xf7] sm:$0x1] %v9802_v47  ;;  %v9849_v49 = vrot.slane %v9821_v25, %v12695_v20  ;;  %v9851_v38 = vcombine.high %v9835_v39, %v9835_v39  ;;  %v9852_v44 = vcombine.high %v9842_v37, %v9842_v37  ;;  %10555 = vst [vmem:[%s12703_s26 + $0x117] sm:$0x1] %v9850_v40 }
 0x8a3   : > { %11277 = vst.sshfl [vmem:[%s12703_s26 + $0x12f] sm:$0x1 pattern:$0x73625140] %v9821_v25  ;;  %v9528_v21 = vpop.f32.mrb[124].mxu0  ;;  %v9854_v59 = vcombine.high %v9582_v42, %v9582_v42  ;;  %v9861_v45 = vrot.slane %v9582_v42, %v12695_v20 }
 0x8a4   : > { %10552 = vst [vmem:[%s12703_s26 + $0xff] sm:$0x1] %v9804_v41  ;;  %v9529_v12 = vpop.f32.mrb[125].mxu0  ;;  %v9853_v10 = vcombine.high %v9849_v49, %v9849_v49  ;;  %10556 = vst [vmem:[%s12703_s26 + $0x11f] sm:$0x1] %v9852_v44 }
 0x8a5   : > { %10559 = vst [vmem:[%s12703_s26 + $0x137] sm:$0x1] %v9851_v38  ;;  %v9583_v50 = vadd.f32 %v14597_v43, %v9529_v12  ;;  %v9868_v22 = vrot.slane %v9854_v59, %v12695_v20  ;;  %v9869_v60 = vcombine.high %v9861_v45, %v9861_v45  ;;  %v9877_v55 = vrot.slane %v9861_v45, %v12695_v20 }
 0x8a6   : > { %11278 = vst.sshfl [vmem:[%s12703_s26 + $0x147] sm:$0x1 pattern:$0x73625140] %v9861_v45  ;;  %10560 = vst [vmem:[%s12703_s26 + $0x13f] sm:$0x1] %v9853_v10 }
 0x8a7   : > { %v9903_v18 = vcombine.high %v9583_v50, %v9583_v50  ;;  %v9910_v52 = vrot.slane %v9583_v50, %v12695_v20  ;;  %v9870_v61 = vcombine.high %v9868_v22, %v9868_v22  ;;  %v9884_v29 = vrot.slane %v9868_v22, %v12695_v20  ;;  %11279 = vst.sshfl [vmem:[%s12703_s26 + $0x14f] sm:$0x1 pattern:$0x73625140] %v9869_v60 }
 0x8a8   : > { %v9891_v28 = vrot.slane %v9869_v60, %v12695_v20  ;;  %v9899_v62 = vcombine.high %v9877_v55, %v9877_v55  ;;  %11280 = vst.sshfl [vmem:[%s12703_s26 + $0x167] sm:$0x1 pattern:$0x73625140] %v9868_v22 }
 0x8a9   : > { %v9917_v0 = vrot.slane %v9903_v18, %v12695_v20  ;;  %v9918_v1 = vcombine.high %v9910_v52, %v9910_v52  ;;  %v9926_v6 = vrot.slane %v9910_v52, %v12695_v20  ;;  %11282 = vst.sshfl [vmem:[%s12703_s26 + $0x187] sm:$0x1 pattern:$0x73625140] %v9910_v52  ;;  %v9533_v48 = vpop.f32.mrb[126].mxu0  ;;  %v9898_v4 = vrot.slane %v9870_v61, %v12695_v20 }
 0x8aa   : > { %v9900_v9 = vcombine.high %v9884_v29, %v9884_v29  ;;  %v9901_v63 = vcombine.high %v9891_v28, %v9891_v28  ;;  %10563 = vst [vmem:[%s12703_s26 + $0x157] sm:$0x1] %v9899_v62  ;;  %11281 = vst.sshfl [vmem:[%s12703_s26 + $0x16f] sm:$0x1 pattern:$0x73625140] %v9870_v61 }
 0x8ab   : > { %v9534_v11 = vpop.f32.mrb[127].mxu0  ;;  %v9919_v51 = vcombine.high %v9917_v0, %v9917_v0  ;;  %v9933_v13 = vrot.slane %v9917_v0, %v12695_v20  ;;  %v9940_v56 = vrot.slane %v9918_v1, %v12695_v20  ;;  %v9948_v53 = vcombine.high %v9926_v6, %v9926_v6  ;;  %11283 = vst.sshfl [vmem:[%s12703_s26 + $0x18f] sm:$0x1 pattern:$0x73625140] %v9918_v1 }
 0x8ac   : > { %11284 = vst.sshfl [vmem:[%s12703_s26 + $0x1a7] sm:$0x1 pattern:$0x73625140] %v9917_v0  ;;  %v9902_v16 = vcombine.high %v9898_v4, %v9898_v4  ;;  %10564 = vst [vmem:[%s12703_s26 + $0x15f] sm:$0x1] %v9901_v63  ;;  %v9584_v19 = vadd.f32 %v14597_v43, %v9534_v11 }
 0x8ad   : > { %10567 = vst [vmem:[%s12703_s26 + $0x177] sm:$0x1] %v9900_v9  ;;  %v9947_v30 = vrot.slane %v9919_v51, %v12695_v20  ;;  %v9949_v33 = vcombine.high %v9933_v13, %v9933_v13  ;;  %v9950_v17 = vcombine.high %v9940_v56, %v9940_v56  ;;  %10571 = vst [vmem:[%s12703_s26 + $0x197] sm:$0x1] %v9948_v53 }
 0x8ae   : > { %11285 = vst.sshfl [vmem:[%s12703_s26 + $0x1af] sm:$0x1 pattern:$0x73625140] %v9919_v51  ;;  %v9538_v5 = vpop.f32.mrb[128].mxu0  ;;  %v9952_v46 = vcombine.high %v9584_v19, %v9584_v19  ;;  %v9959_v24 = vrot.slane %v9584_v19, %v12695_v20 }
 0x8af   : > { %10568 = vst [vmem:[%s12703_s26 + $0x17f] sm:$0x1] %v9902_v16  ;;  %v9539_v3 = vpop.f32.mrb[129].mxu0  ;;  %v9951_v14 = vcombine.high %v9947_v30, %v9947_v30  ;;  %10572 = vst [vmem:[%s12703_s26 + $0x19f] sm:$0x1] %v9950_v17 }
 0x8b0   : > { %10575 = vst [vmem:[%s12703_s26 + $0x1b7] sm:$0x1] %v9949_v33  ;;  %v9585_v26 = vadd.f32 %v14597_v43, %v9539_v3  ;;  %v9966_v27 = vrot.slane %v9952_v46, %v12695_v20  ;;  %v9967_v31 = vcombine.high %v9959_v24, %v9959_v24  ;;  %v9975_v15 = vrot.slane %v9959_v24, %v12695_v20 }
 0x8b1   : > { %11286 = vst.sshfl [vmem:[%s12703_s26 + $0x1c7] sm:$0x1 pattern:$0x73625140] %v9959_v24  ;;  %10576 = vst [vmem:[%s12703_s26 + $0x1bf] sm:$0x1] %v9951_v14 }
 0x8b2   : > { %v10001_v7 = vcombine.high %v9585_v26, %v9585_v26  ;;  %v10008_v32 = vrot.slane %v9585_v26, %v12695_v20  ;;  %v9968_v54 = vcombine.high %v9966_v27, %v9966_v27  ;;  %v9982_v34 = vrot.slane %v9966_v27, %v12695_v20  ;;  %11287 = vst.sshfl [vmem:[%s12703_s26 + $0x1cf] sm:$0x1 pattern:$0x73625140] %v9967_v31 }
 0x8b3   : > { %v9989_v35 = vrot.slane %v9967_v31, %v12695_v20  ;;  %v9997_v8 = vcombine.high %v9975_v15, %v9975_v15  ;;  %11288 = vst.sshfl [vmem:[%s12703_s26 + $0x1e7] sm:$0x1 pattern:$0x73625140] %v9966_v27 }
 0x8b4   : > { %v10015_v58 = vrot.slane %v10001_v7, %v12695_v20  ;;  %v10016_v23 = vcombine.high %v10008_v32, %v10008_v32  ;;  %v10024_v2 = vrot.slane %v10008_v32, %v12695_v20  ;;  %11290 = vst.sshfl [vmem:[%s12703_s26 + $0x207] sm:$0x1 pattern:$0x73625140] %v10008_v32  ;;  %v9543_v47 = vpop.f32.mrb[130].mxu0  ;;  %v9996_v36 = vrot.slane %v9968_v54, %v12695_v20 }
 0x8b5   : > { %v9998_v57 = vcombine.high %v9982_v34, %v9982_v34  ;;  %v9999_v25 = vcombine.high %v9989_v35, %v9989_v35  ;;  %10579 = vst [vmem:[%s12703_s26 + $0x1d7] sm:$0x1] %v9997_v8  ;;  %11289 = vst.sshfl [vmem:[%s12703_s26 + $0x1ef] sm:$0x1 pattern:$0x73625140] %v9968_v54 }
 0x8b6   : > { %v9544_v39 = vpop.f32.mrb[131].mxu0  ;;  %v10017_v37 = vcombine.high %v10015_v58, %v10015_v58  ;;  %v10031_v40 = vrot.slane %v10015_v58, %v12695_v20  ;;  %v10038_v41 = vrot.slane %v10016_v23, %v12695_v20  ;;  %v10046_v42 = vcombine.high %v10024_v2, %v10024_v2  ;;  %11291 = vst.sshfl [vmem:[%s12703_s26 + $0x20f] sm:$0x1 pattern:$0x73625140] %v10016_v23 }
 0x8b7   : > { %11292 = vst.sshfl [vmem:[%s12703_s26 + $0x227] sm:$0x1 pattern:$0x73625140] %v10015_v58  ;;  %v10000_v49 = vcombine.high %v9996_v36, %v9996_v36  ;;  %10580 = vst [vmem:[%s12703_s26 + $0x1df] sm:$0x1] %v9999_v25  ;;  %v9586_v38 = vadd.f32 %v14597_v43, %v9544_v39 }
 0x8b8   : > { %10583 = vst [vmem:[%s12703_s26 + $0x1f7] sm:$0x1] %v9998_v57  ;;  %v10045_v44 = vrot.slane %v10017_v37, %v12695_v20  ;;  %v10047_v21 = vcombine.high %v10031_v40, %v10031_v40  ;;  %v10048_v59 = vcombine.high %v10038_v41, %v10038_v41  ;;  %10587 = vst [vmem:[%s12703_s26 + $0x217] sm:$0x1] %v10046_v42 }
 0x8b9   : > { %11293 = vst.sshfl [vmem:[%s12703_s26 + $0x22f] sm:$0x1 pattern:$0x73625140] %v10017_v37  ;;  %v9548_v45 = vpop.f32.mrb[132].mxu0  ;;  %v10050_v12 = vcombine.high %v9586_v38, %v9586_v38  ;;  %v10057_v10 = vrot.slane %v9586_v38, %v12695_v20 }
 0x8ba   : > { %10584 = vst [vmem:[%s12703_s26 + $0x1ff] sm:$0x1] %v10000_v49  ;;  %v9549_v50 = vpop.f32.mrb[133].mxu0  ;;  %v10049_v22 = vcombine.high %v10045_v44, %v10045_v44  ;;  %10588 = vst [vmem:[%s12703_s26 + $0x21f] sm:$0x1] %v10048_v59 }
 0x8bb   : > { %10591 = vst [vmem:[%s12703_s26 + $0x237] sm:$0x1] %v10047_v21  ;;  %v9587_v60 = vadd.f32 %v14597_v43, %v9549_v50  ;;  %v10064_v55 = vrot.slane %v10050_v12, %v12695_v20  ;;  %v10065_v18 = vcombine.high %v10057_v10, %v10057_v10  ;;  %v10073_v52 = vrot.slane %v10057_v10, %v12695_v20 }
 0x8bc   : > { %11294 = vst.sshfl [vmem:[%s12703_s26 + $0x247] sm:$0x1 pattern:$0x73625140] %v10057_v10  ;;  %10592 = vst [vmem:[%s12703_s26 + $0x23f] sm:$0x1] %v10049_v22 }
 0x8bd   : > { %v10099_v61 = vcombine.high %v9587_v60, %v9587_v60  ;;  %v10106_v29 = vrot.slane %v9587_v60, %v12695_v20  ;;  %v10066_v28 = vcombine.high %v10064_v55, %v10064_v55  ;;  %v10080_v62 = vrot.slane %v10064_v55, %v12695_v20  ;;  %11295 = vst.sshfl [vmem:[%s12703_s26 + $0x24f] sm:$0x1 pattern:$0x73625140] %v10065_v18  ;;  %v9553_v9 = vpop.f32.mrb[134].mxu0 }
 0x8be   : > { %v10087_v0 = vrot.slane %v10065_v18, %v12695_v20  ;;  %v10095_v1 = vcombine.high %v10073_v52, %v10073_v52  ;;  %11296 = vst.sshfl [vmem:[%s12703_s26 + $0x267] sm:$0x1 pattern:$0x73625140] %v10064_v55  ;;  %v9554_v13 = vpop.f32.mrb[135].mxu0 }
 0x8bf   : > { %v10113_v6 = vrot.slane %v10099_v61, %v12695_v20  ;;  %v10114_v48 = vcombine.high %v10106_v29, %v10106_v29  ;;  %v10122_v4 = vrot.slane %v10106_v29, %v12695_v20  ;;  %11298 = vst.sshfl [vmem:[%s12703_s26 + $0x287] sm:$0x1 pattern:$0x73625140] %v10106_v29  ;;  %v10094_v63 = vrot.slane %v10066_v28, %v12695_v20 }
 0x8c0   : > { %v10096_v11 = vcombine.high %v10080_v62, %v10080_v62  ;;  %v10097_v51 = vcombine.high %v10087_v0, %v10087_v0  ;;  %10595 = vst [vmem:[%s12703_s26 + $0x257] sm:$0x1] %v10095_v1  ;;  %11297 = vst.sshfl [vmem:[%s12703_s26 + $0x26f] sm:$0x1 pattern:$0x73625140] %v10066_v28  ;;  %v9588_v33 = vadd.f32 %v14597_v43, %v9554_v13 }
 0x8c1   : > { %v10115_v56 = vcombine.high %v10113_v6, %v10113_v6  ;;  %v10129_v53 = vrot.slane %v10113_v6, %v12695_v20  ;;  %v10136_v16 = vrot.slane %v10114_v48, %v12695_v20  ;;  %v10144_v19 = vcombine.high %v10122_v4, %v10122_v4  ;;  %11299 = vst.sshfl [vmem:[%s12703_s26 + $0x28f] sm:$0x1 pattern:$0x73625140] %v10114_v48 }
 0x8c2   : > { %11300 = vst.sshfl [vmem:[%s12703_s26 + $0x2a7] sm:$0x1 pattern:$0x73625140] %v10113_v6  ;;  %v10098_v30 = vcombine.high %v10094_v63, %v10094_v63  ;;  %10596 = vst [vmem:[%s12703_s26 + $0x25f] sm:$0x1] %v10097_v51  ;;  %v10148_v3 = vcombine.high %v9588_v33, %v9588_v33  ;;  %v10155_v14 = vrot.slane %v9588_v33, %v12695_v20 }
 0x8c3   : > { %10599 = vst [vmem:[%s12703_s26 + $0x277] sm:$0x1] %v10096_v11  ;;  %v10143_v17 = vrot.slane %v10115_v56, %v12695_v20  ;;  %v10145_v5 = vcombine.high %v10129_v53, %v10129_v53  ;;  %v10146_v46 = vcombine.high %v10136_v16, %v10136_v16  ;;  %10603 = vst [vmem:[%s12703_s26 + $0x297] sm:$0x1] %v10144_v19  ;;  %v9558_v24 = vpop.f32.mrb[136].mxu0 }
 0x8c4   : > { %11301 = vst.sshfl [vmem:[%s12703_s26 + $0x2af] sm:$0x1 pattern:$0x73625140] %v10115_v56  ;;  %10600 = vst [vmem:[%s12703_s26 + $0x27f] sm:$0x1] %v10098_v30  ;;  %v10162_v15 = vrot.slane %v10148_v3, %v12695_v20  ;;  %v10163_v7 = vcombine.high %v10155_v14, %v10155_v14  ;;  %v10171_v32 = vrot.slane %v10155_v14, %v12695_v20 }
 0x8c5   : > { %v9559_v26 = vpop.f32.mrb[137].mxu0  ;;  %v10147_v27 = vcombine.high %v10143_v17, %v10143_v17  ;;  %10604 = vst [vmem:[%s12703_s26 + $0x29f] sm:$0x1] %v10146_v46  ;;  %10607 = vst [vmem:[%s12703_s26 + $0x2b7] sm:$0x1] %v10145_v5 }
 0x8c6   : > { %v9589_v31 = vadd.f32 %v14597_v43, %v9559_v26  ;;  %11302 = vst.sshfl [vmem:[%s12703_s26 + $0x2c7] sm:$0x1 pattern:$0x73625140] %v10155_v14  ;;  %v10164_v35 = vcombine.high %v10162_v15, %v10162_v15  ;;  %v10178_v8 = vrot.slane %v10162_v15, %v12695_v20  ;;  %v10185_v58 = vrot.slane %v10163_v7, %v12695_v20 }
 0x8c7   : > { %10608 = vst [vmem:[%s12703_s26 + $0x2bf] sm:$0x1] %v10147_v27  ;;  %v10193_v23 = vcombine.high %v10171_v32, %v10171_v32  ;;  %11303 = vst.sshfl [vmem:[%s12703_s26 + $0x2cf] sm:$0x1 pattern:$0x73625140] %v10163_v7 }
 0x8c8   : > { %v10197_v54 = vcombine.high %v9589_v31, %v9589_v31  ;;  %v10204_v34 = vrot.slane %v9589_v31, %v12695_v20  ;;  %11304 = vst.sshfl [vmem:[%s12703_s26 + $0x2e7] sm:$0x1 pattern:$0x73625140] %v10162_v15  ;;  %v9563_v57 = vpop.f32.mrb[138].mxu0  ;;  %v10192_v25 = vrot.slane %v10164_v35, %v12695_v20  ;;  %v10194_v39 = vcombine.high %v10178_v8, %v10178_v8 }
 0x8c9   : > { %v10195_v37 = vcombine.high %v10185_v58, %v10185_v58  ;;  %10611 = vst [vmem:[%s12703_s26 + $0x2d7] sm:$0x1] %v10193_v23  ;;  %11305 = vst.sshfl [vmem:[%s12703_s26 + $0x2ef] sm:$0x1 pattern:$0x73625140] %v10164_v35 }
 0x8ca   : > { %v10211_v2 = vrot.slane %v10197_v54, %v12695_v20  ;;  %v10212_v47 = vcombine.high %v10204_v34, %v10204_v34  ;;  %v10220_v36 = vrot.slane %v10204_v34, %v12695_v20  ;;  %11306 = vst.sshfl [vmem:[%s12703_s26 + $0x307] sm:$0x1 pattern:$0x73625140] %v10204_v34  ;;  %v9564_v40 = vpop.f32.mrb[139].mxu0  ;;  %v10196_v44 = vcombine.high %v10192_v25, %v10192_v25 }
 0x8cb   : > { %10612 = vst [vmem:[%s12703_s26 + $0x2df] sm:$0x1] %v10195_v37  ;;  %10615 = vst [vmem:[%s12703_s26 + $0x2f7] sm:$0x1] %v10194_v39  ;;  %v9590_v21 = vadd.f32 %v14597_v43, %v9564_v40 }
 0x8cc   : > { %v10213_v41 = vcombine.high %v10211_v2, %v10211_v2  ;;  %v10227_v42 = vrot.slane %v10211_v2, %v12695_v20  ;;  %v10234_v49 = vrot.slane %v10212_v47, %v12695_v20  ;;  %v10242_v38 = vcombine.high %v10220_v36, %v10220_v36  ;;  %11307 = vst.sshfl [vmem:[%s12703_s26 + $0x30f] sm:$0x1 pattern:$0x73625140] %v10212_v47 }
 0x8cd   : > { %11308 = vst.sshfl [vmem:[%s12703_s26 + $0x327] sm:$0x1 pattern:$0x73625140] %v10211_v2  ;;  %v9568_v10 = vpop.f32.mrb[140].mxu0  ;;  %v10246_v50 = vcombine.high %v9590_v21, %v9590_v21  ;;  %v10253_v22 = vrot.slane %v9590_v21, %v12695_v20 }
 0x8ce   : > { %v10241_v59 = vrot.slane %v10213_v41, %v12695_v20  ;;  %v10243_v45 = vcombine.high %v10227_v42, %v10227_v42  ;;  %v10244_v12 = vcombine.high %v10234_v49, %v10234_v49  ;;  %10619 = vst [vmem:[%s12703_s26 + $0x317] sm:$0x1] %v10242_v38  ;;  %11309 = vst.sshfl [vmem:[%s12703_s26 + $0x32f] sm:$0x1 pattern:$0x73625140] %v10213_v41 }
 0x8cf   : > { %10616 = vst [vmem:[%s12703_s26 + $0x2ff] sm:$0x1] %v10196_v44  ;;  %v9569_v60 = vpop.f32.mrb[141].mxu0  ;;  %v10260_v52 = vrot.slane %v10246_v50, %v12695_v20  ;;  %v10261_v61 = vcombine.high %v10253_v22, %v10253_v22  ;;  %v10269_v29 = vrot.slane %v10253_v22, %v12695_v20 }
 0x8d0   : > { %v10245_v55 = vcombine.high %v10241_v59, %v10241_v59  ;;  %10620 = vst [vmem:[%s12703_s26 + $0x31f] sm:$0x1] %v10244_v12  ;;  %10623 = vst [vmem:[%s12703_s26 + $0x337] sm:$0x1] %v10243_v45  ;;  %v9591_v18 = vadd.f32 %v14597_v43, %v9569_v60 }
 0x8d1   : > { %11310 = vst.sshfl [vmem:[%s12703_s26 + $0x347] sm:$0x1 pattern:$0x73625140] %v10253_v22  ;;  %v10262_v0 = vcombine.high %v10260_v52, %v10260_v52  ;;  %v10276_v1 = vrot.slane %v10260_v52, %v12695_v20  ;;  %v10283_v6 = vrot.slane %v10261_v61, %v12695_v20  ;;  %v10291_v48 = vcombine.high %v10269_v29, %v10269_v29  ;;  %v9573_v11 = vpop.f32.mrb[142].mxu0 }
 0x8d2   : > { %10624 = vst [vmem:[%s12703_s26 + $0x33f] sm:$0x1] %v10245_v55  ;;  %v10295_v28 = vcombine.high %v9591_v18, %v9591_v18  ;;  %v10302_v62 = vrot.slane %v9591_v18, %v12695_v20  ;;  %11311 = vst.sshfl [vmem:[%s12703_s26 + $0x34f] sm:$0x1 pattern:$0x73625140] %v10261_v61 }
 0x8d3   : > { %11312 = vst.sshfl [vmem:[%s12703_s26 + $0x367] sm:$0x1 pattern:$0x73625140] %v10260_v52  ;;  %v10290_v51 = vrot.slane %v10262_v0, %v12695_v20  ;;  %v10292_v13 = vcombine.high %v10276_v1, %v10276_v1  ;;  %v10293_v56 = vcombine.high %v10283_v6, %v10283_v6  ;;  %10627 = vst [vmem:[%s12703_s26 + $0x357] sm:$0x1] %v10291_v48 }
 0x8d4   : > { %v10309_v4 = vrot.slane %v10295_v28, %v12695_v20  ;;  %v10310_v9 = vcombine.high %v10302_v62, %v10302_v62  ;;  %v10318_v63 = vrot.slane %v10302_v62, %v12695_v20  ;;  %11314 = vst.sshfl [vmem:[%s12703_s26 + $0x387] sm:$0x1 pattern:$0x73625140] %v10302_v62  ;;  %v9574_v53 = vpop.f32.mrb[143].mxu0 }
 0x8d5   : > { %11313 = vst.sshfl [vmem:[%s12703_s26 + $0x36f] sm:$0x1 pattern:$0x73625140] %v10262_v0  ;;  %v10294_v17 = vcombine.high %v10290_v51, %v10290_v51  ;;  %10628 = vst [vmem:[%s12703_s26 + $0x35f] sm:$0x1] %v10293_v56  ;;  %v9592_v5 = vadd.f32 %v14597_v43, %v9574_v53 }
 0x8d6   : > { %v10311_v16 = vcombine.high %v10309_v4, %v10309_v4  ;;  %v10325_v19 = vrot.slane %v10309_v4, %v12695_v20  ;;  %v10332_v30 = vrot.slane %v10310_v9, %v12695_v20  ;;  %v10340_v33 = vcombine.high %v10318_v63, %v10318_v63  ;;  %11315 = vst.sshfl [vmem:[%s12703_s26 + $0x38f] sm:$0x1 pattern:$0x73625140] %v10310_v9 }
 0x8d7   : > { %11316 = vst.sshfl [vmem:[%s12703_s26 + $0x3a7] sm:$0x1 pattern:$0x73625140] %v10309_v4  ;;  %10631 = vst [vmem:[%s12703_s26 + $0x377] sm:$0x1] %v10292_v13  ;;  %v10344_v14 = vcombine.high %v9592_v5, %v9592_v5  ;;  %v10351_v26 = vrot.slane %v9592_v5, %v12695_v20 }
 0x8d8   : > { %v10339_v46 = vrot.slane %v10311_v16, %v12695_v20  ;;  %v10341_v24 = vcombine.high %v10325_v19, %v10325_v19  ;;  %v10342_v3 = vcombine.high %v10332_v30, %v10332_v30  ;;  %10635 = vst [vmem:[%s12703_s26 + $0x397] sm:$0x1] %v10340_v33  ;;  %11317 = vst.sshfl [vmem:[%s12703_s26 + $0x3af] sm:$0x1 pattern:$0x73625140] %v10311_v16 }
 0x8d9   : > { %10632 = vst [vmem:[%s12703_s26 + $0x37f] sm:$0x1] %v10294_v17  ;;  %v10358_v43 = vrot.slane %v10344_v14, %v12695_v20  ;;  %v10359_v31 = vcombine.high %v10351_v26, %v10351_v26  ;;  %v10367_v15 = vrot.slane %v10351_v26, %v12695_v20  ;;  %11318 = vst.sshfl [vmem:[%s12703_s26 + $0x3c7] sm:$0x1 pattern:$0x73625140] %v10351_v26 }
 0x8da   : > { %v10343_v27 = vcombine.high %v10339_v46, %v10339_v46  ;;  %10636 = vst [vmem:[%s12703_s26 + $0x39f] sm:$0x1] %v10342_v3  ;;  %10639 = vst [vmem:[%s12703_s26 + $0x3b7] sm:$0x1] %v10341_v24 }
 0x8db   : > { %v10360_v7 = vcombine.high %v10358_v43, %v10358_v43  ;;  %v10374_v32 = vrot.slane %v10358_v43, %v12695_v20  ;;  %v10381_v54 = vrot.slane %v10359_v31, %v12695_v20  ;;  %v10389_v34 = vcombine.high %v10367_v15, %v10367_v15  ;;  %11319 = vst.sshfl [vmem:[%s12703_s26 + $0x3cf] sm:$0x1 pattern:$0x73625140] %v10359_v31 }
 0x8dc   : > { %10640 = vst [vmem:[%s12703_s26 + $0x3bf] sm:$0x1] %v10343_v27  ;;  %11320 = vst.sshfl [vmem:[%s12703_s26 + $0x3e7] sm:$0x1 pattern:$0x73625140] %v10358_v43 }
 0x8dd   : > { %v10388_v35 = vrot.slane %v10360_v7, %v12695_v20  ;;  %v10390_v8 = vcombine.high %v10374_v32, %v10374_v32  ;;  %v10391_v58 = vcombine.high %v10381_v54, %v10381_v54  ;;  %10643 = vst [vmem:[%s12703_s26 + $0x3d7] sm:$0x1] %v10389_v34  ;;  %11321 = vst.sshfl [vmem:[%s12703_s26 + $0x3ef] sm:$0x1 pattern:$0x73625140] %v10360_v7 }
 0x8df   : > { %v10392_v23 = vcombine.high %v10388_v35, %v10388_v35  ;;  %10644 = vst [vmem:[%s12703_s26 + $0x3df] sm:$0x1] %v10391_v58  ;;  %10647 = vst [vmem:[%s12703_s26 + $0x3f7] sm:$0x1] %v10390_v8 }
 0x8e1   : > { %10648 = vst [vmem:[%s12703_s26 + $0x3ff] sm:$0x1] %v10392_v23 }
 0x8e2   : > { %12150 = shalt.err (!%p12147_p13)
}
 0x8e3   : > { %s12151_s30 = scalar_lea.hbm %s14933_s17, 16384  ;;  %s12155_s13 = scalar_lea.hbm %s14987_s5, 32768 }
 0x8e4   : > { %p12152_p9 = scmp.ne.s32.totalorder %s14933_s17, %s12151_s30  ;;  %p12156_p4 = scmp.lt.u32.totalorder %s14933_s17, %s14987_s5 }
 0x8e5   : > { %p12157_p8 = scmp.lt.u32.totalorder %s12155_s13, %s12151_s30  ;;  %p12159_p3 = scmp.lt.u32.totalorder %s12151_s30, %s14933_s17 }
 0x8e6   : > { %p12153_p0 = pnand %p12152_p9, %p12421_p10 }
 0x8e7   : > { %p12158_p6 = por %p12157_p8, %p12156_p4 }
 0x8e8   : > { %p12154_p11 = pneg %p12153_p0 }
 0x8e9   : > { %p12160_p5 = por %p12159_p3, %p12158_p6 }
 0x8eb   : > { %p12161_p7 = pnand %p12160_p5, %p12154_p11 }
 0x8ed   : > { %12164 = shalt.err (!%p12161_p7)
}
 0x8ee   : > { %s12226_s27 = smov 128   ;;  %s12227_s8 = smov 8  }
 0x8ef   : > { %11655 = dma.vmem_to_hbm [thread:$0]  (%p12421_p10), %s14935_s16, 16384, %s14933_s17, %s10650_s22, %s12226_s27, %s12226_s27, %s12227_s8  }
 0x8f0 PF: > { %s10678_s6 = sand.u32 1, %s12199_s18   ;;  %p15007_p12 = scmp.ne.s32.totalorder %s14993_s25, 0 }
 0x8f1   : > { %p15008_p1 = scmp.ge.s32.totalorder %s12211_s21, 2  ;;  %s10679_s11 = scalar_lea.sflag [#allocation4], %s10678_s6 }
 0x8f3   : > { %p11675_p2 = pnand %p15008_p1, %p15007_p12 }
 0x8f5   : > { %12194 = dma.done.wait (!%p11675_p2), %s10679_s11, 16384  }
 0x8f6   : > { %12196 = vsyncadd (!%p11675_p2), %s10679_s11, 4294950912  ;;  %p20_p13 = scmp.ge.s32.totalorder %s12411_s14, 4   ;;  %s15009_s18 = smov %s12203_s19 }
 0x8f7   : > { %s15010_s19 = smov %s12207_s20  ;;  %s15011_s20 = smov %s12427_s9 }
 0x8f8   : > { %s15012_s21 = smov %s12411_s14  ;;  %22 = sbr.rel (!%p20_p13) target bundleno = 7 (0x7), region = 101 }
 0x8ff   :  { %10684 = vsyncpa [#allocation3], 1 }
 0x900   :  { %10686 = vsyncpa [#allocation3 + $0x1], 1 }
 0x901   :  { %10687 = vsyncpa [#allocation6], 1 }
 0x902   :  { %10688 = vsyncpa [#allocation9], 1 }
 0x903   :  { %10689 = vsyncpa [#allocation4], 1 }
 0x904   :  { %10691 = vsyncpa [#allocation4 + $0x1], 1 }

</bundles_post_ra>
